<compile_context>
chip_gen: v6e
topology: v6e:2x2x1
jax: 0.10.0
libtpu: 0.0.40
codegen_flags: <defaults>
</compile_context>

<pallas_src>
import math
from functools import partial

import jax
import jax.numpy as jnp
from jax import lax
from jax.experimental import pallas as pl
from jax.experimental.pallas import tpu as pltpu

F32 = jnp.float32
BF16 = jnp.bfloat16


def _pick_tm(m, cap=512):
    """Largest row-tile <= cap that divides m (falls back to the full extent)."""
    for cand in (cap, 256, 128, 64, 32, 16, 8):
        if cand <= m and m % cand == 0:
            return cand
    return m


# -------------------------------------------- LayerNorm + in_proj matmul (two outputs)
def _ln_inproj_kernel(x_ref, g_ref, b_ref, w_ref, ox_ref, oz_ref):
    d_inner = ox_ref.shape[-1]
    x = x_ref[...]
    mu = jnp.mean(x, axis=-1, keepdims=True)
    xc = x - mu
    var = jnp.mean(xc * xc, axis=-1, keepdims=True)
    xn = xc * lax.rsqrt(var + 1e-5) * g_ref[...] + b_ref[...]
    out = jnp.dot(xn.astype(BF16), w_ref[...], preferred_element_type=jnp.float32)
    ox_ref[...] = out[:, :d_inner].astype(ox_ref.dtype)
    oz_ref[...] = out[:, d_inner:].astype(oz_ref.dtype)


def pallas_ln_inproj(x2d, gamma, beta, w_bf16, d_inner):
    M, C = x2d.shape
    N = w_bf16.shape[1]
    tm = _pick_tm(M)
    return pl.pallas_call(
        _ln_inproj_kernel,
        out_shape=(jax.ShapeDtypeStruct((M, d_inner), BF16),
                   jax.ShapeDtypeStruct((M, d_inner), BF16)),
        grid=(M // tm,),
        in_specs=[
            pl.BlockSpec((tm, C), lambda m: (m, 0)),
            pl.BlockSpec((1, C), lambda m: (0, 0)),
            pl.BlockSpec((1, C), lambda m: (0, 0)),
            pl.BlockSpec((C, N), lambda m: (0, 0)),
        ],
        out_specs=(pl.BlockSpec((tm, d_inner), lambda m: (m, 0)),
                   pl.BlockSpec((tm, d_inner), lambda m: (m, 0))),
        compiler_params=pltpu.CompilerParams(dimension_semantics=("parallel",)),
    )(x2d.astype(F32), gamma.reshape(1, C).astype(F32),
      beta.reshape(1, C).astype(F32), w_bf16)


# -------------------- out_norm + SiLU(z) gate + out_proj + fused residual epilogue
def _lngate_outproj_kernel(coef_ref, y_ref, z_ref, g_ref, b_ref, w_ref, r_ref, o_ref):
    y = y_ref[...].astype(F32)
    mu = jnp.mean(y, axis=-1, keepdims=True)
    yc = y - mu
    var = jnp.mean(yc * yc, axis=-1, keepdims=True)
    ln = yc * lax.rsqrt(var + 1e-5) * g_ref[...] + b_ref[...]
    z = z_ref[...].astype(F32)
    gated = ln * (z * jax.nn.sigmoid(z))
    o_ref[...] = (jnp.dot(gated.astype(BF16), w_ref[...],
                          preferred_element_type=jnp.float32)
                  + coef_ref[0, 0] * r_ref[...])


def pallas_lngate_outproj(y2d, z2d, gamma, beta, w_bf16, resid2d, coef):
    M, d_in = y2d.shape
    N = w_bf16.shape[1]
    tm = _pick_tm(M)
    return pl.pallas_call(
        _lngate_outproj_kernel,
        out_shape=jax.ShapeDtypeStruct((M, N), F32),
        grid=(M // tm,),
        in_specs=[
            pl.BlockSpec((1, 1), lambda m: (0, 0),
                         memory_space=pltpu.MemorySpace.SMEM),
            pl.BlockSpec((tm, d_in), lambda m: (m, 0)),
            pl.BlockSpec((tm, d_in), lambda m: (m, 0)),
            pl.BlockSpec((1, d_in), lambda m: (0, 0)),
            pl.BlockSpec((1, d_in), lambda m: (0, 0)),
            pl.BlockSpec((d_in, N), lambda m: (0, 0)),
            pl.BlockSpec((tm, N), lambda m: (m, 0)),
        ],
        out_specs=pl.BlockSpec((tm, N), lambda m: (m, 0)),
        compiler_params=pltpu.CompilerParams(dimension_semantics=("parallel",)),
    )(jnp.reshape(coef, (1, 1)).astype(F32), y2d, z2d,
      gamma.reshape(1, d_in).astype(F32), beta.reshape(1, d_in).astype(F32),
      w_bf16, resid2d.astype(F32))


# ------------------------------------------------------- final residual + LayerNorm
def _ln_residual_kernel(scale_ref, xo_ref, xc_ref, g_ref, b_ref, o_ref):
    s = scale_ref[0, 0]
    r = s * xo_ref[...] + xc_ref[...]
    mu = jnp.mean(r, axis=-1, keepdims=True)
    rc = r - mu
    var = jnp.mean(rc * rc, axis=-1, keepdims=True)
    o_ref[...] = rc * lax.rsqrt(var + 1e-5) * g_ref[...] + b_ref[...]


def pallas_ln_residual(scale, x_orig2d, x_cat2d, gamma, beta):
    M, C = x_orig2d.shape
    tm = _pick_tm(M)
    return pl.pallas_call(
        _ln_residual_kernel,
        out_shape=jax.ShapeDtypeStruct((M, C), F32),
        grid=(M // tm,),
        in_specs=[
            pl.BlockSpec((1, 1), lambda m: (0, 0),
                         memory_space=pltpu.MemorySpace.SMEM),
            pl.BlockSpec((tm, C), lambda m: (m, 0)),
            pl.BlockSpec((tm, C), lambda m: (m, 0)),
            pl.BlockSpec((1, C), lambda m: (0, 0)),
            pl.BlockSpec((1, C), lambda m: (0, 0)),
        ],
        out_specs=pl.BlockSpec((tm, C), lambda m: (m, 0)),
        compiler_params=pltpu.CompilerParams(dimension_semantics=("parallel",)),
    )(jnp.reshape(scale, (1, 1)).astype(F32),
      x_orig2d.astype(F32), x_cat2d.astype(F32),
      gamma.reshape(1, C).astype(F32), beta.reshape(1, C).astype(F32))


# ----------------------------------------------------------- depthwise 3x3 conv + SiLU
def _dwconv_silu_kernel(x_ref, w_ref, b_ref, o_ref):
    H, W, C = o_ref.shape
    acc = jnp.zeros((H, W, C), jnp.float32)
    for dy in range(3):
        for dx in range(3):
            acc = acc + (x_ref[dy:dy + H, dx:dx + W, :].astype(jnp.float32)
                         * w_ref[dy:dy + 1, dx:dx + 1, :])
    acc = acc + b_ref[...][None]            # (1,1,C) broadcast
    o_ref[...] = (acc * jax.nn.sigmoid(acc)).astype(o_ref.dtype)  # SiLU


def pallas_dwconv_silu(x_bhwc, w, b):
    B, H, W, C = x_bhwc.shape
    # TODO(synk): the 1-px halo is still padded on the host (now bf16, half the bytes);
    # an in-kernel masked-roll / lane-dense (H, W*C) variant would remove it entirely.
    # TODO(synk): tile over H rows (with a 2-row halo) for very large images (v7x VMEM).
    xp = jnp.pad(x_bhwc.astype(BF16), ((0, 0), (1, 1), (1, 1), (0, 0)))
    return pl.pallas_call(
        _dwconv_silu_kernel,
        out_shape=jax.ShapeDtypeStruct((B, H, W, C), BF16),
        grid=(B,),
        in_specs=[
            pl.BlockSpec((None, H + 2, W + 2, C), lambda b: (b, 0, 0, 0)),
            pl.BlockSpec((3, 3, C), lambda b: (0, 0, 0)),
            pl.BlockSpec((1, C), lambda b: (0, 0)),
        ],
        out_specs=pl.BlockSpec((None, H, W, C), lambda b: (b, 0, 0, 0)),
        compiler_params=pltpu.CompilerParams(dimension_semantics=("parallel",)),
    )(xp, w.astype(F32), b.reshape(1, C).astype(F32))


# ---------------- fused 4-direction selective scan (x_proj folded in, merge in-kernel)
def _scan_kernel(x_ref, w_ref, A_ref, D_ref, bias_ref, o_ref, u_s, dbl_s, y_s, *, chunk):
    # x_ref:    (H, W, d)        conv output (bf16), one batch
    # w_ref:    (2, d, 2*np_pad) per-ordering [fwd | bwd] x_proj weights (dt folded)
    # A_ref:    (2, 2, n, d)     A^T per (ordering, fwd/bwd)
    # D_ref:    (2, 2, 1, d), bias_ref: (2, 2, 1, d)
    # o_ref:    (H, W, d)        sum over all 4 directions (bf16)
    # scratch:  u_s (L, d) f32, dbl_s (L, 2*np_pad) f32, y_s (L, d) f32
    Hd, Wd, d_inner = o_ref.shape
    d_state = A_ref.shape[2]
    np_pad = w_ref.shape[-1] // 2
    L = Hd * Wd
    n_chunks = L // chunk

    def run_direction(ordering, p, reverse, first):
        col = p * np_pad
        A = A_ref[ordering, p]            # (n, d)
        bias = bias_ref[ordering, p]      # (1, d)

        def chunk_body(c, h):
            cc = (n_chunks - 1 - c) if reverse else c
            base = pl.multiple_of(cc * chunk, chunk)
            u_blk = u_s[pl.ds(base, chunk), :]                               # (T, d)
            dbl = dbl_s[pl.ds(base, chunk), col:col + np_pad]                # (T, np)
            dt_blk = jax.nn.softplus(dbl[:, :d_inner] + bias)                # (T, d)
            dtu = dt_blk * u_blk                                             # (T, d)
            B_T = dbl[:, d_inner:d_inner + d_state].T                        # (n, T)
            C_T = dbl[:, d_inner + d_state:d_inner + 2 * d_state].T          # (n, T)
            a_chunk = jnp.exp(dt_blk[:, None, :] * A[None, :, :])            # (T, n, d)
            rows = range(chunk - 1, -1, -1) if reverse else range(chunk)
            for r in rows:
                h = a_chunk[r] * h + B_T[:, r:r + 1] * dtu[r:r + 1, :]       # (n, d)
                y_r = jnp.sum(C_T[:, r:r + 1] * h, axis=0, keepdims=True)    # (1, d)
                if first:
                    y_s[pl.ds(base + r, 1), :] = y_r
                else:
                    y_s[pl.ds(base + r, 1), :] += y_r
            return h

        lax.fori_loop(0, n_chunks, chunk_body,
                      jnp.zeros((d_state, d_inner), F32))

    def run_ordering(ordering):
        # x_proj (dt_proj folded) for both directions of this ordering: one
        # (L, d) x (d, 2*np_pad) bf16 MXU matmul, result stays in VMEM (no HBM trip).
        dbl_s[...] = jnp.dot(u_s[...].astype(BF16), w_ref[ordering],
                             preferred_element_type=jnp.float32)
        run_direction(ordering, 0, reverse=False, first=True)   # forward scan writes
        run_direction(ordering, 1, reverse=True, first=False)   # backward scan adds
        d_sum = D_ref[ordering, 0] + D_ref[ordering, 1]                      # (1, d)
        y_s[...] = y_s[...] + d_sum * u_s[...]

    # ---- ordering 0: row-major (HW) — directions 0 (fwd) and 2 (bwd)
    u_s[...] = x_ref[...].astype(F32).reshape(L, d_inner)
    run_ordering(0)
    o_ref[...] = y_s[...].reshape(Hd, Wd, d_inner).astype(o_ref.dtype)

    # ---- ordering 1: column-major (WH) — directions 1 (fwd) and 3 (bwd),
    # generated from the VMEM-resident block (no XLA transpose in HBM).
    for w in range(Wd):
        u_s[pl.ds(w * Hd, Hd), :] = x_ref[:, w, :].astype(F32)
    run_ordering(1)
    for w in range(Wd):
        cur = o_ref[:, w, :].astype(F32)
        o_ref[:, w, :] = (cur + y_s[pl.ds(w * Hd, Hd), :]).astype(o_ref.dtype)


def pallas_selective_scan(x_conv, w_pair, A_pair, D_pair, bias_pair):
    B, Hd, Wd, d = x_conv.shape
    L = Hd * Wd
    n = A_pair.shape[2]
    np_pad = w_pair.shape[-1] // 2
    # TODO(synk): pad/mask L instead of shrinking the chunk when H*W % 8 != 0.
    chunk = next(c for c in (8, 4, 2, 1) if L % c == 0)
    # TODO(synk): for very large L (>= ~16k) tile the scan over L with a carried
    # h state instead of whole-L VMEM scratches (v7x 64 MiB VMEM budget).
    kern = partial(_scan_kernel, chunk=chunk)
    return pl.pallas_call(
        kern,
        out_shape=jax.ShapeDtypeStruct((B, Hd, Wd, d), BF16),
        grid=(B,),
        in_specs=[
            pl.BlockSpec((None, Hd, Wd, d), lambda b: (b, 0, 0, 0)),
            pl.BlockSpec((2, d, 2 * np_pad), lambda b: (0, 0, 0)),
            pl.BlockSpec((2, 2, n, d), lambda b: (0, 0, 0, 0)),
            pl.BlockSpec((2, 2, 1, d), lambda b: (0, 0, 0, 0)),
            pl.BlockSpec((2, 2, 1, d), lambda b: (0, 0, 0, 0)),
        ],
        out_specs=pl.BlockSpec((None, Hd, Wd, d), lambda b: (b, 0, 0, 0)),
        scratch_shapes=[
            pltpu.VMEM((L, d), F32),              # u in current ordering
            pltpu.VMEM((L, 2 * np_pad), F32),     # dbl = u @ w (both directions)
            pltpu.VMEM((L, d), F32),              # y accumulator for the pair
        ],
        compiler_params=pltpu.CompilerParams(dimension_semantics=("parallel",)),
    )(x_conv, w_pair, A_pair, D_pair, bias_pair)


# -------------------------------------------------------------------------- SS2D block
def _prepare_vss(vss):
    d_inner = vss["in_proj_w"].shape[1] // 2
    dt_rank = vss["dt_proj_w"].shape[1]
    d_state = vss["A_T"].shape[1]
    # fold dt_proj into x_proj:  (x @ Wx[:, :dt_rank]) @ Wdt == x @ (Wx[:, :dt_rank] @ Wdt)
    w_dt_eff = jnp.einsum("kdr,krm->kdm",
                          vss["x_proj_w"][..., :dt_rank].astype(F32),
                          vss["dt_proj_w"].astype(F32))                     # (4, d, d)
    w_eff = jnp.concatenate(
        [w_dt_eff, vss["x_proj_w"][..., dt_rank:].astype(F32)], axis=-1)    # (4, d, Np)
    Np = w_eff.shape[-1]
    np_pad = ((Np + 127) // 128) * 128
    if np_pad != Np:
        w_eff = jnp.pad(w_eff, ((0, 0), (0, 0), (0, np_pad - Np)))
    # regroup the 4 directions as (ordering, {forward, backward}):
    #   ordering 0 = row-major (HW): dirs 0 (fwd), 2 (bwd)
    #   ordering 1 = col-major (WH): dirs 1 (fwd), 3 (bwd)
    def pair(t):
        return jnp.stack([jnp.stack([t[0], t[2]]), jnp.stack([t[1], t[3]])], axis=0)
    w_pair = jnp.stack([jnp.concatenate([w_eff[0], w_eff[2]], axis=-1),
                        jnp.concatenate([w_eff[1], w_eff[3]], axis=-1)], axis=0)
    return dict(
        ln1_g=vss["ln1_g"], ln1_b=vss["ln1_b"],
        in_proj_w=vss["in_proj_w"].astype(BF16),
        conv_w=vss["conv_w"], conv_b=vss["conv_b"],
        w_pair=w_pair.astype(BF16),                   # (2, d_inner, 2*np_pad)
        A_pair=pair(vss["A_T"]).astype(F32),          # (2, 2, n, d_inner)
        D_pair=pair(vss["Ds"]).astype(F32),           # (2, 2, 1, d_inner)
        bias_pair=pair(vss["dt_bias"]).astype(F32),   # (2, 2, 1, d_inner)
        out_norm_g=vss["out_norm_g"], out_norm_b=vss["out_norm_b"],
        out_proj_w=vss["out_proj_w"].astype(BF16),
        d_inner=d_inner, d_state=d_state,
    )


def ss2d_stage(x_bhwc, p, coef):
    """One cascade stage: SS2D(LN(x)) + coef * x  (DropPath/dropout = identity)."""
    B, H, W, d_model = x_bhwc.shape
    d_inner = p["d_inner"]
    L = H * W
    x2d = x_bhwc.reshape(B * L, d_model)

    # ln_1 fused into in_proj; x and z emitted as two bf16 outputs (no XLA slicing).
    x_in, z = pallas_ln_inproj(x2d, p["ln1_g"], p["ln1_b"], p["in_proj_w"], d_inner)

    # depthwise 3x3 conv + SiLU (bf16 activations, f32 accumulation)
    x_conv = pallas_dwconv_silu(x_in.reshape(B, H, W, d_inner),
                                p["conv_w"], p["conv_b"])

    # fused 4-direction selective scan with x_proj(+dt fold) and the direction /
    # ordering merge done in-kernel.
    y = pallas_selective_scan(x_conv, p["w_pair"], p["A_pair"],
                              p["D_pair"], p["bias_pair"])

    # out_norm + SiLU(z) gate + out_proj + residual epilogue (coef * x) fused.
    # TODO(synk): SS2D output dropout omitted (eval-mode identity).
    out = pallas_lngate_outproj(y.reshape(B * L, d_inner), z,
                                p["out_norm_g"], p["out_norm_b"],
                                p["out_proj_w"], x2d, coef)
    return out.reshape(B, H, W, d_model)


# ----------------------------------------------------------------- CascadedVMambaBlock
def cascaded_vmamba_block(x, params, head, channel_shuffle=True):
    B, H, W, C = x.shape
    p_vss = _prepare_vss(params["vss"])
    if channel_shuffle:
        g = head
        # ShuffleBlock(groups=head) expressed in BHWC
        x = x.reshape(B, H, W, g, C // g).transpose(0, 1, 2, 4, 3).reshape(B, H, W, C)
    x_original = x
    chunks = jnp.split(x, head, axis=3)
    # per-stage output: vss_block(s) + skip*s = ss2d(s) + (1 + skip) * s
    coef = 1.0 + params["vss_skip_scale"]

    cascaded = [ss2d_stage(chunks[0], p_vss, coef)]
    for i in range(1, head):
        s_i = cascaded[-1] + chunks[i]
        cascaded.append(ss2d_stage(s_i, p_vss, coef))
    x_cat = jnp.concatenate(cascaded, axis=3)

    out = pallas_ln_residual(params["cvm_skip_scale"],
                             x_original.reshape(B * H * W, C),
                             x_cat.reshape(B * H * W, C),
                             params["ln_g"], params["ln_b"])
    return out.reshape(B, H, W, C)


# ------------------------------------------------------------------------ parameter init
def init_params(key, input_channel, head, d_state, expand):
    d_model = input_channel // head
    d_inner = int(expand * d_model)
    dt_rank = math.ceil(d_model / 16)
    K = 4
    ks = jax.random.split(key, 8)

    def rnd(k, shape, scale=0.1):
        return scale * jax.random.normal(k, shape, dtype=F32)

    vss = dict(
        ln1_g=jnp.ones((d_model,), F32), ln1_b=jnp.zeros((d_model,), F32),
        in_proj_w=rnd(ks[0], (d_model, 2 * d_inner)),
        conv_w=rnd(ks[1], (3, 3, d_inner)),
        conv_b=rnd(ks[2], (d_inner,)),
        x_proj_w=rnd(ks[3], (K, d_inner, dt_rank + 2 * d_state)),
        dt_proj_w=rnd(ks[4], (K, dt_rank, d_inner)),
        dt_bias=rnd(ks[5], (K, 1, d_inner)),
        # A = -exp(A_log), A_log init = log(1..d_state) (S4D-real), stored transposed (K, n, d)
        A_T=-jnp.tile(jnp.arange(1, d_state + 1, dtype=F32)[None, :, None], (K, 1, d_inner)),
        Ds=jnp.ones((K, 1, d_inner), F32),
        out_norm_g=jnp.ones((d_inner,), F32), out_norm_b=jnp.zeros((d_inner,), F32),
        out_proj_w=rnd(ks[6], (d_inner, d_model)),
    )
    return dict(
        vss=vss,
        vss_skip_scale=jnp.ones((1,), F32),
        cvm_skip_scale=jnp.ones((1,), F32),
        ln_g=jnp.ones((input_channel,), F32),
        ln_b=jnp.zeros((input_channel,), F32),
    )


if __name__ == "__main__":
    key = jax.random.PRNGKey(0)
    kx, kp = jax.random.split(key)

    # CascadedVMambaBlock(input_channel=64, head=2, hidden_state=8,
    #                     ss2d_expand_ratio=2, drop_path_rate=0.0, channel_shuffle=True)
    B, H, W, C = 2, 8, 8, 64
    head, d_state, expand = 2, 8, 2

    x = jax.random.normal(kx, (B, H, W, C), dtype=F32)
    params = init_params(kp, C, head, d_state, expand)

    fwd = jax.jit(partial(cascaded_vmamba_block, head=head, channel_shuffle=True))
    out = fwd(x, params)
    out = jax.block_until_ready(out)
    assert out.shape == (B, H, W, C) and out.dtype == jnp.float32
    assert bool(jnp.all(jnp.isfinite(out)))
    print("KERNEL_OK")
</pallas_src>

<mosaic_0001>
module attributes {stable_mosaic.version = 11 : i64} {
  func.func @_ln_inproj_kernel(%arg0: i32, %arg1: memref<128x32xf32, #tpu.memory_space<vmem>>, %arg2: memref<1x32xf32, #tpu.memory_space<vmem>>, %arg3: memref<1x32xf32, #tpu.memory_space<vmem>>, %arg4: memref<32x128xbf16, #tpu.memory_space<vmem>>, %arg5: memref<128x64xbf16, #tpu.memory_space<vmem>>, %arg6: memref<128x64xbf16, #tpu.memory_space<vmem>>) attributes {dimension_semantics = [#tpu.dimension_semantics<parallel>], iteration_bounds = array<i64: 1>, scalar_prefetch = 0 : i64, scratch_operands = 0 : i64, tpu.core_type = #tpu.core_type<tc>, window_params = [{transform_indices = @transform_0, window_bounds = array<i64: 128, 32>}, {pipeline_mode = #tpu.pipeline_mode<synchronous>, transform_indices = @transform_1, window_bounds = array<i64: 1, 32>}, {pipeline_mode = #tpu.pipeline_mode<synchronous>, transform_indices = @transform_2, window_bounds = array<i64: 1, 32>}, {pipeline_mode = #tpu.pipeline_mode<synchronous>, transform_indices = @transform_3, window_bounds = array<i64: 32, 128>}, {transform_indices = @transform_4, window_bounds = array<i64: 128, 64>}, {transform_indices = @transform_5, window_bounds = array<i64: 128, 64>}]} {
    %c0 = arith.constant 0 : index
    %c0_0 = arith.constant 0 : index
    %0 = vector.load %arg1[%c0, %c0_0] : memref<128x32xf32, #tpu.memory_space<vmem>>, vector<128x32xf32>
    %cst = arith.constant dense<0.000000e+00> : vector<128xf32>
    %1 = vector.multi_reduction <add>, %0, %cst [1] : vector<128x32xf32> to vector<128xf32>
    %2 = vector.shape_cast %1 : vector<128xf32> to vector<128x1xf32>
    %cst_1 = arith.constant 3.200000e+01 : f32
    %3 = vector.broadcast %cst_1 : f32 to vector<128x1xf32>
    %4 = arith.divf %2, %3 : vector<128x1xf32>
    %5 = vector.broadcast %4 : vector<128x1xf32> to vector<128x32xf32>
    %6 = arith.subf %0, %5 : vector<128x32xf32>
    %7 = arith.mulf %6, %6 : vector<128x32xf32>
    %cst_2 = arith.constant dense<0.000000e+00> : vector<128xf32>
    %8 = vector.multi_reduction <add>, %7, %cst_2 [1] : vector<128x32xf32> to vector<128xf32>
    %9 = vector.shape_cast %8 : vector<128xf32> to vector<128x1xf32>
    %cst_3 = arith.constant 3.200000e+01 : f32
    %10 = vector.broadcast %cst_3 : f32 to vector<128x1xf32>
    %11 = arith.divf %9, %10 : vector<128x1xf32>
    %cst_4 = arith.constant 9.99999974E-6 : f32
    %12 = vector.broadcast %cst_4 : f32 to vector<128x1xf32>
    %13 = arith.addf %11, %12 : vector<128x1xf32>
    %14 = math.rsqrt %13 : vector<128x1xf32>
    %15 = vector.broadcast %14 : vector<128x1xf32> to vector<128x32xf32>
    %16 = arith.mulf %6, %15 : vector<128x32xf32>
    %c0_5 = arith.constant 0 : index
    %c0_6 = arith.constant 0 : index
    %17 = vector.load %arg2[%c0_5, %c0_6] : memref<1x32xf32, #tpu.memory_space<vmem>>, vector<1x32xf32>
    %18 = vector.broadcast %17 : vector<1x32xf32> to vector<128x32xf32>
    %19 = arith.mulf %16, %18 : vector<128x32xf32>
    %c0_7 = arith.constant 0 : index
    %c0_8 = arith.constant 0 : index
    %20 = vector.load %arg3[%c0_7, %c0_8] : memref<1x32xf32, #tpu.memory_space<vmem>>, vector<1x32xf32>
    %21 = vector.broadcast %20 : vector<1x32xf32> to vector<128x32xf32>
    %22 = arith.addf %19, %21 : vector<128x32xf32>
    %23 = arith.truncf %22 : vector<128x32xf32> to vector<128x32xbf16>
    %c0_9 = arith.constant 0 : index
    %c0_10 = arith.constant 0 : index
    %24 = vector.load %arg4[%c0_9, %c0_10] : memref<32x128xbf16, #tpu.memory_space<vmem>>, vector<32x128xbf16>
    %cst_11 = arith.constant dense<0.000000e+00> : vector<128x128xf32>
    %25 = tpu.matmul %23, %24, %cst_11 {dimension_numbers = #tpu.dot_dimension_numbers<[1], [0], [0], [1], [0, 0, 1, 1], [], []>} : vector<128x32xbf16>, vector<32x128xbf16>, vector<128x128xf32> -> vector<128x128xf32>
    %26 = vector.extract_strided_slice %25 {offsets = [0, 0], sizes = [128, 64], strides = [1, 1]} : vector<128x128xf32> to vector<128x64xf32>
    %27 = arith.truncf %26 : vector<128x64xf32> to vector<128x64xbf16>
    %c0_12 = arith.constant 0 : index
    %c0_13 = arith.constant 0 : index
    %28 = vector.load %arg5[%c0_12, %c0_13] : memref<128x64xbf16, #tpu.memory_space<vmem>>, vector<128x64xbf16>
    tpu.vector_store %arg5[%c0_12, %c0_13], %27 {strides = array<i32>} : memref<128x64xbf16, #tpu.memory_space<vmem>>, vector<128x64xbf16>,
    %29 = vector.extract_strided_slice %25 {offsets = [0, 64], sizes = [128, 64], strides = [1, 1]} : vector<128x128xf32> to vector<128x64xf32>
    %30 = arith.truncf %29 : vector<128x64xf32> to vector<128x64xbf16>
    %c0_14 = arith.constant 0 : index
    %c0_15 = arith.constant 0 : index
    %31 = vector.load %arg6[%c0_14, %c0_15] : memref<128x64xbf16, #tpu.memory_space<vmem>>, vector<128x64xbf16>
    tpu.vector_store %arg6[%c0_14, %c0_15], %30 {strides = array<i32>} : memref<128x64xbf16, #tpu.memory_space<vmem>>, vector<128x64xbf16>,
    return
  }
  func.func @transform_0(%arg0: i32) -> (i32, i32) {
    %c0_i32 = arith.constant 0 : i32
    %c0_i32_0 = arith.constant 0 : i32
    return %arg0, %c0_i32 : i32, i32
  }
  func.func @transform_1(%arg0: i32) -> (i32, i32) {
    %c0_i32 = arith.constant 0 : i32
    %c0_i32_0 = arith.constant 0 : i32
    %c0_i32_1 = arith.constant 0 : i32
    return %c0_i32, %c0_i32_0 : i32, i32
  }
  func.func @transform_2(%arg0: i32) -> (i32, i32) {
    %c0_i32 = arith.constant 0 : i32
    %c0_i32_0 = arith.constant 0 : i32
    %c0_i32_1 = arith.constant 0 : i32
    return %c0_i32, %c0_i32_0 : i32, i32
  }
  func.func @transform_3(%arg0: i32) -> (i32, i32) {
    %c0_i32 = arith.constant 0 : i32
    %c0_i32_0 = arith.constant 0 : i32
    %c0_i32_1 = arith.constant 0 : i32
    return %c0_i32, %c0_i32_0 : i32, i32
  }
  func.func @transform_4(%arg0: i32) -> (i32, i32) {
    %c0_i32 = arith.constant 0 : i32
    %c0_i32_0 = arith.constant 0 : i32
    return %arg0, %c0_i32 : i32, i32
  }
  func.func @transform_5(%arg0: i32) -> (i32, i32) {
    %c0_i32 = arith.constant 0 : i32
    %c0_i32_0 = arith.constant 0 : i32
    return %arg0, %c0_i32 : i32, i32
  }
}

module attributes {stable_mosaic.version = 11 : i64} {
  func.func @_dwconv_silu_kernel(%arg0: i32, %arg1: memref<1x10x10x64xbf16, #tpu.memory_space<vmem>>, %arg2: memref<3x3x64xf32, #tpu.memory_space<vmem>>, %arg3: memref<1x64xf32, #tpu.memory_space<vmem>>, %arg4: memref<1x8x8x64xbf16, #tpu.memory_space<vmem>>) attributes {dimension_semantics = [#tpu.dimension_semantics<parallel>], iteration_bounds = array<i64: 2>, scalar_prefetch = 0 : i64, scratch_operands = 0 : i64, tpu.core_type = #tpu.core_type<tc>, window_params = [{transform_indices = @transform_0, window_bounds = array<i64: 1, 10, 10, 64>}, {pipeline_mode = #tpu.pipeline_mode<synchronous>, transform_indices = @transform_1, window_bounds = array<i64: 3, 3, 64>}, {pipeline_mode = #tpu.pipeline_mode<synchronous>, transform_indices = @transform_2, window_bounds = array<i64: 1, 64>}, {transform_indices = @transform_3, window_bounds = array<i64: 1, 8, 8, 64>}]} {
    %cst = arith.constant 0.000000e+00 : f32
    %0 = vector.broadcast %cst : f32 to vector<8x8x64xf32>
    %c0 = arith.constant 0 : index
    %c0_0 = arith.constant 0 : index
    %c0_1 = arith.constant 0 : index
    %c0_2 = arith.constant 0 : index
    %1 = vector.load %arg1[%c0, %c0_0, %c0_1, %c0_2] : memref<1x10x10x64xbf16, #tpu.memory_space<vmem>>, vector<1x8x8x64xbf16>
    %2 = vector.shape_cast %1 : vector<1x8x8x64xbf16> to vector<8x8x64xbf16>
    %3 = arith.extf %2 : vector<8x8x64xbf16> to vector<8x8x64xf32>
    %c0_3 = arith.constant 0 : index
    %c0_4 = arith.constant 0 : index
    %c0_5 = arith.constant 0 : index
    %4 = vector.load %arg2[%c0_3, %c0_4, %c0_5] : memref<3x3x64xf32, #tpu.memory_space<vmem>>, vector<1x1x64xf32>
    %5 = vector.broadcast %4 : vector<1x1x64xf32> to vector<8x8x64xf32>
    %6 = arith.mulf %3, %5 : vector<8x8x64xf32>
    %7 = arith.addf %0, %6 : vector<8x8x64xf32>
    %c0_6 = arith.constant 0 : index
    %c0_7 = arith.constant 0 : index
    %c1 = arith.constant 1 : index
    %c0_8 = arith.constant 0 : index
    %8 = vector.load %arg1[%c0_6, %c0_7, %c1, %c0_8] : memref<1x10x10x64xbf16, #tpu.memory_space<vmem>>, vector<1x8x8x64xbf16>
    %9 = vector.shape_cast %8 : vector<1x8x8x64xbf16> to vector<8x8x64xbf16>
    %10 = arith.extf %9 : vector<8x8x64xbf16> to vector<8x8x64xf32>
    %c0_9 = arith.constant 0 : index
    %c1_10 = arith.constant 1 : index
    %c0_11 = arith.constant 0 : index
    %11 = vector.load %arg2[%c0_9, %c1_10, %c0_11] : memref<3x3x64xf32, #tpu.memory_space<vmem>>, vector<1x1x64xf32>
    %12 = vector.broadcast %11 : vector<1x1x64xf32> to vector<8x8x64xf32>
    %13 = arith.mulf %10, %12 : vector<8x8x64xf32>
    %14 = arith.addf %7, %13 : vector<8x8x64xf32>
    %c0_12 = arith.constant 0 : index
    %c0_13 = arith.constant 0 : index
    %c2 = arith.constant 2 : index
    %c0_14 = arith.constant 0 : index
    %15 = vector.load %arg1[%c0_12, %c0_13, %c2, %c0_14] : memref<1x10x10x64xbf16, #tpu.memory_space<vmem>>, vector<1x8x8x64xbf16>
    %16 = vector.shape_cast %15 : vector<1x8x8x64xbf16> to vector<8x8x64xbf16>
    %17 = arith.extf %16 : vector<8x8x64xbf16> to vector<8x8x64xf32>
    %c0_15 = arith.constant 0 : index
    %c2_16 = arith.constant 2 : index
    %c0_17 = arith.constant 0 : index
    %18 = vector.load %arg2[%c0_15, %c2_16, %c0_17] : memref<3x3x64xf32, #tpu.memory_space<vmem>>, vector<1x1x64xf32>
    %19 = vector.broadcast %18 : vector<1x1x64xf32> to vector<8x8x64xf32>
    %20 = arith.mulf %17, %19 : vector<8x8x64xf32>
    %21 = arith.addf %14, %20 : vector<8x8x64xf32>
    %c0_18 = arith.constant 0 : index
    %c1_19 = arith.constant 1 : index
    %c0_20 = arith.constant 0 : index
    %c0_21 = arith.constant 0 : index
    %22 = vector.load %arg1[%c0_18, %c1_19, %c0_20, %c0_21] : memref<1x10x10x64xbf16, #tpu.memory_space<vmem>>, vector<1x8x8x64xbf16>
    %23 = vector.shape_cast %22 : vector<1x8x8x64xbf16> to vector<8x8x64xbf16>
    %24 = arith.extf %23 : vector<8x8x64xbf16> to vector<8x8x64xf32>
    %c1_22 = arith.constant 1 : index
    %c0_23 = arith.constant 0 : index
    %c0_24 = arith.constant 0 : index
    %25 = vector.load %arg2[%c1_22, %c0_23, %c0_24] : memref<3x3x64xf32, #tpu.memory_space<vmem>>, vector<1x1x64xf32>
    %26 = vector.broadcast %25 : vector<1x1x64xf32> to vector<8x8x64xf32>
    %27 = arith.mulf %24, %26 : vector<8x8x64xf32>
    %28 = arith.addf %21, %27 : vector<8x8x64xf32>
    %c0_25 = arith.constant 0 : index
    %c1_26 = arith.constant 1 : index
    %c1_27 = arith.constant 1 : index
    %c0_28 = arith.constant 0 : index
    %29 = vector.load %arg1[%c0_25, %c1_26, %c1_27, %c0_28] : memref<1x10x10x64xbf16, #tpu.memory_space<vmem>>, vector<1x8x8x64xbf16>
    %30 = vector.shape_cast %29 : vector<1x8x8x64xbf16> to vector<8x8x64xbf16>
    %31 = arith.extf %30 : vector<8x8x64xbf16> to vector<8x8x64xf32>
    %c1_29 = arith.constant 1 : index
    %c1_30 = arith.constant 1 : index
    %c0_31 = arith.constant 0 : index
    %32 = vector.load %arg2[%c1_29, %c1_30, %c0_31] : memref<3x3x64xf32, #tpu.memory_space<vmem>>, vector<1x1x64xf32>
    %33 = vector.broadcast %32 : vector<1x1x64xf32> to vector<8x8x64xf32>
    %34 = arith.mulf %31, %33 : vector<8x8x64xf32>
    %35 = arith.addf %28, %34 : vector<8x8x64xf32>
    %c0_32 = arith.constant 0 : index
    %c1_33 = arith.constant 1 : index
    %c2_34 = arith.constant 2 : index
    %c0_35 = arith.constant 0 : index
    %36 = vector.load %arg1[%c0_32, %c1_33, %c2_34, %c0_35] : memref<1x10x10x64xbf16, #tpu.memory_space<vmem>>, vector<1x8x8x64xbf16>
    %37 = vector.shape_cast %36 : vector<1x8x8x64xbf16> to vector<8x8x64xbf16>
    %38 = arith.extf %37 : vector<8x8x64xbf16> to vector<8x8x64xf32>
    %c1_36 = arith.constant 1 : index
    %c2_37 = arith.constant 2 : index
    %c0_38 = arith.constant 0 : index
    %39 = vector.load %arg2[%c1_36, %c2_37, %c0_38] : memref<3x3x64xf32, #tpu.memory_space<vmem>>, vector<1x1x64xf32>
    %40 = vector.broadcast %39 : vector<1x1x64xf32> to vector<8x8x64xf32>
    %41 = arith.mulf %38, %40 : vector<8x8x64xf32>
    %42 = arith.addf %35, %41 : vector<8x8x64xf32>
    %c0_39 = arith.constant 0 : index
    %c2_40 = arith.constant 2 : index
    %c0_41 = arith.constant 0 : index
    %c0_42 = arith.constant 0 : index
    %43 = vector.load %arg1[%c0_39, %c2_40, %c0_41, %c0_42] : memref<1x10x10x64xbf16, #tpu.memory_space<vmem>>, vector<1x8x8x64xbf16>
    %44 = vector.shape_cast %43 : vector<1x8x8x64xbf16> to vector<8x8x64xbf16>
    %45 = arith.extf %44 : vector<8x8x64xbf16> to vector<8x8x64xf32>
    %c2_43 = arith.constant 2 : index
    %c0_44 = arith.constant 0 : index
    %c0_45 = arith.constant 0 : index
    %46 = vector.load %arg2[%c2_43, %c0_44, %c0_45] : memref<3x3x64xf32, #tpu.memory_space<vmem>>, vector<1x1x64xf32>
    %47 = vector.broadcast %46 : vector<1x1x64xf32> to vector<8x8x64xf32>
    %48 = arith.mulf %45, %47 : vector<8x8x64xf32>
    %49 = arith.addf %42, %48 : vector<8x8x64xf32>
    %c0_46 = arith.constant 0 : index
    %c2_47 = arith.constant 2 : index
    %c1_48 = arith.constant 1 : index
    %c0_49 = arith.constant 0 : index
    %50 = vector.load %arg1[%c0_46, %c2_47, %c1_48, %c0_49] : memref<1x10x10x64xbf16, #tpu.memory_space<vmem>>, vector<1x8x8x64xbf16>
    %51 = vector.shape_cast %50 : vector<1x8x8x64xbf16> to vector<8x8x64xbf16>
    %52 = arith.extf %51 : vector<8x8x64xbf16> to vector<8x8x64xf32>
    %c2_50 = arith.constant 2 : index
    %c1_51 = arith.constant 1 : index
    %c0_52 = arith.constant 0 : index
    %53 = vector.load %arg2[%c2_50, %c1_51, %c0_52] : memref<3x3x64xf32, #tpu.memory_space<vmem>>, vector<1x1x64xf32>
    %54 = vector.broadcast %53 : vector<1x1x64xf32> to vector<8x8x64xf32>
    %55 = arith.mulf %52, %54 : vector<8x8x64xf32>
    %56 = arith.addf %49, %55 : vector<8x8x64xf32>
    %c0_53 = arith.constant 0 : index
    %c2_54 = arith.constant 2 : index
    %c2_55 = arith.constant 2 : index
    %c0_56 = arith.constant 0 : index
    %57 = vector.load %arg1[%c0_53, %c2_54, %c2_55, %c0_56] : memref<1x10x10x64xbf16, #tpu.memory_space<vmem>>, vector<1x8x8x64xbf16>
    %58 = vector.shape_cast %57 : vector<1x8x8x64xbf16> to vector<8x8x64xbf16>
    %59 = arith.extf %58 : vector<8x8x64xbf16> to vector<8x8x64xf32>
    %c2_57 = arith.constant 2 : index
    %c2_58 = arith.constant 2 : index
    %c0_59 = arith.constant 0 : index
    %60 = vector.load %arg2[%c2_57, %c2_58, %c0_59] : memref<3x3x64xf32, #tpu.memory_space<vmem>>, vector<1x1x64xf32>
    %61 = vector.broadcast %60 : vector<1x1x64xf32> to vector<8x8x64xf32>
    %62 = arith.mulf %59, %61 : vector<8x8x64xf32>
    %63 = arith.addf %56, %62 : vector<8x8x64xf32>
    %c0_60 = arith.constant 0 : index
    %c0_61 = arith.constant 0 : index
    %64 = vector.load %arg3[%c0_60, %c0_61] : memref<1x64xf32, #tpu.memory_space<vmem>>, vector<1x64xf32>
    %65 = vector.shape_cast %64 : vector<1x64xf32> to vector<1x1x64xf32>
    %66 = vector.broadcast %65 : vector<1x1x64xf32> to vector<8x8x64xf32>
    %67 = arith.addf %63, %66 : vector<8x8x64xf32>
    %68 = arith.negf %67 : vector<8x8x64xf32>
    %69 = math.exp %68 : vector<8x8x64xf32>
    %cst_62 = arith.constant 1.000000e+00 : f32
    %70 = vector.broadcast %cst_62 : f32 to vector<8x8x64xf32>
    %71 = arith.addf %70, %69 : vector<8x8x64xf32>
    %72 = arith.divf %70, %71 : vector<8x8x64xf32>
    %73 = arith.mulf %67, %72 : vector<8x8x64xf32>
    %74 = arith.truncf %73 : vector<8x8x64xf32> to vector<8x8x64xbf16>
    %c0_63 = arith.constant 0 : index
    %c0_64 = arith.constant 0 : index
    %c0_65 = arith.constant 0 : index
    %c0_66 = arith.constant 0 : index
    %75 = vector.load %arg4[%c0_63, %c0_64, %c0_65, %c0_66] : memref<1x8x8x64xbf16, #tpu.memory_space<vmem>>, vector<1x8x8x64xbf16>
    %76 = vector.shape_cast %75 : vector<1x8x8x64xbf16> to vector<8x8x64xbf16>
    %77 = vector.shape_cast %74 : vector<8x8x64xbf16> to vector<1x8x8x64xbf16>
    tpu.vector_store %arg4[%c0_63, %c0_64, %c0_65, %c0_66], %77 {strides = array<i32>} : memref<1x8x8x64xbf16, #tpu.memory_space<vmem>>, vector<1x8x8x64xbf16>,
    return
  }
  func.func @transform_0(%arg0: i32) -> (i32, i32, i32, i32) {
    %c0_i32 = arith.constant 0 : i32
    %c0_i32_0 = arith.constant 0 : i32
    %c0_i32_1 = arith.constant 0 : i32
    %c0_i32_2 = arith.constant 0 : i32
    return %arg0, %c0_i32, %c0_i32_0, %c0_i32_1 : i32, i32, i32, i32
  }
  func.func @transform_1(%arg0: i32) -> (i32, i32, i32) {
    %c0_i32 = arith.constant 0 : i32
    %c0_i32_0 = arith.constant 0 : i32
    %c0_i32_1 = arith.constant 0 : i32
    %c0_i32_2 = arith.constant 0 : i32
    return %c0_i32, %c0_i32_0, %c0_i32_1 : i32, i32, i32
  }
  func.func @transform_2(%arg0: i32) -> (i32, i32) {
    %c0_i32 = arith.constant 0 : i32
    %c0_i32_0 = arith.constant 0 : i32
    %c0_i32_1 = arith.constant 0 : i32
    return %c0_i32, %c0_i32_0 : i32, i32
  }
  func.func @transform_3(%arg0: i32) -> (i32, i32, i32, i32) {
    %c0_i32 = arith.constant 0 : i32
    %c0_i32_0 = arith.constant 0 : i32
    %c0_i32_1 = arith.constant 0 : i32
    %c0_i32_2 = arith.constant 0 : i32
    return %arg0, %c0_i32, %c0_i32_0, %c0_i32_1 : i32, i32, i32, i32
  }
}

module attributes {stable_mosaic.version = 11 : i64} {
  func.func @_lngate_outproj_kernel(%arg0: i32, %arg1: memref<1x1xf32, #tpu.memory_space<smem>>, %arg2: memref<128x64xbf16, #tpu.memory_space<vmem>>, %arg3: memref<128x64xbf16, #tpu.memory_space<vmem>>, %arg4: memref<1x64xf32, #tpu.memory_space<vmem>>, %arg5: memref<1x64xf32, #tpu.memory_space<vmem>>, %arg6: memref<64x32xbf16, #tpu.memory_space<vmem>>, %arg7: memref<128x32xf32, #tpu.memory_space<vmem>>, %arg8: memref<128x32xf32, #tpu.memory_space<vmem>>) attributes {dimension_semantics = [#tpu.dimension_semantics<parallel>], iteration_bounds = array<i64: 1>, scalar_prefetch = 0 : i64, scratch_operands = 0 : i64, tpu.core_type = #tpu.core_type<tc>, window_params = [{transform_indices = @transform_0, window_bounds = array<i64: 1, 1>}, {transform_indices = @transform_1, window_bounds = array<i64: 128, 64>}, {transform_indices = @transform_2, window_bounds = array<i64: 128, 64>}, {pipeline_mode = #tpu.pipeline_mode<synchronous>, transform_indices = @transform_3, window_bounds = array<i64: 1, 64>}, {pipeline_mode = #tpu.pipeline_mode<synchronous>, transform_indices = @transform_4, window_bounds = array<i64: 1, 64>}, {pipeline_mode = #tpu.pipeline_mode<synchronous>, transform_indices = @transform_5, window_bounds = array<i64: 64, 32>}, {transform_indices = @transform_6, window_bounds = array<i64: 128, 32>}, {transform_indices = @transform_7, window_bounds = array<i64: 128, 32>}]} {
    %c0 = arith.constant 0 : index
    %c0_0 = arith.constant 0 : index
    %0 = vector.load %arg2[%c0, %c0_0] : memref<128x64xbf16, #tpu.memory_space<vmem>>, vector<128x64xbf16>
    %1 = arith.extf %0 : vector<128x64xbf16> to vector<128x64xf32>
    %cst = arith.constant dense<0.000000e+00> : vector<128xf32>
    %2 = vector.multi_reduction <add>, %1, %cst [1] : vector<128x64xf32> to vector<128xf32>
    %3 = vector.shape_cast %2 : vector<128xf32> to vector<128x1xf32>
    %cst_1 = arith.constant 6.400000e+01 : f32
    %4 = vector.broadcast %cst_1 : f32 to vector<128x1xf32>
    %5 = arith.divf %3, %4 : vector<128x1xf32>
    %6 = vector.broadcast %5 : vector<128x1xf32> to vector<128x64xf32>
    %7 = arith.subf %1, %6 : vector<128x64xf32>
    %8 = arith.mulf %7, %7 : vector<128x64xf32>
    %cst_2 = arith.constant dense<0.000000e+00> : vector<128xf32>
    %9 = vector.multi_reduction <add>, %8, %cst_2 [1] : vector<128x64xf32> to vector<128xf32>
    %10 = vector.shape_cast %9 : vector<128xf32> to vector<128x1xf32>
    %cst_3 = arith.constant 6.400000e+01 : f32
    %11 = vector.broadcast %cst_3 : f32 to vector<128x1xf32>
    %12 = arith.divf %10, %11 : vector<128x1xf32>
    %cst_4 = arith.constant 9.99999974E-6 : f32
    %13 = vector.broadcast %cst_4 : f32 to vector<128x1xf32>
    %14 = arith.addf %12, %13 : vector<128x1xf32>
    %15 = math.rsqrt %14 : vector<128x1xf32>
    %16 = vector.broadcast %15 : vector<128x1xf32> to vector<128x64xf32>
    %17 = arith.mulf %7, %16 : vector<128x64xf32>
    %c0_5 = arith.constant 0 : index
    %c0_6 = arith.constant 0 : index
    %18 = vector.load %arg4[%c0_5, %c0_6] : memref<1x64xf32, #tpu.memory_space<vmem>>, vector<1x64xf32>
    %19 = vector.broadcast %18 : vector<1x64xf32> to vector<128x64xf32>
    %20 = arith.mulf %17, %19 : vector<128x64xf32>
    %c0_7 = arith.constant 0 : index
    %c0_8 = arith.constant 0 : index
    %21 = vector.load %arg5[%c0_7, %c0_8] : memref<1x64xf32, #tpu.memory_space<vmem>>, vector<1x64xf32>
    %22 = vector.broadcast %21 : vector<1x64xf32> to vector<128x64xf32>
    %23 = arith.addf %20, %22 : vector<128x64xf32>
    %c0_9 = arith.constant 0 : index
    %c0_10 = arith.constant 0 : index
    %24 = vector.load %arg3[%c0_9, %c0_10] : memref<128x64xbf16, #tpu.memory_space<vmem>>, vector<128x64xbf16>
    %25 = arith.extf %24 : vector<128x64xbf16> to vector<128x64xf32>
    %26 = arith.negf %25 : vector<128x64xf32>
    %27 = math.exp %26 : vector<128x64xf32>
    %cst_11 = arith.constant 1.000000e+00 : f32
    %28 = vector.broadcast %cst_11 : f32 to vector<128x64xf32>
    %29 = arith.addf %28, %27 : vector<128x64xf32>
    %30 = arith.divf %28, %29 : vector<128x64xf32>
    %31 = arith.mulf %25, %30 : vector<128x64xf32>
    %32 = arith.mulf %23, %31 : vector<128x64xf32>
    %33 = arith.truncf %32 : vector<128x64xf32> to vector<128x64xbf16>
    %c0_12 = arith.constant 0 : index
    %c0_13 = arith.constant 0 : index
    %34 = vector.load %arg6[%c0_12, %c0_13] : memref<64x32xbf16, #tpu.memory_space<vmem>>, vector<64x32xbf16>
    %cst_14 = arith.constant dense<0.000000e+00> : vector<128x32xf32>
    %35 = tpu.matmul %33, %34, %cst_14 {dimension_numbers = #tpu.dot_dimension_numbers<[1], [0], [0], [1], [0, 0, 1, 1], [], []>} : vector<128x64xbf16>, vector<64x32xbf16>, vector<128x32xf32> -> vector<128x32xf32>
    %c0_15 = arith.constant 0 : index
    %c0_16 = arith.constant 0 : index
    %36 = memref.load %arg1[%c0_15, %c0_16] : memref<1x1xf32, #tpu.memory_space<smem>>
    %c0_17 = arith.constant 0 : index
    %c0_18 = arith.constant 0 : index
    %37 = vector.load %arg7[%c0_17, %c0_18] : memref<128x32xf32, #tpu.memory_space<vmem>>, vector<128x32xf32>
    %38 = vector.broadcast %36 : f32 to vector<128x32xf32>
    %39 = arith.mulf %38, %37 : vector<128x32xf32>
    %40 = arith.addf %35, %39 : vector<128x32xf32>
    %c0_19 = arith.constant 0 : index
    %c0_20 = arith.constant 0 : index
    %41 = vector.load %arg8[%c0_19, %c0_20] : memref<128x32xf32, #tpu.memory_space<vmem>>, vector<128x32xf32>
    tpu.vector_store %arg8[%c0_19, %c0_20], %40 {strides = array<i32>} : memref<128x32xf32, #tpu.memory_space<vmem>>, vector<128x32xf32>,
    return
  }
  func.func @transform_0(%arg0: i32) -> (i32, i32) {
    %c0_i32 = arith.constant 0 : i32
    %c0_i32_0 = arith.constant 0 : i32
    %c0_i32_1 = arith.constant 0 : i32
    return %c0_i32, %c0_i32_0 : i32, i32
  }
  func.func @transform_1(%arg0: i32) -> (i32, i32) {
    %c0_i32 = arith.constant 0 : i32
    %c0_i32_0 = arith.constant 0 : i32
    return %arg0, %c0_i32 : i32, i32
  }
  func.func @transform_2(%arg0: i32) -> (i32, i32) {
    %c0_i32 = arith.constant 0 : i32
    %c0_i32_0 = arith.constant 0 : i32
    return %arg0, %c0_i32 : i32, i32
  }
  func.func @transform_3(%arg0: i32) -> (i32, i32) {
    %c0_i32 = arith.constant 0 : i32
    %c0_i32_0 = arith.constant 0 : i32
    %c0_i32_1 = arith.constant 0 : i32
    return %c0_i32, %c0_i32_0 : i32, i32
  }
  func.func @transform_4(%arg0: i32) -> (i32, i32) {
    %c0_i32 = arith.constant 0 : i32
    %c0_i32_0 = arith.constant 0 : i32
    %c0_i32_1 = arith.constant 0 : i32
    return %c0_i32, %c0_i32_0 : i32, i32
  }
  func.func @transform_5(%arg0: i32) -> (i32, i32) {
    %c0_i32 = arith.constant 0 : i32
    %c0_i32_0 = arith.constant 0 : i32
    %c0_i32_1 = arith.constant 0 : i32
    return %c0_i32, %c0_i32_0 : i32, i32
  }
  func.func @transform_6(%arg0: i32) -> (i32, i32) {
    %c0_i32 = arith.constant 0 : i32
    %c0_i32_0 = arith.constant 0 : i32
    return %arg0, %c0_i32 : i32, i32
  }
  func.func @transform_7(%arg0: i32) -> (i32, i32) {
    %c0_i32 = arith.constant 0 : i32
    %c0_i32_0 = arith.constant 0 : i32
    return %arg0, %c0_i32 : i32, i32
  }
}

module attributes {stable_mosaic.version = 11 : i64} {
  func.func @_scan_kernel(%arg0: i32, %arg1: memref<1x8x8x64xbf16, #tpu.memory_space<vmem>>, %arg2: memref<2x64x256xbf16, #tpu.memory_space<vmem>>, %arg3: memref<2x2x8x64xf32, #tpu.memory_space<vmem>>, %arg4: memref<2x2x1x64xf32, #tpu.memory_space<vmem>>, %arg5: memref<2x2x1x64xf32, #tpu.memory_space<vmem>>, %arg6: memref<1x8x8x64xbf16, #tpu.memory_space<vmem>>, %arg7: memref<64x64xf32, #tpu.memory_space<vmem>>, %arg8: memref<64x256xf32, #tpu.memory_space<vmem>>, %arg9: memref<64x64xf32, #tpu.memory_space<vmem>>) attributes {dimension_semantics = [#tpu.dimension_semantics<parallel>], iteration_bounds = array<i64: 2>, scalar_prefetch = 0 : i64, scratch_operands = 3 : i64, tpu.core_type = #tpu.core_type<tc>, window_params = [{transform_indices = @transform_0, window_bounds = array<i64: 1, 8, 8, 64>}, {pipeline_mode = #tpu.pipeline_mode<synchronous>, transform_indices = @transform_1, window_bounds = array<i64: 2, 64, 256>}, {pipeline_mode = #tpu.pipeline_mode<synchronous>, transform_indices = @transform_2, window_bounds = array<i64: 2, 2, 8, 64>}, {pipeline_mode = #tpu.pipeline_mode<synchronous>, transform_indices = @transform_3, window_bounds = array<i64: 2, 2, 1, 64>}, {pipeline_mode = #tpu.pipeline_mode<synchronous>, transform_indices = @transform_4, window_bounds = array<i64: 2, 2, 1, 64>}, {transform_indices = @transform_5, window_bounds = array<i64: 1, 8, 8, 64>}]} {
    %c0 = arith.constant 0 : index
    %c0_0 = arith.constant 0 : index
    %c0_1 = arith.constant 0 : index
    %c0_2 = arith.constant 0 : index
    %0 = vector.load %arg1[%c0, %c0_0, %c0_1, %c0_2] : memref<1x8x8x64xbf16, #tpu.memory_space<vmem>>, vector<1x8x8x64xbf16>
    %1 = vector.shape_cast %0 : vector<1x8x8x64xbf16> to vector<8x8x64xbf16>
    %2 = arith.extf %1 : vector<8x8x64xbf16> to vector<8x8x64xf32>
    %3 = vector.shape_cast %2 : vector<8x8x64xf32> to vector<64x64xf32>
    %c0_3 = arith.constant 0 : index
    %c0_4 = arith.constant 0 : index
    %4 = vector.load %arg7[%c0_3, %c0_4] : memref<64x64xf32, #tpu.memory_space<vmem>>, vector<64x64xf32>
    tpu.vector_store %arg7[%c0_3, %c0_4], %3 {strides = array<i32>} : memref<64x64xf32, #tpu.memory_space<vmem>>, vector<64x64xf32>,
    %c0_5 = arith.constant 0 : index
    %c0_6 = arith.constant 0 : index
    %5 = vector.load %arg7[%c0_5, %c0_6] : memref<64x64xf32, #tpu.memory_space<vmem>>, vector<64x64xf32>
    %6 = arith.truncf %5 : vector<64x64xf32> to vector<64x64xbf16>
    %c0_7 = arith.constant 0 : index
    %c0_8 = arith.constant 0 : index
    %c0_9 = arith.constant 0 : index
    %7 = vector.load %arg2[%c0_7, %c0_8, %c0_9] : memref<2x64x256xbf16, #tpu.memory_space<vmem>>, vector<1x64x256xbf16>
    %8 = vector.shape_cast %7 : vector<1x64x256xbf16> to vector<64x256xbf16>
    %cst = arith.constant dense<0.000000e+00> : vector<64x256xf32>
    %9 = tpu.matmul %6, %8, %cst {dimension_numbers = #tpu.dot_dimension_numbers<[1], [0], [0], [1], [0, 0, 1, 1], [], []>} : vector<64x64xbf16>, vector<64x256xbf16>, vector<64x256xf32> -> vector<64x256xf32>
    %c0_10 = arith.constant 0 : index
    %c0_11 = arith.constant 0 : index
    %10 = vector.load %arg8[%c0_10, %c0_11] : memref<64x256xf32, #tpu.memory_space<vmem>>, vector<64x256xf32>
    tpu.vector_store %arg8[%c0_10, %c0_11], %9 {strides = array<i32>} : memref<64x256xf32, #tpu.memory_space<vmem>>, vector<64x256xf32>,
    %c0_12 = arith.constant 0 : index
    %c0_13 = arith.constant 0 : index
    %c0_14 = arith.constant 0 : index
    %c0_15 = arith.constant 0 : index
    %11 = vector.load %arg3[%c0_12, %c0_13, %c0_14, %c0_15] : memref<2x2x8x64xf32, #tpu.memory_space<vmem>>, vector<1x1x8x64xf32>
    %12 = vector.shape_cast %11 : vector<1x1x8x64xf32> to vector<8x64xf32>
    %c0_16 = arith.constant 0 : index
    %c0_17 = arith.constant 0 : index
    %c0_18 = arith.constant 0 : index
    %c0_19 = arith.constant 0 : index
    %13 = vector.load %arg5[%c0_16, %c0_17, %c0_18, %c0_19] : memref<2x2x1x64xf32, #tpu.memory_space<vmem>>, vector<1x1x1x64xf32>
    %14 = vector.shape_cast %13 : vector<1x1x1x64xf32> to vector<1x64xf32>
    %cst_20 = arith.constant 0.000000e+00 : f32
    %15 = vector.broadcast %cst_20 : f32 to vector<8x64xf32>
    %c0_i32 = arith.constant 0 : i32
    %c8_i32 = arith.constant 8 : i32
    %16 = arith.addi %c0_i32, %c8_i32 : i32
    %c1_i32 = arith.constant 1 : i32
    %17 = scf.for %arg10 = %c0_i32 to %16 step %c1_i32 iter_args(%arg11 = %15) -> (vector<8x64xf32>)  : i32 {
      %c8_i32_217 = arith.constant 8 : i32
      %177 = arith.muli %arg10, %c8_i32_217 : i32
      %178 = tpu.assume_multiple %177, 8 : i32
      %179 = arith.index_cast %178 : i32 to index
      %c0_218 = arith.constant 0 : index
      %180 = vector.load %arg7[%179, %c0_218] : memref<64x64xf32, #tpu.memory_space<vmem>>, vector<8x64xf32>
      %181 = arith.index_cast %178 : i32 to index
      %c0_219 = arith.constant 0 : index
      %182 = vector.load %arg8[%181, %c0_219] : memref<64x256xf32, #tpu.memory_space<vmem>>, vector<8x128xf32>
      %183 = vector.extract_strided_slice %182 {offsets = [0, 0], sizes = [8, 64], strides = [1, 1]} : vector<8x128xf32> to vector<8x64xf32>
      %184 = vector.broadcast %14 : vector<1x64xf32> to vector<8x64xf32>
      %185 = arith.addf %183, %184 : vector<8x64xf32>
      %cst_220 = arith.constant 0.000000e+00 : f32
      %186 = vector.broadcast %cst_220 : f32 to vector<8x64xf32>
      %187 = arith.maximumf %185, %186 : vector<8x64xf32>
      %188 = vector.broadcast %cst_220 : f32 to vector<8x64xf32>
      %189 = arith.subf %185, %188 : vector<8x64xf32>
      %190 = arith.cmpf one, %189, %189 : vector<8x64xf32>
      %191 = vector.broadcast %cst_220 : f32 to vector<8x64xf32>
      %192 = arith.addf %185, %191 : vector<8x64xf32>
      %193 = math.absf %189 : vector<8x64xf32>
      %cst_221 = arith.constant 0.000000e+00 : f32
      %194 = vector.broadcast %cst_221 : f32 to vector<8x64xf32>
      %195 = arith.subf %194, %193 : vector<8x64xf32>
      %196 = math.exp %195 : vector<8x64xf32>
      %197 = math.log1p %196 : vector<8x64xf32>
      %198 = arith.addf %187, %197 : vector<8x64xf32>
      %199 = arith.select %190, %192, %198 : vector<8x64xi1>, vector<8x64xf32>
      %200 = arith.mulf %199, %180 : vector<8x64xf32>
      %201 = vector.extract_strided_slice %182 {offsets = [0, 64], sizes = [8, 8], strides = [1, 1]} : vector<8x128xf32> to vector<8x8xf32>
      %202 = tpu.transpose %201, [1, 0] : vector<8x8xf32> -> vector<8x8xf32>
      %203 = vector.extract_strided_slice %182 {offsets = [0, 72], sizes = [8, 8], strides = [1, 1]} : vector<8x128xf32> to vector<8x8xf32>
      %204 = tpu.transpose %203, [1, 0] : vector<8x8xf32> -> vector<8x8xf32>
      %205 = vector.shape_cast %199 : vector<8x64xf32> to vector<8x1x64xf32>
      %206 = vector.shape_cast %12 : vector<8x64xf32> to vector<1x8x64xf32>
      %207 = vector.broadcast %205 : vector<8x1x64xf32> to vector<8x8x64xf32>
      %208 = vector.broadcast %206 : vector<1x8x64xf32> to vector<8x8x64xf32>
      %209 = arith.mulf %207, %208 : vector<8x8x64xf32>
      %210 = math.exp %209 : vector<8x8x64xf32>
      %211 = vector.extract_strided_slice %210 {offsets = [0, 0, 0], sizes = [1, 8, 64], strides = [1, 1, 1]} : vector<8x8x64xf32> to vector<1x8x64xf32>
      %212 = vector.shape_cast %211 : vector<1x8x64xf32> to vector<8x64xf32>
      %213 = arith.mulf %212, %arg11 : vector<8x64xf32>
      %214 = vector.extract_strided_slice %202 {offsets = [0, 0], sizes = [8, 1], strides = [1, 1]} : vector<8x8xf32> to vector<8x1xf32>
      %215 = vector.extract_strided_slice %200 {offsets = [0, 0], sizes = [1, 64], strides = [1, 1]} : vector<8x64xf32> to vector<1x64xf32>
      %216 = vector.broadcast %214 : vector<8x1xf32> to vector<8x64xf32>
      %217 = vector.broadcast %215 : vector<1x64xf32> to vector<8x64xf32>
      %218 = arith.mulf %216, %217 : vector<8x64xf32>
      %219 = arith.addf %213, %218 : vector<8x64xf32>
      %220 = vector.extract_strided_slice %204 {offsets = [0, 0], sizes = [8, 1], strides = [1, 1]} : vector<8x8xf32> to vector<8x1xf32>
      %221 = vector.broadcast %220 : vector<8x1xf32> to vector<8x64xf32>
      %222 = arith.mulf %221, %219 : vector<8x64xf32>
      %cst_222 = arith.constant dense<0.000000e+00> : vector<64xf32>
      %223 = vector.multi_reduction <add>, %222, %cst_222 [0] : vector<8x64xf32> to vector<64xf32>
      %224 = vector.shape_cast %223 : vector<64xf32> to vector<1x64xf32>
      %c0_i32_223 = arith.constant 0 : i32
      %225 = arith.addi %178, %c0_i32_223 : i32
      %226 = arith.index_cast %225 : i32 to index
      %c0_224 = arith.constant 0 : index
      %227 = vector.load %arg9[%226, %c0_224] : memref<64x64xf32, #tpu.memory_space<vmem>>, vector<1x64xf32>
      tpu.vector_store %arg9[%226, %c0_224], %224 {strides = array<i32>} : memref<64x64xf32, #tpu.memory_space<vmem>>, vector<1x64xf32>,
      %228 = vector.extract_strided_slice %210 {offsets = [1, 0, 0], sizes = [1, 8, 64], strides = [1, 1, 1]} : vector<8x8x64xf32> to vector<1x8x64xf32>
      %229 = vector.shape_cast %228 : vector<1x8x64xf32> to vector<8x64xf32>
      %230 = arith.mulf %229, %219 : vector<8x64xf32>
      %231 = vector.extract_strided_slice %202 {offsets = [0, 1], sizes = [8, 1], strides = [1, 1]} : vector<8x8xf32> to vector<8x1xf32>
      %232 = vector.extract_strided_slice %200 {offsets = [1, 0], sizes = [1, 64], strides = [1, 1]} : vector<8x64xf32> to vector<1x64xf32>
      %233 = vector.broadcast %231 : vector<8x1xf32> to vector<8x64xf32>
      %234 = vector.broadcast %232 : vector<1x64xf32> to vector<8x64xf32>
      %235 = arith.mulf %233, %234 : vector<8x64xf32>
      %236 = arith.addf %230, %235 : vector<8x64xf32>
      %237 = vector.extract_strided_slice %204 {offsets = [0, 1], sizes = [8, 1], strides = [1, 1]} : vector<8x8xf32> to vector<8x1xf32>
      %238 = vector.broadcast %237 : vector<8x1xf32> to vector<8x64xf32>
      %239 = arith.mulf %238, %236 : vector<8x64xf32>
      %cst_225 = arith.constant dense<0.000000e+00> : vector<64xf32>
      %240 = vector.multi_reduction <add>, %239, %cst_225 [0] : vector<8x64xf32> to vector<64xf32>
      %241 = vector.shape_cast %240 : vector<64xf32> to vector<1x64xf32>
      %c1_i32_226 = arith.constant 1 : i32
      %242 = arith.addi %178, %c1_i32_226 : i32
      %243 = arith.index_cast %242 : i32 to index
      %c0_227 = arith.constant 0 : index
      %244 = vector.load %arg9[%243, %c0_227] : memref<64x64xf32, #tpu.memory_space<vmem>>, vector<1x64xf32>
      tpu.vector_store %arg9[%243, %c0_227], %241 {strides = array<i32>} : memref<64x64xf32, #tpu.memory_space<vmem>>, vector<1x64xf32>,
      %245 = vector.extract_strided_slice %210 {offsets = [2, 0, 0], sizes = [1, 8, 64], strides = [1, 1, 1]} : vector<8x8x64xf32> to vector<1x8x64xf32>
      %246 = vector.shape_cast %245 : vector<1x8x64xf32> to vector<8x64xf32>
      %247 = arith.mulf %246, %236 : vector<8x64xf32>
      %248 = vector.extract_strided_slice %202 {offsets = [0, 2], sizes = [8, 1], strides = [1, 1]} : vector<8x8xf32> to vector<8x1xf32>
      %249 = vector.extract_strided_slice %200 {offsets = [2, 0], sizes = [1, 64], strides = [1, 1]} : vector<8x64xf32> to vector<1x64xf32>
      %250 = vector.broadcast %248 : vector<8x1xf32> to vector<8x64xf32>
      %251 = vector.broadcast %249 : vector<1x64xf32> to vector<8x64xf32>
      %252 = arith.mulf %250, %251 : vector<8x64xf32>
      %253 = arith.addf %247, %252 : vector<8x64xf32>
      %254 = vector.extract_strided_slice %204 {offsets = [0, 2], sizes = [8, 1], strides = [1, 1]} : vector<8x8xf32> to vector<8x1xf32>
      %255 = vector.broadcast %254 : vector<8x1xf32> to vector<8x64xf32>
      %256 = arith.mulf %255, %253 : vector<8x64xf32>
      %cst_228 = arith.constant dense<0.000000e+00> : vector<64xf32>
      %257 = vector.multi_reduction <add>, %256, %cst_228 [0] : vector<8x64xf32> to vector<64xf32>
      %258 = vector.shape_cast %257 : vector<64xf32> to vector<1x64xf32>
      %c2_i32 = arith.constant 2 : i32
      %259 = arith.addi %178, %c2_i32 : i32
      %260 = arith.index_cast %259 : i32 to index
      %c0_229 = arith.constant 0 : index
      %261 = vector.load %arg9[%260, %c0_229] : memref<64x64xf32, #tpu.memory_space<vmem>>, vector<1x64xf32>
      tpu.vector_store %arg9[%260, %c0_229], %258 {strides = array<i32>} : memref<64x64xf32, #tpu.memory_space<vmem>>, vector<1x64xf32>,
      %262 = vector.extract_strided_slice %210 {offsets = [3, 0, 0], sizes = [1, 8, 64], strides = [1, 1, 1]} : vector<8x8x64xf32> to vector<1x8x64xf32>
      %263 = vector.shape_cast %262 : vector<1x8x64xf32> to vector<8x64xf32>
      %264 = arith.mulf %263, %253 : vector<8x64xf32>
      %265 = vector.extract_strided_slice %202 {offsets = [0, 3], sizes = [8, 1], strides = [1, 1]} : vector<8x8xf32> to vector<8x1xf32>
      %266 = vector.extract_strided_slice %200 {offsets = [3, 0], sizes = [1, 64], strides = [1, 1]} : vector<8x64xf32> to vector<1x64xf32>
      %267 = vector.broadcast %265 : vector<8x1xf32> to vector<8x64xf32>
      %268 = vector.broadcast %266 : vector<1x64xf32> to vector<8x64xf32>
      %269 = arith.mulf %267, %268 : vector<8x64xf32>
      %270 = arith.addf %264, %269 : vector<8x64xf32>
      %271 = vector.extract_strided_slice %204 {offsets = [0, 3], sizes = [8, 1], strides = [1, 1]} : vector<8x8xf32> to vector<8x1xf32>
      %272 = vector.broadcast %271 : vector<8x1xf32> to vector<8x64xf32>
      %273 = arith.mulf %272, %270 : vector<8x64xf32>
      %cst_230 = arith.constant dense<0.000000e+00> : vector<64xf32>
      %274 = vector.multi_reduction <add>, %273, %cst_230 [0] : vector<8x64xf32> to vector<64xf32>
      %275 = vector.shape_cast %274 : vector<64xf32> to vector<1x64xf32>
      %c3_i32 = arith.constant 3 : i32
      %276 = arith.addi %178, %c3_i32 : i32
      %277 = arith.index_cast %276 : i32 to index
      %c0_231 = arith.constant 0 : index
      %278 = vector.load %arg9[%277, %c0_231] : memref<64x64xf32, #tpu.memory_space<vmem>>, vector<1x64xf32>
      tpu.vector_store %arg9[%277, %c0_231], %275 {strides = array<i32>} : memref<64x64xf32, #tpu.memory_space<vmem>>, vector<1x64xf32>,
      %279 = vector.extract_strided_slice %210 {offsets = [4, 0, 0], sizes = [1, 8, 64], strides = [1, 1, 1]} : vector<8x8x64xf32> to vector<1x8x64xf32>
      %280 = vector.shape_cast %279 : vector<1x8x64xf32> to vector<8x64xf32>
      %281 = arith.mulf %280, %270 : vector<8x64xf32>
      %282 = vector.extract_strided_slice %202 {offsets = [0, 4], sizes = [8, 1], strides = [1, 1]} : vector<8x8xf32> to vector<8x1xf32>
      %283 = vector.extract_strided_slice %200 {offsets = [4, 0], sizes = [1, 64], strides = [1, 1]} : vector<8x64xf32> to vector<1x64xf32>
      %284 = vector.broadcast %282 : vector<8x1xf32> to vector<8x64xf32>
      %285 = vector.broadcast %283 : vector<1x64xf32> to vector<8x64xf32>
      %286 = arith.mulf %284, %285 : vector<8x64xf32>
      %287 = arith.addf %281, %286 : vector<8x64xf32>
      %288 = vector.extract_strided_slice %204 {offsets = [0, 4], sizes = [8, 1], strides = [1, 1]} : vector<8x8xf32> to vector<8x1xf32>
      %289 = vector.broadcast %288 : vector<8x1xf32> to vector<8x64xf32>
      %290 = arith.mulf %289, %287 : vector<8x64xf32>
      %cst_232 = arith.constant dense<0.000000e+00> : vector<64xf32>
      %291 = vector.multi_reduction <add>, %290, %cst_232 [0] : vector<8x64xf32> to vector<64xf32>
      %292 = vector.shape_cast %291 : vector<64xf32> to vector<1x64xf32>
      %c4_i32 = arith.constant 4 : i32
      %293 = arith.addi %178, %c4_i32 : i32
      %294 = arith.index_cast %293 : i32 to index
      %c0_233 = arith.constant 0 : index
      %295 = vector.load %arg9[%294, %c0_233] : memref<64x64xf32, #tpu.memory_space<vmem>>, vector<1x64xf32>
      tpu.vector_store %arg9[%294, %c0_233], %292 {strides = array<i32>} : memref<64x64xf32, #tpu.memory_space<vmem>>, vector<1x64xf32>,
      %296 = vector.extract_strided_slice %210 {offsets = [5, 0, 0], sizes = [1, 8, 64], strides = [1, 1, 1]} : vector<8x8x64xf32> to vector<1x8x64xf32>
      %297 = vector.shape_cast %296 : vector<1x8x64xf32> to vector<8x64xf32>
      %298 = arith.mulf %297, %287 : vector<8x64xf32>
      %299 = vector.extract_strided_slice %202 {offsets = [0, 5], sizes = [8, 1], strides = [1, 1]} : vector<8x8xf32> to vector<8x1xf32>
      %300 = vector.extract_strided_slice %200 {offsets = [5, 0], sizes = [1, 64], strides = [1, 1]} : vector<8x64xf32> to vector<1x64xf32>
      %301 = vector.broadcast %299 : vector<8x1xf32> to vector<8x64xf32>
      %302 = vector.broadcast %300 : vector<1x64xf32> to vector<8x64xf32>
      %303 = arith.mulf %301, %302 : vector<8x64xf32>
      %304 = arith.addf %298, %303 : vector<8x64xf32>
      %305 = vector.extract_strided_slice %204 {offsets = [0, 5], sizes = [8, 1], strides = [1, 1]} : vector<8x8xf32> to vector<8x1xf32>
      %306 = vector.broadcast %305 : vector<8x1xf32> to vector<8x64xf32>
      %307 = arith.mulf %306, %304 : vector<8x64xf32>
      %cst_234 = arith.constant dense<0.000000e+00> : vector<64xf32>
      %308 = vector.multi_reduction <add>, %307, %cst_234 [0] : vector<8x64xf32> to vector<64xf32>
      %309 = vector.shape_cast %308 : vector<64xf32> to vector<1x64xf32>
      %c5_i32 = arith.constant 5 : i32
      %310 = arith.addi %178, %c5_i32 : i32
      %311 = arith.index_cast %310 : i32 to index
      %c0_235 = arith.constant 0 : index
      %312 = vector.load %arg9[%311, %c0_235] : memref<64x64xf32, #tpu.memory_space<vmem>>, vector<1x64xf32>
      tpu.vector_store %arg9[%311, %c0_235], %309 {strides = array<i32>} : memref<64x64xf32, #tpu.memory_space<vmem>>, vector<1x64xf32>,
      %313 = vector.extract_strided_slice %210 {offsets = [6, 0, 0], sizes = [1, 8, 64], strides = [1, 1, 1]} : vector<8x8x64xf32> to vector<1x8x64xf32>
      %314 = vector.shape_cast %313 : vector<1x8x64xf32> to vector<8x64xf32>
      %315 = arith.mulf %314, %304 : vector<8x64xf32>
      %316 = vector.extract_strided_slice %202 {offsets = [0, 6], sizes = [8, 1], strides = [1, 1]} : vector<8x8xf32> to vector<8x1xf32>
      %317 = vector.extract_strided_slice %200 {offsets = [6, 0], sizes = [1, 64], strides = [1, 1]} : vector<8x64xf32> to vector<1x64xf32>
      %318 = vector.broadcast %316 : vector<8x1xf32> to vector<8x64xf32>
      %319 = vector.broadcast %317 : vector<1x64xf32> to vector<8x64xf32>
      %320 = arith.mulf %318, %319 : vector<8x64xf32>
      %321 = arith.addf %315, %320 : vector<8x64xf32>
      %322 = vector.extract_strided_slice %204 {offsets = [0, 6], sizes = [8, 1], strides = [1, 1]} : vector<8x8xf32> to vector<8x1xf32>
      %323 = vector.broadcast %322 : vector<8x1xf32> to vector<8x64xf32>
      %324 = arith.mulf %323, %321 : vector<8x64xf32>
      %cst_236 = arith.constant dense<0.000000e+00> : vector<64xf32>
      %325 = vector.multi_reduction <add>, %324, %cst_236 [0] : vector<8x64xf32> to vector<64xf32>
      %326 = vector.shape_cast %325 : vector<64xf32> to vector<1x64xf32>
      %c6_i32 = arith.constant 6 : i32
      %327 = arith.addi %178, %c6_i32 : i32
      %328 = arith.index_cast %327 : i32 to index
      %c0_237 = arith.constant 0 : index
      %329 = vector.load %arg9[%328, %c0_237] : memref<64x64xf32, #tpu.memory_space<vmem>>, vector<1x64xf32>
      tpu.vector_store %arg9[%328, %c0_237], %326 {strides = array<i32>} : memref<64x64xf32, #tpu.memory_space<vmem>>, vector<1x64xf32>,
      %330 = vector.extract_strided_slice %210 {offsets = [7, 0, 0], sizes = [1, 8, 64], strides = [1, 1, 1]} : vector<8x8x64xf32> to vector<1x8x64xf32>
      %331 = vector.shape_cast %330 : vector<1x8x64xf32> to vector<8x64xf32>
      %332 = arith.mulf %331, %321 : vector<8x64xf32>
      %333 = vector.extract_strided_slice %202 {offsets = [0, 7], sizes = [8, 1], strides = [1, 1]} : vector<8x8xf32> to vector<8x1xf32>
      %334 = vector.extract_strided_slice %200 {offsets = [7, 0], sizes = [1, 64], strides = [1, 1]} : vector<8x64xf32> to vector<1x64xf32>
      %335 = vector.broadcast %333 : vector<8x1xf32> to vector<8x64xf32>
      %336 = vector.broadcast %334 : vector<1x64xf32> to vector<8x64xf32>
      %337 = arith.mulf %335, %336 : vector<8x64xf32>
      %338 = arith.addf %332, %337 : vector<8x64xf32>
      %339 = vector.extract_strided_slice %204 {offsets = [0, 7], sizes = [8, 1], strides = [1, 1]} : vector<8x8xf32> to vector<8x1xf32>
      %340 = vector.broadcast %339 : vector<8x1xf32> to vector<8x64xf32>
      %341 = arith.mulf %340, %338 : vector<8x64xf32>
      %cst_238 = arith.constant dense<0.000000e+00> : vector<64xf32>
      %342 = vector.multi_reduction <add>, %341, %cst_238 [0] : vector<8x64xf32> to vector<64xf32>
      %343 = vector.shape_cast %342 : vector<64xf32> to vector<1x64xf32>
      %c7_i32 = arith.constant 7 : i32
      %344 = arith.addi %178, %c7_i32 : i32
      %345 = arith.index_cast %344 : i32 to index
      %c0_239 = arith.constant 0 : index
      %346 = vector.load %arg9[%345, %c0_239] : memref<64x64xf32, #tpu.memory_space<vmem>>, vector<1x64xf32>
      tpu.vector_store %arg9[%345, %c0_239], %343 {strides = array<i32>} : memref<64x64xf32, #tpu.memory_space<vmem>>, vector<1x64xf32>,
      scf.yield %338 : vector<8x64xf32>
    }
    %c8_i32_21 = arith.constant 8 : i32
    %c0_22 = arith.constant 0 : index
    %c1 = arith.constant 1 : index
    %c0_23 = arith.constant 0 : index
    %c0_24 = arith.constant 0 : index
    %18 = vector.load %arg3[%c0_22, %c1, %c0_23, %c0_24] : memref<2x2x8x64xf32, #tpu.memory_space<vmem>>, vector<1x1x8x64xf32>
    %19 = vector.shape_cast %18 : vector<1x1x8x64xf32> to vector<8x64xf32>
    %c0_25 = arith.constant 0 : index
    %c1_26 = arith.constant 1 : index
    %c0_27 = arith.constant 0 : index
    %c0_28 = arith.constant 0 : index
    %20 = vector.load %arg5[%c0_25, %c1_26, %c0_27, %c0_28] : memref<2x2x1x64xf32, #tpu.memory_space<vmem>>, vector<1x1x1x64xf32>
    %21 = vector.shape_cast %20 : vector<1x1x1x64xf32> to vector<1x64xf32>
    %cst_29 = arith.constant 0.000000e+00 : f32
    %22 = vector.broadcast %cst_29 : f32 to vector<8x64xf32>
    %c0_i32_30 = arith.constant 0 : i32
    %c8_i32_31 = arith.constant 8 : i32
    %23 = arith.addi %c0_i32_30, %c8_i32_31 : i32
    %c1_i32_32 = arith.constant 1 : i32
    %24 = scf.for %arg10 = %c0_i32_30 to %23 step %c1_i32_32 iter_args(%arg11 = %22) -> (vector<8x64xf32>)  : i32 {
      %c7_i32 = arith.constant 7 : i32
      %177 = arith.subi %c7_i32, %arg10 : i32
      %c8_i32_217 = arith.constant 8 : i32
      %178 = arith.muli %177, %c8_i32_217 : i32
      %179 = tpu.assume_multiple %178, 8 : i32
      %180 = arith.index_cast %179 : i32 to index
      %c0_218 = arith.constant 0 : index
      %181 = vector.load %arg7[%180, %c0_218] : memref<64x64xf32, #tpu.memory_space<vmem>>, vector<8x64xf32>
      %182 = arith.index_cast %179 : i32 to index
      %c128 = arith.constant 128 : index
      %183 = vector.load %arg8[%182, %c128] : memref<64x256xf32, #tpu.memory_space<vmem>>, vector<8x128xf32>
      %184 = vector.extract_strided_slice %183 {offsets = [0, 0], sizes = [8, 64], strides = [1, 1]} : vector<8x128xf32> to vector<8x64xf32>
      %185 = vector.broadcast %21 : vector<1x64xf32> to vector<8x64xf32>
      %186 = arith.addf %184, %185 : vector<8x64xf32>
      %cst_219 = arith.constant 0.000000e+00 : f32
      %187 = vector.broadcast %cst_219 : f32 to vector<8x64xf32>
      %188 = arith.maximumf %186, %187 : vector<8x64xf32>
      %189 = vector.broadcast %cst_219 : f32 to vector<8x64xf32>
      %190 = arith.subf %186, %189 : vector<8x64xf32>
      %191 = arith.cmpf one, %190, %190 : vector<8x64xf32>
      %192 = vector.broadcast %cst_219 : f32 to vector<8x64xf32>
      %193 = arith.addf %186, %192 : vector<8x64xf32>
      %194 = math.absf %190 : vector<8x64xf32>
      %cst_220 = arith.constant 0.000000e+00 : f32
      %195 = vector.broadcast %cst_220 : f32 to vector<8x64xf32>
      %196 = arith.subf %195, %194 : vector<8x64xf32>
      %197 = math.exp %196 : vector<8x64xf32>
      %198 = math.log1p %197 : vector<8x64xf32>
      %199 = arith.addf %188, %198 : vector<8x64xf32>
      %200 = arith.select %191, %193, %199 : vector<8x64xi1>, vector<8x64xf32>
      %201 = arith.mulf %200, %181 : vector<8x64xf32>
      %202 = vector.extract_strided_slice %183 {offsets = [0, 64], sizes = [8, 8], strides = [1, 1]} : vector<8x128xf32> to vector<8x8xf32>
      %203 = tpu.transpose %202, [1, 0] : vector<8x8xf32> -> vector<8x8xf32>
      %204 = vector.extract_strided_slice %183 {offsets = [0, 72], sizes = [8, 8], strides = [1, 1]} : vector<8x128xf32> to vector<8x8xf32>
      %205 = tpu.transpose %204, [1, 0] : vector<8x8xf32> -> vector<8x8xf32>
      %206 = vector.shape_cast %200 : vector<8x64xf32> to vector<8x1x64xf32>
      %207 = vector.shape_cast %19 : vector<8x64xf32> to vector<1x8x64xf32>
      %208 = vector.broadcast %206 : vector<8x1x64xf32> to vector<8x8x64xf32>
      %209 = vector.broadcast %207 : vector<1x8x64xf32> to vector<8x8x64xf32>
      %210 = arith.mulf %208, %209 : vector<8x8x64xf32>
      %211 = math.exp %210 : vector<8x8x64xf32>
      %212 = vector.extract_strided_slice %211 {offsets = [7, 0, 0], sizes = [1, 8, 64], strides = [1, 1, 1]} : vector<8x8x64xf32> to vector<1x8x64xf32>
      %213 = vector.shape_cast %212 : vector<1x8x64xf32> to vector<8x64xf32>
      %214 = arith.mulf %213, %arg11 : vector<8x64xf32>
      %215 = vector.extract_strided_slice %203 {offsets = [0, 7], sizes = [8, 1], strides = [1, 1]} : vector<8x8xf32> to vector<8x1xf32>
      %216 = vector.extract_strided_slice %201 {offsets = [7, 0], sizes = [1, 64], strides = [1, 1]} : vector<8x64xf32> to vector<1x64xf32>
      %217 = vector.broadcast %215 : vector<8x1xf32> to vector<8x64xf32>
      %218 = vector.broadcast %216 : vector<1x64xf32> to vector<8x64xf32>
      %219 = arith.mulf %217, %218 : vector<8x64xf32>
      %220 = arith.addf %214, %219 : vector<8x64xf32>
      %221 = vector.extract_strided_slice %205 {offsets = [0, 7], sizes = [8, 1], strides = [1, 1]} : vector<8x8xf32> to vector<8x1xf32>
      %222 = vector.broadcast %221 : vector<8x1xf32> to vector<8x64xf32>
      %223 = arith.mulf %222, %220 : vector<8x64xf32>
      %cst_221 = arith.constant dense<0.000000e+00> : vector<64xf32>
      %224 = vector.multi_reduction <add>, %223, %cst_221 [0] : vector<8x64xf32> to vector<64xf32>
      %225 = vector.shape_cast %224 : vector<64xf32> to vector<1x64xf32>
      %c7_i32_222 = arith.constant 7 : i32
      %226 = arith.addi %179, %c7_i32_222 : i32
      %227 = arith.index_cast %226 : i32 to index
      %c0_223 = arith.constant 0 : index
      %228 = vector.load %arg9[%227, %c0_223] : memref<64x64xf32, #tpu.memory_space<vmem>>, vector<1x64xf32>
      %229 = arith.addf %228, %225 : vector<1x64xf32>
      %230 = arith.index_cast %226 : i32 to index
      %c0_224 = arith.constant 0 : index
      %231 = vector.load %arg9[%230, %c0_224] : memref<64x64xf32, #tpu.memory_space<vmem>>, vector<1x64xf32>
      tpu.vector_store %arg9[%230, %c0_224], %229 {strides = array<i32>} : memref<64x64xf32, #tpu.memory_space<vmem>>, vector<1x64xf32>,
      %232 = vector.extract_strided_slice %211 {offsets = [6, 0, 0], sizes = [1, 8, 64], strides = [1, 1, 1]} : vector<8x8x64xf32> to vector<1x8x64xf32>
      %233 = vector.shape_cast %232 : vector<1x8x64xf32> to vector<8x64xf32>
      %234 = arith.mulf %233, %220 : vector<8x64xf32>
      %235 = vector.extract_strided_slice %203 {offsets = [0, 6], sizes = [8, 1], strides = [1, 1]} : vector<8x8xf32> to vector<8x1xf32>
      %236 = vector.extract_strided_slice %201 {offsets = [6, 0], sizes = [1, 64], strides = [1, 1]} : vector<8x64xf32> to vector<1x64xf32>
      %237 = vector.broadcast %235 : vector<8x1xf32> to vector<8x64xf32>
      %238 = vector.broadcast %236 : vector<1x64xf32> to vector<8x64xf32>
      %239 = arith.mulf %237, %238 : vector<8x64xf32>
      %240 = arith.addf %234, %239 : vector<8x64xf32>
      %241 = vector.extract_strided_slice %205 {offsets = [0, 6], sizes = [8, 1], strides = [1, 1]} : vector<8x8xf32> to vector<8x1xf32>
      %242 = vector.broadcast %241 : vector<8x1xf32> to vector<8x64xf32>
      %243 = arith.mulf %242, %240 : vector<8x64xf32>
      %cst_225 = arith.constant dense<0.000000e+00> : vector<64xf32>
      %244 = vector.multi_reduction <add>, %243, %cst_225 [0] : vector<8x64xf32> to vector<64xf32>
      %245 = vector.shape_cast %244 : vector<64xf32> to vector<1x64xf32>
      %c6_i32 = arith.constant 6 : i32
      %246 = arith.addi %179, %c6_i32 : i32
      %247 = arith.index_cast %246 : i32 to index
      %c0_226 = arith.constant 0 : index
      %248 = vector.load %arg9[%247, %c0_226] : memref<64x64xf32, #tpu.memory_space<vmem>>, vector<1x64xf32>
      %249 = arith.addf %248, %245 : vector<1x64xf32>
      %250 = arith.index_cast %246 : i32 to index
      %c0_227 = arith.constant 0 : index
      %251 = vector.load %arg9[%250, %c0_227] : memref<64x64xf32, #tpu.memory_space<vmem>>, vector<1x64xf32>
      tpu.vector_store %arg9[%250, %c0_227], %249 {strides = array<i32>} : memref<64x64xf32, #tpu.memory_space<vmem>>, vector<1x64xf32>,
      %252 = vector.extract_strided_slice %211 {offsets = [5, 0, 0], sizes = [1, 8, 64], strides = [1, 1, 1]} : vector<8x8x64xf32> to vector<1x8x64xf32>
      %253 = vector.shape_cast %252 : vector<1x8x64xf32> to vector<8x64xf32>
      %254 = arith.mulf %253, %240 : vector<8x64xf32>
      %255 = vector.extract_strided_slice %203 {offsets = [0, 5], sizes = [8, 1], strides = [1, 1]} : vector<8x8xf32> to vector<8x1xf32>
      %256 = vector.extract_strided_slice %201 {offsets = [5, 0], sizes = [1, 64], strides = [1, 1]} : vector<8x64xf32> to vector<1x64xf32>
      %257 = vector.broadcast %255 : vector<8x1xf32> to vector<8x64xf32>
      %258 = vector.broadcast %256 : vector<1x64xf32> to vector<8x64xf32>
      %259 = arith.mulf %257, %258 : vector<8x64xf32>
      %260 = arith.addf %254, %259 : vector<8x64xf32>
      %261 = vector.extract_strided_slice %205 {offsets = [0, 5], sizes = [8, 1], strides = [1, 1]} : vector<8x8xf32> to vector<8x1xf32>
      %262 = vector.broadcast %261 : vector<8x1xf32> to vector<8x64xf32>
      %263 = arith.mulf %262, %260 : vector<8x64xf32>
      %cst_228 = arith.constant dense<0.000000e+00> : vector<64xf32>
      %264 = vector.multi_reduction <add>, %263, %cst_228 [0] : vector<8x64xf32> to vector<64xf32>
      %265 = vector.shape_cast %264 : vector<64xf32> to vector<1x64xf32>
      %c5_i32 = arith.constant 5 : i32
      %266 = arith.addi %179, %c5_i32 : i32
      %267 = arith.index_cast %266 : i32 to index
      %c0_229 = arith.constant 0 : index
      %268 = vector.load %arg9[%267, %c0_229] : memref<64x64xf32, #tpu.memory_space<vmem>>, vector<1x64xf32>
      %269 = arith.addf %268, %265 : vector<1x64xf32>
      %270 = arith.index_cast %266 : i32 to index
      %c0_230 = arith.constant 0 : index
      %271 = vector.load %arg9[%270, %c0_230] : memref<64x64xf32, #tpu.memory_space<vmem>>, vector<1x64xf32>
      tpu.vector_store %arg9[%270, %c0_230], %269 {strides = array<i32>} : memref<64x64xf32, #tpu.memory_space<vmem>>, vector<1x64xf32>,
      %272 = vector.extract_strided_slice %211 {offsets = [4, 0, 0], sizes = [1, 8, 64], strides = [1, 1, 1]} : vector<8x8x64xf32> to vector<1x8x64xf32>
      %273 = vector.shape_cast %272 : vector<1x8x64xf32> to vector<8x64xf32>
      %274 = arith.mulf %273, %260 : vector<8x64xf32>
      %275 = vector.extract_strided_slice %203 {offsets = [0, 4], sizes = [8, 1], strides = [1, 1]} : vector<8x8xf32> to vector<8x1xf32>
      %276 = vector.extract_strided_slice %201 {offsets = [4, 0], sizes = [1, 64], strides = [1, 1]} : vector<8x64xf32> to vector<1x64xf32>
      %277 = vector.broadcast %275 : vector<8x1xf32> to vector<8x64xf32>
      %278 = vector.broadcast %276 : vector<1x64xf32> to vector<8x64xf32>
      %279 = arith.mulf %277, %278 : vector<8x64xf32>
      %280 = arith.addf %274, %279 : vector<8x64xf32>
      %281 = vector.extract_strided_slice %205 {offsets = [0, 4], sizes = [8, 1], strides = [1, 1]} : vector<8x8xf32> to vector<8x1xf32>
      %282 = vector.broadcast %281 : vector<8x1xf32> to vector<8x64xf32>
      %283 = arith.mulf %282, %280 : vector<8x64xf32>
      %cst_231 = arith.constant dense<0.000000e+00> : vector<64xf32>
      %284 = vector.multi_reduction <add>, %283, %cst_231 [0] : vector<8x64xf32> to vector<64xf32>
      %285 = vector.shape_cast %284 : vector<64xf32> to vector<1x64xf32>
      %c4_i32 = arith.constant 4 : i32
      %286 = arith.addi %179, %c4_i32 : i32
      %287 = arith.index_cast %286 : i32 to index
      %c0_232 = arith.constant 0 : index
      %288 = vector.load %arg9[%287, %c0_232] : memref<64x64xf32, #tpu.memory_space<vmem>>, vector<1x64xf32>
      %289 = arith.addf %288, %285 : vector<1x64xf32>
      %290 = arith.index_cast %286 : i32 to index
      %c0_233 = arith.constant 0 : index
      %291 = vector.load %arg9[%290, %c0_233] : memref<64x64xf32, #tpu.memory_space<vmem>>, vector<1x64xf32>
      tpu.vector_store %arg9[%290, %c0_233], %289 {strides = array<i32>} : memref<64x64xf32, #tpu.memory_space<vmem>>, vector<1x64xf32>,
      %292 = vector.extract_strided_slice %211 {offsets = [3, 0, 0], sizes = [1, 8, 64], strides = [1, 1, 1]} : vector<8x8x64xf32> to vector<1x8x64xf32>
      %293 = vector.shape_cast %292 : vector<1x8x64xf32> to vector<8x64xf32>
      %294 = arith.mulf %293, %280 : vector<8x64xf32>
      %295 = vector.extract_strided_slice %203 {offsets = [0, 3], sizes = [8, 1], strides = [1, 1]} : vector<8x8xf32> to vector<8x1xf32>
      %296 = vector.extract_strided_slice %201 {offsets = [3, 0], sizes = [1, 64], strides = [1, 1]} : vector<8x64xf32> to vector<1x64xf32>
      %297 = vector.broadcast %295 : vector<8x1xf32> to vector<8x64xf32>
      %298 = vector.broadcast %296 : vector<1x64xf32> to vector<8x64xf32>
      %299 = arith.mulf %297, %298 : vector<8x64xf32>
      %300 = arith.addf %294, %299 : vector<8x64xf32>
      %301 = vector.extract_strided_slice %205 {offsets = [0, 3], sizes = [8, 1], strides = [1, 1]} : vector<8x8xf32> to vector<8x1xf32>
      %302 = vector.broadcast %301 : vector<8x1xf32> to vector<8x64xf32>
      %303 = arith.mulf %302, %300 : vector<8x64xf32>
      %cst_234 = arith.constant dense<0.000000e+00> : vector<64xf32>
      %304 = vector.multi_reduction <add>, %303, %cst_234 [0] : vector<8x64xf32> to vector<64xf32>
      %305 = vector.shape_cast %304 : vector<64xf32> to vector<1x64xf32>
      %c3_i32 = arith.constant 3 : i32
      %306 = arith.addi %179, %c3_i32 : i32
      %307 = arith.index_cast %306 : i32 to index
      %c0_235 = arith.constant 0 : index
      %308 = vector.load %arg9[%307, %c0_235] : memref<64x64xf32, #tpu.memory_space<vmem>>, vector<1x64xf32>
      %309 = arith.addf %308, %305 : vector<1x64xf32>
      %310 = arith.index_cast %306 : i32 to index
      %c0_236 = arith.constant 0 : index
      %311 = vector.load %arg9[%310, %c0_236] : memref<64x64xf32, #tpu.memory_space<vmem>>, vector<1x64xf32>
      tpu.vector_store %arg9[%310, %c0_236], %309 {strides = array<i32>} : memref<64x64xf32, #tpu.memory_space<vmem>>, vector<1x64xf32>,
      %312 = vector.extract_strided_slice %211 {offsets = [2, 0, 0], sizes = [1, 8, 64], strides = [1, 1, 1]} : vector<8x8x64xf32> to vector<1x8x64xf32>
      %313 = vector.shape_cast %312 : vector<1x8x64xf32> to vector<8x64xf32>
      %314 = arith.mulf %313, %300 : vector<8x64xf32>
      %315 = vector.extract_strided_slice %203 {offsets = [0, 2], sizes = [8, 1], strides = [1, 1]} : vector<8x8xf32> to vector<8x1xf32>
      %316 = vector.extract_strided_slice %201 {offsets = [2, 0], sizes = [1, 64], strides = [1, 1]} : vector<8x64xf32> to vector<1x64xf32>
      %317 = vector.broadcast %315 : vector<8x1xf32> to vector<8x64xf32>
      %318 = vector.broadcast %316 : vector<1x64xf32> to vector<8x64xf32>
      %319 = arith.mulf %317, %318 : vector<8x64xf32>
      %320 = arith.addf %314, %319 : vector<8x64xf32>
      %321 = vector.extract_strided_slice %205 {offsets = [0, 2], sizes = [8, 1], strides = [1, 1]} : vector<8x8xf32> to vector<8x1xf32>
      %322 = vector.broadcast %321 : vector<8x1xf32> to vector<8x64xf32>
      %323 = arith.mulf %322, %320 : vector<8x64xf32>
      %cst_237 = arith.constant dense<0.000000e+00> : vector<64xf32>
      %324 = vector.multi_reduction <add>, %323, %cst_237 [0] : vector<8x64xf32> to vector<64xf32>
      %325 = vector.shape_cast %324 : vector<64xf32> to vector<1x64xf32>
      %c2_i32 = arith.constant 2 : i32
      %326 = arith.addi %179, %c2_i32 : i32
      %327 = arith.index_cast %326 : i32 to index
      %c0_238 = arith.constant 0 : index
      %328 = vector.load %arg9[%327, %c0_238] : memref<64x64xf32, #tpu.memory_space<vmem>>, vector<1x64xf32>
      %329 = arith.addf %328, %325 : vector<1x64xf32>
      %330 = arith.index_cast %326 : i32 to index
      %c0_239 = arith.constant 0 : index
      %331 = vector.load %arg9[%330, %c0_239] : memref<64x64xf32, #tpu.memory_space<vmem>>, vector<1x64xf32>
      tpu.vector_store %arg9[%330, %c0_239], %329 {strides = array<i32>} : memref<64x64xf32, #tpu.memory_space<vmem>>, vector<1x64xf32>,
      %332 = vector.extract_strided_slice %211 {offsets = [1, 0, 0], sizes = [1, 8, 64], strides = [1, 1, 1]} : vector<8x8x64xf32> to vector<1x8x64xf32>
      %333 = vector.shape_cast %332 : vector<1x8x64xf32> to vector<8x64xf32>
      %334 = arith.mulf %333, %320 : vector<8x64xf32>
      %335 = vector.extract_strided_slice %203 {offsets = [0, 1], sizes = [8, 1], strides = [1, 1]} : vector<8x8xf32> to vector<8x1xf32>
      %336 = vector.extract_strided_slice %201 {offsets = [1, 0], sizes = [1, 64], strides = [1, 1]} : vector<8x64xf32> to vector<1x64xf32>
      %337 = vector.broadcast %335 : vector<8x1xf32> to vector<8x64xf32>
      %338 = vector.broadcast %336 : vector<1x64xf32> to vector<8x64xf32>
      %339 = arith.mulf %337, %338 : vector<8x64xf32>
      %340 = arith.addf %334, %339 : vector<8x64xf32>
      %341 = vector.extract_strided_slice %205 {offsets = [0, 1], sizes = [8, 1], strides = [1, 1]} : vector<8x8xf32> to vector<8x1xf32>
      %342 = vector.broadcast %341 : vector<8x1xf32> to vector<8x64xf32>
      %343 = arith.mulf %342, %340 : vector<8x64xf32>
      %cst_240 = arith.constant dense<0.000000e+00> : vector<64xf32>
      %344 = vector.multi_reduction <add>, %343, %cst_240 [0] : vector<8x64xf32> to vector<64xf32>
      %345 = vector.shape_cast %344 : vector<64xf32> to vector<1x64xf32>
      %c1_i32_241 = arith.constant 1 : i32
      %346 = arith.addi %179, %c1_i32_241 : i32
      %347 = arith.index_cast %346 : i32 to index
      %c0_242 = arith.constant 0 : index
      %348 = vector.load %arg9[%347, %c0_242] : memref<64x64xf32, #tpu.memory_space<vmem>>, vector<1x64xf32>
      %349 = arith.addf %348, %345 : vector<1x64xf32>
      %350 = arith.index_cast %346 : i32 to index
      %c0_243 = arith.constant 0 : index
      %351 = vector.load %arg9[%350, %c0_243] : memref<64x64xf32, #tpu.memory_space<vmem>>, vector<1x64xf32>
      tpu.vector_store %arg9[%350, %c0_243], %349 {strides = array<i32>} : memref<64x64xf32, #tpu.memory_space<vmem>>, vector<1x64xf32>,
      %352 = vector.extract_strided_slice %211 {offsets = [0, 0, 0], sizes = [1, 8, 64], strides = [1, 1, 1]} : vector<8x8x64xf32> to vector<1x8x64xf32>
      %353 = vector.shape_cast %352 : vector<1x8x64xf32> to vector<8x64xf32>
      %354 = arith.mulf %353, %340 : vector<8x64xf32>
      %355 = vector.extract_strided_slice %203 {offsets = [0, 0], sizes = [8, 1], strides = [1, 1]} : vector<8x8xf32> to vector<8x1xf32>
      %356 = vector.extract_strided_slice %201 {offsets = [0, 0], sizes = [1, 64], strides = [1, 1]} : vector<8x64xf32> to vector<1x64xf32>
      %357 = vector.broadcast %355 : vector<8x1xf32> to vector<8x64xf32>
      %358 = vector.broadcast %356 : vector<1x64xf32> to vector<8x64xf32>
      %359 = arith.mulf %357, %358 : vector<8x64xf32>
      %360 = arith.addf %354, %359 : vector<8x64xf32>
      %361 = vector.extract_strided_slice %205 {offsets = [0, 0], sizes = [8, 1], strides = [1, 1]} : vector<8x8xf32> to vector<8x1xf32>
      %362 = vector.broadcast %361 : vector<8x1xf32> to vector<8x64xf32>
      %363 = arith.mulf %362, %360 : vector<8x64xf32>
      %cst_244 = arith.constant dense<0.000000e+00> : vector<64xf32>
      %364 = vector.multi_reduction <add>, %363, %cst_244 [0] : vector<8x64xf32> to vector<64xf32>
      %365 = vector.shape_cast %364 : vector<64xf32> to vector<1x64xf32>
      %c0_i32_245 = arith.constant 0 : i32
      %366 = arith.addi %179, %c0_i32_245 : i32
      %367 = arith.index_cast %366 : i32 to index
      %c0_246 = arith.constant 0 : index
      %368 = vector.load %arg9[%367, %c0_246] : memref<64x64xf32, #tpu.memory_space<vmem>>, vector<1x64xf32>
      %369 = arith.addf %368, %365 : vector<1x64xf32>
      %370 = arith.index_cast %366 : i32 to index
      %c0_247 = arith.constant 0 : index
      %371 = vector.load %arg9[%370, %c0_247] : memref<64x64xf32, #tpu.memory_space<vmem>>, vector<1x64xf32>
      tpu.vector_store %arg9[%370, %c0_247], %369 {strides = array<i32>} : memref<64x64xf32, #tpu.memory_space<vmem>>, vector<1x64xf32>,
      scf.yield %360 : vector<8x64xf32>
    }
    %c8_i32_33 = arith.constant 8 : i32
    %c0_34 = arith.constant 0 : index
    %c0_35 = arith.constant 0 : index
    %c0_36 = arith.constant 0 : index
    %c0_37 = arith.constant 0 : index
    %25 = vector.load %arg4[%c0_34, %c0_35, %c0_36, %c0_37] : memref<2x2x1x64xf32, #tpu.memory_space<vmem>>, vector<1x1x1x64xf32>
    %26 = vector.shape_cast %25 : vector<1x1x1x64xf32> to vector<1x64xf32>
    %c0_38 = arith.constant 0 : index
    %c1_39 = arith.constant 1 : index
    %c0_40 = arith.constant 0 : index
    %c0_41 = arith.constant 0 : index
    %27 = vector.load %arg4[%c0_38, %c1_39, %c0_40, %c0_41] : memref<2x2x1x64xf32, #tpu.memory_space<vmem>>, vector<1x1x1x64xf32>
    %28 = vector.shape_cast %27 : vector<1x1x1x64xf32> to vector<1x64xf32>
    %29 = arith.addf %26, %28 : vector<1x64xf32>
    %c0_42 = arith.constant 0 : index
    %c0_43 = arith.constant 0 : index
    %30 = vector.load %arg9[%c0_42, %c0_43] : memref<64x64xf32, #tpu.memory_space<vmem>>, vector<64x64xf32>
    %c0_44 = arith.constant 0 : index
    %c0_45 = arith.constant 0 : index
    %31 = vector.load %arg7[%c0_44, %c0_45] : memref<64x64xf32, #tpu.memory_space<vmem>>, vector<64x64xf32>
    %32 = vector.broadcast %29 : vector<1x64xf32> to vector<64x64xf32>
    %33 = arith.mulf %32, %31 : vector<64x64xf32>
    %34 = arith.addf %30, %33 : vector<64x64xf32>
    %c0_46 = arith.constant 0 : index
    %c0_47 = arith.constant 0 : index
    %35 = vector.load %arg9[%c0_46, %c0_47] : memref<64x64xf32, #tpu.memory_space<vmem>>, vector<64x64xf32>
    tpu.vector_store %arg9[%c0_46, %c0_47], %34 {strides = array<i32>} : memref<64x64xf32, #tpu.memory_space<vmem>>, vector<64x64xf32>,
    %c0_48 = arith.constant 0 : index
    %c0_49 = arith.constant 0 : index
    %36 = vector.load %arg9[%c0_48, %c0_49] : memref<64x64xf32, #tpu.memory_space<vmem>>, vector<64x64xf32>
    %37 = vector.shape_cast %36 : vector<64x64xf32> to vector<8x8x64xf32>
    %38 = arith.truncf %37 : vector<8x8x64xf32> to vector<8x8x64xbf16>
    %c0_50 = arith.constant 0 : index
    %c0_51 = arith.constant 0 : index
    %c0_52 = arith.constant 0 : index
    %c0_53 = arith.constant 0 : index
    %39 = vector.load %arg6[%c0_50, %c0_51, %c0_52, %c0_53] : memref<1x8x8x64xbf16, #tpu.memory_space<vmem>>, vector<1x8x8x64xbf16>
    %40 = vector.shape_cast %39 : vector<1x8x8x64xbf16> to vector<8x8x64xbf16>
    %41 = vector.shape_cast %38 : vector<8x8x64xbf16> to vector<1x8x8x64xbf16>
    tpu.vector_store %arg6[%c0_50, %c0_51, %c0_52, %c0_53], %41 {strides = array<i32>} : memref<1x8x8x64xbf16, #tpu.memory_space<vmem>>, vector<1x8x8x64xbf16>,
    %c0_54 = arith.constant 0 : index
    %c0_55 = arith.constant 0 : index
    %c0_56 = arith.constant 0 : index
    %c0_57 = arith.constant 0 : index
    %42 = vector.load %arg1[%c0_54, %c0_55, %c0_56, %c0_57] : memref<1x8x8x64xbf16, #tpu.memory_space<vmem>>, vector<1x8x1x64xbf16>
    %43 = vector.shape_cast %42 : vector<1x8x1x64xbf16> to vector<8x64xbf16>
    %44 = arith.extf %43 : vector<8x64xbf16> to vector<8x64xf32>
    %c0_58 = arith.constant 0 : index
    %c0_59 = arith.constant 0 : index
    %45 = vector.load %arg7[%c0_58, %c0_59] : memref<64x64xf32, #tpu.memory_space<vmem>>, vector<8x64xf32>
    tpu.vector_store %arg7[%c0_58, %c0_59], %44 {strides = array<i32>} : memref<64x64xf32, #tpu.memory_space<vmem>>, vector<8x64xf32>,
    %c0_60 = arith.constant 0 : index
    %c0_61 = arith.constant 0 : index
    %c1_62 = arith.constant 1 : index
    %c0_63 = arith.constant 0 : index
    %46 = vector.load %arg1[%c0_60, %c0_61, %c1_62, %c0_63] : memref<1x8x8x64xbf16, #tpu.memory_space<vmem>>, vector<1x8x1x64xbf16>
    %47 = vector.shape_cast %46 : vector<1x8x1x64xbf16> to vector<8x64xbf16>
    %48 = arith.extf %47 : vector<8x64xbf16> to vector<8x64xf32>
    %c8 = arith.constant 8 : index
    %c0_64 = arith.constant 0 : index
    %49 = vector.load %arg7[%c8, %c0_64] : memref<64x64xf32, #tpu.memory_space<vmem>>, vector<8x64xf32>
    tpu.vector_store %arg7[%c8, %c0_64], %48 {strides = array<i32>} : memref<64x64xf32, #tpu.memory_space<vmem>>, vector<8x64xf32>,
    %c0_65 = arith.constant 0 : index
    %c0_66 = arith.constant 0 : index
    %c2 = arith.constant 2 : index
    %c0_67 = arith.constant 0 : index
    %50 = vector.load %arg1[%c0_65, %c0_66, %c2, %c0_67] : memref<1x8x8x64xbf16, #tpu.memory_space<vmem>>, vector<1x8x1x64xbf16>
    %51 = vector.shape_cast %50 : vector<1x8x1x64xbf16> to vector<8x64xbf16>
    %52 = arith.extf %51 : vector<8x64xbf16> to vector<8x64xf32>
    %c16 = arith.constant 16 : index
    %c0_68 = arith.constant 0 : index
    %53 = vector.load %arg7[%c16, %c0_68] : memref<64x64xf32, #tpu.memory_space<vmem>>, vector<8x64xf32>
    tpu.vector_store %arg7[%c16, %c0_68], %52 {strides = array<i32>} : memref<64x64xf32, #tpu.memory_space<vmem>>, vector<8x64xf32>,
    %c0_69 = arith.constant 0 : index
    %c0_70 = arith.constant 0 : index
    %c3 = arith.constant 3 : index
    %c0_71 = arith.constant 0 : index
    %54 = vector.load %arg1[%c0_69, %c0_70, %c3, %c0_71] : memref<1x8x8x64xbf16, #tpu.memory_space<vmem>>, vector<1x8x1x64xbf16>
    %55 = vector.shape_cast %54 : vector<1x8x1x64xbf16> to vector<8x64xbf16>
    %56 = arith.extf %55 : vector<8x64xbf16> to vector<8x64xf32>
    %c24 = arith.constant 24 : index
    %c0_72 = arith.constant 0 : index
    %57 = vector.load %arg7[%c24, %c0_72] : memref<64x64xf32, #tpu.memory_space<vmem>>, vector<8x64xf32>
    tpu.vector_store %arg7[%c24, %c0_72], %56 {strides = array<i32>} : memref<64x64xf32, #tpu.memory_space<vmem>>, vector<8x64xf32>,
    %c0_73 = arith.constant 0 : index
    %c0_74 = arith.constant 0 : index
    %c4 = arith.constant 4 : index
    %c0_75 = arith.constant 0 : index
    %58 = vector.load %arg1[%c0_73, %c0_74, %c4, %c0_75] : memref<1x8x8x64xbf16, #tpu.memory_space<vmem>>, vector<1x8x1x64xbf16>
    %59 = vector.shape_cast %58 : vector<1x8x1x64xbf16> to vector<8x64xbf16>
    %60 = arith.extf %59 : vector<8x64xbf16> to vector<8x64xf32>
    %c32 = arith.constant 32 : index
    %c0_76 = arith.constant 0 : index
    %61 = vector.load %arg7[%c32, %c0_76] : memref<64x64xf32, #tpu.memory_space<vmem>>, vector<8x64xf32>
    tpu.vector_store %arg7[%c32, %c0_76], %60 {strides = array<i32>} : memref<64x64xf32, #tpu.memory_space<vmem>>, vector<8x64xf32>,
    %c0_77 = arith.constant 0 : index
    %c0_78 = arith.constant 0 : index
    %c5 = arith.constant 5 : index
    %c0_79 = arith.constant 0 : index
    %62 = vector.load %arg1[%c0_77, %c0_78, %c5, %c0_79] : memref<1x8x8x64xbf16, #tpu.memory_space<vmem>>, vector<1x8x1x64xbf16>
    %63 = vector.shape_cast %62 : vector<1x8x1x64xbf16> to vector<8x64xbf16>
    %64 = arith.extf %63 : vector<8x64xbf16> to vector<8x64xf32>
    %c40 = arith.constant 40 : index
    %c0_80 = arith.constant 0 : index
    %65 = vector.load %arg7[%c40, %c0_80] : memref<64x64xf32, #tpu.memory_space<vmem>>, vector<8x64xf32>
    tpu.vector_store %arg7[%c40, %c0_80], %64 {strides = array<i32>} : memref<64x64xf32, #tpu.memory_space<vmem>>, vector<8x64xf32>,
    %c0_81 = arith.constant 0 : index
    %c0_82 = arith.constant 0 : index
    %c6 = arith.constant 6 : index
    %c0_83 = arith.constant 0 : index
    %66 = vector.load %arg1[%c0_81, %c0_82, %c6, %c0_83] : memref<1x8x8x64xbf16, #tpu.memory_space<vmem>>, vector<1x8x1x64xbf16>
    %67 = vector.shape_cast %66 : vector<1x8x1x64xbf16> to vector<8x64xbf16>
    %68 = arith.extf %67 : vector<8x64xbf16> to vector<8x64xf32>
    %c48 = arith.constant 48 : index
    %c0_84 = arith.constant 0 : index
    %69 = vector.load %arg7[%c48, %c0_84] : memref<64x64xf32, #tpu.memory_space<vmem>>, vector<8x64xf32>
    tpu.vector_store %arg7[%c48, %c0_84], %68 {strides = array<i32>} : memref<64x64xf32, #tpu.memory_space<vmem>>, vector<8x64xf32>,
    %c0_85 = arith.constant 0 : index
    %c0_86 = arith.constant 0 : index
    %c7 = arith.constant 7 : index
    %c0_87 = arith.constant 0 : index
    %70 = vector.load %arg1[%c0_85, %c0_86, %c7, %c0_87] : memref<1x8x8x64xbf16, #tpu.memory_space<vmem>>, vector<1x8x1x64xbf16>
    %71 = vector.shape_cast %70 : vector<1x8x1x64xbf16> to vector<8x64xbf16>
    %72 = arith.extf %71 : vector<8x64xbf16> to vector<8x64xf32>
    %c56 = arith.constant 56 : index
    %c0_88 = arith.constant 0 : index
    %73 = vector.load %arg7[%c56, %c0_88] : memref<64x64xf32, #tpu.memory_space<vmem>>, vector<8x64xf32>
    tpu.vector_store %arg7[%c56, %c0_88], %72 {strides = array<i32>} : memref<64x64xf32, #tpu.memory_space<vmem>>, vector<8x64xf32>,
    %c0_89 = arith.constant 0 : index
    %c0_90 = arith.constant 0 : index
    %74 = vector.load %arg7[%c0_89, %c0_90] : memref<64x64xf32, #tpu.memory_space<vmem>>, vector<64x64xf32>
    %75 = arith.truncf %74 : vector<64x64xf32> to vector<64x64xbf16>
    %c1_91 = arith.constant 1 : index
    %c0_92 = arith.constant 0 : index
    %c0_93 = arith.constant 0 : index
    %76 = vector.load %arg2[%c1_91, %c0_92, %c0_93] : memref<2x64x256xbf16, #tpu.memory_space<vmem>>, vector<1x64x256xbf16>
    %77 = vector.shape_cast %76 : vector<1x64x256xbf16> to vector<64x256xbf16>
    %cst_94 = arith.constant dense<0.000000e+00> : vector<64x256xf32>
    %78 = tpu.matmul %75, %77, %cst_94 {dimension_numbers = #tpu.dot_dimension_numbers<[1], [0], [0], [1], [0, 0, 1, 1], [], []>} : vector<64x64xbf16>, vector<64x256xbf16>, vector<64x256xf32> -> vector<64x256xf32>
    %c0_95 = arith.constant 0 : index
    %c0_96 = arith.constant 0 : index
    %79 = vector.load %arg8[%c0_95, %c0_96] : memref<64x256xf32, #tpu.memory_space<vmem>>, vector<64x256xf32>
    tpu.vector_store %arg8[%c0_95, %c0_96], %78 {strides = array<i32>} : memref<64x256xf32, #tpu.memory_space<vmem>>, vector<64x256xf32>,
    %c1_97 = arith.constant 1 : index
    %c0_98 = arith.constant 0 : index
    %c0_99 = arith.constant 0 : index
    %c0_100 = arith.constant 0 : index
    %80 = vector.load %arg3[%c1_97, %c0_98, %c0_99, %c0_100] : memref<2x2x8x64xf32, #tpu.memory_space<vmem>>, vector<1x1x8x64xf32>
    %81 = vector.shape_cast %80 : vector<1x1x8x64xf32> to vector<8x64xf32>
    %c1_101 = arith.constant 1 : index
    %c0_102 = arith.constant 0 : index
    %c0_103 = arith.constant 0 : index
    %c0_104 = arith.constant 0 : index
    %82 = vector.load %arg5[%c1_101, %c0_102, %c0_103, %c0_104] : memref<2x2x1x64xf32, #tpu.memory_space<vmem>>, vector<1x1x1x64xf32>
    %83 = vector.shape_cast %82 : vector<1x1x1x64xf32> to vector<1x64xf32>
    %cst_105 = arith.constant 0.000000e+00 : f32
    %84 = vector.broadcast %cst_105 : f32 to vector<8x64xf32>
    %c0_i32_106 = arith.constant 0 : i32
    %c8_i32_107 = arith.constant 8 : i32
    %85 = arith.addi %c0_i32_106, %c8_i32_107 : i32
    %c1_i32_108 = arith.constant 1 : i32
    %86 = scf.for %arg10 = %c0_i32_106 to %85 step %c1_i32_108 iter_args(%arg11 = %84) -> (vector<8x64xf32>)  : i32 {
      %c8_i32_217 = arith.constant 8 : i32
      %177 = arith.muli %arg10, %c8_i32_217 : i32
      %178 = tpu.assume_multiple %177, 8 : i32
      %179 = arith.index_cast %178 : i32 to index
      %c0_218 = arith.constant 0 : index
      %180 = vector.load %arg7[%179, %c0_218] : memref<64x64xf32, #tpu.memory_space<vmem>>, vector<8x64xf32>
      %181 = arith.index_cast %178 : i32 to index
      %c0_219 = arith.constant 0 : index
      %182 = vector.load %arg8[%181, %c0_219] : memref<64x256xf32, #tpu.memory_space<vmem>>, vector<8x128xf32>
      %183 = vector.extract_strided_slice %182 {offsets = [0, 0], sizes = [8, 64], strides = [1, 1]} : vector<8x128xf32> to vector<8x64xf32>
      %184 = vector.broadcast %83 : vector<1x64xf32> to vector<8x64xf32>
      %185 = arith.addf %183, %184 : vector<8x64xf32>
      %cst_220 = arith.constant 0.000000e+00 : f32
      %186 = vector.broadcast %cst_220 : f32 to vector<8x64xf32>
      %187 = arith.maximumf %185, %186 : vector<8x64xf32>
      %188 = vector.broadcast %cst_220 : f32 to vector<8x64xf32>
      %189 = arith.subf %185, %188 : vector<8x64xf32>
      %190 = arith.cmpf one, %189, %189 : vector<8x64xf32>
      %191 = vector.broadcast %cst_220 : f32 to vector<8x64xf32>
      %192 = arith.addf %185, %191 : vector<8x64xf32>
      %193 = math.absf %189 : vector<8x64xf32>
      %cst_221 = arith.constant 0.000000e+00 : f32
      %194 = vector.broadcast %cst_221 : f32 to vector<8x64xf32>
      %195 = arith.subf %194, %193 : vector<8x64xf32>
      %196 = math.exp %195 : vector<8x64xf32>
      %197 = math.log1p %196 : vector<8x64xf32>
      %198 = arith.addf %187, %197 : vector<8x64xf32>
      %199 = arith.select %190, %192, %198 : vector<8x64xi1>, vector<8x64xf32>
      %200 = arith.mulf %199, %180 : vector<8x64xf32>
      %201 = vector.extract_strided_slice %182 {offsets = [0, 64], sizes = [8, 8], strides = [1, 1]} : vector<8x128xf32> to vector<8x8xf32>
      %202 = tpu.transpose %201, [1, 0] : vector<8x8xf32> -> vector<8x8xf32>
      %203 = vector.extract_strided_slice %182 {offsets = [0, 72], sizes = [8, 8], strides = [1, 1]} : vector<8x128xf32> to vector<8x8xf32>
      %204 = tpu.transpose %203, [1, 0] : vector<8x8xf32> -> vector<8x8xf32>
      %205 = vector.shape_cast %199 : vector<8x64xf32> to vector<8x1x64xf32>
      %206 = vector.shape_cast %81 : vector<8x64xf32> to vector<1x8x64xf32>
      %207 = vector.broadcast %205 : vector<8x1x64xf32> to vector<8x8x64xf32>
      %208 = vector.broadcast %206 : vector<1x8x64xf32> to vector<8x8x64xf32>
      %209 = arith.mulf %207, %208 : vector<8x8x64xf32>
      %210 = math.exp %209 : vector<8x8x64xf32>
      %211 = vector.extract_strided_slice %210 {offsets = [0, 0, 0], sizes = [1, 8, 64], strides = [1, 1, 1]} : vector<8x8x64xf32> to vector<1x8x64xf32>
      %212 = vector.shape_cast %211 : vector<1x8x64xf32> to vector<8x64xf32>
      %213 = arith.mulf %212, %arg11 : vector<8x64xf32>
      %214 = vector.extract_strided_slice %202 {offsets = [0, 0], sizes = [8, 1], strides = [1, 1]} : vector<8x8xf32> to vector<8x1xf32>
      %215 = vector.extract_strided_slice %200 {offsets = [0, 0], sizes = [1, 64], strides = [1, 1]} : vector<8x64xf32> to vector<1x64xf32>
      %216 = vector.broadcast %214 : vector<8x1xf32> to vector<8x64xf32>
      %217 = vector.broadcast %215 : vector<1x64xf32> to vector<8x64xf32>
      %218 = arith.mulf %216, %217 : vector<8x64xf32>
      %219 = arith.addf %213, %218 : vector<8x64xf32>
      %220 = vector.extract_strided_slice %204 {offsets = [0, 0], sizes = [8, 1], strides = [1, 1]} : vector<8x8xf32> to vector<8x1xf32>
      %221 = vector.broadcast %220 : vector<8x1xf32> to vector<8x64xf32>
      %222 = arith.mulf %221, %219 : vector<8x64xf32>
      %cst_222 = arith.constant dense<0.000000e+00> : vector<64xf32>
      %223 = vector.multi_reduction <add>, %222, %cst_222 [0] : vector<8x64xf32> to vector<64xf32>
      %224 = vector.shape_cast %223 : vector<64xf32> to vector<1x64xf32>
      %c0_i32_223 = arith.constant 0 : i32
      %225 = arith.addi %178, %c0_i32_223 : i32
      %226 = arith.index_cast %225 : i32 to index
      %c0_224 = arith.constant 0 : index
      %227 = vector.load %arg9[%226, %c0_224] : memref<64x64xf32, #tpu.memory_space<vmem>>, vector<1x64xf32>
      tpu.vector_store %arg9[%226, %c0_224], %224 {strides = array<i32>} : memref<64x64xf32, #tpu.memory_space<vmem>>, vector<1x64xf32>,
      %228 = vector.extract_strided_slice %210 {offsets = [1, 0, 0], sizes = [1, 8, 64], strides = [1, 1, 1]} : vector<8x8x64xf32> to vector<1x8x64xf32>
      %229 = vector.shape_cast %228 : vector<1x8x64xf32> to vector<8x64xf32>
      %230 = arith.mulf %229, %219 : vector<8x64xf32>
      %231 = vector.extract_strided_slice %202 {offsets = [0, 1], sizes = [8, 1], strides = [1, 1]} : vector<8x8xf32> to vector<8x1xf32>
      %232 = vector.extract_strided_slice %200 {offsets = [1, 0], sizes = [1, 64], strides = [1, 1]} : vector<8x64xf32> to vector<1x64xf32>
      %233 = vector.broadcast %231 : vector<8x1xf32> to vector<8x64xf32>
      %234 = vector.broadcast %232 : vector<1x64xf32> to vector<8x64xf32>
      %235 = arith.mulf %233, %234 : vector<8x64xf32>
      %236 = arith.addf %230, %235 : vector<8x64xf32>
      %237 = vector.extract_strided_slice %204 {offsets = [0, 1], sizes = [8, 1], strides = [1, 1]} : vector<8x8xf32> to vector<8x1xf32>
      %238 = vector.broadcast %237 : vector<8x1xf32> to vector<8x64xf32>
      %239 = arith.mulf %238, %236 : vector<8x64xf32>
      %cst_225 = arith.constant dense<0.000000e+00> : vector<64xf32>
      %240 = vector.multi_reduction <add>, %239, %cst_225 [0] : vector<8x64xf32> to vector<64xf32>
      %241 = vector.shape_cast %240 : vector<64xf32> to vector<1x64xf32>
      %c1_i32_226 = arith.constant 1 : i32
      %242 = arith.addi %178, %c1_i32_226 : i32
      %243 = arith.index_cast %242 : i32 to index
      %c0_227 = arith.constant 0 : index
      %244 = vector.load %arg9[%243, %c0_227] : memref<64x64xf32, #tpu.memory_space<vmem>>, vector<1x64xf32>
      tpu.vector_store %arg9[%243, %c0_227], %241 {strides = array<i32>} : memref<64x64xf32, #tpu.memory_space<vmem>>, vector<1x64xf32>,
      %245 = vector.extract_strided_slice %210 {offsets = [2, 0, 0], sizes = [1, 8, 64], strides = [1, 1, 1]} : vector<8x8x64xf32> to vector<1x8x64xf32>
      %246 = vector.shape_cast %245 : vector<1x8x64xf32> to vector<8x64xf32>
      %247 = arith.mulf %246, %236 : vector<8x64xf32>
      %248 = vector.extract_strided_slice %202 {offsets = [0, 2], sizes = [8, 1], strides = [1, 1]} : vector<8x8xf32> to vector<8x1xf32>
      %249 = vector.extract_strided_slice %200 {offsets = [2, 0], sizes = [1, 64], strides = [1, 1]} : vector<8x64xf32> to vector<1x64xf32>
      %250 = vector.broadcast %248 : vector<8x1xf32> to vector<8x64xf32>
      %251 = vector.broadcast %249 : vector<1x64xf32> to vector<8x64xf32>
      %252 = arith.mulf %250, %251 : vector<8x64xf32>
      %253 = arith.addf %247, %252 : vector<8x64xf32>
      %254 = vector.extract_strided_slice %204 {offsets = [0, 2], sizes = [8, 1], strides = [1, 1]} : vector<8x8xf32> to vector<8x1xf32>
      %255 = vector.broadcast %254 : vector<8x1xf32> to vector<8x64xf32>
      %256 = arith.mulf %255, %253 : vector<8x64xf32>
      %cst_228 = arith.constant dense<0.000000e+00> : vector<64xf32>
      %257 = vector.multi_reduction <add>, %256, %cst_228 [0] : vector<8x64xf32> to vector<64xf32>
      %258 = vector.shape_cast %257 : vector<64xf32> to vector<1x64xf32>
      %c2_i32 = arith.constant 2 : i32
      %259 = arith.addi %178, %c2_i32 : i32
      %260 = arith.index_cast %259 : i32 to index
      %c0_229 = arith.constant 0 : index
      %261 = vector.load %arg9[%260, %c0_229] : memref<64x64xf32, #tpu.memory_space<vmem>>, vector<1x64xf32>
      tpu.vector_store %arg9[%260, %c0_229], %258 {strides = array<i32>} : memref<64x64xf32, #tpu.memory_space<vmem>>, vector<1x64xf32>,
      %262 = vector.extract_strided_slice %210 {offsets = [3, 0, 0], sizes = [1, 8, 64], strides = [1, 1, 1]} : vector<8x8x64xf32> to vector<1x8x64xf32>
      %263 = vector.shape_cast %262 : vector<1x8x64xf32> to vector<8x64xf32>
      %264 = arith.mulf %263, %253 : vector<8x64xf32>
      %265 = vector.extract_strided_slice %202 {offsets = [0, 3], sizes = [8, 1], strides = [1, 1]} : vector<8x8xf32> to vector<8x1xf32>
      %266 = vector.extract_strided_slice %200 {offsets = [3, 0], sizes = [1, 64], strides = [1, 1]} : vector<8x64xf32> to vector<1x64xf32>
      %267 = vector.broadcast %265 : vector<8x1xf32> to vector<8x64xf32>
      %268 = vector.broadcast %266 : vector<1x64xf32> to vector<8x64xf32>
      %269 = arith.mulf %267, %268 : vector<8x64xf32>
      %270 = arith.addf %264, %269 : vector<8x64xf32>
      %271 = vector.extract_strided_slice %204 {offsets = [0, 3], sizes = [8, 1], strides = [1, 1]} : vector<8x8xf32> to vector<8x1xf32>
      %272 = vector.broadcast %271 : vector<8x1xf32> to vector<8x64xf32>
      %273 = arith.mulf %272, %270 : vector<8x64xf32>
      %cst_230 = arith.constant dense<0.000000e+00> : vector<64xf32>
      %274 = vector.multi_reduction <add>, %273, %cst_230 [0] : vector<8x64xf32> to vector<64xf32>
      %275 = vector.shape_cast %274 : vector<64xf32> to vector<1x64xf32>
      %c3_i32 = arith.constant 3 : i32
      %276 = arith.addi %178, %c3_i32 : i32
      %277 = arith.index_cast %276 : i32 to index
      %c0_231 = arith.constant 0 : index
      %278 = vector.load %arg9[%277, %c0_231] : memref<64x64xf32, #tpu.memory_space<vmem>>, vector<1x64xf32>
      tpu.vector_store %arg9[%277, %c0_231], %275 {strides = array<i32>} : memref<64x64xf32, #tpu.memory_space<vmem>>, vector<1x64xf32>,
      %279 = vector.extract_strided_slice %210 {offsets = [4, 0, 0], sizes = [1, 8, 64], strides = [1, 1, 1]} : vector<8x8x64xf32> to vector<1x8x64xf32>
      %280 = vector.shape_cast %279 : vector<1x8x64xf32> to vector<8x64xf32>
      %281 = arith.mulf %280, %270 : vector<8x64xf32>
      %282 = vector.extract_strided_slice %202 {offsets = [0, 4], sizes = [8, 1], strides = [1, 1]} : vector<8x8xf32> to vector<8x1xf32>
      %283 = vector.extract_strided_slice %200 {offsets = [4, 0], sizes = [1, 64], strides = [1, 1]} : vector<8x64xf32> to vector<1x64xf32>
      %284 = vector.broadcast %282 : vector<8x1xf32> to vector<8x64xf32>
      %285 = vector.broadcast %283 : vector<1x64xf32> to vector<8x64xf32>
      %286 = arith.mulf %284, %285 : vector<8x64xf32>
      %287 = arith.addf %281, %286 : vector<8x64xf32>
      %288 = vector.extract_strided_slice %204 {offsets = [0, 4], sizes = [8, 1], strides = [1, 1]} : vector<8x8xf32> to vector<8x1xf32>
      %289 = vector.broadcast %288 : vector<8x1xf32> to vector<8x64xf32>
      %290 = arith.mulf %289, %287 : vector<8x64xf32>
      %cst_232 = arith.constant dense<0.000000e+00> : vector<64xf32>
      %291 = vector.multi_reduction <add>, %290, %cst_232 [0] : vector<8x64xf32> to vector<64xf32>
      %292 = vector.shape_cast %291 : vector<64xf32> to vector<1x64xf32>
      %c4_i32 = arith.constant 4 : i32
      %293 = arith.addi %178, %c4_i32 : i32
      %294 = arith.index_cast %293 : i32 to index
      %c0_233 = arith.constant 0 : index
      %295 = vector.load %arg9[%294, %c0_233] : memref<64x64xf32, #tpu.memory_space<vmem>>, vector<1x64xf32>
      tpu.vector_store %arg9[%294, %c0_233], %292 {strides = array<i32>} : memref<64x64xf32, #tpu.memory_space<vmem>>, vector<1x64xf32>,
      %296 = vector.extract_strided_slice %210 {offsets = [5, 0, 0], sizes = [1, 8, 64], strides = [1, 1, 1]} : vector<8x8x64xf32> to vector<1x8x64xf32>
      %297 = vector.shape_cast %296 : vector<1x8x64xf32> to vector<8x64xf32>
      %298 = arith.mulf %297, %287 : vector<8x64xf32>
      %299 = vector.extract_strided_slice %202 {offsets = [0, 5], sizes = [8, 1], strides = [1, 1]} : vector<8x8xf32> to vector<8x1xf32>
      %300 = vector.extract_strided_slice %200 {offsets = [5, 0], sizes = [1, 64], strides = [1, 1]} : vector<8x64xf32> to vector<1x64xf32>
      %301 = vector.broadcast %299 : vector<8x1xf32> to vector<8x64xf32>
      %302 = vector.broadcast %300 : vector<1x64xf32> to vector<8x64xf32>
      %303 = arith.mulf %301, %302 : vector<8x64xf32>
      %304 = arith.addf %298, %303 : vector<8x64xf32>
      %305 = vector.extract_strided_slice %204 {offsets = [0, 5], sizes = [8, 1], strides = [1, 1]} : vector<8x8xf32> to vector<8x1xf32>
      %306 = vector.broadcast %305 : vector<8x1xf32> to vector<8x64xf32>
      %307 = arith.mulf %306, %304 : vector<8x64xf32>
      %cst_234 = arith.constant dense<0.000000e+00> : vector<64xf32>
      %308 = vector.multi_reduction <add>, %307, %cst_234 [0] : vector<8x64xf32> to vector<64xf32>
      %309 = vector.shape_cast %308 : vector<64xf32> to vector<1x64xf32>
      %c5_i32 = arith.constant 5 : i32
      %310 = arith.addi %178, %c5_i32 : i32
      %311 = arith.index_cast %310 : i32 to index
      %c0_235 = arith.constant 0 : index
      %312 = vector.load %arg9[%311, %c0_235] : memref<64x64xf32, #tpu.memory_space<vmem>>, vector<1x64xf32>
      tpu.vector_store %arg9[%311, %c0_235], %309 {strides = array<i32>} : memref<64x64xf32, #tpu.memory_space<vmem>>, vector<1x64xf32>,
      %313 = vector.extract_strided_slice %210 {offsets = [6, 0, 0], sizes = [1, 8, 64], strides = [1, 1, 1]} : vector<8x8x64xf32> to vector<1x8x64xf32>
      %314 = vector.shape_cast %313 : vector<1x8x64xf32> to vector<8x64xf32>
      %315 = arith.mulf %314, %304 : vector<8x64xf32>
      %316 = vector.extract_strided_slice %202 {offsets = [0, 6], sizes = [8, 1], strides = [1, 1]} : vector<8x8xf32> to vector<8x1xf32>
      %317 = vector.extract_strided_slice %200 {offsets = [6, 0], sizes = [1, 64], strides = [1, 1]} : vector<8x64xf32> to vector<1x64xf32>
      %318 = vector.broadcast %316 : vector<8x1xf32> to vector<8x64xf32>
      %319 = vector.broadcast %317 : vector<1x64xf32> to vector<8x64xf32>
      %320 = arith.mulf %318, %319 : vector<8x64xf32>
      %321 = arith.addf %315, %320 : vector<8x64xf32>
      %322 = vector.extract_strided_slice %204 {offsets = [0, 6], sizes = [8, 1], strides = [1, 1]} : vector<8x8xf32> to vector<8x1xf32>
      %323 = vector.broadcast %322 : vector<8x1xf32> to vector<8x64xf32>
      %324 = arith.mulf %323, %321 : vector<8x64xf32>
      %cst_236 = arith.constant dense<0.000000e+00> : vector<64xf32>
      %325 = vector.multi_reduction <add>, %324, %cst_236 [0] : vector<8x64xf32> to vector<64xf32>
      %326 = vector.shape_cast %325 : vector<64xf32> to vector<1x64xf32>
      %c6_i32 = arith.constant 6 : i32
      %327 = arith.addi %178, %c6_i32 : i32
      %328 = arith.index_cast %327 : i32 to index
      %c0_237 = arith.constant 0 : index
      %329 = vector.load %arg9[%328, %c0_237] : memref<64x64xf32, #tpu.memory_space<vmem>>, vector<1x64xf32>
      tpu.vector_store %arg9[%328, %c0_237], %326 {strides = array<i32>} : memref<64x64xf32, #tpu.memory_space<vmem>>, vector<1x64xf32>,
      %330 = vector.extract_strided_slice %210 {offsets = [7, 0, 0], sizes = [1, 8, 64], strides = [1, 1, 1]} : vector<8x8x64xf32> to vector<1x8x64xf32>
      %331 = vector.shape_cast %330 : vector<1x8x64xf32> to vector<8x64xf32>
      %332 = arith.mulf %331, %321 : vector<8x64xf32>
      %333 = vector.extract_strided_slice %202 {offsets = [0, 7], sizes = [8, 1], strides = [1, 1]} : vector<8x8xf32> to vector<8x1xf32>
      %334 = vector.extract_strided_slice %200 {offsets = [7, 0], sizes = [1, 64], strides = [1, 1]} : vector<8x64xf32> to vector<1x64xf32>
      %335 = vector.broadcast %333 : vector<8x1xf32> to vector<8x64xf32>
      %336 = vector.broadcast %334 : vector<1x64xf32> to vector<8x64xf32>
      %337 = arith.mulf %335, %336 : vector<8x64xf32>
      %338 = arith.addf %332, %337 : vector<8x64xf32>
      %339 = vector.extract_strided_slice %204 {offsets = [0, 7], sizes = [8, 1], strides = [1, 1]} : vector<8x8xf32> to vector<8x1xf32>
      %340 = vector.broadcast %339 : vector<8x1xf32> to vector<8x64xf32>
      %341 = arith.mulf %340, %338 : vector<8x64xf32>
      %cst_238 = arith.constant dense<0.000000e+00> : vector<64xf32>
      %342 = vector.multi_reduction <add>, %341, %cst_238 [0] : vector<8x64xf32> to vector<64xf32>
      %343 = vector.shape_cast %342 : vector<64xf32> to vector<1x64xf32>
      %c7_i32 = arith.constant 7 : i32
      %344 = arith.addi %178, %c7_i32 : i32
      %345 = arith.index_cast %344 : i32 to index
      %c0_239 = arith.constant 0 : index
      %346 = vector.load %arg9[%345, %c0_239] : memref<64x64xf32, #tpu.memory_space<vmem>>, vector<1x64xf32>
      tpu.vector_store %arg9[%345, %c0_239], %343 {strides = array<i32>} : memref<64x64xf32, #tpu.memory_space<vmem>>, vector<1x64xf32>,
      scf.yield %338 : vector<8x64xf32>
    }
    %c8_i32_109 = arith.constant 8 : i32
    %c1_110 = arith.constant 1 : index
    %c1_111 = arith.constant 1 : index
    %c0_112 = arith.constant 0 : index
    %c0_113 = arith.constant 0 : index
    %87 = vector.load %arg3[%c1_110, %c1_111, %c0_112, %c0_113] : memref<2x2x8x64xf32, #tpu.memory_space<vmem>>, vector<1x1x8x64xf32>
    %88 = vector.shape_cast %87 : vector<1x1x8x64xf32> to vector<8x64xf32>
    %c1_114 = arith.constant 1 : index
    %c1_115 = arith.constant 1 : index
    %c0_116 = arith.constant 0 : index
    %c0_117 = arith.constant 0 : index
    %89 = vector.load %arg5[%c1_114, %c1_115, %c0_116, %c0_117] : memref<2x2x1x64xf32, #tpu.memory_space<vmem>>, vector<1x1x1x64xf32>
    %90 = vector.shape_cast %89 : vector<1x1x1x64xf32> to vector<1x64xf32>
    %cst_118 = arith.constant 0.000000e+00 : f32
    %91 = vector.broadcast %cst_118 : f32 to vector<8x64xf32>
    %c0_i32_119 = arith.constant 0 : i32
    %c8_i32_120 = arith.constant 8 : i32
    %92 = arith.addi %c0_i32_119, %c8_i32_120 : i32
    %c1_i32_121 = arith.constant 1 : i32
    %93 = scf.for %arg10 = %c0_i32_119 to %92 step %c1_i32_121 iter_args(%arg11 = %91) -> (vector<8x64xf32>)  : i32 {
      %c7_i32 = arith.constant 7 : i32
      %177 = arith.subi %c7_i32, %arg10 : i32
      %c8_i32_217 = arith.constant 8 : i32
      %178 = arith.muli %177, %c8_i32_217 : i32
      %179 = tpu.assume_multiple %178, 8 : i32
      %180 = arith.index_cast %179 : i32 to index
      %c0_218 = arith.constant 0 : index
      %181 = vector.load %arg7[%180, %c0_218] : memref<64x64xf32, #tpu.memory_space<vmem>>, vector<8x64xf32>
      %182 = arith.index_cast %179 : i32 to index
      %c128 = arith.constant 128 : index
      %183 = vector.load %arg8[%182, %c128] : memref<64x256xf32, #tpu.memory_space<vmem>>, vector<8x128xf32>
      %184 = vector.extract_strided_slice %183 {offsets = [0, 0], sizes = [8, 64], strides = [1, 1]} : vector<8x128xf32> to vector<8x64xf32>
      %185 = vector.broadcast %90 : vector<1x64xf32> to vector<8x64xf32>
      %186 = arith.addf %184, %185 : vector<8x64xf32>
      %cst_219 = arith.constant 0.000000e+00 : f32
      %187 = vector.broadcast %cst_219 : f32 to vector<8x64xf32>
      %188 = arith.maximumf %186, %187 : vector<8x64xf32>
      %189 = vector.broadcast %cst_219 : f32 to vector<8x64xf32>
      %190 = arith.subf %186, %189 : vector<8x64xf32>
      %191 = arith.cmpf one, %190, %190 : vector<8x64xf32>
      %192 = vector.broadcast %cst_219 : f32 to vector<8x64xf32>
      %193 = arith.addf %186, %192 : vector<8x64xf32>
      %194 = math.absf %190 : vector<8x64xf32>
      %cst_220 = arith.constant 0.000000e+00 : f32
      %195 = vector.broadcast %cst_220 : f32 to vector<8x64xf32>
      %196 = arith.subf %195, %194 : vector<8x64xf32>
      %197 = math.exp %196 : vector<8x64xf32>
      %198 = math.log1p %197 : vector<8x64xf32>
      %199 = arith.addf %188, %198 : vector<8x64xf32>
      %200 = arith.select %191, %193, %199 : vector<8x64xi1>, vector<8x64xf32>
      %201 = arith.mulf %200, %181 : vector<8x64xf32>
      %202 = vector.extract_strided_slice %183 {offsets = [0, 64], sizes = [8, 8], strides = [1, 1]} : vector<8x128xf32> to vector<8x8xf32>
      %203 = tpu.transpose %202, [1, 0] : vector<8x8xf32> -> vector<8x8xf32>
      %204 = vector.extract_strided_slice %183 {offsets = [0, 72], sizes = [8, 8], strides = [1, 1]} : vector<8x128xf32> to vector<8x8xf32>
      %205 = tpu.transpose %204, [1, 0] : vector<8x8xf32> -> vector<8x8xf32>
      %206 = vector.shape_cast %200 : vector<8x64xf32> to vector<8x1x64xf32>
      %207 = vector.shape_cast %88 : vector<8x64xf32> to vector<1x8x64xf32>
      %208 = vector.broadcast %206 : vector<8x1x64xf32> to vector<8x8x64xf32>
      %209 = vector.broadcast %207 : vector<1x8x64xf32> to vector<8x8x64xf32>
      %210 = arith.mulf %208, %209 : vector<8x8x64xf32>
      %211 = math.exp %210 : vector<8x8x64xf32>
      %212 = vector.extract_strided_slice %211 {offsets = [7, 0, 0], sizes = [1, 8, 64], strides = [1, 1, 1]} : vector<8x8x64xf32> to vector<1x8x64xf32>
      %213 = vector.shape_cast %212 : vector<1x8x64xf32> to vector<8x64xf32>
      %214 = arith.mulf %213, %arg11 : vector<8x64xf32>
      %215 = vector.extract_strided_slice %203 {offsets = [0, 7], sizes = [8, 1], strides = [1, 1]} : vector<8x8xf32> to vector<8x1xf32>
      %216 = vector.extract_strided_slice %201 {offsets = [7, 0], sizes = [1, 64], strides = [1, 1]} : vector<8x64xf32> to vector<1x64xf32>
      %217 = vector.broadcast %215 : vector<8x1xf32> to vector<8x64xf32>
      %218 = vector.broadcast %216 : vector<1x64xf32> to vector<8x64xf32>
      %219 = arith.mulf %217, %218 : vector<8x64xf32>
      %220 = arith.addf %214, %219 : vector<8x64xf32>
      %221 = vector.extract_strided_slice %205 {offsets = [0, 7], sizes = [8, 1], strides = [1, 1]} : vector<8x8xf32> to vector<8x1xf32>
      %222 = vector.broadcast %221 : vector<8x1xf32> to vector<8x64xf32>
      %223 = arith.mulf %222, %220 : vector<8x64xf32>
      %cst_221 = arith.constant dense<0.000000e+00> : vector<64xf32>
      %224 = vector.multi_reduction <add>, %223, %cst_221 [0] : vector<8x64xf32> to vector<64xf32>
      %225 = vector.shape_cast %224 : vector<64xf32> to vector<1x64xf32>
      %c7_i32_222 = arith.constant 7 : i32
      %226 = arith.addi %179, %c7_i32_222 : i32
      %227 = arith.index_cast %226 : i32 to index
      %c0_223 = arith.constant 0 : index
      %228 = vector.load %arg9[%227, %c0_223] : memref<64x64xf32, #tpu.memory_space<vmem>>, vector<1x64xf32>
      %229 = arith.addf %228, %225 : vector<1x64xf32>
      %230 = arith.index_cast %226 : i32 to index
      %c0_224 = arith.constant 0 : index
      %231 = vector.load %arg9[%230, %c0_224] : memref<64x64xf32, #tpu.memory_space<vmem>>, vector<1x64xf32>
      tpu.vector_store %arg9[%230, %c0_224], %229 {strides = array<i32>} : memref<64x64xf32, #tpu.memory_space<vmem>>, vector<1x64xf32>,
      %232 = vector.extract_strided_slice %211 {offsets = [6, 0, 0], sizes = [1, 8, 64], strides = [1, 1, 1]} : vector<8x8x64xf32> to vector<1x8x64xf32>
      %233 = vector.shape_cast %232 : vector<1x8x64xf32> to vector<8x64xf32>
      %234 = arith.mulf %233, %220 : vector<8x64xf32>
      %235 = vector.extract_strided_slice %203 {offsets = [0, 6], sizes = [8, 1], strides = [1, 1]} : vector<8x8xf32> to vector<8x1xf32>
      %236 = vector.extract_strided_slice %201 {offsets = [6, 0], sizes = [1, 64], strides = [1, 1]} : vector<8x64xf32> to vector<1x64xf32>
      %237 = vector.broadcast %235 : vector<8x1xf32> to vector<8x64xf32>
      %238 = vector.broadcast %236 : vector<1x64xf32> to vector<8x64xf32>
      %239 = arith.mulf %237, %238 : vector<8x64xf32>
      %240 = arith.addf %234, %239 : vector<8x64xf32>
      %241 = vector.extract_strided_slice %205 {offsets = [0, 6], sizes = [8, 1], strides = [1, 1]} : vector<8x8xf32> to vector<8x1xf32>
      %242 = vector.broadcast %241 : vector<8x1xf32> to vector<8x64xf32>
      %243 = arith.mulf %242, %240 : vector<8x64xf32>
      %cst_225 = arith.constant dense<0.000000e+00> : vector<64xf32>
      %244 = vector.multi_reduction <add>, %243, %cst_225 [0] : vector<8x64xf32> to vector<64xf32>
      %245 = vector.shape_cast %244 : vector<64xf32> to vector<1x64xf32>
      %c6_i32 = arith.constant 6 : i32
      %246 = arith.addi %179, %c6_i32 : i32
      %247 = arith.index_cast %246 : i32 to index
      %c0_226 = arith.constant 0 : index
      %248 = vector.load %arg9[%247, %c0_226] : memref<64x64xf32, #tpu.memory_space<vmem>>, vector<1x64xf32>
      %249 = arith.addf %248, %245 : vector<1x64xf32>
      %250 = arith.index_cast %246 : i32 to index
      %c0_227 = arith.constant 0 : index
      %251 = vector.load %arg9[%250, %c0_227] : memref<64x64xf32, #tpu.memory_space<vmem>>, vector<1x64xf32>
      tpu.vector_store %arg9[%250, %c0_227], %249 {strides = array<i32>} : memref<64x64xf32, #tpu.memory_space<vmem>>, vector<1x64xf32>,
      %252 = vector.extract_strided_slice %211 {offsets = [5, 0, 0], sizes = [1, 8, 64], strides = [1, 1, 1]} : vector<8x8x64xf32> to vector<1x8x64xf32>
      %253 = vector.shape_cast %252 : vector<1x8x64xf32> to vector<8x64xf32>
      %254 = arith.mulf %253, %240 : vector<8x64xf32>
      %255 = vector.extract_strided_slice %203 {offsets = [0, 5], sizes = [8, 1], strides = [1, 1]} : vector<8x8xf32> to vector<8x1xf32>
      %256 = vector.extract_strided_slice %201 {offsets = [5, 0], sizes = [1, 64], strides = [1, 1]} : vector<8x64xf32> to vector<1x64xf32>
      %257 = vector.broadcast %255 : vector<8x1xf32> to vector<8x64xf32>
      %258 = vector.broadcast %256 : vector<1x64xf32> to vector<8x64xf32>
      %259 = arith.mulf %257, %258 : vector<8x64xf32>
      %260 = arith.addf %254, %259 : vector<8x64xf32>
      %261 = vector.extract_strided_slice %205 {offsets = [0, 5], sizes = [8, 1], strides = [1, 1]} : vector<8x8xf32> to vector<8x1xf32>
      %262 = vector.broadcast %261 : vector<8x1xf32> to vector<8x64xf32>
      %263 = arith.mulf %262, %260 : vector<8x64xf32>
      %cst_228 = arith.constant dense<0.000000e+00> : vector<64xf32>
      %264 = vector.multi_reduction <add>, %263, %cst_228 [0] : vector<8x64xf32> to vector<64xf32>
      %265 = vector.shape_cast %264 : vector<64xf32> to vector<1x64xf32>
      %c5_i32 = arith.constant 5 : i32
      %266 = arith.addi %179, %c5_i32 : i32
      %267 = arith.index_cast %266 : i32 to index
      %c0_229 = arith.constant 0 : index
      %268 = vector.load %arg9[%267, %c0_229] : memref<64x64xf32, #tpu.memory_space<vmem>>, vector<1x64xf32>
      %269 = arith.addf %268, %265 : vector<1x64xf32>
      %270 = arith.index_cast %266 : i32 to index
      %c0_230 = arith.constant 0 : index
      %271 = vector.load %arg9[%270, %c0_230] : memref<64x64xf32, #tpu.memory_space<vmem>>, vector<1x64xf32>
      tpu.vector_store %arg9[%270, %c0_230], %269 {strides = array<i32>} : memref<64x64xf32, #tpu.memory_space<vmem>>, vector<1x64xf32>,
      %272 = vector.extract_strided_slice %211 {offsets = [4, 0, 0], sizes = [1, 8, 64], strides = [1, 1, 1]} : vector<8x8x64xf32> to vector<1x8x64xf32>
      %273 = vector.shape_cast %272 : vector<1x8x64xf32> to vector<8x64xf32>
      %274 = arith.mulf %273, %260 : vector<8x64xf32>
      %275 = vector.extract_strided_slice %203 {offsets = [0, 4], sizes = [8, 1], strides = [1, 1]} : vector<8x8xf32> to vector<8x1xf32>
      %276 = vector.extract_strided_slice %201 {offsets = [4, 0], sizes = [1, 64], strides = [1, 1]} : vector<8x64xf32> to vector<1x64xf32>
      %277 = vector.broadcast %275 : vector<8x1xf32> to vector<8x64xf32>
      %278 = vector.broadcast %276 : vector<1x64xf32> to vector<8x64xf32>
      %279 = arith.mulf %277, %278 : vector<8x64xf32>
      %280 = arith.addf %274, %279 : vector<8x64xf32>
      %281 = vector.extract_strided_slice %205 {offsets = [0, 4], sizes = [8, 1], strides = [1, 1]} : vector<8x8xf32> to vector<8x1xf32>
      %282 = vector.broadcast %281 : vector<8x1xf32> to vector<8x64xf32>
      %283 = arith.mulf %282, %280 : vector<8x64xf32>
      %cst_231 = arith.constant dense<0.000000e+00> : vector<64xf32>
      %284 = vector.multi_reduction <add>, %283, %cst_231 [0] : vector<8x64xf32> to vector<64xf32>
      %285 = vector.shape_cast %284 : vector<64xf32> to vector<1x64xf32>
      %c4_i32 = arith.constant 4 : i32
      %286 = arith.addi %179, %c4_i32 : i32
      %287 = arith.index_cast %286 : i32 to index
      %c0_232 = arith.constant 0 : index
      %288 = vector.load %arg9[%287, %c0_232] : memref<64x64xf32, #tpu.memory_space<vmem>>, vector<1x64xf32>
      %289 = arith.addf %288, %285 : vector<1x64xf32>
      %290 = arith.index_cast %286 : i32 to index
      %c0_233 = arith.constant 0 : index
      %291 = vector.load %arg9[%290, %c0_233] : memref<64x64xf32, #tpu.memory_space<vmem>>, vector<1x64xf32>
      tpu.vector_store %arg9[%290, %c0_233], %289 {strides = array<i32>} : memref<64x64xf32, #tpu.memory_space<vmem>>, vector<1x64xf32>,
      %292 = vector.extract_strided_slice %211 {offsets = [3, 0, 0], sizes = [1, 8, 64], strides = [1, 1, 1]} : vector<8x8x64xf32> to vector<1x8x64xf32>
      %293 = vector.shape_cast %292 : vector<1x8x64xf32> to vector<8x64xf32>
      %294 = arith.mulf %293, %280 : vector<8x64xf32>
      %295 = vector.extract_strided_slice %203 {offsets = [0, 3], sizes = [8, 1], strides = [1, 1]} : vector<8x8xf32> to vector<8x1xf32>
      %296 = vector.extract_strided_slice %201 {offsets = [3, 0], sizes = [1, 64], strides = [1, 1]} : vector<8x64xf32> to vector<1x64xf32>
      %297 = vector.broadcast %295 : vector<8x1xf32> to vector<8x64xf32>
      %298 = vector.broadcast %296 : vector<1x64xf32> to vector<8x64xf32>
      %299 = arith.mulf %297, %298 : vector<8x64xf32>
      %300 = arith.addf %294, %299 : vector<8x64xf32>
      %301 = vector.extract_strided_slice %205 {offsets = [0, 3], sizes = [8, 1], strides = [1, 1]} : vector<8x8xf32> to vector<8x1xf32>
      %302 = vector.broadcast %301 : vector<8x1xf32> to vector<8x64xf32>
      %303 = arith.mulf %302, %300 : vector<8x64xf32>
      %cst_234 = arith.constant dense<0.000000e+00> : vector<64xf32>
      %304 = vector.multi_reduction <add>, %303, %cst_234 [0] : vector<8x64xf32> to vector<64xf32>
      %305 = vector.shape_cast %304 : vector<64xf32> to vector<1x64xf32>
      %c3_i32 = arith.constant 3 : i32
      %306 = arith.addi %179, %c3_i32 : i32
      %307 = arith.index_cast %306 : i32 to index
      %c0_235 = arith.constant 0 : index
      %308 = vector.load %arg9[%307, %c0_235] : memref<64x64xf32, #tpu.memory_space<vmem>>, vector<1x64xf32>
      %309 = arith.addf %308, %305 : vector<1x64xf32>
      %310 = arith.index_cast %306 : i32 to index
      %c0_236 = arith.constant 0 : index
      %311 = vector.load %arg9[%310, %c0_236] : memref<64x64xf32, #tpu.memory_space<vmem>>, vector<1x64xf32>
      tpu.vector_store %arg9[%310, %c0_236], %309 {strides = array<i32>} : memref<64x64xf32, #tpu.memory_space<vmem>>, vector<1x64xf32>,
      %312 = vector.extract_strided_slice %211 {offsets = [2, 0, 0], sizes = [1, 8, 64], strides = [1, 1, 1]} : vector<8x8x64xf32> to vector<1x8x64xf32>
      %313 = vector.shape_cast %312 : vector<1x8x64xf32> to vector<8x64xf32>
      %314 = arith.mulf %313, %300 : vector<8x64xf32>
      %315 = vector.extract_strided_slice %203 {offsets = [0, 2], sizes = [8, 1], strides = [1, 1]} : vector<8x8xf32> to vector<8x1xf32>
      %316 = vector.extract_strided_slice %201 {offsets = [2, 0], sizes = [1, 64], strides = [1, 1]} : vector<8x64xf32> to vector<1x64xf32>
      %317 = vector.broadcast %315 : vector<8x1xf32> to vector<8x64xf32>
      %318 = vector.broadcast %316 : vector<1x64xf32> to vector<8x64xf32>
      %319 = arith.mulf %317, %318 : vector<8x64xf32>
      %320 = arith.addf %314, %319 : vector<8x64xf32>
      %321 = vector.extract_strided_slice %205 {offsets = [0, 2], sizes = [8, 1], strides = [1, 1]} : vector<8x8xf32> to vector<8x1xf32>
      %322 = vector.broadcast %321 : vector<8x1xf32> to vector<8x64xf32>
      %323 = arith.mulf %322, %320 : vector<8x64xf32>
      %cst_237 = arith.constant dense<0.000000e+00> : vector<64xf32>
      %324 = vector.multi_reduction <add>, %323, %cst_237 [0] : vector<8x64xf32> to vector<64xf32>
      %325 = vector.shape_cast %324 : vector<64xf32> to vector<1x64xf32>
      %c2_i32 = arith.constant 2 : i32
      %326 = arith.addi %179, %c2_i32 : i32
      %327 = arith.index_cast %326 : i32 to index
      %c0_238 = arith.constant 0 : index
      %328 = vector.load %arg9[%327, %c0_238] : memref<64x64xf32, #tpu.memory_space<vmem>>, vector<1x64xf32>
      %329 = arith.addf %328, %325 : vector<1x64xf32>
      %330 = arith.index_cast %326 : i32 to index
      %c0_239 = arith.constant 0 : index
      %331 = vector.load %arg9[%330, %c0_239] : memref<64x64xf32, #tpu.memory_space<vmem>>, vector<1x64xf32>
      tpu.vector_store %arg9[%330, %c0_239], %329 {strides = array<i32>} : memref<64x64xf32, #tpu.memory_space<vmem>>, vector<1x64xf32>,
      %332 = vector.extract_strided_slice %211 {offsets = [1, 0, 0], sizes = [1, 8, 64], strides = [1, 1, 1]} : vector<8x8x64xf32> to vector<1x8x64xf32>
      %333 = vector.shape_cast %332 : vector<1x8x64xf32> to vector<8x64xf32>
      %334 = arith.mulf %333, %320 : vector<8x64xf32>
      %335 = vector.extract_strided_slice %203 {offsets = [0, 1], sizes = [8, 1], strides = [1, 1]} : vector<8x8xf32> to vector<8x1xf32>
      %336 = vector.extract_strided_slice %201 {offsets = [1, 0], sizes = [1, 64], strides = [1, 1]} : vector<8x64xf32> to vector<1x64xf32>
      %337 = vector.broadcast %335 : vector<8x1xf32> to vector<8x64xf32>
      %338 = vector.broadcast %336 : vector<1x64xf32> to vector<8x64xf32>
      %339 = arith.mulf %337, %338 : vector<8x64xf32>
      %340 = arith.addf %334, %339 : vector<8x64xf32>
      %341 = vector.extract_strided_slice %205 {offsets = [0, 1], sizes = [8, 1], strides = [1, 1]} : vector<8x8xf32> to vector<8x1xf32>
      %342 = vector.broadcast %341 : vector<8x1xf32> to vector<8x64xf32>
      %343 = arith.mulf %342, %340 : vector<8x64xf32>
      %cst_240 = arith.constant dense<0.000000e+00> : vector<64xf32>
      %344 = vector.multi_reduction <add>, %343, %cst_240 [0] : vector<8x64xf32> to vector<64xf32>
      %345 = vector.shape_cast %344 : vector<64xf32> to vector<1x64xf32>
      %c1_i32_241 = arith.constant 1 : i32
      %346 = arith.addi %179, %c1_i32_241 : i32
      %347 = arith.index_cast %346 : i32 to index
      %c0_242 = arith.constant 0 : index
      %348 = vector.load %arg9[%347, %c0_242] : memref<64x64xf32, #tpu.memory_space<vmem>>, vector<1x64xf32>
      %349 = arith.addf %348, %345 : vector<1x64xf32>
      %350 = arith.index_cast %346 : i32 to index
      %c0_243 = arith.constant 0 : index
      %351 = vector.load %arg9[%350, %c0_243] : memref<64x64xf32, #tpu.memory_space<vmem>>, vector<1x64xf32>
      tpu.vector_store %arg9[%350, %c0_243], %349 {strides = array<i32>} : memref<64x64xf32, #tpu.memory_space<vmem>>, vector<1x64xf32>,
      %352 = vector.extract_strided_slice %211 {offsets = [0, 0, 0], sizes = [1, 8, 64], strides = [1, 1, 1]} : vector<8x8x64xf32> to vector<1x8x64xf32>
      %353 = vector.shape_cast %352 : vector<1x8x64xf32> to vector<8x64xf32>
      %354 = arith.mulf %353, %340 : vector<8x64xf32>
      %355 = vector.extract_strided_slice %203 {offsets = [0, 0], sizes = [8, 1], strides = [1, 1]} : vector<8x8xf32> to vector<8x1xf32>
      %356 = vector.extract_strided_slice %201 {offsets = [0, 0], sizes = [1, 64], strides = [1, 1]} : vector<8x64xf32> to vector<1x64xf32>
      %357 = vector.broadcast %355 : vector<8x1xf32> to vector<8x64xf32>
      %358 = vector.broadcast %356 : vector<1x64xf32> to vector<8x64xf32>
      %359 = arith.mulf %357, %358 : vector<8x64xf32>
      %360 = arith.addf %354, %359 : vector<8x64xf32>
      %361 = vector.extract_strided_slice %205 {offsets = [0, 0], sizes = [8, 1], strides = [1, 1]} : vector<8x8xf32> to vector<8x1xf32>
      %362 = vector.broadcast %361 : vector<8x1xf32> to vector<8x64xf32>
      %363 = arith.mulf %362, %360 : vector<8x64xf32>
      %cst_244 = arith.constant dense<0.000000e+00> : vector<64xf32>
      %364 = vector.multi_reduction <add>, %363, %cst_244 [0] : vector<8x64xf32> to vector<64xf32>
      %365 = vector.shape_cast %364 : vector<64xf32> to vector<1x64xf32>
      %c0_i32_245 = arith.constant 0 : i32
      %366 = arith.addi %179, %c0_i32_245 : i32
      %367 = arith.index_cast %366 : i32 to index
      %c0_246 = arith.constant 0 : index
      %368 = vector.load %arg9[%367, %c0_246] : memref<64x64xf32, #tpu.memory_space<vmem>>, vector<1x64xf32>
      %369 = arith.addf %368, %365 : vector<1x64xf32>
      %370 = arith.index_cast %366 : i32 to index
      %c0_247 = arith.constant 0 : index
      %371 = vector.load %arg9[%370, %c0_247] : memref<64x64xf32, #tpu.memory_space<vmem>>, vector<1x64xf32>
      tpu.vector_store %arg9[%370, %c0_247], %369 {strides = array<i32>} : memref<64x64xf32, #tpu.memory_space<vmem>>, vector<1x64xf32>,
      scf.yield %360 : vector<8x64xf32>
    }
    %c8_i32_122 = arith.constant 8 : i32
    %c1_123 = arith.constant 1 : index
    %c0_124 = arith.constant 0 : index
    %c0_125 = arith.constant 0 : index
    %c0_126 = arith.constant 0 : index
    %94 = vector.load %arg4[%c1_123, %c0_124, %c0_125, %c0_126] : memref<2x2x1x64xf32, #tpu.memory_space<vmem>>, vector<1x1x1x64xf32>
    %95 = vector.shape_cast %94 : vector<1x1x1x64xf32> to vector<1x64xf32>
    %c1_127 = arith.constant 1 : index
    %c1_128 = arith.constant 1 : index
    %c0_129 = arith.constant 0 : index
    %c0_130 = arith.constant 0 : index
    %96 = vector.load %arg4[%c1_127, %c1_128, %c0_129, %c0_130] : memref<2x2x1x64xf32, #tpu.memory_space<vmem>>, vector<1x1x1x64xf32>
    %97 = vector.shape_cast %96 : vector<1x1x1x64xf32> to vector<1x64xf32>
    %98 = arith.addf %95, %97 : vector<1x64xf32>
    %c0_131 = arith.constant 0 : index
    %c0_132 = arith.constant 0 : index
    %99 = vector.load %arg9[%c0_131, %c0_132] : memref<64x64xf32, #tpu.memory_space<vmem>>, vector<64x64xf32>
    %c0_133 = arith.constant 0 : index
    %c0_134 = arith.constant 0 : index
    %100 = vector.load %arg7[%c0_133, %c0_134] : memref<64x64xf32, #tpu.memory_space<vmem>>, vector<64x64xf32>
    %101 = vector.broadcast %98 : vector<1x64xf32> to vector<64x64xf32>
    %102 = arith.mulf %101, %100 : vector<64x64xf32>
    %103 = arith.addf %99, %102 : vector<64x64xf32>
    %c0_135 = arith.constant 0 : index
    %c0_136 = arith.constant 0 : index
    %104 = vector.load %arg9[%c0_135, %c0_136] : memref<64x64xf32, #tpu.memory_space<vmem>>, vector<64x64xf32>
    tpu.vector_store %arg9[%c0_135, %c0_136], %103 {strides = array<i32>} : memref<64x64xf32, #tpu.memory_space<vmem>>, vector<64x64xf32>,
    %c0_137 = arith.constant 0 : index
    %c0_138 = arith.constant 0 : index
    %c0_139 = arith.constant 0 : index
    %c0_140 = arith.constant 0 : index
    %105 = vector.load %arg6[%c0_137, %c0_138, %c0_139, %c0_140] : memref<1x8x8x64xbf16, #tpu.memory_space<vmem>>, vector<1x8x1x64xbf16>
    %106 = vector.shape_cast %105 : vector<1x8x1x64xbf16> to vector<8x64xbf16>
    %107 = arith.extf %106 : vector<8x64xbf16> to vector<8x64xf32>
    %c0_141 = arith.constant 0 : index
    %c0_142 = arith.constant 0 : index
    %108 = vector.load %arg9[%c0_141, %c0_142] : memref<64x64xf32, #tpu.memory_space<vmem>>, vector<8x64xf32>
    %109 = arith.addf %107, %108 : vector<8x64xf32>
    %110 = arith.truncf %109 : vector<8x64xf32> to vector<8x64xbf16>
    %c0_143 = arith.constant 0 : index
    %c0_144 = arith.constant 0 : index
    %c0_145 = arith.constant 0 : index
    %c0_146 = arith.constant 0 : index
    %111 = vector.load %arg6[%c0_143, %c0_144, %c0_145, %c0_146] : memref<1x8x8x64xbf16, #tpu.memory_space<vmem>>, vector<1x8x1x64xbf16>
    %112 = vector.shape_cast %111 : vector<1x8x1x64xbf16> to vector<8x64xbf16>
    %113 = vector.shape_cast %110 : vector<8x64xbf16> to vector<1x8x1x64xbf16>
    tpu.vector_store %arg6[%c0_143, %c0_144, %c0_145, %c0_146], %113 {strides = array<i32>} : memref<1x8x8x64xbf16, #tpu.memory_space<vmem>>, vector<1x8x1x64xbf16>,
    %c0_147 = arith.constant 0 : index
    %c0_148 = arith.constant 0 : index
    %c1_149 = arith.constant 1 : index
    %c0_150 = arith.constant 0 : index
    %114 = vector.load %arg6[%c0_147, %c0_148, %c1_149, %c0_150] : memref<1x8x8x64xbf16, #tpu.memory_space<vmem>>, vector<1x8x1x64xbf16>
    %115 = vector.shape_cast %114 : vector<1x8x1x64xbf16> to vector<8x64xbf16>
    %116 = arith.extf %115 : vector<8x64xbf16> to vector<8x64xf32>
    %c8_151 = arith.constant 8 : index
    %c0_152 = arith.constant 0 : index
    %117 = vector.load %arg9[%c8_151, %c0_152] : memref<64x64xf32, #tpu.memory_space<vmem>>, vector<8x64xf32>
    %118 = arith.addf %116, %117 : vector<8x64xf32>
    %119 = arith.truncf %118 : vector<8x64xf32> to vector<8x64xbf16>
    %c0_153 = arith.constant 0 : index
    %c0_154 = arith.constant 0 : index
    %c1_155 = arith.constant 1 : index
    %c0_156 = arith.constant 0 : index
    %120 = vector.load %arg6[%c0_153, %c0_154, %c1_155, %c0_156] : memref<1x8x8x64xbf16, #tpu.memory_space<vmem>>, vector<1x8x1x64xbf16>
    %121 = vector.shape_cast %120 : vector<1x8x1x64xbf16> to vector<8x64xbf16>
    %122 = vector.shape_cast %119 : vector<8x64xbf16> to vector<1x8x1x64xbf16>
    tpu.vector_store %arg6[%c0_153, %c0_154, %c1_155, %c0_156], %122 {strides = array<i32>} : memref<1x8x8x64xbf16, #tpu.memory_space<vmem>>, vector<1x8x1x64xbf16>,
    %c0_157 = arith.constant 0 : index
    %c0_158 = arith.constant 0 : index
    %c2_159 = arith.constant 2 : index
    %c0_160 = arith.constant 0 : index
    %123 = vector.load %arg6[%c0_157, %c0_158, %c2_159, %c0_160] : memref<1x8x8x64xbf16, #tpu.memory_space<vmem>>, vector<1x8x1x64xbf16>
    %124 = vector.shape_cast %123 : vector<1x8x1x64xbf16> to vector<8x64xbf16>
    %125 = arith.extf %124 : vector<8x64xbf16> to vector<8x64xf32>
    %c16_161 = arith.constant 16 : index
    %c0_162 = arith.constant 0 : index
    %126 = vector.load %arg9[%c16_161, %c0_162] : memref<64x64xf32, #tpu.memory_space<vmem>>, vector<8x64xf32>
    %127 = arith.addf %125, %126 : vector<8x64xf32>
    %128 = arith.truncf %127 : vector<8x64xf32> to vector<8x64xbf16>
    %c0_163 = arith.constant 0 : index
    %c0_164 = arith.constant 0 : index
    %c2_165 = arith.constant 2 : index
    %c0_166 = arith.constant 0 : index
    %129 = vector.load %arg6[%c0_163, %c0_164, %c2_165, %c0_166] : memref<1x8x8x64xbf16, #tpu.memory_space<vmem>>, vector<1x8x1x64xbf16>
    %130 = vector.shape_cast %129 : vector<1x8x1x64xbf16> to vector<8x64xbf16>
    %131 = vector.shape_cast %128 : vector<8x64xbf16> to vector<1x8x1x64xbf16>
    tpu.vector_store %arg6[%c0_163, %c0_164, %c2_165, %c0_166], %131 {strides = array<i32>} : memref<1x8x8x64xbf16, #tpu.memory_space<vmem>>, vector<1x8x1x64xbf16>,
    %c0_167 = arith.constant 0 : index
    %c0_168 = arith.constant 0 : index
    %c3_169 = arith.constant 3 : index
    %c0_170 = arith.constant 0 : index
    %132 = vector.load %arg6[%c0_167, %c0_168, %c3_169, %c0_170] : memref<1x8x8x64xbf16, #tpu.memory_space<vmem>>, vector<1x8x1x64xbf16>
    %133 = vector.shape_cast %132 : vector<1x8x1x64xbf16> to vector<8x64xbf16>
    %134 = arith.extf %133 : vector<8x64xbf16> to vector<8x64xf32>
    %c24_171 = arith.constant 24 : index
    %c0_172 = arith.constant 0 : index
    %135 = vector.load %arg9[%c24_171, %c0_172] : memref<64x64xf32, #tpu.memory_space<vmem>>, vector<8x64xf32>
    %136 = arith.addf %134, %135 : vector<8x64xf32>
    %137 = arith.truncf %136 : vector<8x64xf32> to vector<8x64xbf16>
    %c0_173 = arith.constant 0 : index
    %c0_174 = arith.constant 0 : index
    %c3_175 = arith.constant 3 : index
    %c0_176 = arith.constant 0 : index
    %138 = vector.load %arg6[%c0_173, %c0_174, %c3_175, %c0_176] : memref<1x8x8x64xbf16, #tpu.memory_space<vmem>>, vector<1x8x1x64xbf16>
    %139 = vector.shape_cast %138 : vector<1x8x1x64xbf16> to vector<8x64xbf16>
    %140 = vector.shape_cast %137 : vector<8x64xbf16> to vector<1x8x1x64xbf16>
    tpu.vector_store %arg6[%c0_173, %c0_174, %c3_175, %c0_176], %140 {strides = array<i32>} : memref<1x8x8x64xbf16, #tpu.memory_space<vmem>>, vector<1x8x1x64xbf16>,
    %c0_177 = arith.constant 0 : index
    %c0_178 = arith.constant 0 : index
    %c4_179 = arith.constant 4 : index
    %c0_180 = arith.constant 0 : index
    %141 = vector.load %arg6[%c0_177, %c0_178, %c4_179, %c0_180] : memref<1x8x8x64xbf16, #tpu.memory_space<vmem>>, vector<1x8x1x64xbf16>
    %142 = vector.shape_cast %141 : vector<1x8x1x64xbf16> to vector<8x64xbf16>
    %143 = arith.extf %142 : vector<8x64xbf16> to vector<8x64xf32>
    %c32_181 = arith.constant 32 : index
    %c0_182 = arith.constant 0 : index
    %144 = vector.load %arg9[%c32_181, %c0_182] : memref<64x64xf32, #tpu.memory_space<vmem>>, vector<8x64xf32>
    %145 = arith.addf %143, %144 : vector<8x64xf32>
    %146 = arith.truncf %145 : vector<8x64xf32> to vector<8x64xbf16>
    %c0_183 = arith.constant 0 : index
    %c0_184 = arith.constant 0 : index
    %c4_185 = arith.constant 4 : index
    %c0_186 = arith.constant 0 : index
    %147 = vector.load %arg6[%c0_183, %c0_184, %c4_185, %c0_186] : memref<1x8x8x64xbf16, #tpu.memory_space<vmem>>, vector<1x8x1x64xbf16>
    %148 = vector.shape_cast %147 : vector<1x8x1x64xbf16> to vector<8x64xbf16>
    %149 = vector.shape_cast %146 : vector<8x64xbf16> to vector<1x8x1x64xbf16>
    tpu.vector_store %arg6[%c0_183, %c0_184, %c4_185, %c0_186], %149 {strides = array<i32>} : memref<1x8x8x64xbf16, #tpu.memory_space<vmem>>, vector<1x8x1x64xbf16>,
    %c0_187 = arith.constant 0 : index
    %c0_188 = arith.constant 0 : index
    %c5_189 = arith.constant 5 : index
    %c0_190 = arith.constant 0 : index
    %150 = vector.load %arg6[%c0_187, %c0_188, %c5_189, %c0_190] : memref<1x8x8x64xbf16, #tpu.memory_space<vmem>>, vector<1x8x1x64xbf16>
    %151 = vector.shape_cast %150 : vector<1x8x1x64xbf16> to vector<8x64xbf16>
    %152 = arith.extf %151 : vector<8x64xbf16> to vector<8x64xf32>
    %c40_191 = arith.constant 40 : index
    %c0_192 = arith.constant 0 : index
    %153 = vector.load %arg9[%c40_191, %c0_192] : memref<64x64xf32, #tpu.memory_space<vmem>>, vector<8x64xf32>
    %154 = arith.addf %152, %153 : vector<8x64xf32>
    %155 = arith.truncf %154 : vector<8x64xf32> to vector<8x64xbf16>
    %c0_193 = arith.constant 0 : index
    %c0_194 = arith.constant 0 : index
    %c5_195 = arith.constant 5 : index
    %c0_196 = arith.constant 0 : index
    %156 = vector.load %arg6[%c0_193, %c0_194, %c5_195, %c0_196] : memref<1x8x8x64xbf16, #tpu.memory_space<vmem>>, vector<1x8x1x64xbf16>
    %157 = vector.shape_cast %156 : vector<1x8x1x64xbf16> to vector<8x64xbf16>
    %158 = vector.shape_cast %155 : vector<8x64xbf16> to vector<1x8x1x64xbf16>
    tpu.vector_store %arg6[%c0_193, %c0_194, %c5_195, %c0_196], %158 {strides = array<i32>} : memref<1x8x8x64xbf16, #tpu.memory_space<vmem>>, vector<1x8x1x64xbf16>,
    %c0_197 = arith.constant 0 : index
    %c0_198 = arith.constant 0 : index
    %c6_199 = arith.constant 6 : index
    %c0_200 = arith.constant 0 : index
    %159 = vector.load %arg6[%c0_197, %c0_198, %c6_199, %c0_200] : memref<1x8x8x64xbf16, #tpu.memory_space<vmem>>, vector<1x8x1x64xbf16>
    %160 = vector.shape_cast %159 : vector<1x8x1x64xbf16> to vector<8x64xbf16>
    %161 = arith.extf %160 : vector<8x64xbf16> to vector<8x64xf32>
    %c48_201 = arith.constant 48 : index
    %c0_202 = arith.constant 0 : index
    %162 = vector.load %arg9[%c48_201, %c0_202] : memref<64x64xf32, #tpu.memory_space<vmem>>, vector<8x64xf32>
    %163 = arith.addf %161, %162 : vector<8x64xf32>
    %164 = arith.truncf %163 : vector<8x64xf32> to vector<8x64xbf16>
    %c0_203 = arith.constant 0 : index
    %c0_204 = arith.constant 0 : index
    %c6_205 = arith.constant 6 : index
    %c0_206 = arith.constant 0 : index
    %165 = vector.load %arg6[%c0_203, %c0_204, %c6_205, %c0_206] : memref<1x8x8x64xbf16, #tpu.memory_space<vmem>>, vector<1x8x1x64xbf16>
    %166 = vector.shape_cast %165 : vector<1x8x1x64xbf16> to vector<8x64xbf16>
    %167 = vector.shape_cast %164 : vector<8x64xbf16> to vector<1x8x1x64xbf16>
    tpu.vector_store %arg6[%c0_203, %c0_204, %c6_205, %c0_206], %167 {strides = array<i32>} : memref<1x8x8x64xbf16, #tpu.memory_space<vmem>>, vector<1x8x1x64xbf16>,
    %c0_207 = arith.constant 0 : index
    %c0_208 = arith.constant 0 : index
    %c7_209 = arith.constant 7 : index
    %c0_210 = arith.constant 0 : index
    %168 = vector.load %arg6[%c0_207, %c0_208, %c7_209, %c0_210] : memref<1x8x8x64xbf16, #tpu.memory_space<vmem>>, vector<1x8x1x64xbf16>
    %169 = vector.shape_cast %168 : vector<1x8x1x64xbf16> to vector<8x64xbf16>
    %170 = arith.extf %169 : vector<8x64xbf16> to vector<8x64xf32>
    %c56_211 = arith.constant 56 : index
    %c0_212 = arith.constant 0 : index
    %171 = vector.load %arg9[%c56_211, %c0_212] : memref<64x64xf32, #tpu.memory_space<vmem>>, vector<8x64xf32>
    %172 = arith.addf %170, %171 : vector<8x64xf32>
    %173 = arith.truncf %172 : vector<8x64xf32> to vector<8x64xbf16>
    %c0_213 = arith.constant 0 : index
    %c0_214 = arith.constant 0 : index
    %c7_215 = arith.constant 7 : index
    %c0_216 = arith.constant 0 : index
    %174 = vector.load %arg6[%c0_213, %c0_214, %c7_215, %c0_216] : memref<1x8x8x64xbf16, #tpu.memory_space<vmem>>, vector<1x8x1x64xbf16>
    %175 = vector.shape_cast %174 : vector<1x8x1x64xbf16> to vector<8x64xbf16>
    %176 = vector.shape_cast %173 : vector<8x64xbf16> to vector<1x8x1x64xbf16>
    tpu.vector_store %arg6[%c0_213, %c0_214, %c7_215, %c0_216], %176 {strides = array<i32>} : memref<1x8x8x64xbf16, #tpu.memory_space<vmem>>, vector<1x8x1x64xbf16>,
    return
  }
  func.func @transform_0(%arg0: i32) -> (i32, i32, i32, i32) {
    %c0_i32 = arith.constant 0 : i32
    %c0_i32_0 = arith.constant 0 : i32
    %c0_i32_1 = arith.constant 0 : i32
    %c0_i32_2 = arith.constant 0 : i32
    return %arg0, %c0_i32, %c0_i32_0, %c0_i32_1 : i32, i32, i32, i32
  }
  func.func @transform_1(%arg0: i32) -> (i32, i32, i32) {
    %c0_i32 = arith.constant 0 : i32
    %c0_i32_0 = arith.constant 0 : i32
    %c0_i32_1 = arith.constant 0 : i32
    %c0_i32_2 = arith.constant 0 : i32
    return %c0_i32, %c0_i32_0, %c0_i32_1 : i32, i32, i32
  }
  func.func @transform_2(%arg0: i32) -> (i32, i32, i32, i32) {
    %c0_i32 = arith.constant 0 : i32
    %c0_i32_0 = arith.constant 0 : i32
    %c0_i32_1 = arith.constant 0 : i32
    %c0_i32_2 = arith.constant 0 : i32
    %c0_i32_3 = arith.constant 0 : i32
    return %c0_i32, %c0_i32_0, %c0_i32_1, %c0_i32_2 : i32, i32, i32, i32
  }
  func.func @transform_3(%arg0: i32) -> (i32, i32, i32, i32) {
    %c0_i32 = arith.constant 0 : i32
    %c0_i32_0 = arith.constant 0 : i32
    %c0_i32_1 = arith.constant 0 : i32
    %c0_i32_2 = arith.constant 0 : i32
    %c0_i32_3 = arith.constant 0 : i32
    return %c0_i32, %c0_i32_0, %c0_i32_1, %c0_i32_2 : i32, i32, i32, i32
  }
  func.func @transform_4(%arg0: i32) -> (i32, i32, i32, i32) {
    %c0_i32 = arith.constant 0 : i32
    %c0_i32_0 = arith.constant 0 : i32
    %c0_i32_1 = arith.constant 0 : i32
    %c0_i32_2 = arith.constant 0 : i32
    %c0_i32_3 = arith.constant 0 : i32
    return %c0_i32, %c0_i32_0, %c0_i32_1, %c0_i32_2 : i32, i32, i32, i32
  }
  func.func @transform_5(%arg0: i32) -> (i32, i32, i32, i32) {
    %c0_i32 = arith.constant 0 : i32
    %c0_i32_0 = arith.constant 0 : i32
    %c0_i32_1 = arith.constant 0 : i32
    %c0_i32_2 = arith.constant 0 : i32
    return %arg0, %c0_i32, %c0_i32_0, %c0_i32_1 : i32, i32, i32, i32
  }
}

module attributes {stable_mosaic.version = 11 : i64} {
  func.func @_ln_residual_kernel(%arg0: i32, %arg1: memref<1x1xf32, #tpu.memory_space<smem>>, %arg2: memref<128x64xf32, #tpu.memory_space<vmem>>, %arg3: memref<128x64xf32, #tpu.memory_space<vmem>>, %arg4: memref<1x64xf32, #tpu.memory_space<vmem>>, %arg5: memref<1x64xf32, #tpu.memory_space<vmem>>, %arg6: memref<128x64xf32, #tpu.memory_space<vmem>>) attributes {dimension_semantics = [#tpu.dimension_semantics<parallel>], iteration_bounds = array<i64: 1>, scalar_prefetch = 0 : i64, scratch_operands = 0 : i64, tpu.core_type = #tpu.core_type<tc>, window_params = [{transform_indices = @transform_0, window_bounds = array<i64: 1, 1>}, {transform_indices = @transform_1, window_bounds = array<i64: 128, 64>}, {transform_indices = @transform_2, window_bounds = array<i64: 128, 64>}, {pipeline_mode = #tpu.pipeline_mode<synchronous>, transform_indices = @transform_3, window_bounds = array<i64: 1, 64>}, {pipeline_mode = #tpu.pipeline_mode<synchronous>, transform_indices = @transform_4, window_bounds = array<i64: 1, 64>}, {transform_indices = @transform_5, window_bounds = array<i64: 128, 64>}]} {
    %c0 = arith.constant 0 : index
    %c0_0 = arith.constant 0 : index
    %0 = memref.load %arg1[%c0, %c0_0] : memref<1x1xf32, #tpu.memory_space<smem>>
    %c0_1 = arith.constant 0 : index
    %c0_2 = arith.constant 0 : index
    %1 = vector.load %arg2[%c0_1, %c0_2] : memref<128x64xf32, #tpu.memory_space<vmem>>, vector<128x64xf32>
    %2 = vector.broadcast %0 : f32 to vector<128x64xf32>
    %3 = arith.mulf %2, %1 : vector<128x64xf32>
    %c0_3 = arith.constant 0 : index
    %c0_4 = arith.constant 0 : index
    %4 = vector.load %arg3[%c0_3, %c0_4] : memref<128x64xf32, #tpu.memory_space<vmem>>, vector<128x64xf32>
    %5 = arith.addf %3, %4 : vector<128x64xf32>
    %cst = arith.constant dense<0.000000e+00> : vector<128xf32>
    %6 = vector.multi_reduction <add>, %5, %cst [1] : vector<128x64xf32> to vector<128xf32>
    %7 = vector.shape_cast %6 : vector<128xf32> to vector<128x1xf32>
    %cst_5 = arith.constant 6.400000e+01 : f32
    %8 = vector.broadcast %cst_5 : f32 to vector<128x1xf32>
    %9 = arith.divf %7, %8 : vector<128x1xf32>
    %10 = vector.broadcast %9 : vector<128x1xf32> to vector<128x64xf32>
    %11 = arith.subf %5, %10 : vector<128x64xf32>
    %12 = arith.mulf %11, %11 : vector<128x64xf32>
    %cst_6 = arith.constant dense<0.000000e+00> : vector<128xf32>
    %13 = vector.multi_reduction <add>, %12, %cst_6 [1] : vector<128x64xf32> to vector<128xf32>
    %14 = vector.shape_cast %13 : vector<128xf32> to vector<128x1xf32>
    %cst_7 = arith.constant 6.400000e+01 : f32
    %15 = vector.broadcast %cst_7 : f32 to vector<128x1xf32>
    %16 = arith.divf %14, %15 : vector<128x1xf32>
    %cst_8 = arith.constant 9.99999974E-6 : f32
    %17 = vector.broadcast %cst_8 : f32 to vector<128x1xf32>
    %18 = arith.addf %16, %17 : vector<128x1xf32>
    %19 = math.rsqrt %18 : vector<128x1xf32>
    %20 = vector.broadcast %19 : vector<128x1xf32> to vector<128x64xf32>
    %21 = arith.mulf %11, %20 : vector<128x64xf32>
    %c0_9 = arith.constant 0 : index
    %c0_10 = arith.constant 0 : index
    %22 = vector.load %arg4[%c0_9, %c0_10] : memref<1x64xf32, #tpu.memory_space<vmem>>, vector<1x64xf32>
    %23 = vector.broadcast %22 : vector<1x64xf32> to vector<128x64xf32>
    %24 = arith.mulf %21, %23 : vector<128x64xf32>
    %c0_11 = arith.constant 0 : index
    %c0_12 = arith.constant 0 : index
    %25 = vector.load %arg5[%c0_11, %c0_12] : memref<1x64xf32, #tpu.memory_space<vmem>>, vector<1x64xf32>
    %26 = vector.broadcast %25 : vector<1x64xf32> to vector<128x64xf32>
    %27 = arith.addf %24, %26 : vector<128x64xf32>
    %c0_13 = arith.constant 0 : index
    %c0_14 = arith.constant 0 : index
    %28 = vector.load %arg6[%c0_13, %c0_14] : memref<128x64xf32, #tpu.memory_space<vmem>>, vector<128x64xf32>
    tpu.vector_store %arg6[%c0_13, %c0_14], %27 {strides = array<i32>} : memref<128x64xf32, #tpu.memory_space<vmem>>, vector<128x64xf32>,
    return
  }
  func.func @transform_0(%arg0: i32) -> (i32, i32) {
    %c0_i32 = arith.constant 0 : i32
    %c0_i32_0 = arith.constant 0 : i32
    %c0_i32_1 = arith.constant 0 : i32
    return %c0_i32, %c0_i32_0 : i32, i32
  }
  func.func @transform_1(%arg0: i32) -> (i32, i32) {
    %c0_i32 = arith.constant 0 : i32
    %c0_i32_0 = arith.constant 0 : i32
    return %arg0, %c0_i32 : i32, i32
  }
  func.func @transform_2(%arg0: i32) -> (i32, i32) {
    %c0_i32 = arith.constant 0 : i32
    %c0_i32_0 = arith.constant 0 : i32
    return %arg0, %c0_i32 : i32, i32
  }
  func.func @transform_3(%arg0: i32) -> (i32, i32) {
    %c0_i32 = arith.constant 0 : i32
    %c0_i32_0 = arith.constant 0 : i32
    %c0_i32_1 = arith.constant 0 : i32
    return %c0_i32, %c0_i32_0 : i32, i32
  }
  func.func @transform_4(%arg0: i32) -> (i32, i32) {
    %c0_i32 = arith.constant 0 : i32
    %c0_i32_0 = arith.constant 0 : i32
    %c0_i32_1 = arith.constant 0 : i32
    return %c0_i32, %c0_i32_0 : i32, i32
  }
  func.func @transform_5(%arg0: i32) -> (i32, i32) {
    %c0_i32 = arith.constant 0 : i32
    %c0_i32_0 = arith.constant 0 : i32
    return %arg0, %c0_i32 : i32, i32
  }
}

</mosaic_0001>

<bundles_post_ra>
// kernel: cascaded_vmamba_block.9
= control target key start
LH: loop header
LB: loop body
LE: loop exit
PB: predicated region body
PF: predicated region fallthrough
CT: control target
= control target key end

     0   :  { %vm36_vm0 = vcmask 261120   ;;  %vm501_vm1 = vcmask 519168   ;;  %s703_s6 = smov 64   ;;  %s1134_s0 = inlined_call_operand.vmem [shape: f32[128,32], index: 0, kind: input, shape index: {}]   ;;  %s1135_s3 = inlined_call_operand.vmem [shape: bf16[32,128], index: 3, kind: input, shape index: {}]   ;;  %s1136_s1 = inlined_call_operand.vmem [shape: f32[1,32], index: 1, kind: input, shape index: {}]   ;;  %s1137_s2 = inlined_call_operand.vmem [shape: f32[1,32], index: 2, kind: input, shape index: {}]   ;;  %s1138_s4 = inlined_call_operand.vmem [shape: bf16[128,64], index: 4, kind: output, shape index: {0}]   ;;  %s1139_s5 = inlined_call_operand.vmem [shape: bf16[128,64], index: 5, kind: output, shape index: {1}]  }
   0x1   :  { %v20_v0 = vld [vmem:[%s1134_s0] sm:$0xff]  ;;  %v21_v2 = vld [vmem:[%s1134_s0 + $0x8] sm:$0xff]  ;;  %v22_v8 = vld [vmem:[%s1134_s0 + $0x10] sm:$0xff] }
   0x2   :  { %v28_v1 = vld [vmem:[%s1134_s0 + $0x40] sm:$0xff]  ;;  %v37_v3 = vsel %vm36_vm0, %v20_v0, 0.0  ;;  %v29_v5 = vld [vmem:[%s1134_s0 + $0x48] sm:$0xff]  ;;  %v40_v6 = vsel %vm36_vm0, %v21_v2, 0.0  ;;  %v23_v9 = vld [vmem:[%s1134_s0 + $0x18] sm:$0xff]  ;;  %v43_v10 = vsel %vm36_vm0, %v22_v8, 0.0 }
   0x3   :  { %v61_v4 = vsel %vm36_vm0, %v28_v1, 0.0  ;;  %38 = vadd.xlane.f32.xlu0 %v37_v3  ;;  %v64_v7 = vsel %vm36_vm0, %v29_v5, 0.0  ;;  %v46_v11 = vsel %vm36_vm0, %v23_v9, 0.0  ;;  %v761_v12 = vld [vmem:[%s1134_s0 + $0x50] sm:$0xff]  ;;  %v766_v13 = vld [vmem:[%s1134_s0 + $0x58] sm:$0xff]  ;;  %v775_v16 = vld [vmem:[%s1134_s0 + $0x20] sm:$0xff] }
   0x4   :  { %62 = vadd.xlane.f32.xlu1 %v61_v4  ;;  %v67_v14 = vsel %vm36_vm0, %v761_v12, 0.0  ;;  %v70_v15 = vsel %vm36_vm0, %v766_v13, 0.0  ;;  %v780_v17 = vld [vmem:[%s1134_s0 + $0x28] sm:$0xff]  ;;  %v49_v18 = vsel %vm36_vm0, %v775_v16, 0.0  ;;  %v789_v20 = vld [vmem:[%s1134_s0 + $0x60] sm:$0xff]  ;;  %v803_v24 = vld [vmem:[%s1134_s0 + $0x30] sm:$0xff] }
   0x5   :  { %v52_v19 = vsel %vm36_vm0, %v780_v17, 0.0  ;;  %v794_v21 = vld [vmem:[%s1134_s0 + $0x68] sm:$0xff]  ;;  %v73_v22 = vsel %vm36_vm0, %v789_v20, 0.0  ;;  %v808_v25 = vld [vmem:[%s1134_s0 + $0x38] sm:$0xff]  ;;  %v55_v26 = vsel %vm36_vm0, %v803_v24, 0.0  ;;  %v817_v28 = vld [vmem:[%s1134_s0 + $0x70] sm:$0xff] }
   0x6   :  { %v76_v23 = vsel %vm36_vm0, %v794_v21, 0.0  ;;  %v58_v27 = vsel %vm36_vm0, %v808_v25, 0.0  ;;  %v822_v29 = vld [vmem:[%s1134_s0 + $0x78] sm:$0xff]  ;;  %v79_v30 = vsel %vm36_vm0, %v817_v28, 0.0 }
   0x7   :  { %41 = vadd.xlane.f32.xlu0 %v40_v6  ;;  %v82_v31 = vsel %vm36_vm0, %v822_v29, 0.0 }
   0x8   :  { %65 = vadd.xlane.f32.xlu1 %v64_v7 }
   0xb   :  { %44 = vadd.xlane.f32.xlu0 %v43_v10 }
   0xc   :  { %47 = vadd.xlane.f32.xlu1 %v46_v11 }
   0xf   :  { %68 = vadd.xlane.f32.xlu0 %v67_v14 }
  0x10   :  { %71 = vadd.xlane.f32.xlu1 %v70_v15 }
  0x13   :  { %50 = vadd.xlane.f32.xlu0 %v49_v18 }
  0x14   :  { %53 = vadd.xlane.f32.xlu1 %v52_v19 }
  0x17   :  { %74 = vadd.xlane.f32.xlu0 %v73_v22 }
  0x18   :  { %77 = vadd.xlane.f32.xlu1 %v76_v23 }
  0x1b   :  { %56 = vadd.xlane.f32.xlu0 %v55_v26 }
  0x1c   :  { %59 = vadd.xlane.f32.xlu1 %v58_v27 }
  0x1f   :  { %80 = vadd.xlane.f32.xlu0 %v79_v30 }
  0x20   :  { %83 = vadd.xlane.f32.xlu1 %v82_v31 }
  0x8c   :  { %v39_v32 = vpop.xlane.xlu0 %38 }
  0x8d   :  { %v63_v33 = vpop.xlane.xlu1 %62  ;;  %v86_v34 = vmul.f32 0.03125, %v39_v32 }
  0x8e   :  { %v94_v35 = vmul.f32 0.03125, %v63_v33 }
  0x8f   :  { %v828_v36 = vsub.f32 %v20_v0, %v86_v34 }
  0x90   :  { %v830_v37 = vsub.f32 %v28_v1, %v94_v35  ;;  %v42_v38 = vpop.xlane.xlu0 %41 }
  0x91   :  { %v66_v39 = vpop.xlane.xlu1 %65  ;;  %v87_v40 = vmul.f32 0.03125, %v42_v38  ;;  %v118_v42 = vmul.f32 %v828_v36, %v828_v36 }
  0x92   :  { %v95_v41 = vmul.f32 0.03125, %v66_v39  ;;  %v126_v43 = vmul.f32 %v830_v37, %v830_v37 }
  0x93   :  { %v836_v44 = vsub.f32 %v21_v2, %v87_v40  ;;  %v134_v46 = vsel %vm36_vm0, %v118_v42, 0.0 }
  0x94   :  { %v838_v45 = vsub.f32 %v29_v5, %v95_v41  ;;  %135 = vadd.xlane.f32.xlu0 %v134_v46  ;;  %v45_v47 = vpop.xlane.xlu0 %44  ;;  %v158_v49 = vsel %vm36_vm0, %v126_v43, 0.0 }
  0x95   :  { %v48_v48 = vpop.xlane.xlu1 %47  ;;  %v88_v50 = vmul.f32 0.03125, %v45_v47  ;;  %v119_v52 = vmul.f32 %v836_v44, %v836_v44 }
  0x96   :  { %v89_v51 = vmul.f32 0.03125, %v48_v48  ;;  %v127_v53 = vmul.f32 %v838_v45, %v838_v45 }
  0x97   :  { %v846_v54 = vsub.f32 %v22_v8, %v88_v50  ;;  %v137_v56 = vsel %vm36_vm0, %v119_v52, 0.0 }
  0x98   :  { %v848_v55 = vsub.f32 %v23_v9, %v89_v51  ;;  %159 = vadd.xlane.f32.xlu0 %v158_v49  ;;  %138 = vadd.xlane.f32.xlu1 %v137_v56  ;;  %v69_v57 = vpop.xlane.xlu0 %68  ;;  %v161_v59 = vsel %vm36_vm0, %v127_v53, 0.0  ;;  %v670_v53 = vld [vmem:[%s1135_s3] sm:$0xff]  }
  0x99   :  { %v72_v58 = vpop.xlane.xlu1 %71  ;;  %v96_v60 = vmul.f32 0.03125, %v69_v57  ;;  %v120_v62 = vmul.f32 %v846_v54, %v846_v54 }
  0x9a   :  { %v97_v61 = vmul.f32 0.03125, %v72_v58  ;;  %v121_v63 = vmul.f32 %v848_v55, %v848_v55 }
  0x9b   :  { %v857_v0 = vsub.f32 %v761_v12, %v96_v60  ;;  %v140_v2 = vsel %vm36_vm0, %v120_v62, 0.0 }
  0x9c   :  { %v860_v1 = vsub.f32 %v766_v13, %v97_v61  ;;  %162 = vadd.xlane.f32.xlu1 %v161_v59  ;;  %141 = vadd.xlane.f32.xlu0 %v140_v2  ;;  %v51_v3 = vpop.xlane.xlu0 %50  ;;  %v143_v5 = vsel %vm36_vm0, %v121_v63, 0.0 }
  0x9d   :  { %v54_v4 = vpop.xlane.xlu1 %53  ;;  %v90_v6 = vmul.f32 0.03125, %v51_v3  ;;  %v128_v8 = vmul.f32 %v857_v0, %v857_v0 }
  0x9e   :  { %v91_v7 = vmul.f32 0.03125, %v54_v4  ;;  %v129_v9 = vmul.f32 %v860_v1, %v860_v1 }
  0x9f   :  { %v869_v10 = vsub.f32 %v775_v16, %v90_v6  ;;  %v164_v12 = vsel %vm36_vm0, %v128_v8, 0.0 }
  0xa0   :  { %v872_v11 = vsub.f32 %v780_v17, %v91_v7  ;;  %144 = vadd.xlane.f32.xlu1 %v143_v5  ;;  %165 = vadd.xlane.f32.xlu0 %v164_v12  ;;  %v75_v13 = vpop.xlane.xlu0 %74  ;;  %v167_v15 = vsel %vm36_vm0, %v129_v9, 0.0 }
  0xa1   :  { %v78_v14 = vpop.xlane.xlu1 %77  ;;  %v98_v18 = vmul.f32 0.03125, %v75_v13  ;;  %v122_v22 = vmul.f32 %v869_v10, %v869_v10 }
  0xa2   :  { %v99_v19 = vmul.f32 0.03125, %v78_v14  ;;  %v123_v16 = vmul.f32 %v872_v11, %v872_v11 }
  0xa3   :  { %v881_v23 = vsub.f32 %v789_v20, %v98_v18  ;;  %v146_v26 = vsel %vm36_vm0, %v122_v22, 0.0 }
  0xa4   :  { %v884_v17 = vsub.f32 %v794_v21, %v99_v19  ;;  %168 = vadd.xlane.f32.xlu1 %v167_v15  ;;  %147 = vadd.xlane.f32.xlu0 %v146_v26  ;;  %v57_v27 = vpop.xlane.xlu0 %56  ;;  %v149_v31 = vsel %vm36_vm0, %v123_v16, 0.0 }
  0xa5   :  { %v60_v30 = vpop.xlane.xlu1 %59  ;;  %v92_v32 = vmul.f32 0.03125, %v57_v27  ;;  %v130_v34 = vmul.f32 %v881_v23, %v881_v23 }
  0xa6   :  { %v93_v33 = vmul.f32 0.03125, %v60_v30  ;;  %v131_v20 = vmul.f32 %v884_v17, %v884_v17 }
  0xa7   :  { %v893_v35 = vsub.f32 %v803_v24, %v92_v32  ;;  %v170_v38 = vsel %vm36_vm0, %v130_v34, 0.0 }
  0xa8   :  { %v896_v21 = vsub.f32 %v808_v25, %v93_v33  ;;  %150 = vadd.xlane.f32.xlu1 %v149_v31  ;;  %171 = vadd.xlane.f32.xlu0 %v170_v38  ;;  %v81_v39 = vpop.xlane.xlu0 %80  ;;  %v173_v41 = vsel %vm36_vm0, %v131_v20, 0.0  ;;  %v928_v33 = vld [vmem:[%s1136_s1] ss:$0 sm:$0xff] }
  0xa9   :  { %v84_v40 = vpop.xlane.xlu1 %83  ;;  %v100_v42 = vmul.f32 0.03125, %v81_v39  ;;  %v124_v46 = vmul.f32 %v893_v35, %v893_v35 }
  0xaa   :  { %v101_v43 = vmul.f32 0.03125, %v84_v40  ;;  %v125_v24 = vmul.f32 %v896_v21, %v896_v21 }
  0xab   :  { %v905_v47 = vsub.f32 %v817_v28, %v100_v42  ;;  %v152_v48 = vsel %vm36_vm0, %v124_v46, 0.0 }
  0xac   :  { %v908_v25 = vsub.f32 %v822_v29, %v101_v43  ;;  %174 = vadd.xlane.f32.xlu1 %v173_v41  ;;  %153 = vadd.xlane.f32.xlu0 %v152_v48  ;;  %v155_v49 = vsel %vm36_vm0, %v125_v24, 0.0  ;;  %v669_v29 = vld [vmem:[%s1135_s3 + $0x8] sm:$0xff]  }
  0xad   :  { %v132_v50 = vmul.f32 %v905_v47, %v905_v47  ;;  %644 = vmatprep.subr.bf16.mxu0 %v669_v29  ;;  %664 = vmatprep.subr.bf16.mxu1 %v669_v29 }
  0xae   :  { %v133_v51 = vmul.f32 %v908_v25, %v908_v25  ;;  %645 = vmatpush3.bf16.msra.mxu0 %v669_v29  ;;  %666 = vmatpush3.bf16.msra.mxu1 %v669_v29 }
  0xaf   :  { %v176_v52 = vsel %vm36_vm0, %v132_v50, 0.0  ;;  %646 = vmatprep.subr.bf16.mxu0 %v670_v53  ;;  %665 = vmatprep.subr.bf16.mxu1 %v670_v53 }
  0xb0   :  { %156 = vadd.xlane.f32.xlu1 %v155_v49  ;;  %177 = vadd.xlane.f32.xlu0 %v176_v52  ;;  %v179_v28 = vsel %vm36_vm0, %v133_v51, 0.0 }
  0xb2   :  { %647 = vmatpush3.bf16.msra.mxu0 %v670_v53  ;;  %667 = vmatpush3.bf16.msra.mxu1 %v670_v53 }
  0xb4   :  { %180 = vadd.xlane.f32.xlu1 %v179_v28 }
 0x11d   :  { %v136_v56 = vpop.xlane.xlu0 %135 }
 0x11e   :  { %v182_v57 = vmul.f32 0.03125, %v136_v56 }
 0x120   :  { %v198_v58 = vadd.f32 1e-05, %v182_v57 }
 0x121   :  { %v139_v59 = vpop.xlane.xlu1 %138  ;;  %v160_v60 = vpop.xlane.xlu0 %159 }
 0x122   :  { %671 = vrsqrt.f32 %v198_v58  ;;  %v183_v61 = vmul.f32 0.03125, %v139_v59  ;;  %v190_v62 = vmul.f32 0.03125, %v160_v60 }
 0x124   :  { %v199_v63 = vadd.f32 1e-05, %v183_v61  ;;  %v206_v2 = vadd.f32 1e-05, %v190_v62 }
 0x125   :  { %v163_v3 = vpop.xlane.xlu1 %162  ;;  %v142_v4 = vpop.xlane.xlu0 %141 }
 0x126   :  { %673 = vrsqrt.f32 %v199_v63  ;;  %v191_v5 = vmul.f32 0.03125, %v163_v3  ;;  %v184_v6 = vmul.f32 0.03125, %v142_v4 }
 0x127   :  { %675 = vrsqrt.f32 %v206_v2 }
 0x128   :  { %v207_v7 = vadd.f32 1e-05, %v191_v5  ;;  %v200_v8 = vadd.f32 1e-05, %v184_v6 }
 0x129   :  { %v145_v9 = vpop.xlane.xlu1 %144  ;;  %v166_v12 = vpop.xlane.xlu0 %165 }
 0x12a   :  { %677 = vrsqrt.f32 %v207_v7  ;;  %v185_v13 = vmul.f32 0.03125, %v145_v9  ;;  %v192_v14 = vmul.f32 0.03125, %v166_v12 }
 0x12b   :  { %679 = vrsqrt.f32 %v200_v8 }
 0x12c   :  { %v201_v15 = vadd.f32 1e-05, %v185_v13  ;;  %v208_v18 = vadd.f32 1e-05, %v192_v14 }
 0x12d   :  { %v169_v19 = vpop.xlane.xlu1 %168  ;;  %v148_v22 = vpop.xlane.xlu0 %147 }
 0x12e   :  { %681 = vrsqrt.f32 %v201_v15  ;;  %v193_v16 = vmul.f32 0.03125, %v169_v19  ;;  %v186_v26 = vmul.f32 0.03125, %v148_v22 }
 0x12f   :  { %v672_v27 = vpop.eup %671  ;;  %683 = vrsqrt.f32 %v208_v18 }
 0x130   :  { %v209_v30 = vadd.f32 1e-05, %v193_v16  ;;  %v202_v31 = vadd.f32 1e-05, %v186_v26  ;;  %v230_v32 = vmul.f32 %v672_v27, %v828_v36  ;;  %v935_v36 = vld [vmem:[%s1137_s2] ss:$0 sm:$0xff] }
 0x131   :  { %v151_v34 = vpop.xlane.xlu1 %150  ;;  %v172_v20 = vpop.xlane.xlu0 %171 }
 0x132   :  { %685 = vrsqrt.f32 %v209_v30  ;;  %v187_v38 = vmul.f32 0.03125, %v151_v34  ;;  %v194_v39 = vmul.f32 0.03125, %v172_v20  ;;  %v253_v41 = vmul.f32 %v928_v33, %v230_v32 }
 0x133   :  { %v674_v40 = vpop.eup %673  ;;  %687 = vrsqrt.f32 %v202_v31 }
 0x134   :  { %v676_v42 = vpop.eup %675  ;;  %v203_v43 = vadd.f32 1e-05, %v187_v38  ;;  %v210_v46 = vadd.f32 1e-05, %v194_v39  ;;  %v231_v24 = vmul.f32 %v674_v40, %v836_v44  ;;  %v276_v53 = vadd.f32 %v935_v36, %v253_v41 }
 0x135   :  { %v175_v48 = vpop.xlane.xlu1 %174  ;;  %v154_v49 = vpop.xlane.xlu0 %153  ;;  %v238_v50 = vmul.f32 %v676_v42, %v830_v37 }
 0x136   :  { %689 = vrsqrt.f32 %v203_v43  ;;  %v195_v51 = vmul.f32 0.03125, %v175_v48  ;;  %v188_v52 = vmul.f32 0.03125, %v154_v49  ;;  %v254_v28 = vmul.f32 %v928_v33, %v231_v24 }
 0x137   :  { %v678_v29 = vpop.eup %677  ;;  %691 = vrsqrt.f32 %v210_v46  ;;  %v261_v37 = vmul.f32 %v928_v33, %v238_v50 }
 0x138   :  { %v680_v56 = vpop.eup %679  ;;  %v211_v44 = vadd.f32 1e-05, %v195_v51  ;;  %v204_v57 = vadd.f32 1e-05, %v188_v52  ;;  %v277_v58 = vadd.f32 %v935_v36, %v254_v28  ;;  %v239_v59 = vmul.f32 %v678_v29, %v838_v45 }
 0x139   :  { %v157_v60 = vpop.xlane.xlu1 %156  ;;  %v178_v61 = vpop.xlane.xlu0 %177  ;;  %v232_v62 = vmul.f32 %v680_v56, %v846_v54  ;;  %v284_v54 = vadd.f32 %v935_v36, %v261_v37 }
 0x13a   :  { %693 = vrsqrt.f32 %v211_v44  ;;  %v189_v63 = vmul.f32 0.03125, %v157_v60  ;;  %v196_v2 = vmul.f32 0.03125, %v178_v61  ;;  %v292_v3 = vpack.c.bf16 %v277_v58, %v276_v53 }
 0x13b   :  { %v682_v4 = vpop.eup %681  ;;  %695 = vrsqrt.f32 %v204_v57  ;;  %v262_v5 = vmul.f32 %v928_v33, %v239_v59  ;;  %v255_v6 = vmul.f32 %v928_v33, %v232_v62 }
 0x13c   :  { %v684_v7 = vpop.eup %683  ;;  %v205_v8 = vadd.f32 1e-05, %v189_v63  ;;  %v212_v9 = vadd.f32 1e-05, %v196_v2  ;;  %648 = vmatprep.mubr.msk.bf16.mxu0 %vm36_vm0, %v292_v3  ;;  %v233_v45 = vmul.f32 %v682_v4, %v848_v55 }
 0x13d   :  { %v181_v12 = vpop.xlane.xlu1 %180  ;;  %v285_v13 = vadd.f32 %v935_v36, %v262_v5  ;;  %v240_v14 = vmul.f32 %v684_v7, %v857_v0  ;;  %v278_v16 = vadd.f32 %v935_v36, %v255_v6 }
 0x13e   :  { %697 = vrsqrt.f32 %v205_v8  ;;  %v197_v15 = vmul.f32 0.03125, %v181_v12  ;;  %v256_v18 = vmul.f32 %v928_v33, %v233_v45 }
 0x13f   :  { %v686_v19 = vpop.eup %685  ;;  %699 = vrsqrt.f32 %v212_v9  ;;  %v296_v22 = vpack.c.bf16 %v285_v13, %v284_v54  ;;  %v263_v31 = vmul.f32 %v928_v33, %v240_v14 }
 0x140   :  { %v688_v26 = vpop.eup %687  ;;  %v213_v27 = vadd.f32 1e-05, %v197_v15  ;;  %v279_v55 = vadd.f32 %v935_v36, %v256_v18  ;;  %v241_v30 = vmul.f32 %v686_v19, %v860_v1 }
 0x141   :  { %656 = vmatprep.mubr.msk.bf16.mxu1 %vm36_vm0, %v296_v22  ;;  %v234_v0 = vmul.f32 %v688_v26, %v869_v10  ;;  %v286_v39 = vadd.f32 %v935_v36, %v263_v31 }
 0x142   :  { %701 = vrsqrt.f32 %v213_v27  ;;  %v293_v32 = vpack.c.bf16 %v279_v55, %v278_v16  ;;  %v264_v34 = vmul.f32 %v928_v33, %v241_v30 }
 0x143   :  { %v690_v20 = vpop.eup %689  ;;  %v257_v41 = vmul.f32 %v928_v33, %v234_v0 }
 0x144   :  { %v692_v38 = vpop.eup %691  ;;  %649 = vmatmul.mubr.msk.bf16.vlgmr.msra.gmra.mxu0 %vm36_vm0, %v293_v32  ;;  %v287_v40 = vadd.f32 %v935_v36, %v264_v34  ;;  %v235_v1 = vmul.f32 %v690_v20, %v872_v11 }
 0x145   :  { %v242_v42 = vmul.f32 %v692_v38, %v881_v23  ;;  %v280_v48 = vadd.f32 %v935_v36, %v257_v41 }
 0x146   :  { %v297_v43 = vpack.c.bf16 %v287_v40, %v286_v39  ;;  %v258_v10 = vmul.f32 %v928_v33, %v235_v1 }
 0x147   :  { %v694_v46 = vpop.eup %693  ;;  %v265_v51 = vmul.f32 %v928_v33, %v242_v42 }
 0x148   :  { %v696_v24 = vpop.eup %695  ;;  %657 = vmatmul.mubr.msk.bf16.vlgmr.msra.gmra.mxu1 %vm36_vm0, %v297_v43  ;;  %v281_v49 = vadd.f32 %v935_v36, %v258_v10  ;;  %v243_v50 = vmul.f32 %v694_v46, %v884_v17 }
 0x149   :  { %v236_v11 = vmul.f32 %v696_v24, %v893_v35  ;;  %v288_v53 = vadd.f32 %v935_v36, %v265_v51 }
 0x14a   :  { %v294_v52 = vpack.c.bf16 %v281_v49, %v280_v48  ;;  %v266_v23 = vmul.f32 %v928_v33, %v243_v50 }
 0x14b   :  { %v698_v28 = vpop.eup %697  ;;  %v259_v57 = vmul.f32 %v928_v33, %v236_v11 }
 0x14c   :  { %v700_v29 = vpop.eup %699  ;;  %652 = vmatprep.mubr.msk.bf16.mxu0 %vm36_vm0, %v294_v52  ;;  %v289_v56 = vadd.f32 %v935_v36, %v266_v23  ;;  %v237_v44 = vmul.f32 %v698_v28, %v896_v21 }
 0x14d   :  { %v244_v17 = vmul.f32 %v700_v29, %v905_v47  ;;  %v282_v60 = vadd.f32 %v935_v36, %v259_v57 }
 0x14e   :  { %v298_v58 = vpack.c.bf16 %v289_v56, %v288_v53  ;;  %v260_v35 = vmul.f32 %v928_v33, %v237_v44 }
 0x14f   :  { %v702_v59 = vpop.eup %701  ;;  %v267_v62 = vmul.f32 %v928_v33, %v244_v17 }
 0x150   :  { %660 = vmatprep.mubr.msk.bf16.mxu1 %vm36_vm0, %v298_v58  ;;  %v283_v61 = vadd.f32 %v935_v36, %v260_v35  ;;  %v245_v37 = vmul.f32 %v702_v59, %v908_v25 }
 0x151   :  { %v290_v47 = vadd.f32 %v935_v36, %v267_v62 }
 0x152   :  { %v295_v63 = vpack.c.bf16 %v283_v61, %v282_v60  ;;  %v268_v21 = vmul.f32 %v928_v33, %v245_v37 }
 0x154   :  { %653 = vmatmul.mubr.msk.bf16.gmra.mxu0 %vm36_vm0, %v295_v63  ;;  %v291_v2 = vadd.f32 %v935_v36, %v268_v21 }
 0x156   :  { %v299_v3 = vpack.c.bf16 %v291_v2, %v290_v47 }
 0x158   :  { %661 = vmatmul.mubr.msk.bf16.gmra.mxu1 %vm36_vm0, %v299_v3 }
 0x204   :  { %v650_v4 = vpop.f32.mrf.mxu0 }
 0x205   :  { %v620_v5 = vpack.c.bf16 %v650_v4, %v650_v4 }
 0x206   :  { %v374_v6 = vpop.f32.mrf.mxu0 }
 0x207   :  { %504 = vst.msk [vmem:[%s1138_s4 + $0x8] sm:$0xf] %vm501_vm1, %v620_v5  ;;  %v618_v25 = vpack.c.bf16 %v374_v6, %v374_v6  ;;  %522 = vrot.lane.b32.xlu1 %v620_v5, %s703_s6 }
 0x208   :  { %v651_v33 = vpop.f32.mrf.mxu0  ;;  %v658_v7 = vpop.f32.mrf.mxu1 }
 0x209   :  { %502 = vst.msk [vmem:[%s1138_s4] sm:$0xf] %vm501_vm1, %v618_v25  ;;  %v621_v36 = vpack.c.bf16 %v651_v33, %v651_v33  ;;  %v628_v8 = vpack.c.bf16 %v658_v7, %v658_v7 }
 0x20a   :  { %v377_v9 = vpop.f32.mrf.mxu0  ;;  %v406_v45 = vpop.f32.mrf.mxu1 }
 0x20b   :  { %505 = vst.msk [vmem:[%s1138_s4 + $0xc] sm:$0xf] %vm501_vm1, %v621_v36  ;;  %512 = vst.msk [vmem:[%s1138_s4 + $0x28] sm:$0xf] %vm501_vm1, %v628_v8  ;;  %v619_v12 = vpack.c.bf16 %v377_v9, %v377_v9  ;;  %v626_v54 = vpack.c.bf16 %v406_v45, %v406_v45  ;;  %524 = vrot.lane.b32.xlu1 %v621_v36, %s703_s6  ;;  %538 = vrot.lane.b32.xlu0 %v628_v8, %s703_s6 }
 0x20c   :  { %v659_v13 = vpop.f32.mrf.mxu1 }
 0x20d   :  { %503 = vst.msk [vmem:[%s1138_s4 + $0x4] sm:$0xf] %vm501_vm1, %v619_v12  ;;  %510 = vst.msk [vmem:[%s1138_s4 + $0x20] sm:$0xf] %vm501_vm1, %v626_v54  ;;  %v629_v14 = vpack.c.bf16 %v659_v13, %v659_v13 }
 0x20e   :  { %v409_v15 = vpop.f32.mrf.mxu1 }
 0x20f   :  { %513 = vst.msk [vmem:[%s1138_s4 + $0x2c] sm:$0xf] %vm501_vm1, %v629_v14  ;;  %v627_v18 = vpack.c.bf16 %v409_v15, %v409_v15  ;;  %518 = vrot.lane.b32.xlu0 %v618_v25, %s703_s6  ;;  %540 = vrot.lane.b32.xlu1 %v629_v14, %s703_s6 }
 0x211   :  { %511 = vst.msk [vmem:[%s1138_s4 + $0x24] sm:$0xf] %vm501_vm1, %v627_v18 }
 0x213   :  { %534 = vrot.lane.b32.xlu0 %v626_v54, %s703_s6  ;;  %520 = vrot.lane.b32.xlu1 %v619_v12, %s703_s6 }
 0x214   :  { %v654_v19 = vpop.f32.mrf.mxu0 }
 0x215   :  { %v624_v22 = vpack.c.bf16 %v654_v19, %v654_v19 }
 0x216   :  { %v390_v16 = vpop.f32.mrf.mxu0 }
 0x217   :  { %508 = vst.msk [vmem:[%s1138_s4 + $0x18] sm:$0xf] %vm501_vm1, %v624_v22  ;;  %v622_v26 = vpack.c.bf16 %v390_v16, %v390_v16  ;;  %536 = vrot.lane.b32.xlu1 %v627_v18, %s703_s6  ;;  %530 = vrot.lane.b32.xlu0 %v624_v22, %s703_s6 }
 0x218   :  { %v655_v27 = vpop.f32.mrf.mxu0  ;;  %v662_v55 = vpop.f32.mrf.mxu1 }
 0x219   :  { %506 = vst.msk [vmem:[%s1138_s4 + $0x10] sm:$0xf] %vm501_vm1, %v622_v26  ;;  %v625_v30 = vpack.c.bf16 %v655_v27, %v655_v27  ;;  %v632_v31 = vpack.c.bf16 %v662_v55, %v662_v55 }
 0x21a   :  { %v393_v0 = vpop.f32.mrf.mxu0  ;;  %v422_v32 = vpop.f32.mrf.mxu1 }
 0x21b   :  { %509 = vst.msk [vmem:[%s1138_s4 + $0x1c] sm:$0xf] %vm501_vm1, %v625_v30  ;;  %516 = vst.msk [vmem:[%s1138_s4 + $0x38] sm:$0xf] %vm501_vm1, %v632_v31  ;;  %v623_v34 = vpack.c.bf16 %v393_v0, %v393_v0  ;;  %v630_v20 = vpack.c.bf16 %v422_v32, %v422_v32  ;;  %526 = vrot.lane.b32.xlu0 %v622_v26, %s703_s6  ;;  %532 = vrot.lane.b32.xlu1 %v625_v30, %s703_s6 }
 0x21c   :  { %v663_v38 = vpop.f32.mrf.mxu1 }
 0x21d   :  { %507 = vst.msk [vmem:[%s1138_s4 + $0x14] sm:$0xf] %vm501_vm1, %v623_v34  ;;  %514 = vst.msk [vmem:[%s1138_s4 + $0x30] sm:$0xf] %vm501_vm1, %v630_v20  ;;  %v633_v39 = vpack.c.bf16 %v663_v38, %v663_v38 }
 0x21e   :  { %v425_v40 = vpop.f32.mrf.mxu1 }
 0x21f   :  { %517 = vst.msk [vmem:[%s1138_s4 + $0x3c] sm:$0xf] %vm501_vm1, %v633_v39  ;;  %v631_v1 = vpack.c.bf16 %v425_v40, %v425_v40  ;;  %528 = vrot.lane.b32.xlu1 %v623_v34, %s703_s6  ;;  %542 = vrot.lane.b32.xlu0 %v630_v20, %s703_s6 }
 0x221   :  { %515 = vst.msk [vmem:[%s1138_s4 + $0x34] sm:$0xf] %vm501_vm1, %v631_v1 }
 0x223   :  { %546 = vrot.lane.b32.xlu0 %v632_v31, %s703_s6  ;;  %544 = vrot.lane.b32.xlu1 %v631_v1, %s703_s6 }
 0x227   :  { %548 = vrot.lane.b32.xlu1 %v633_v39, %s703_s6 }
 0x279   :  { %v523_v41 = vpop.permute.xlu1 %522 }
 0x27a   :  { %568 = vst.msk [vmem:[%s1139_s5 + $0x8] sm:$0xf] %vm501_vm1, %v523_v41 }
 0x27d   :  { %v525_v42 = vpop.permute.xlu1 %524  ;;  %v539_v43 = vpop.permute.xlu0 %538 }
 0x27e   :  { %569 = vst.msk [vmem:[%s1139_s5 + $0xc] sm:$0xf] %vm501_vm1, %v525_v42  ;;  %576 = vst.msk [vmem:[%s1139_s5 + $0x28] sm:$0xf] %vm501_vm1, %v539_v43 }
 0x281   :  { %v541_v10 = vpop.permute.xlu1 %540  ;;  %v519_v46 = vpop.permute.xlu0 %518 }
 0x282   :  { %577 = vst.msk [vmem:[%s1139_s5 + $0x2c] sm:$0xf] %vm501_vm1, %v541_v10  ;;  %566 = vst.msk [vmem:[%s1139_s5] sm:$0xf] %vm501_vm1, %v519_v46 }
 0x285   :  { %v521_v24 = vpop.permute.xlu1 %520  ;;  %v535_v48 = vpop.permute.xlu0 %534 }
 0x286   :  { %567 = vst.msk [vmem:[%s1139_s5 + $0x4] sm:$0xf] %vm501_vm1, %v521_v24  ;;  %574 = vst.msk [vmem:[%s1139_s5 + $0x20] sm:$0xf] %vm501_vm1, %v535_v48 }
 0x289   :  { %v537_v49 = vpop.permute.xlu1 %536  ;;  %v531_v50 = vpop.permute.xlu0 %530 }
 0x28a   :  { %575 = vst.msk [vmem:[%s1139_s5 + $0x24] sm:$0xf] %vm501_vm1, %v537_v49  ;;  %572 = vst.msk [vmem:[%s1139_s5 + $0x18] sm:$0xf] %vm501_vm1, %v531_v50 }
 0x28d   :  { %v533_v51 = vpop.permute.xlu1 %532  ;;  %v527_v11 = vpop.permute.xlu0 %526 }
 0x28e   :  { %573 = vst.msk [vmem:[%s1139_s5 + $0x1c] sm:$0xf] %vm501_vm1, %v533_v51  ;;  %570 = vst.msk [vmem:[%s1139_s5 + $0x10] sm:$0xf] %vm501_vm1, %v527_v11 }
 0x291   :  { %v529_v52 = vpop.permute.xlu1 %528  ;;  %v543_v23 = vpop.permute.xlu0 %542 }
 0x292   :  { %571 = vst.msk [vmem:[%s1139_s5 + $0x14] sm:$0xf] %vm501_vm1, %v529_v52  ;;  %578 = vst.msk [vmem:[%s1139_s5 + $0x30] sm:$0xf] %vm501_vm1, %v543_v23 }
 0x295   :  { %v545_v28 = vpop.permute.xlu1 %544  ;;  %v547_v29 = vpop.permute.xlu0 %546 }
 0x296   :  { %579 = vst.msk [vmem:[%s1139_s5 + $0x34] sm:$0xf] %vm501_vm1, %v545_v28  ;;  %580 = vst.msk [vmem:[%s1139_s5 + $0x38] sm:$0xf] %vm501_vm1, %v547_v29 }
 0x299   :  { %v549_v53 = vpop.permute.xlu1 %548 }
 0x29a   :  { %581 = vst.msk [vmem:[%s1139_s5 + $0x3c] sm:$0xf] %vm501_vm1, %v549_v53 }

// kernel: cascaded_vmamba_block.10
= control target key start
LH: loop header
LB: loop body
LE: loop exit
PB: predicated region body
PF: predicated region fallthrough
CT: control target
= control target key end

     0   :  { %s1141_s12 = smov 0   ;;  %s1555_s0 = inlined_call_operand.vmem [shape: bf16[2,10,10,64], index: 0, kind: input, shape index: {}]   ;;  %s1556_s1 = inlined_call_operand.vmem [shape: f32[3,3,64], index: 1, kind: input, shape index: {}]   ;;  %s1557_s2 = inlined_call_operand.vmem [shape: f32[1,64], index: 2, kind: input, shape index: {}]   ;;  %s1558_s3 = inlined_call_operand.vmem [shape: bf16[2,8,8,64], index: 3, kind: output, shape index: {}]  }
   0x1 LB: > { %s989_s13 = sadd.s32 4294967295, %s1119_s12   ;;  %p993_p0 = scmp.ge.s32.totalorder %s1119_s12, 1  ;;  %s1119_s12 = sphi %s1141_s12, %s13_s12  }
   0x2   : > { %p137_p1 = scmp.lt.s32.totalorder %s1119_s12, 3 }
   0x4   : > { %p138_p2 = pnand %p993_p0, %p137_p1 }
   0x5   : > { %p161_p3 = scmp.lt.s32.totalorder (!%p138_p2), %s989_s13, 1 }
   0x6   : > { %141 = sbr.rel (%p138_p2) target bundleno = 161 (0xa1), region = 32 }
   0xb   : > { %s1560_s13 = smov (!%p161_p3, %s989_s13), 1  ;;  %v997_v0 = vld [vmem:[%s1556_s1] ss:$0 sm:$0xff]  ;;  %vm261_vm0 = vcmask 1046528   ;;  %v998_v29 = vld [vmem:[%s1556_s1 + $0x1] ss:$0 sm:$0xff] }
   0xc   : > { %s1072_s14 = smul.u32 80, %s1560_s13  ;;  %vm355_vm1 = vcmask 1045504   ;;  %s1071_s11 = sshll.u32 %s1560_s13, 5  ;;  %vm925_vm2 = vcmask 519168  }
   0xd   : > { %s170_s16 = scalar_lea.vmem %s1558_s3, %s1071_s11 }
   0xe   : > { %s1155_s17 = scalar_lea.vmem %s1555_s0, %s1072_s14 }
   0xf   : > { %v171_v1 = vld [vmem:[%s1155_s17] ss:$8 sps:$4 sm:$0xff]   ;;  %v173_v2 = vld [vmem:[%s1155_s17 + $0x10] ss:$8 sps:$4 sm:$0xff]   ;;  %v1165_v9 = vld [vmem:[%s1155_s17 + $0x4] sm:$0x1] }
  0x10   : > { %v175_v3 = vld [vmem:[%s1155_s17 + $0x20] ss:$8 sps:$4 sm:$0xff]   ;;  %v177_v4 = vld [vmem:[%s1155_s17 + $0x30] ss:$8 sps:$4 sm:$0xff]   ;;  %v179_v5 = vunpack.c.l.bf16 %v171_v1  ;;  %v180_v6 = vunpack.c.h.bf16 %v171_v1  ;;  %v181_v7 = vunpack.c.l.bf16 %v173_v2  ;;  %v182_v8 = vunpack.c.h.bf16 %v173_v2  ;;  %v1168_v10 = vld [vmem:[%s1155_s17 + $0xc] sm:$0x1] }
  0x11   : > { %v183_v11 = vunpack.c.l.bf16 %v175_v3  ;;  %v184_v12 = vunpack.c.h.bf16 %v175_v3  ;;  %v185_v13 = vunpack.c.l.bf16 %v177_v4  ;;  %v186_v14 = vunpack.c.h.bf16 %v177_v4  ;;  %v1171_v15 = vld [vmem:[%s1155_s17 + $0x14] sm:$0x1]  ;;  %v1174_v16 = vld [vmem:[%s1155_s17 + $0x1c] sm:$0x1]  ;;  %v1177_v17 = vld [vmem:[%s1155_s17 + $0x24] sm:$0x1] }
  0x12   : > { %v192_v18 = vmul.f32 %v997_v0, %v179_v5  ;;  %v193_v19 = vmul.f32 %v997_v0, %v180_v6  ;;  %v1179_v20 = vmul.f32 %v997_v0, %v181_v7  ;;  %v1181_v21 = vmul.f32 %v997_v0, %v182_v8  ;;  %v1184_v22 = vld [vmem:[%s1155_s17 + $0x2c] sm:$0x1]  ;;  %v1187_v23 = vld [vmem:[%s1155_s17 + $0x34] sm:$0x1]  ;;  %v1190_v24 = vld [vmem:[%s1155_s17 + $0x3c] sm:$0x1] }
  0x13   : > { %v196_v25 = vmul.f32 %v997_v0, %v183_v11  ;;  %v1192_v26 = vmul.f32 %v997_v0, %v184_v12  ;;  %v1194_v27 = vmul.f32 %v997_v0, %v185_v13  ;;  %v1196_v28 = vmul.f32 %v997_v0, %v186_v14 }
  0x14   : > { %v216_v30 = vunpack.c.l.bf16 %v1165_v9  ;;  %v217_v31 = vunpack.c.l.bf16 %v1168_v10  ;;  %v218_v32 = vunpack.c.l.bf16 %v1171_v15  ;;  %v219_v33 = vunpack.c.l.bf16 %v1174_v16 }
  0x15   : > { %v220_v34 = vunpack.c.l.bf16 %v1177_v17  ;;  %v221_v35 = vunpack.c.l.bf16 %v1184_v22  ;;  %v222_v36 = vunpack.c.l.bf16 %v1187_v23  ;;  %v223_v37 = vunpack.c.l.bf16 %v1190_v24 }
  0x16   : > { %v229_v38 = vmul.f32 %v998_v29, %v179_v5  ;;  %v230_v39 = vmul.f32 %v998_v29, %v216_v30  ;;  %v231_v40 = vmul.f32 %v998_v29, %v180_v6  ;;  %v232_v41 = vmul.f32 %v998_v29, %v217_v31  ;;  %v302_v6 = vld [vmem:[%s1155_s17] sm:$0xe] }
  0x17   : > { %v233_v42 = vmul.f32 %v998_v29, %v181_v7  ;;  %v234_v43 = vmul.f32 %v998_v29, %v218_v32  ;;  %v235_v44 = vmul.f32 %v998_v29, %v182_v8  ;;  %v236_v45 = vmul.f32 %v998_v29, %v219_v33  ;;  %v303_v7 = vld [vmem:[%s1155_s17 + $0x8] sm:$0xe] }
  0x18   : > { %v237_v46 = vmul.f32 %v998_v29, %v183_v11  ;;  %v238_v47 = vmul.f32 %v998_v29, %v220_v34  ;;  %v239_v48 = vmul.f32 %v998_v29, %v184_v12  ;;  %v240_v49 = vmul.f32 %v998_v29, %v221_v35 }
  0x19   : > { %v241_v50 = vmul.f32 %v998_v29, %v185_v13  ;;  %v242_v51 = vmul.f32 %v998_v29, %v222_v36  ;;  %v243_v52 = vmul.f32 %v998_v29, %v186_v14  ;;  %v244_v53 = vmul.f32 %v998_v29, %v223_v37  ;;  %v304_v14 = vld [vmem:[%s1155_s17 + $0x10] sm:$0xe] }
  0x1a   : > { %v262_v54 = vrot.slane %v229_v38, 1  ;;  %v263_v55 = vrot.slane %v230_v39, 1  ;;  %v265_v56 = vrot.slane %v231_v40, 1  ;;  %v266_v57 = vrot.slane %v232_v41, 1  ;;  %v305_v41 = vld [vmem:[%s1155_s17 + $0x18] sm:$0xe] }
  0x1b   : > { %v268_v58 = vrot.slane %v233_v42, 1  ;;  %v269_v59 = vrot.slane %v234_v43, 1  ;;  %v271_v60 = vrot.slane %v235_v44, 1  ;;  %v272_v61 = vrot.slane %v236_v45, 1  ;;  %v306_v42 = vld [vmem:[%s1155_s17 + $0x20] sm:$0xe] }
  0x1c   : > { %v264_v62 = vsel %vm261_vm0, %v262_v54, %v263_v55  ;;  %v267_v63 = vsel %vm261_vm0, %v265_v56, %v266_v57  ;;  %v274_v0 = vrot.slane %v237_v46, 1  ;;  %v275_v1 = vrot.slane %v238_v47, 1  ;;  %v307_v47 = vld [vmem:[%s1155_s17 + $0x28] sm:$0xe] }
  0x1d   : > { %v270_v2 = vsel %vm261_vm0, %v268_v58, %v269_v59  ;;  %v273_v3 = vsel %vm261_vm0, %v271_v60, %v272_v61  ;;  %v277_v4 = vrot.slane %v239_v48, 1  ;;  %v278_v5 = vrot.slane %v240_v49, 1  ;;  %v308_v48 = vld [vmem:[%s1155_s17 + $0x30] sm:$0xe]  ;;  %v309_v49 = vld [vmem:[%s1155_s17 + $0x38] sm:$0xe] }
  0x1e   : > { %v276_v8 = vsel %vm261_vm0, %v274_v0, %v275_v1  ;;  %v280_v11 = vrot.slane %v241_v50, 1  ;;  %v281_v12 = vrot.slane %v242_v51, 1  ;;  %v283_v13 = vrot.slane %v243_v52, 1  ;;  %v999_v52 = vld [vmem:[%s1556_s1 + $0x2] ss:$0 sm:$0xff] }
  0x1f   : > { %v279_v29 = vsel %vm261_vm0, %v277_v4, %v278_v5  ;;  %v284_v38 = vrot.slane %v244_v53, 1  ;;  %v1234_v39 = vadd.f32 %v264_v62, %v192_v18  ;;  %v1236_v40 = vadd.f32 %v267_v63, %v193_v19 }
  0x20   : > { %v282_v43 = vsel %vm261_vm0, %v280_v11, %v281_v12  ;;  %v1242_v44 = vadd.f32 %v270_v2, %v1179_v20  ;;  %v297_v45 = vadd.f32 %v273_v3, %v1181_v21  ;;  %v298_v46 = vadd.f32 %v276_v8, %v196_v25 }
  0x21   : > { %v285_v50 = vsel %vm261_vm0, %v283_v13, %v284_v38  ;;  %v299_v18 = vadd.f32 %v279_v29, %v1192_v26  ;;  %v300_v19 = vadd.f32 %v282_v43, %v1194_v27  ;;  %v310_v51 = vunpack.c.l.bf16 %v302_v6  ;;  %v1000_v13 = vld [vmem:[%s1155_s17 + $0x8] ss:$8 sps:$4 sm:$0xff]  }
  0x22   : > { %v301_v20 = vadd.f32 %v285_v50, %v1196_v28  ;;  %v311_v53 = vunpack.c.l.bf16 %v303_v7  ;;  %v312_v54 = vunpack.c.l.bf16 %v304_v14  ;;  %v313_v21 = vunpack.c.l.bf16 %v305_v41  ;;  %v1004_v50 = vld [vmem:[%s1155_s17 + $0x28] ss:$8 sps:$4 sm:$0xff]  }
  0x23   : > { %v314_v25 = vunpack.c.l.bf16 %v306_v42  ;;  %v315_v55 = vunpack.c.l.bf16 %v307_v47  ;;  %v316_v56 = vunpack.c.l.bf16 %v308_v48  ;;  %v317_v57 = vunpack.c.l.bf16 %v309_v49  ;;  %v1002_v42 = vld [vmem:[%s1155_s17 + $0x18] ss:$8 sps:$4 sm:$0xff]  }
  0x24   : > { %v323_v58 = vmul.f32 %v999_v52, %v310_v51  ;;  %v324_v26 = vmul.f32 %v999_v52, %v216_v30  ;;  %v325_v59 = vmul.f32 %v999_v52, %v311_v53  ;;  %v326_v27 = vmul.f32 %v999_v52, %v217_v31  ;;  %v1006_v51 = vld [vmem:[%s1155_s17 + $0x38] ss:$8 sps:$4 sm:$0xff]  }
  0x25   : > { %v327_v60 = vmul.f32 %v999_v52, %v312_v54  ;;  %v328_v61 = vmul.f32 %v999_v52, %v218_v32  ;;  %v329_v28 = vmul.f32 %v999_v52, %v313_v21  ;;  %v330_v62 = vmul.f32 %v999_v52, %v219_v33 }
  0x26   : > { %v331_v63 = vmul.f32 %v999_v52, %v314_v25  ;;  %v332_v0 = vmul.f32 %v999_v52, %v220_v34  ;;  %v333_v1 = vmul.f32 %v999_v52, %v315_v55  ;;  %v334_v9 = vmul.f32 %v999_v52, %v221_v35 }
  0x27   : > { %v335_v30 = vmul.f32 %v999_v52, %v316_v56  ;;  %v336_v10 = vmul.f32 %v999_v52, %v222_v36  ;;  %v337_v31 = vmul.f32 %v999_v52, %v317_v57  ;;  %v338_v15 = vmul.f32 %v999_v52, %v223_v37 }
  0x28   : > { %v356_v32 = vrot.slane %v323_v58, 2  ;;  %v357_v2 = vrot.slane %v324_v26, 2  ;;  %v359_v16 = vrot.slane %v325_v59, 2  ;;  %v360_v33 = vrot.slane %v326_v27, 2  ;;  %v1290_v59 = vld [vmem:[%s1155_s17 + $0xc] sm:$0x1] }
  0x29   : > { %v362_v3 = vrot.slane %v327_v60, 2  ;;  %v363_v17 = vrot.slane %v328_v61, 2  ;;  %v365_v34 = vrot.slane %v329_v28, 2  ;;  %v366_v4 = vrot.slane %v330_v62, 2  ;;  %v1296_v62 = vld [vmem:[%s1155_s17 + $0x1c] sm:$0x1] }
  0x2a   : > { %v358_v22 = vsel %vm355_vm1, %v356_v32, %v357_v2  ;;  %v361_v35 = vsel %vm355_vm1, %v359_v16, %v360_v33  ;;  %v368_v23 = vrot.slane %v331_v63, 2  ;;  %v369_v36 = vrot.slane %v332_v0, 2  ;;  %v1299_v63 = vld [vmem:[%s1155_s17 + $0x24] sm:$0x1]  ;;  %v1302_v0 = vld [vmem:[%s1155_s17 + $0x2c] sm:$0x1] }
  0x2b   : > { %v364_v5 = vsel %vm355_vm1, %v362_v3, %v363_v17  ;;  %v367_v24 = vsel %vm355_vm1, %v365_v34, %v366_v4  ;;  %v371_v37 = vrot.slane %v333_v1, 2  ;;  %v372_v6 = vrot.slane %v334_v9, 2  ;;  %v1315_v32 = vld [vmem:[%s1155_s17 + $0x44] sm:$0x1]  ;;  %v1019_v17 = vld [vmem:[%s1556_s1 + $0x5] ss:$0 sm:$0xff] }
  0x2c   : > { %v370_v7 = vsel %vm355_vm1, %v368_v23, %v369_v36  ;;  %v374_v8 = vrot.slane %v335_v30, 2  ;;  %v375_v11 = vrot.slane %v336_v10, 2  ;;  %v377_v12 = vrot.slane %v337_v31, 2  ;;  %v1309_v31 = vld [vmem:[%s1155_s17 + $0x34] sm:$0x1] }
  0x2d   : > { %v373_v14 = vsel %vm355_vm1, %v371_v37, %v372_v6  ;;  %v378_v29 = vrot.slane %v338_v15, 2  ;;  %v388_v38 = vadd.f32 %v358_v22, %v1234_v39  ;;  %v389_v41 = vadd.f32 %v361_v35, %v1236_v40  ;;  %v1009_v39 = vld [vmem:[%s1556_s1 + $0x4] ss:$0 sm:$0xff]  ;;  %v1312_v15 = vld [vmem:[%s1155_s17 + $0x3c] sm:$0x1] }
  0x2e   : > { %v376_v43 = vsel %vm355_vm1, %v374_v8, %v375_v11  ;;  %v390_v47 = vadd.f32 %v364_v5, %v1242_v44  ;;  %v391_v48 = vadd.f32 %v367_v24, %v297_v45  ;;  %v392_v49 = vadd.f32 %v370_v7, %v298_v46 }
  0x2f   : > { %v379_v52 = vsel %vm355_vm1, %v377_v12, %v378_v29  ;;  %v393_v53 = vadd.f32 %v373_v14, %v299_v18  ;;  %v394_v54 = vadd.f32 %v376_v43, %v300_v19  ;;  %v405_v21 = vunpack.c.l.bf16 %v1000_v13 }
  0x30   : > { %v395_v40 = vadd.f32 %v379_v52, %v301_v20  ;;  %v406_v25 = vunpack.c.h.bf16 %v1000_v13  ;;  %v407_v55 = vunpack.c.l.bf16 %v1002_v42  ;;  %v408_v44 = vunpack.c.h.bf16 %v1002_v42  ;;  %v1293_v20 = vld [vmem:[%s1155_s17 + $0x14] sm:$0x1] }
  0x31   : > { %v409_v45 = vunpack.c.l.bf16 %v1004_v50  ;;  %v410_v46 = vunpack.c.h.bf16 %v1004_v50  ;;  %v411_v56 = vunpack.c.l.bf16 %v1006_v51  ;;  %v412_v57 = vunpack.c.h.bf16 %v1006_v51 }
  0x32   : > { %v419_v18 = vmul.f32 %v1009_v39, %v405_v21  ;;  %v420_v58 = vmul.f32 %v1009_v39, %v406_v25  ;;  %v421_v19 = vmul.f32 %v1009_v39, %v407_v55  ;;  %v422_v26 = vmul.f32 %v1009_v39, %v408_v44 }
  0x33   : > { %v423_v27 = vmul.f32 %v1009_v39, %v409_v45  ;;  %v424_v60 = vmul.f32 %v1009_v39, %v410_v46  ;;  %v425_v61 = vmul.f32 %v1009_v39, %v411_v56  ;;  %v426_v28 = vmul.f32 %v1009_v39, %v412_v57 }
  0x34   : > { %v427_v1 = vadd.f32 %v419_v18, %v388_v38  ;;  %v428_v9 = vadd.f32 %v420_v58, %v389_v41  ;;  %v1304_v30 = vadd.f32 %v421_v19, %v390_v47  ;;  %v1306_v10 = vadd.f32 %v422_v26, %v391_v48  ;;  %v1020_v58 = vld [vmem:[%s1155_s17 + $0x8] sm:$0xe]  ;;  %v1021_v19 = vld [vmem:[%s1155_s17 + $0x10] sm:$0xe] }
  0x35   : > { %v431_v2 = vadd.f32 %v423_v27, %v392_v49  ;;  %v1317_v16 = vadd.f32 %v424_v60, %v393_v53  ;;  %v1319_v33 = vadd.f32 %v425_v61, %v394_v54  ;;  %v1321_v3 = vadd.f32 %v426_v28, %v395_v40  ;;  %v1022_v28 = vld [vmem:[%s1155_s17 + $0x18] sm:$0xe] }
  0x36   : > { %v443_v34 = vunpack.c.l.bf16 %v1290_v59  ;;  %v444_v4 = vunpack.c.l.bf16 %v1293_v20  ;;  %v445_v22 = vunpack.c.l.bf16 %v1296_v62  ;;  %v446_v35 = vunpack.c.l.bf16 %v1299_v63 }
  0x37   : > { %v447_v23 = vunpack.c.l.bf16 %v1302_v0  ;;  %v448_v36 = vunpack.c.l.bf16 %v1309_v31  ;;  %v449_v5 = vunpack.c.l.bf16 %v1312_v15  ;;  %v450_v24 = vunpack.c.l.bf16 %v1315_v32 }
  0x38   : > { %v456_v37 = vmul.f32 %v1019_v17, %v405_v21  ;;  %v457_v6 = vmul.f32 %v1019_v17, %v443_v34  ;;  %v458_v7 = vmul.f32 %v1019_v17, %v406_v25  ;;  %v459_v8 = vmul.f32 %v1019_v17, %v444_v4 }
  0x39   : > { %v460_v11 = vmul.f32 %v1019_v17, %v407_v55  ;;  %v461_v12 = vmul.f32 %v1019_v17, %v445_v22  ;;  %v462_v13 = vmul.f32 %v1019_v17, %v408_v44  ;;  %v463_v14 = vmul.f32 %v1019_v17, %v446_v35 }
  0x3a   : > { %v464_v29 = vmul.f32 %v1019_v17, %v409_v45  ;;  %v465_v38 = vmul.f32 %v1019_v17, %v447_v23  ;;  %v466_v41 = vmul.f32 %v1019_v17, %v410_v46  ;;  %v467_v42 = vmul.f32 %v1019_v17, %v448_v36 }
  0x3b   : > { %v468_v43 = vmul.f32 %v1019_v17, %v411_v56  ;;  %v469_v47 = vmul.f32 %v1019_v17, %v449_v5  ;;  %v470_v48 = vmul.f32 %v1019_v17, %v412_v57  ;;  %v471_v49 = vmul.f32 %v1019_v17, %v450_v24 }
  0x3c   : > { %v488_v50 = vrot.slane %v456_v37, 1  ;;  %v489_v51 = vrot.slane %v457_v6, 1  ;;  %v491_v52 = vrot.slane %v458_v7, 1  ;;  %v492_v53 = vrot.slane %v459_v8, 1  ;;  %v1023_v8 = vld [vmem:[%s1155_s17 + $0x20] sm:$0xe] }
  0x3d   : > { %v494_v54 = vrot.slane %v460_v11, 1  ;;  %v495_v21 = vrot.slane %v461_v12, 1  ;;  %v497_v39 = vrot.slane %v462_v13, 1  ;;  %v498_v40 = vrot.slane %v463_v14, 1  ;;  %v1024_v11 = vld [vmem:[%s1155_s17 + $0x28] sm:$0xe] }
  0x3e   : > { %v490_v25 = vsel %vm261_vm0, %v488_v50, %v489_v51  ;;  %v493_v55 = vsel %vm261_vm0, %v491_v52, %v492_v53  ;;  %v500_v44 = vrot.slane %v464_v29, 1  ;;  %v501_v45 = vrot.slane %v465_v38, 1  ;;  %v1025_v38 = vld [vmem:[%s1155_s17 + $0x30] sm:$0xe] }
  0x3f   : > { %v496_v46 = vsel %vm261_vm0, %v494_v54, %v495_v21  ;;  %v499_v56 = vsel %vm261_vm0, %v497_v39, %v498_v40  ;;  %v503_v57 = vrot.slane %v466_v41, 1  ;;  %v504_v18 = vrot.slane %v467_v42, 1  ;;  %v1026_v41 = vld [vmem:[%s1155_s17 + $0x38] sm:$0xe]  ;;  %v1027_v42 = vld [vmem:[%s1155_s17 + $0x40] sm:$0xe] }
  0x40   : > { %v502_v26 = vsel %vm261_vm0, %v500_v44, %v501_v45  ;;  %v506_v27 = vrot.slane %v468_v43, 1  ;;  %v507_v60 = vrot.slane %v469_v47, 1  ;;  %v509_v61 = vrot.slane %v470_v48, 1  ;;  %v1029_v48 = vld [vmem:[%s1556_s1 + $0x6] ss:$0 sm:$0xff] }
  0x41   : > { %v505_v17 = vsel %vm261_vm0, %v503_v57, %v504_v18  ;;  %v510_v37 = vrot.slane %v471_v49, 1  ;;  %v1359_v6 = vadd.f32 %v490_v25, %v427_v1  ;;  %v1361_v7 = vadd.f32 %v493_v55, %v428_v9 }
  0x42   : > { %v508_v12 = vsel %vm261_vm0, %v506_v27, %v507_v60  ;;  %v1367_v13 = vadd.f32 %v496_v46, %v1304_v30  ;;  %v523_v14 = vadd.f32 %v499_v56, %v1306_v10  ;;  %v524_v29 = vadd.f32 %v502_v26, %v431_v2 }
  0x43   : > { %v511_v43 = vsel %vm261_vm0, %v509_v61, %v510_v37  ;;  %v525_v1 = vadd.f32 %v505_v17, %v1317_v16  ;;  %v526_v9 = vadd.f32 %v508_v12, %v1319_v33  ;;  %v536_v47 = vunpack.c.l.bf16 %v1020_v58  ;;  %v1030_v61 = vld [vmem:[%s1155_s17 + $0x10] ss:$8 sps:$4 sm:$0xff]  }
  0x44   : > { %v527_v30 = vadd.f32 %v511_v43, %v1321_v3  ;;  %v537_v49 = vunpack.c.l.bf16 %v1021_v19  ;;  %v538_v50 = vunpack.c.l.bf16 %v1022_v28  ;;  %v539_v10 = vunpack.c.l.bf16 %v1023_v8  ;;  %v1034_v43 = vld [vmem:[%s1155_s17 + $0x30] ss:$8 sps:$4 sm:$0xff]  }
  0x45   : > { %v540_v2 = vunpack.c.l.bf16 %v1024_v11  ;;  %v541_v51 = vunpack.c.l.bf16 %v1025_v38  ;;  %v542_v52 = vunpack.c.l.bf16 %v1026_v41  ;;  %v543_v53 = vunpack.c.l.bf16 %v1027_v42  ;;  %v1032_v11 = vld [vmem:[%s1155_s17 + $0x20] ss:$8 sps:$4 sm:$0xff]  }
  0x46   : > { %v549_v54 = vmul.f32 %v1029_v48, %v536_v47  ;;  %v550_v16 = vmul.f32 %v1029_v48, %v443_v34  ;;  %v551_v21 = vmul.f32 %v1029_v48, %v537_v49  ;;  %v552_v33 = vmul.f32 %v1029_v48, %v444_v4  ;;  %v1036_v47 = vld [vmem:[%s1155_s17 + $0x40] ss:$8 sps:$4 sm:$0xff]  }
  0x47   : > { %v553_v39 = vmul.f32 %v1029_v48, %v538_v50  ;;  %v554_v40 = vmul.f32 %v1029_v48, %v445_v22  ;;  %v555_v3 = vmul.f32 %v1029_v48, %v539_v10  ;;  %v556_v25 = vmul.f32 %v1029_v48, %v446_v35 }
  0x48   : > { %v557_v55 = vmul.f32 %v1029_v48, %v540_v2  ;;  %v558_v44 = vmul.f32 %v1029_v48, %v447_v23  ;;  %v559_v45 = vmul.f32 %v1029_v48, %v541_v51  ;;  %v560_v59 = vmul.f32 %v1029_v48, %v448_v36 }
  0x49   : > { %v561_v34 = vmul.f32 %v1029_v48, %v542_v52  ;;  %v562_v20 = vmul.f32 %v1029_v48, %v449_v5  ;;  %v563_v4 = vmul.f32 %v1029_v48, %v543_v53  ;;  %v564_v62 = vmul.f32 %v1029_v48, %v450_v24 }
  0x4a   : > { %v581_v22 = vrot.slane %v549_v54, 2  ;;  %v582_v46 = vrot.slane %v550_v16, 2  ;;  %v584_v63 = vrot.slane %v551_v21, 2  ;;  %v585_v35 = vrot.slane %v552_v33, 2  ;;  %v1415_v21 = vld [vmem:[%s1155_s17 + $0x14] sm:$0x1] }
  0x4b   : > { %v587_v56 = vrot.slane %v553_v39, 2  ;;  %v588_v0 = vrot.slane %v554_v40, 2  ;;  %v590_v23 = vrot.slane %v555_v3, 2  ;;  %v591_v57 = vrot.slane %v556_v25, 2  ;;  %v1421_v25 = vld [vmem:[%s1155_s17 + $0x24] sm:$0x1] }
  0x4c   : > { %v583_v31 = vsel %vm355_vm1, %v581_v22, %v582_v46  ;;  %v586_v36 = vsel %vm355_vm1, %v584_v63, %v585_v35  ;;  %v593_v15 = vrot.slane %v557_v55, 2  ;;  %v594_v5 = vrot.slane %v558_v44, 2  ;;  %v1424_v55 = vld [vmem:[%s1155_s17 + $0x2c] sm:$0x1]  ;;  %v1427_v44 = vld [vmem:[%s1155_s17 + $0x34] sm:$0x1] }
  0x4d   : > { %v589_v18 = vsel %vm355_vm1, %v587_v56, %v588_v0  ;;  %v592_v32 = vsel %vm355_vm1, %v590_v23, %v591_v57  ;;  %v596_v24 = vrot.slane %v559_v45, 2  ;;  %v597_v58 = vrot.slane %v560_v59, 2  ;;  %v1440_v22 = vld [vmem:[%s1155_s17 + $0x4c] sm:$0x1]  ;;  %v1049_v0 = vld [vmem:[%s1556_s1 + $0x9] ss:$0 sm:$0xff] }
  0x4e   : > { %v595_v19 = vsel %vm355_vm1, %v593_v15, %v594_v5  ;;  %v599_v26 = vrot.slane %v561_v34, 2  ;;  %v600_v27 = vrot.slane %v562_v20, 2  ;;  %v602_v60 = vrot.slane %v563_v4, 2  ;;  %v1434_v4 = vld [vmem:[%s1155_s17 + $0x3c] sm:$0x1] }
  0x4f   : > { %v598_v28 = vsel %vm355_vm1, %v596_v24, %v597_v58  ;;  %v603_v17 = vrot.slane %v564_v62, 2  ;;  %v613_v37 = vadd.f32 %v583_v31, %v1359_v6  ;;  %v614_v8 = vadd.f32 %v586_v36, %v1361_v7  ;;  %v1039_v6 = vld [vmem:[%s1556_s1 + $0x8] ss:$0 sm:$0xff]  ;;  %v1437_v62 = vld [vmem:[%s1155_s17 + $0x44] sm:$0x1] }
  0x50   : > { %v601_v12 = vsel %vm355_vm1, %v599_v26, %v600_v27  ;;  %v615_v38 = vadd.f32 %v589_v18, %v1367_v13  ;;  %v616_v41 = vadd.f32 %v592_v32, %v523_v14  ;;  %v617_v42 = vadd.f32 %v595_v19, %v524_v29 }
  0x51   : > { %v604_v48 = vsel %vm355_vm1, %v602_v60, %v603_v17  ;;  %v618_v49 = vadd.f32 %v598_v28, %v525_v1  ;;  %v619_v50 = vadd.f32 %v601_v12, %v526_v9  ;;  %v630_v10 = vunpack.c.l.bf16 %v1030_v61 }
  0x52   : > { %v620_v7 = vadd.f32 %v604_v48, %v527_v30  ;;  %v631_v2 = vunpack.c.h.bf16 %v1030_v61  ;;  %v632_v51 = vunpack.c.l.bf16 %v1032_v11  ;;  %v633_v13 = vunpack.c.h.bf16 %v1032_v11  ;;  %v1418_v30 = vld [vmem:[%s1155_s17 + $0x1c] sm:$0x1] }
  0x53   : > { %v634_v14 = vunpack.c.l.bf16 %v1034_v43  ;;  %v635_v29 = vunpack.c.h.bf16 %v1034_v43  ;;  %v636_v52 = vunpack.c.l.bf16 %v1036_v47  ;;  %v637_v53 = vunpack.c.h.bf16 %v1036_v47 }
  0x54   : > { %v644_v1 = vmul.f32 %v1039_v6, %v630_v10  ;;  %v645_v54 = vmul.f32 %v1039_v6, %v631_v2  ;;  %v646_v9 = vmul.f32 %v1039_v6, %v632_v51  ;;  %v647_v16 = vmul.f32 %v1039_v6, %v633_v13 }
  0x55   : > { %v648_v33 = vmul.f32 %v1039_v6, %v634_v14  ;;  %v649_v39 = vmul.f32 %v1039_v6, %v635_v29  ;;  %v650_v40 = vmul.f32 %v1039_v6, %v636_v52  ;;  %v651_v3 = vmul.f32 %v1039_v6, %v637_v53 }
  0x56   : > { %v652_v45 = vadd.f32 %v644_v1, %v613_v37  ;;  %v653_v59 = vadd.f32 %v645_v54, %v614_v8  ;;  %v1429_v34 = vadd.f32 %v646_v9, %v615_v38  ;;  %v1431_v20 = vadd.f32 %v647_v16, %v616_v41  ;;  %v1050_v54 = vld [vmem:[%s1155_s17 + $0x10] sm:$0xe]  ;;  %v1051_v9 = vld [vmem:[%s1155_s17 + $0x18] sm:$0xe] }
  0x57   : > { %v656_v46 = vadd.f32 %v648_v33, %v617_v42  ;;  %v1442_v63 = vadd.f32 %v649_v39, %v618_v49  ;;  %v1444_v35 = vadd.f32 %v650_v40, %v619_v50  ;;  %v1446_v56 = vadd.f32 %v651_v3, %v620_v7  ;;  %v1052_v3 = vld [vmem:[%s1155_s17 + $0x20] sm:$0xe] }
  0x58   : > { %v668_v23 = vunpack.c.l.bf16 %v1415_v21  ;;  %v669_v57 = vunpack.c.l.bf16 %v1418_v30  ;;  %v670_v31 = vunpack.c.l.bf16 %v1421_v25  ;;  %v671_v36 = vunpack.c.l.bf16 %v1424_v55 }
  0x59   : > { %v672_v15 = vunpack.c.l.bf16 %v1427_v44  ;;  %v673_v5 = vunpack.c.l.bf16 %v1434_v4  ;;  %v674_v18 = vunpack.c.l.bf16 %v1437_v62  ;;  %v675_v32 = vunpack.c.l.bf16 %v1440_v22 }
  0x5a   : > { %v681_v24 = vmul.f32 %v1049_v0, %v630_v10  ;;  %v682_v58 = vmul.f32 %v1049_v0, %v668_v23  ;;  %v683_v19 = vmul.f32 %v1049_v0, %v631_v2  ;;  %v684_v26 = vmul.f32 %v1049_v0, %v669_v57 }
  0x5b   : > { %v685_v27 = vmul.f32 %v1049_v0, %v632_v51  ;;  %v686_v60 = vmul.f32 %v1049_v0, %v670_v31  ;;  %v687_v61 = vmul.f32 %v1049_v0, %v633_v13  ;;  %v688_v28 = vmul.f32 %v1049_v0, %v671_v36 }
  0x5c   : > { %v689_v17 = vmul.f32 %v1049_v0, %v634_v14  ;;  %v690_v37 = vmul.f32 %v1049_v0, %v672_v15  ;;  %v691_v8 = vmul.f32 %v1049_v0, %v635_v29  ;;  %v692_v11 = vmul.f32 %v1049_v0, %v673_v5 }
  0x5d   : > { %v693_v12 = vmul.f32 %v1049_v0, %v636_v52  ;;  %v694_v38 = vmul.f32 %v1049_v0, %v674_v18  ;;  %v695_v41 = vmul.f32 %v1049_v0, %v637_v53  ;;  %v696_v42 = vmul.f32 %v1049_v0, %v675_v32 }
  0x5e   : > { %v713_v43 = vrot.slane %v681_v24, 1  ;;  %v714_v47 = vrot.slane %v682_v58, 1  ;;  %v716_v48 = vrot.slane %v683_v19, 1  ;;  %v717_v49 = vrot.slane %v684_v26, 1  ;;  %v1053_v26 = vld [vmem:[%s1155_s17 + $0x28] sm:$0xe] }
  0x5f   : > { %v719_v50 = vrot.slane %v685_v27, 1  ;;  %v720_v10 = vrot.slane %v686_v60, 1  ;;  %v722_v6 = vrot.slane %v687_v61, 1  ;;  %v723_v7 = vrot.slane %v688_v28, 1  ;;  %v1054_v27 = vld [vmem:[%s1155_s17 + $0x30] sm:$0xe] }
  0x60   : > { %v715_v2 = vsel %vm261_vm0, %v713_v43, %v714_v47  ;;  %v718_v51 = vsel %vm261_vm0, %v716_v48, %v717_v49  ;;  %v725_v13 = vrot.slane %v689_v17, 1  ;;  %v726_v14 = vrot.slane %v690_v37, 1  ;;  %v1055_v37 = vld [vmem:[%s1155_s17 + $0x38] sm:$0xe] }
  0x61   : > { %v721_v29 = vsel %vm261_vm0, %v719_v50, %v720_v10  ;;  %v724_v52 = vsel %vm261_vm0, %v722_v6, %v723_v7  ;;  %v728_v53 = vrot.slane %v691_v8, 1  ;;  %v729_v1 = vrot.slane %v692_v11, 1  ;;  %v1056_v8 = vld [vmem:[%s1155_s17 + $0x40] sm:$0xe]  ;;  %v1057_v11 = vld [vmem:[%s1155_s17 + $0x48] sm:$0xe] }
  0x62   : > { %v727_v16 = vsel %vm261_vm0, %v725_v13, %v726_v14  ;;  %v731_v33 = vrot.slane %v693_v12, 1  ;;  %v732_v39 = vrot.slane %v694_v38, 1  ;;  %v734_v40 = vrot.slane %v695_v41, 1  ;;  %v1059_v41 = vld [vmem:[%s1556_s1 + $0xa] ss:$0 sm:$0xff] }
  0x63   : > { %v730_v0 = vsel %vm261_vm0, %v728_v53, %v729_v1  ;;  %v735_v24 = vrot.slane %v696_v42, 1  ;;  %v1484_v58 = vadd.f32 %v715_v2, %v652_v45  ;;  %v1486_v19 = vadd.f32 %v718_v51, %v653_v59 }
  0x64   : > { %v733_v60 = vsel %vm261_vm0, %v731_v33, %v732_v39  ;;  %v747_v61 = vadd.f32 %v721_v29, %v1429_v34  ;;  %v748_v28 = vadd.f32 %v724_v52, %v1431_v20  ;;  %v749_v17 = vadd.f32 %v727_v16, %v656_v46 }
  0x65   : > { %v736_v12 = vsel %vm261_vm0, %v734_v40, %v735_v24  ;;  %v750_v38 = vadd.f32 %v730_v0, %v1442_v63  ;;  %v751_v45 = vadd.f32 %v733_v60, %v1444_v35  ;;  %v761_v59 = vunpack.c.l.bf16 %v1050_v54  ;;  %v1060_v40 = vld [vmem:[%s1557_s2] ss:$0 sm:$0xff] }
  0x66   : > { %v752_v42 = vadd.f32 %v736_v12, %v1446_v56  ;;  %v762_v34 = vunpack.c.l.bf16 %v1051_v9  ;;  %v763_v43 = vunpack.c.l.bf16 %v1052_v3  ;;  %v764_v20 = vunpack.c.l.bf16 %v1053_v26 }
  0x67   : > { %v765_v46 = vunpack.c.l.bf16 %v1054_v27  ;;  %v766_v47 = vunpack.c.l.bf16 %v1055_v37  ;;  %v767_v48 = vunpack.c.l.bf16 %v1056_v8  ;;  %v768_v49 = vunpack.c.l.bf16 %v1057_v11 }
  0x68   : > { %v774_v50 = vmul.f32 %v1059_v41, %v761_v59  ;;  %v775_v63 = vmul.f32 %v1059_v41, %v668_v23  ;;  %v776_v10 = vmul.f32 %v1059_v41, %v762_v34  ;;  %v777_v35 = vmul.f32 %v1059_v41, %v669_v57 }
  0x69   : > { %v778_v6 = vmul.f32 %v1059_v41, %v763_v43  ;;  %v779_v7 = vmul.f32 %v1059_v41, %v670_v31  ;;  %v780_v56 = vmul.f32 %v1059_v41, %v764_v20  ;;  %v781_v2 = vmul.f32 %v1059_v41, %v671_v36 }
  0x6a   : > { %v782_v51 = vmul.f32 %v1059_v41, %v765_v46  ;;  %v783_v13 = vmul.f32 %v1059_v41, %v672_v15  ;;  %v784_v14 = vmul.f32 %v1059_v41, %v766_v47  ;;  %v785_v21 = vmul.f32 %v1059_v41, %v673_v5 }
  0x6b   : > { %v786_v23 = vmul.f32 %v1059_v41, %v767_v48  ;;  %v787_v30 = vmul.f32 %v1059_v41, %v674_v18  ;;  %v788_v57 = vmul.f32 %v1059_v41, %v768_v49  ;;  %v789_v25 = vmul.f32 %v1059_v41, %v675_v32 }
  0x6c   : > { %v806_v31 = vrot.slane %v774_v50, 2  ;;  %v807_v29 = vrot.slane %v775_v63, 2  ;;  %v809_v55 = vrot.slane %v776_v10, 2  ;;  %v810_v36 = vrot.slane %v777_v35, 2 }
  0x6d   : > { %v812_v52 = vrot.slane %v778_v6, 2  ;;  %v813_v53 = vrot.slane %v779_v7, 2  ;;  %v815_v44 = vrot.slane %v780_v56, 2  ;;  %v816_v15 = vrot.slane %v781_v2, 2 }
  0x6e   : > { %v808_v1 = vsel %vm355_vm1, %v806_v31, %v807_v29  ;;  %v811_v4 = vsel %vm355_vm1, %v809_v55, %v810_v36  ;;  %v818_v5 = vrot.slane %v782_v51, 2  ;;  %v819_v54 = vrot.slane %v783_v13, 2 }
  0x6f   : > { %v814_v62 = vsel %vm355_vm1, %v812_v52, %v813_v53  ;;  %v817_v18 = vsel %vm355_vm1, %v815_v44, %v816_v15  ;;  %v821_v22 = vrot.slane %v784_v14, 2  ;;  %v822_v32 = vrot.slane %v785_v21, 2 }
  0x70   : > { %v820_v9 = vsel %vm355_vm1, %v818_v5, %v819_v54  ;;  %v824_v16 = vrot.slane %v786_v23, 2  ;;  %v825_v33 = vrot.slane %v787_v30, 2  ;;  %v827_v39 = vrot.slane %v788_v57, 2 }
  0x71   : > { %v823_v3 = vsel %vm355_vm1, %v821_v22, %v822_v32  ;;  %v828_v0 = vrot.slane %v789_v25, 2  ;;  %v838_v24 = vadd.f32 %v808_v1, %v1484_v58  ;;  %v839_v26 = vadd.f32 %v811_v4, %v1486_v19 }
  0x72   : > { %v826_v27 = vsel %vm355_vm1, %v824_v16, %v825_v33  ;;  %v840_v60 = vadd.f32 %v814_v62, %v747_v61  ;;  %v841_v37 = vadd.f32 %v817_v18, %v748_v28  ;;  %v842_v8 = vadd.f32 %v820_v9, %v749_v17 }
  0x73   : > { %v829_v11 = vsel %vm355_vm1, %v827_v39, %v828_v0  ;;  %v843_v12 = vadd.f32 %v823_v3, %v750_v38  ;;  %v844_v59 = vadd.f32 %v826_v27, %v751_v45  ;;  %v853_v41 = vadd.f32 %v1060_v40, %v838_v24 }
  0x74   : > { %v845_v34 = vadd.f32 %v829_v11, %v752_v42  ;;  %v854_v43 = vadd.f32 %v1060_v40, %v839_v26  ;;  %v855_v20 = vadd.f32 %v1060_v40, %v840_v60  ;;  %v856_v46 = vadd.f32 %v1060_v40, %v841_v37 }
  0x75   : > { %v857_v47 = vadd.f32 %v1060_v40, %v842_v8  ;;  %v858_v48 = vadd.f32 %v1060_v40, %v843_v12  ;;  %v1532_v49 = vadd.f32 %v1060_v40, %v844_v59  ;;  %v1061_v58 = vmul.f32 -1.442695, %v853_v41 }
  0x76   : > { %v1534_v19 = vadd.f32 %v1060_v40, %v845_v34  ;;  %v1062_v50 = vmul.f32 -1.442695, %v854_v43  ;;  %v1063_v61 = vmul.f32 -1.442695, %v855_v20  ;;  %v1064_v28 = vmul.f32 -1.442695, %v856_v46 }
  0x77   : > { %1081 = vpow2.f32 %v1061_v58  ;;  %v1065_v17 = vmul.f32 -1.442695, %v857_v47  ;;  %v1066_v38 = vmul.f32 -1.442695, %v858_v48  ;;  %v1067_v45 = vmul.f32 -1.442695, %v1532_v49 }
  0x78   : > { %1083 = vpow2.f32 %v1062_v50  ;;  %v1068_v42 = vmul.f32 -1.442695, %v1534_v19 }
  0x79   : > { %1085 = vpow2.f32 %v1063_v61 }
  0x7a   : > { %1087 = vpow2.f32 %v1064_v28 }
  0x7b   : > { %1089 = vpow2.f32 %v1065_v17 }
  0x7c   : > { %1091 = vpow2.f32 %v1066_v38 }
  0x7d   : > { %1093 = vpow2.f32 %v1067_v45 }
  0x7e   : > { %1095 = vpow2.f32 %v1068_v42 }
  0x84   : > { %v1082_v63 = vpop.eup %1081 }
  0x85   : > { %v1084_v10 = vpop.eup %1083  ;;  %v885_v35 = vadd.f32 1.0, %v1082_v63 }
  0x86   : > { %v1086_v6 = vpop.eup %1085  ;;  %v886_v7 = vadd.f32 1.0, %v1084_v10 }
  0x87   : > { %v1088_v56 = vpop.eup %1087  ;;  %v887_v2 = vadd.f32 1.0, %v1086_v6  ;;  %1097 = vrcp.f32 %v885_v35 }
  0x88   : > { %v1090_v51 = vpop.eup %1089  ;;  %v888_v13 = vadd.f32 1.0, %v1088_v56  ;;  %1099 = vrcp.f32 %v886_v7 }
  0x89   : > { %v1092_v14 = vpop.eup %1091  ;;  %v889_v21 = vadd.f32 1.0, %v1090_v51  ;;  %1101 = vrcp.f32 %v887_v2 }
  0x8a   : > { %v1094_v23 = vpop.eup %1093  ;;  %v890_v30 = vadd.f32 1.0, %v1092_v14  ;;  %1103 = vrcp.f32 %v888_v13 }
  0x8b   : > { %v1096_v57 = vpop.eup %1095  ;;  %v891_v25 = vadd.f32 1.0, %v1094_v23  ;;  %1105 = vrcp.f32 %v889_v21 }
  0x8c   : > { %v892_v31 = vadd.f32 1.0, %v1096_v57  ;;  %1107 = vrcp.f32 %v890_v30 }
  0x8d   : > { %1109 = vrcp.f32 %v891_v25 }
  0x8e   : > { %1111 = vrcp.f32 %v892_v31 }
  0x94   : > { %v1098_v29 = vpop.eup %1097 }
  0x95   : > { %v1100_v55 = vpop.eup %1099  ;;  %v909_v36 = vmul.f32 %v1098_v29, %v853_v41 }
  0x96   : > { %v1102_v52 = vpop.eup %1101  ;;  %v910_v53 = vmul.f32 %v1100_v55, %v854_v43 }
  0x97   : > { %v1104_v44 = vpop.eup %1103  ;;  %v911_v15 = vmul.f32 %v1102_v52, %v855_v20  ;;  %v917_v1 = vpack.c.bf16 %v909_v36, %v909_v36 }
  0x98   : > { %v1106_v4 = vpop.eup %1105  ;;  %v912_v5 = vmul.f32 %v1104_v44, %v856_v46  ;;  %v918_v54 = vpack.c.bf16 %v910_v53, %v910_v53 }
  0x99   : > { %v1108_v62 = vpop.eup %1107  ;;  %v913_v18 = vmul.f32 %v1106_v4, %v857_v47  ;;  %v919_v22 = vpack.c.bf16 %v911_v15, %v911_v15  ;;  %926 = vst.msk [vmem:[%s170_s16] sm:$0xf] %vm925_vm2, %v917_v1 }
  0x9a   : > { %v1110_v32 = vpop.eup %1109  ;;  %v914_v9 = vmul.f32 %v1108_v62, %v858_v48  ;;  %v920_v16 = vpack.c.bf16 %v912_v5, %v912_v5  ;;  %927 = vst.msk [vmem:[%s170_s16 + $0x4] sm:$0xf] %vm925_vm2, %v918_v54 }
  0x9b   : > { %v1112_v33 = vpop.eup %1111  ;;  %v915_v39 = vmul.f32 %v1110_v32, %v1532_v49  ;;  %v921_v40 = vpack.c.bf16 %v913_v18, %v913_v18  ;;  %928 = vst.msk [vmem:[%s170_s16 + $0x8] sm:$0xf] %vm925_vm2, %v919_v22 }
  0x9c   : > { %v916_v3 = vmul.f32 %v1112_v33, %v1534_v19  ;;  %v922_v0 = vpack.c.bf16 %v914_v9, %v914_v9  ;;  %929 = vst.msk [vmem:[%s170_s16 + $0xc] sm:$0xf] %vm925_vm2, %v920_v16 }
  0x9d   : > { %v923_v24 = vpack.c.bf16 %v915_v39, %v915_v39  ;;  %930 = vst.msk [vmem:[%s170_s16 + $0x10] sm:$0xf] %vm925_vm2, %v921_v40 }
  0x9e   : > { %v924_v26 = vpack.c.bf16 %v916_v3, %v916_v3  ;;  %931 = vst.msk [vmem:[%s170_s16 + $0x14] sm:$0xf] %vm925_vm2, %v922_v0 }
  0x9f   : > { %932 = vst.msk [vmem:[%s170_s16 + $0x18] sm:$0xf] %vm925_vm2, %v923_v24 }
  0xa0   : > { %933 = vst.msk [vmem:[%s170_s16 + $0x1c] sm:$0xf] %vm925_vm2, %v924_v26 }
  0xa1 PF: > { %s13_s12 = sadd.s32 1, %s1119_s12  }
  0xa2   : > { %p10_p4 = scmp.ge.s32.totalorder %s13_s12, 4  }
  0xa4   :  { %12 = sbr.rel (!%p10_p4) target bundleno = 1 (0x1), region = 66 }

// kernel: cascaded_vmamba_block.12
= control target key start
LH: loop header
LB: loop body
LE: loop exit
PB: predicated region body
PF: predicated region fallthrough
CT: control target
= control target key end

     0   :  { %vm60_vm0 = vcmask 523264   ;;  %vm671_vm1 = vcmask 261120   ;;  %s1535_s1 = inlined_call_operand.vmem [shape: bf16[128,64], index: 1, kind: input, shape index: {}]   ;;  %s1536_s5 = inlined_call_operand.vmem [shape: bf16[64,32], index: 5, kind: input, shape index: {}]   ;;  %s1537_s2 = inlined_call_operand.vmem [shape: bf16[128,64], index: 2, kind: input, shape index: {}]   ;;  %s1538_s3 = inlined_call_operand.vmem [shape: f32[1,64], index: 3, kind: input, shape index: {}]   ;;  %s1539_s4 = inlined_call_operand.vmem [shape: f32[1,64], index: 4, kind: input, shape index: {}]   ;;  %s1540_s0 = inlined_call_operand.<no memory space> [shape: f32[1,1], index: 0, kind: input, shape index: {}]   ;;  %s1541_s6 = inlined_call_operand.vmem [shape: f32[128,32], index: 6, kind: input, shape index: {}]   ;;  %s1542_s7 = inlined_call_operand.vmem [shape: f32[128,32], index: 7, kind: output, shape index: {}]  }
   0x1   :  { %v987_v0 = vld [vmem:[%s1535_s1] sm:$0xff]   ;;  %v1001_v6 = vld [vmem:[%s1535_s1 + $0x8] sm:$0xff]   ;;  %v1029_v18 = vld [vmem:[%s1535_s1 + $0x10] sm:$0xff]  }
   0x2   :  { %v992_v1 = vld [vmem:[%s1535_s1 + $0x20] sm:$0xff]   ;;  %v724_v2 = vunpack.c.l.bf16 %v987_v0  ;;  %v725_v4 = vunpack.c.h.bf16 %v987_v0  ;;  %v728_v11 = vunpack.c.l.bf16 %v1001_v6  ;;  %v729_v12 = vunpack.c.h.bf16 %v1001_v6  ;;  %v1016_v13 = vld [vmem:[%s1535_s1 + $0x28] sm:$0xff]   ;;  %v1042_v23 = vld [vmem:[%s1535_s1 + $0x30] sm:$0xff]  }
   0x3   :  { %v740_v3 = vunpack.c.l.bf16 %v992_v1  ;;  %v741_v5 = vunpack.c.h.bf16 %v992_v1  ;;  %v744_v16 = vunpack.c.l.bf16 %v1016_v13  ;;  %v745_v17 = vunpack.c.h.bf16 %v1016_v13  ;;  %v1055_v28 = vld [vmem:[%s1535_s1 + $0x18] sm:$0xff]  }
   0x4   :  { %v61_v7 = vsel %vm60_vm0, %v724_v2, 0.0  ;;  %v64_v9 = vsel %vm60_vm0, %v725_v4, 0.0  ;;  %v67_v14 = vsel %vm60_vm0, %v728_v11, 0.0  ;;  %v70_v15 = vsel %vm60_vm0, %v729_v12, 0.0  ;;  %v1068_v33 = vld [vmem:[%s1535_s1 + $0x38] sm:$0xff]  }
   0x5   :  { %v85_v8 = vsel %vm60_vm0, %v740_v3, 0.0  ;;  %62 = vadd.xlane.f32.xlu0 %v61_v7  ;;  %v88_v10 = vsel %vm60_vm0, %v741_v5, 0.0  ;;  %v91_v19 = vsel %vm60_vm0, %v744_v16, 0.0  ;;  %v94_v20 = vsel %vm60_vm0, %v745_v17, 0.0 }
   0x6   :  { %86 = vadd.xlane.f32.xlu1 %v85_v8  ;;  %v732_v21 = vunpack.c.l.bf16 %v1029_v18  ;;  %v733_v22 = vunpack.c.h.bf16 %v1029_v18  ;;  %v748_v26 = vunpack.c.l.bf16 %v1042_v23  ;;  %v749_v27 = vunpack.c.h.bf16 %v1042_v23 }
   0x7   :  { %v736_v31 = vunpack.c.l.bf16 %v1055_v28  ;;  %v737_v32 = vunpack.c.h.bf16 %v1055_v28  ;;  %v752_v36 = vunpack.c.l.bf16 %v1068_v33  ;;  %v753_v37 = vunpack.c.h.bf16 %v1068_v33 }
   0x8   :  { %v73_v24 = vsel %vm60_vm0, %v732_v21, 0.0  ;;  %v76_v25 = vsel %vm60_vm0, %v733_v22, 0.0  ;;  %v97_v29 = vsel %vm60_vm0, %v748_v26, 0.0  ;;  %v100_v30 = vsel %vm60_vm0, %v749_v27, 0.0 }
   0x9   :  { %65 = vadd.xlane.f32.xlu0 %v64_v9  ;;  %v79_v34 = vsel %vm60_vm0, %v736_v31, 0.0  ;;  %v82_v35 = vsel %vm60_vm0, %v737_v32, 0.0  ;;  %v103_v38 = vsel %vm60_vm0, %v752_v36, 0.0  ;;  %v106_v39 = vsel %vm60_vm0, %v753_v37, 0.0 }
   0xa   :  { %89 = vadd.xlane.f32.xlu1 %v88_v10 }
   0xd   :  { %68 = vadd.xlane.f32.xlu0 %v67_v14 }
   0xe   :  { %71 = vadd.xlane.f32.xlu1 %v70_v15 }
  0x11   :  { %92 = vadd.xlane.f32.xlu0 %v91_v19 }
  0x12   :  { %95 = vadd.xlane.f32.xlu1 %v94_v20 }
  0x15   :  { %74 = vadd.xlane.f32.xlu0 %v73_v24 }
  0x16   :  { %77 = vadd.xlane.f32.xlu1 %v76_v25 }
  0x19   :  { %98 = vadd.xlane.f32.xlu0 %v97_v29 }
  0x1a   :  { %101 = vadd.xlane.f32.xlu1 %v100_v30 }
  0x1d   :  { %80 = vadd.xlane.f32.xlu0 %v79_v34 }
  0x1e   :  { %83 = vadd.xlane.f32.xlu1 %v82_v35 }
  0x21   :  { %104 = vadd.xlane.f32.xlu0 %v103_v38 }
  0x22   :  { %107 = vadd.xlane.f32.xlu1 %v106_v39 }
  0x8e   :  { %v63_v40 = vpop.xlane.xlu0 %62 }
  0x8f   :  { %v87_v41 = vpop.xlane.xlu1 %86  ;;  %v110_v42 = vmul.f32 0.015625, %v63_v40 }
  0x90   :  { %v118_v43 = vmul.f32 0.015625, %v87_v41 }
  0x91   :  { %v1084_v44 = vsub.f32 %v724_v2, %v110_v42 }
  0x92   :  { %v1086_v45 = vsub.f32 %v740_v3, %v118_v43  ;;  %v66_v46 = vpop.xlane.xlu0 %65 }
  0x93   :  { %v90_v47 = vpop.xlane.xlu1 %89  ;;  %v111_v48 = vmul.f32 0.015625, %v66_v46  ;;  %v142_v50 = vmul.f32 %v1084_v44, %v1084_v44 }
  0x94   :  { %v119_v49 = vmul.f32 0.015625, %v90_v47  ;;  %v150_v51 = vmul.f32 %v1086_v45, %v1086_v45 }
  0x95   :  { %v1094_v52 = vsub.f32 %v725_v4, %v111_v48  ;;  %v158_v54 = vsel %vm60_vm0, %v142_v50, 0.0 }
  0x96   :  { %v1098_v53 = vsub.f32 %v741_v5, %v119_v49  ;;  %159 = vadd.xlane.f32.xlu0 %v158_v54  ;;  %v69_v55 = vpop.xlane.xlu0 %68  ;;  %v182_v57 = vsel %vm60_vm0, %v150_v51, 0.0 }
  0x97   :  { %v72_v56 = vpop.xlane.xlu1 %71  ;;  %v112_v58 = vmul.f32 0.015625, %v69_v55  ;;  %v143_v60 = vmul.f32 %v1094_v52, %v1094_v52 }
  0x98   :  { %v113_v59 = vmul.f32 0.015625, %v72_v56  ;;  %v151_v61 = vmul.f32 %v1098_v53, %v1098_v53 }
  0x99   :  { %v1108_v62 = vsub.f32 %v728_v11, %v112_v58  ;;  %v161_v0 = vsel %vm60_vm0, %v143_v60, 0.0 }
  0x9a   :  { %v1112_v63 = vsub.f32 %v729_v12, %v113_v59  ;;  %183 = vadd.xlane.f32.xlu0 %v182_v57  ;;  %162 = vadd.xlane.f32.xlu1 %v161_v0  ;;  %v93_v1 = vpop.xlane.xlu0 %92  ;;  %v185_v3 = vsel %vm60_vm0, %v151_v61, 0.0  ;;  %v846_v0 = vld [vmem:[%s1536_s5 + $0x8] sm:$0xff]  }
  0x9b   :  { %v96_v2 = vpop.xlane.xlu1 %95  ;;  %v120_v4 = vmul.f32 0.015625, %v93_v1  ;;  %v144_v7 = vmul.f32 %v1108_v62, %v1108_v62  ;;  %v847_v1 = vld [vmem:[%s1536_s5] sm:$0xff]  }
  0x9c   :  { %v121_v5 = vmul.f32 0.015625, %v96_v2  ;;  %v145_v8 = vmul.f32 %v1112_v63, %v1112_v63  ;;  %v1207_v2 = vld [vmem:[%s1537_s2] sm:$0xff]  }
  0x9d   :  { %v1122_v6 = vsub.f32 %v744_v16, %v120_v4  ;;  %v164_v10 = vsel %vm60_vm0, %v144_v7, 0.0  ;;  %v1213_v4 = vld [vmem:[%s1537_s2 + $0x20] sm:$0xff]  }
  0x9e   :  { %v1126_v9 = vsub.f32 %v745_v17, %v121_v5  ;;  %186 = vadd.xlane.f32.xlu1 %v185_v3  ;;  %165 = vadd.xlane.f32.xlu0 %v164_v10  ;;  %v75_v11 = vpop.xlane.xlu0 %74  ;;  %v167_v14 = vsel %vm60_vm0, %v145_v8, 0.0  ;;  %v756_v3 = vunpack.c.l.bf16 %v1207_v2  ;;  %v757_v5 = vunpack.c.h.bf16 %v1207_v2  ;;  %v1222_v10 = vld [vmem:[%s1537_s2 + $0x8] sm:$0xff]  }
  0x9f   :  { %v78_v12 = vpop.xlane.xlu1 %77  ;;  %v114_v15 = vmul.f32 0.015625, %v75_v11  ;;  %v152_v20 = vmul.f32 %v1122_v6, %v1122_v6  ;;  %v772_v8 = vunpack.c.l.bf16 %v1213_v4  ;;  %v773_v11 = vunpack.c.h.bf16 %v1213_v4 }
  0xa0   :  { %v115_v19 = vmul.f32 0.015625, %v78_v12  ;;  %v153_v16 = vmul.f32 %v1126_v9, %v1126_v9  ;;  %v694_v7 = vmul.f32 -1.442695, %v756_v3  ;;  %v695_v12 = vmul.f32 -1.442695, %v757_v5 }
  0xa1   :  { %v1136_v13 = vsub.f32 %v732_v21, %v114_v15  ;;  %v188_v24 = vsel %vm60_vm0, %v152_v20, 0.0  ;;  %v702_v15 = vmul.f32 -1.442695, %v772_v8  ;;  %v761_v20 = vunpack.c.h.bf16 %v1222_v10 }
  0xa2   :  { %v1140_v17 = vsub.f32 %v733_v22, %v115_v19  ;;  %168 = vadd.xlane.f32.xlu1 %v167_v14  ;;  %189 = vadd.xlane.f32.xlu0 %v188_v24  ;;  %v99_v25 = vpop.xlane.xlu0 %98  ;;  %v191_v30 = vsel %vm60_vm0, %v153_v16, 0.0  ;;  %v760_v14 = vunpack.c.l.bf16 %v1222_v10  ;;  %848 = vpow2.f32 %v694_v7  ;;  %v1236_v16 = vld [vmem:[%s1537_s2 + $0x28] sm:$0xff]  }
  0xa3   :  { %v102_v29 = vpop.xlane.xlu1 %101  ;;  %v122_v34 = vmul.f32 0.015625, %v99_v25  ;;  %v146_v38 = vmul.f32 %v1136_v13, %v1136_v13  ;;  %v703_v19 = vmul.f32 -1.442695, %v773_v11  ;;  %850 = vpow2.f32 %v695_v12 }
  0xa4   :  { %v123_v35 = vmul.f32 0.015625, %v102_v29  ;;  %v147_v21 = vmul.f32 %v1140_v17, %v1140_v17  ;;  %v696_v24 = vmul.f32 -1.442695, %v760_v14  ;;  %852 = vpow2.f32 %v702_v15 }
  0xa5   :  { %v1150_v18 = vsub.f32 %v748_v26, %v122_v34  ;;  %v170_v39 = vsel %vm60_vm0, %v146_v38, 0.0  ;;  %v776_v25 = vunpack.c.l.bf16 %v1236_v16  ;;  %854 = vpow2.f32 %v703_v19 }
  0xa6   :  { %v1154_v22 = vsub.f32 %v749_v27, %v123_v35  ;;  %192 = vadd.xlane.f32.xlu1 %v191_v30  ;;  %171 = vadd.xlane.f32.xlu0 %v170_v39  ;;  %v81_v40 = vpop.xlane.xlu0 %80  ;;  %v173_v42 = vsel %vm60_vm0, %v147_v21, 0.0  ;;  %v697_v29 = vmul.f32 -1.442695, %v761_v20  ;;  %856 = vpow2.f32 %v696_v24  ;;  %v1249_v35 = vld [vmem:[%s1537_s2 + $0x10] sm:$0xff]  }
  0xa7   :  { %v84_v41 = vpop.xlane.xlu1 %83  ;;  %v116_v43 = vmul.f32 0.015625, %v81_v40  ;;  %v154_v47 = vmul.f32 %v1150_v18, %v1150_v18  ;;  %v704_v30 = vmul.f32 -1.442695, %v776_v25  ;;  %v777_v34 = vunpack.c.h.bf16 %v1236_v16 }
  0xa8   :  { %v117_v46 = vmul.f32 0.015625, %v84_v41  ;;  %v155_v26 = vmul.f32 %v1154_v22, %v1154_v22  ;;  %858 = vpow2.f32 %v697_v29  ;;  %v764_v39 = vunpack.c.l.bf16 %v1249_v35  ;;  %v1258_v41 = vld [vmem:[%s1537_s2 + $0x30] sm:$0xff]  }
  0xa9   :  { %v1164_v23 = vsub.f32 %v736_v31, %v116_v43  ;;  %v194_v48 = vsel %vm60_vm0, %v154_v47, 0.0  ;;  %860 = vpow2.f32 %v704_v30  ;;  %v705_v21 = vmul.f32 -1.442695, %v777_v34 }
  0xaa   :  { %v1168_v27 = vsub.f32 %v737_v32, %v117_v46  ;;  %174 = vadd.xlane.f32.xlu1 %v173_v42  ;;  %195 = vadd.xlane.f32.xlu0 %v194_v48  ;;  %v105_v49 = vpop.xlane.xlu0 %104  ;;  %v197_v51 = vsel %vm60_vm0, %v155_v26, 0.0  ;;  %v765_v40 = vunpack.c.h.bf16 %v1249_v35  ;;  %v698_v47 = vmul.f32 -1.442695, %v764_v39 }
  0xab   :  { %v108_v50 = vpop.xlane.xlu1 %107  ;;  %v124_v54 = vmul.f32 0.015625, %v105_v49  ;;  %v148_v56 = vmul.f32 %v1164_v23, %v1164_v23  ;;  %862 = vpow2.f32 %v705_v21  ;;  %v780_v49 = vunpack.c.l.bf16 %v1258_v41 }
  0xac   :  { %v125_v55 = vmul.f32 0.015625, %v108_v50  ;;  %v149_v31 = vmul.f32 %v1168_v27, %v1168_v27  ;;  %v699_v48 = vmul.f32 -1.442695, %v765_v40 }
  0xad   :  { %v1178_v28 = vsub.f32 %v752_v36, %v124_v54  ;;  %v176_v57 = vsel %vm60_vm0, %v148_v56, 0.0  ;;  %v844_v36 = vld [vmem:[%s1536_s5 + $0x18] sm:$0xff]   ;;  %v781_v56 = vunpack.c.h.bf16 %v1258_v41 }
  0xae   :  { %v1182_v32 = vsub.f32 %v753_v37, %v125_v55  ;;  %198 = vadd.xlane.f32.xlu1 %v197_v51  ;;  %177 = vadd.xlane.f32.xlu0 %v176_v57  ;;  %v179_v58 = vsel %vm60_vm0, %v149_v31, 0.0  ;;  %v845_v37 = vld [vmem:[%s1536_s5 + $0x10] sm:$0xff]   ;;  %v1268_v51 = vld [vmem:[%s1537_s2 + $0x18] sm:$0xff]  }
  0xaf   :  { %v156_v59 = vmul.f32 %v1178_v28, %v1178_v28  ;;  %812 = vmatprep.subr.bf16.mxu0 %v844_v36  ;;  %836 = vmatprep.subr.bf16.mxu1 %v844_v36  ;;  %v849_v38 = vpop.eup %848 }
  0xb0   :  { %v157_v60 = vmul.f32 %v1182_v32, %v1182_v32  ;;  %813 = vmatpush3.bf16.msra.mxu0 %v844_v36  ;;  %840 = vmatpush3.bf16.msra.mxu1 %v844_v36  ;;  %v851_v42 = vpop.eup %850  ;;  %v396_v43 = vadd.f32 1.0, %v849_v38 }
  0xb1   :  { %v200_v61 = vsel %vm60_vm0, %v156_v59, 0.0  ;;  %814 = vmatprep.subr.bf16.mxu0 %v845_v37  ;;  %837 = vmatprep.subr.bf16.mxu1 %v845_v37  ;;  %v853_v46 = vpop.eup %852  ;;  %v397_v50 = vadd.f32 1.0, %v851_v42  ;;  %v768_v59 = vunpack.c.l.bf16 %v1268_v51 }
  0xb2   :  { %180 = vadd.xlane.f32.xlu1 %v179_v58  ;;  %201 = vadd.xlane.f32.xlu0 %v200_v61  ;;  %v203_v33 = vsel %vm60_vm0, %v157_v60, 0.0  ;;  %v855_v26 = vpop.eup %854  ;;  %864 = vrcp.f32 %v396_v43  ;;  %v404_v55 = vadd.f32 1.0, %v853_v46  ;;  %v706_v58 = vmul.f32 -1.442695, %v780_v49  ;;  %v1277_v61 = vld [vmem:[%s1537_s2 + $0x38] sm:$0xff]  }
  0xb3   :  { %v857_v54 = vpop.eup %856  ;;  %v405_v31 = vadd.f32 1.0, %v855_v26  ;;  %866 = vpow2.f32 %v698_v47  ;;  %v700_v7 = vmul.f32 -1.442695, %v768_v59  ;;  %v1544_v12 = vunpack.c.l.bf16 %v1277_v61 }
  0xb4   :  { %815 = vmatpush3.bf16.msra.mxu0 %v845_v37  ;;  %841 = vmatpush3.bf16.msra.mxu1 %v845_v37  ;;  %868 = vpow2.f32 %v699_v48  ;;  %v398_v60 = vadd.f32 1.0, %v857_v54  ;;  %v1543_v42 = vunpack.c.h.bf16 %v1277_v61 }
  0xb5   :  { %816 = vmatprep.subr.bf16.mxu0 %v846_v0  ;;  %838 = vmatprep.subr.bf16.mxu1 %v846_v0  ;;  %v859_v57 = vpop.eup %858  ;;  %870 = vrcp.f32 %v397_v50  ;;  %v708_v43 = vmul.f32 -1.442695, %v1544_v12 }
  0xb6   :  { %204 = vadd.xlane.f32.xlu1 %v203_v33  ;;  %872 = vrcp.f32 %v404_v55  ;;  %v707_v33 = vmul.f32 -1.442695, %v781_v56  ;;  %v861_v36 = vpop.eup %860  ;;  %v399_v37 = vadd.f32 1.0, %v859_v57 }
  0xb7   :  { %874 = vrcp.f32 %v405_v31  ;;  %v406_v19 = vadd.f32 1.0, %v861_v36 }
  0xb8   :  { %817 = vmatpush3.bf16.msra.mxu0 %v846_v0  ;;  %842 = vmatpush3.bf16.msra.mxu1 %v846_v0  ;;  %v1545_v0 = vunpack.c.h.bf16 %v1268_v51  ;;  %876 = vpow2.f32 %v706_v58  ;;  %v863_v30 = vpop.eup %862  ;;  %v709_v58 = vmul.f32 -1.442695, %v1543_v42 }
  0xb9   :  { %818 = vmatprep.subr.bf16.mxu0 %v847_v1  ;;  %839 = vmatprep.subr.bf16.mxu1 %v847_v1  ;;  %878 = vrcp.f32 %v398_v60  ;;  %v407_v54 = vadd.f32 1.0, %v863_v30 }
  0xba   :  { %880 = vpow2.f32 %v707_v33  ;;  %v701_v29 = vmul.f32 -1.442695, %v1545_v0 }
  0xbb   :  { %882 = vrcp.f32 %v399_v37 }
  0xbc   :  { %819 = vmatpush3.bf16.msra.mxu0 %v847_v1  ;;  %843 = vmatpush3.bf16.msra.mxu1 %v847_v1  ;;  %884 = vpow2.f32 %v700_v7 }
  0xbf   :  { %v865_v26 = vpop.eup %864 }
  0xc0   :  { %v867_v55 = vpop.eup %866 }
  0xc1   :  { %v869_v60 = vpop.eup %868 }
  0xc2   :  { %v871_v37 = vpop.eup %870 }
 0x11f   :  { %v160_v1 = vpop.xlane.xlu0 %159 }
 0x120   :  { %v206_v15 = vmul.f32 0.015625, %v160_v1  ;;  %v873_v1 = vpop.eup %872 }
 0x122   :  { %v222_v24 = vadd.f32 1e-05, %v206_v15 }
 0x123   :  { %v163_v38 = vpop.xlane.xlu1 %162  ;;  %v184_v21 = vpop.xlane.xlu0 %183 }
 0x124   :  { %886 = vrsqrt.f32 %v222_v24  ;;  %v207_v46 = vmul.f32 0.015625, %v163_v38  ;;  %v214_v47 = vmul.f32 0.015625, %v184_v21  ;;  %v875_v24 = vpop.eup %874  ;;  %v401_v38 = vadd.f32 1.0, %v869_v60 }
 0x125   :  { %888 = vrcp.f32 %v406_v19  ;;  %v400_v19 = vadd.f32 1.0, %v867_v55  ;;  %v877_v21 = vpop.eup %876  ;;  %v1314_v2 = vmul.f32 %v875_v24, %v773_v11 }
 0x126   :  { %v223_v48 = vadd.f32 1e-05, %v207_v46  ;;  %v230_v50 = vadd.f32 1e-05, %v214_v47  ;;  %890 = vpow2.f32 %v701_v29  ;;  %v879_v47 = vpop.eup %878 }
 0x127   :  { %v187_v31 = vpop.xlane.xlu1 %186  ;;  %v166_v57 = vpop.xlane.xlu0 %165  ;;  %892 = vpow2.f32 %v708_v43 }
 0x128   :  { %894 = vrsqrt.f32 %v223_v48  ;;  %v215_v33 = vmul.f32 0.015625, %v187_v31  ;;  %v208_v36 = vmul.f32 0.015625, %v166_v57  ;;  %v881_v48 = vpop.eup %880 }
 0x129   :  { %896 = vrsqrt.f32 %v230_v50  ;;  %v883_v50 = vpop.eup %882 }
 0x12a   :  { %v231_v7 = vadd.f32 1e-05, %v215_v33  ;;  %v224_v15 = vadd.f32 1e-05, %v208_v36  ;;  %898 = vrcp.f32 %v407_v54  ;;  %v408_v54 = vadd.f32 1.0, %v877_v21  ;;  %v885_v55 = vpop.eup %884 }
 0x12b   :  { %v169_v29 = vpop.xlane.xlu1 %168  ;;  %v190_v30 = vpop.xlane.xlu0 %189  ;;  %900 = vpow2.f32 %v709_v58 }
 0x12c   :  { %902 = vrsqrt.f32 %v231_v7  ;;  %v209_v43 = vmul.f32 0.015625, %v169_v29  ;;  %v216_v46 = vmul.f32 0.015625, %v190_v30  ;;  %v1295_v7 = vld [vmem:[%s1538_s3] ss:$0 sm:$0xff] }
 0x12d   :  { %904 = vrsqrt.f32 %v224_v15 }
 0x12e   :  { %v225_v31 = vadd.f32 1e-05, %v209_v43  ;;  %v232_v57 = vadd.f32 1e-05, %v216_v46  ;;  %906 = vrcp.f32 %v400_v19  ;;  %v409_v43 = vadd.f32 1.0, %v881_v48 }
 0x12f   :  { %v193_v33 = vpop.xlane.xlu1 %192  ;;  %v172_v36 = vpop.xlane.xlu0 %171  ;;  %908 = vrcp.f32 %v401_v38 }
 0x130   :  { %910 = vrsqrt.f32 %v225_v31  ;;  %v217_v42 = vmul.f32 0.015625, %v193_v33  ;;  %v210_v60 = vmul.f32 0.015625, %v172_v36  ;;  %v444_v31 = vmul.f32 %v865_v26, %v756_v3 }
 0x131   :  { %v887_v58 = vpop.eup %886  ;;  %912 = vrsqrt.f32 %v232_v57  ;;  %v445_v57 = vmul.f32 %v871_v37, %v757_v5  ;;  %v402_v33 = vadd.f32 1.0, %v885_v55  ;;  %v1310_v3 = vmul.f32 %v873_v1, %v772_v8 }
 0x132   :  { %v889_v15 = vpop.eup %888  ;;  %v233_v29 = vadd.f32 1e-05, %v217_v42  ;;  %v226_v30 = vadd.f32 1e-05, %v210_v60  ;;  %v254_v19 = vmul.f32 %v887_v58, %v1084_v44  ;;  %914 = vrcp.f32 %v408_v54  ;;  %v1306_v44 = vld [vmem:[%s1539_s4] ss:$0 sm:$0xff] }
 0x133   :  { %v891_v46 = vpop.eup %890  ;;  %v175_v38 = vpop.xlane.xlu1 %174  ;;  %v1318_v5 = vmul.f32 %v879_v47, %v760_v14 }
 0x134   :  { %v196_v21 = vpop.xlane.xlu0 %195  ;;  %v893_v36 = vpop.eup %892  ;;  %916 = vrsqrt.f32 %v233_v29  ;;  %v211_v12 = vmul.f32 0.015625, %v175_v38  ;;  %v277_v42 = vmul.f32 %v1295_v7, %v254_v19  ;;  %v403_v4 = vadd.f32 1.0, %v891_v46 }
 0x135   :  { %v218_v0 = vmul.f32 0.015625, %v196_v21  ;;  %v895_v48 = vpop.eup %894  ;;  %918 = vrsqrt.f32 %v226_v30  ;;  %v1329_v30 = vmul.f32 %v889_v15, %v776_v25  ;;  %v410_v10 = vadd.f32 1.0, %v893_v36 }
 0x136   :  { %v897_v26 = vpop.eup %896  ;;  %v227_v37 = vadd.f32 1e-05, %v211_v12  ;;  %v255_v55 = vmul.f32 %v895_v48, %v1094_v52  ;;  %920 = vrcp.f32 %v409_v43  ;;  %v300_v8 = vadd.f32 %v1306_v44, %v277_v42 }
 0x137   :  { %v234_v54 = vadd.f32 1e-05, %v218_v0  ;;  %v899_v60 = vpop.eup %898  ;;  %v199_v58 = vpop.xlane.xlu1 %198  ;;  %v262_v1 = vmul.f32 %v897_v26, %v1086_v45  ;;  %922 = vrcp.f32 %v402_v33  ;;  %v447_v0 = vmul.f32 %v883_v50, %v761_v20 }
 0x138   :  { %v178_v29 = vpop.xlane.xlu0 %177  ;;  %v901_v11 = vpop.eup %900  ;;  %924 = vrsqrt.f32 %v227_v37  ;;  %v219_v24 = vmul.f32 0.015625, %v199_v58  ;;  %v278_v47 = vmul.f32 %v1295_v7, %v255_v55  ;;  %v460_v48 = vmul.f32 %v444_v31, %v300_v8 }
 0x139   :  { %v212_v14 = vmul.f32 0.015625, %v178_v29  ;;  %v903_v12 = vpop.eup %902  ;;  %926 = vrsqrt.f32 %v234_v54  ;;  %v285_v52 = vmul.f32 %v1295_v7, %v262_v1 }
 0x13a   :  { %v905_v45 = vpop.eup %904  ;;  %v235_v19 = vadd.f32 1e-05, %v219_v24  ;;  %v301_v46 = vadd.f32 %v1306_v44, %v278_v47  ;;  %v263_v38 = vmul.f32 %v903_v12, %v1098_v53  ;;  %928 = vrcp.f32 %v403_v4 }
 0x13b   :  { %v228_v43 = vadd.f32 1e-05, %v212_v14  ;;  %v907_v21 = vpop.eup %906  ;;  %v181_v33 = vpop.xlane.xlu1 %180  ;;  %v256_v26 = vmul.f32 %v905_v45, %v1108_v62  ;;  %v308_v55 = vadd.f32 %v1306_v44, %v285_v52  ;;  %v411_v24 = vadd.f32 1.0, %v901_v11 }
 0x13c   :  { %v202_v42 = vpop.xlane.xlu0 %201  ;;  %v909_v20 = vpop.eup %908  ;;  %930 = vrsqrt.f32 %v235_v19  ;;  %v213_v50 = vmul.f32 0.015625, %v181_v33  ;;  %v461_v15 = vmul.f32 %v445_v57, %v301_v46  ;;  %v286_v54 = vmul.f32 %v1295_v7, %v263_v38 }
 0x13d   :  { %v220_v25 = vmul.f32 0.015625, %v202_v42  ;;  %v911_v37 = vpop.eup %910  ;;  %932 = vrsqrt.f32 %v228_v43  ;;  %v279_v53 = vmul.f32 %v1295_v7, %v256_v26  ;;  %v455_v52 = vmul.f32 %v899_v60, %v777_v34 }
 0x13e   :  { %v913_v58 = vpop.eup %912  ;;  %v229_v29 = vadd.f32 1e-05, %v213_v50  ;;  %v476_v8 = vpack.c.bf16 %v461_v15, %v460_v48  ;;  %v257_v62 = vmul.f32 %v911_v37, %v1112_v63  ;;  %v309_v1 = vadd.f32 %v1306_v44, %v286_v54 }
 0x13f   :  { %v236_v31 = vadd.f32 1e-05, %v220_v25  ;;  %v205_v36 = vpop.xlane.xlu1 %204  ;;  %v302_v4 = vadd.f32 %v1306_v44, %v279_v53  ;;  %v264_v57 = vmul.f32 %v913_v58, %v1122_v6  ;;  %v915_v14 = vpop.eup %914  ;;  %v468_v63 = vmul.f32 %v1310_v3, %v308_v55 }
 0x140   :  { %934 = vrsqrt.f32 %v229_v29  ;;  %v221_v47 = vmul.f32 0.015625, %v205_v36  ;;  %820 = vmatprep.mubr.msk.bf16.mxu0 %vm60_vm0, %v476_v8  ;;  %v280_v12 = vmul.f32 %v1295_v7, %v257_v62  ;;  %v469_v19 = vmul.f32 %v1314_v2, %v309_v1 }
 0x141   :  { %v917_v45 = vpop.eup %916  ;;  %936 = vrsqrt.f32 %v236_v31  ;;  %v287_v43 = vmul.f32 %v1295_v7, %v264_v57  ;;  %v462_v16 = vmul.f32 %v1318_v5, %v302_v4 }
 0x142   :  { %v919_v6 = vpop.eup %918  ;;  %v237_v11 = vadd.f32 1e-05, %v221_v47  ;;  %v303_v46 = vadd.f32 %v1306_v44, %v280_v12  ;;  %v265_v38 = vmul.f32 %v917_v45, %v1126_v9  ;;  %938 = vrcp.f32 %v410_v10 }
 0x143   :  { %v921_v33 = vpop.eup %920  ;;  %v480_v42 = vpack.c.bf16 %v469_v19, %v468_v63  ;;  %v258_v34 = vmul.f32 %v919_v6, %v1136_v13  ;;  %940 = vrcp.f32 %v411_v24  ;;  %v310_v48 = vadd.f32 %v1306_v44, %v287_v43 }
 0x144   :  { %v923_v60 = vpop.eup %922  ;;  %942 = vrsqrt.f32 %v237_v11  ;;  %v463_v3 = vmul.f32 %v447_v0, %v303_v46  ;;  %v288_v2 = vmul.f32 %v1295_v7, %v265_v38  ;;  %v448_v13 = vmul.f32 %v907_v21, %v764_v39 }
 0x145   :  { %v925_v26 = vpop.eup %924  ;;  %828 = vmatprep.mubr.msk.bf16.mxu1 %vm60_vm0, %v480_v42  ;;  %v281_v9 = vmul.f32 %v1295_v7, %v258_v34  ;;  %v449_v0 = vmul.f32 %v909_v20, %v765_v40  ;;  %v470_v54 = vmul.f32 %v1329_v30, %v310_v48  ;;  %v457_v30 = vmul.f32 %v921_v33, %v781_v56 }
 0x146   :  { %v927_v10 = vpop.eup %926  ;;  %v477_v50 = vpack.c.bf16 %v463_v3, %v462_v16  ;;  %v311_v25 = vadd.f32 %v1306_v44, %v288_v2  ;;  %v259_v5 = vmul.f32 %v925_v26, %v1140_v17  ;;  %v450_v24 = vmul.f32 %v923_v60, %v768_v59 }
 0x147   :  { %v266_v15 = vmul.f32 %v927_v10, %v1150_v18  ;;  %v929_v37 = vpop.eup %928  ;;  %v304_v58 = vadd.f32 %v1306_v44, %v281_v9  ;;  %v456_v18 = vmul.f32 %v915_v14, %v780_v49  ;;  %v1546_v14 = vunpack.c.h.bf16 %v1268_v51  ;;  %v496_v9 = vld [vmem:[%s1541_s6 + $0x18] sm:$0xff]  ;;  %v503_v10 = vld [vmem:[%s1541_s6 + $0x50] sm:$0xff] }
 0x148   :  { %821 = vmatmul.mubr.msk.bf16.vlgmr.msra.gmra.mxu0 %vm60_vm0, %v477_v50  ;;  %v471_v55 = vmul.f32 %v455_v52, %v311_v25  ;;  %v282_v53 = vmul.f32 %v1295_v7, %v259_v5  ;;  %v1547_v51 = vunpack.c.l.bf16 %v1277_v61  ;;  %v1548_v46 = vunpack.c.h.bf16 %v1277_v61  ;;  %v495_v61 = vld [vmem:[%s1541_s6 + $0x10] sm:$0xff]  ;;  %v494_v5 = vld [vmem:[%s1541_s6 + $0x8] sm:$0xff] }
 0x149   :  { %v931_v29 = vpop.eup %930  ;;  %v289_v17 = vmul.f32 %v1295_v7, %v266_v15  ;;  %v464_v20 = vmul.f32 %v448_v13, %v304_v58  ;;  %v451_v47 = vmul.f32 %v929_v37, %v1546_v14  ;;  %v501_v13 = vld [vmem:[%s1541_s6 + $0x40] sm:$0xff] }
 0x14a   :  { %v933_v31 = vpop.eup %932  ;;  %v481_v39 = vpack.c.bf16 %v471_v55, %v470_v54  ;;  %v305_v35 = vadd.f32 %v1306_v44, %v282_v53  ;;  %v267_v40 = vmul.f32 %v931_v29, %v1154_v22  ;;  %v504_v55 = vld [vmem:[%s1541_s6 + $0x58] sm:$0xff] }
 0x14b   :  { %v260_v21 = vmul.f32 %v933_v31, %v1164_v23  ;;  %v312_v36 = vadd.f32 %v1306_v44, %v289_v17 }
 0x14c   :  { %829 = vmatmul.mubr.msk.bf16.vlgmr.msra.gmra.mxu1 %vm60_vm0, %v481_v39  ;;  %v465_v8 = vmul.f32 %v449_v0, %v305_v35  ;;  %v290_v62 = vmul.f32 %v1295_v7, %v267_v40  ;;  %v502_v39 = vld [vmem:[%s1541_s6 + $0x48] sm:$0xff] }
 0x14d   :  { %v935_v1 = vpop.eup %934  ;;  %v283_v4 = vmul.f32 %v1295_v7, %v260_v21  ;;  %v472_v52 = vmul.f32 %v456_v18, %v312_v36 }
 0x14e   :  { %v937_v22 = vpop.eup %936  ;;  %v478_v57 = vpack.c.bf16 %v465_v8, %v464_v20  ;;  %v313_v49 = vadd.f32 %v1306_v44, %v290_v62  ;;  %v261_v41 = vmul.f32 %v935_v1, %v1168_v27 }
 0x14f   :  { %v939_v56 = vpop.eup %938  ;;  %v268_v23 = vmul.f32 %v937_v22, %v1178_v28  ;;  %v306_v19 = vadd.f32 %v1306_v44, %v283_v4  ;;  %v499_v22 = vld [vmem:[%s1541_s6 + $0x30] sm:$0xff] }
 0x150   :  { %v941_v12 = vpop.eup %940  ;;  %824 = vmatprep.mubr.msk.bf16.mxu0 %vm60_vm0, %v478_v57  ;;  %v473_v45 = vmul.f32 %v457_v30, %v313_v49  ;;  %v284_v63 = vmul.f32 %v1295_v7, %v261_v41  ;;  %v458_v11 = vmul.f32 %v939_v56, %v1547_v51  ;;  %v497_v49 = vld [vmem:[%s1541_s6 + $0x20] sm:$0xff]  ;;  %v500_v56 = vld [vmem:[%s1541_s6 + $0x38] sm:$0xff] }
 0x151   :  { %v943_v43 = vpop.eup %942  ;;  %v291_v27 = vmul.f32 %v1295_v7, %v268_v23  ;;  %v459_v38 = vmul.f32 %v941_v12, %v1548_v46  ;;  %v466_v33 = vmul.f32 %v450_v24, %v306_v19  ;;  %v507_v23 = vld [vmem:[%s1541_s6 + $0x70] sm:$0xff]  ;;  %v505_v12 = vld [vmem:[%s1541_s6 + $0x60] sm:$0xff] }
 0x152   :  { %v269_v28 = vmul.f32 %v943_v43, %v1182_v32  ;;  %v482_v6 = vpack.c.bf16 %v473_v45, %v472_v52  ;;  %v307_v59 = vadd.f32 %v1306_v44, %v284_v63  ;;  %v508_v43 = vld [vmem:[%s1541_s6 + $0x78] sm:$0xff] }
 0x153   :  { %v314_v34 = vadd.f32 %v1306_v44, %v291_v27 }
 0x154   :  { %832 = vmatprep.mubr.msk.bf16.mxu1 %vm60_vm0, %v482_v6  ;;  %v467_v42 = vmul.f32 %v451_v47, %v307_v59  ;;  %v292_v16 = vmul.f32 %v1295_v7, %v269_v28  ;;  %v1408_v7 = vstv %s1540_s0  ;;  %v498_v47 = vld [vmem:[%s1541_s6 + $0x28] sm:$0xff] }
 0x155   :  { %v474_v3 = vmul.f32 %v458_v11, %v314_v34  ;;  %v512_v26 = vmul.f32 %v1408_v7, %v495_v61  ;;  %v513_v15 = vmul.f32 %v1408_v7, %v496_v9  ;;  %v520_v37 = vmul.f32 %v1408_v7, %v503_v10  ;;  %v506_v11 = vld [vmem:[%s1541_s6 + $0x68] sm:$0xff] }
 0x156   :  { %v479_v60 = vpack.c.bf16 %v467_v42, %v466_v33  ;;  %v315_v32 = vadd.f32 %v1306_v44, %v292_v16  ;;  %v493_v44 = vld [vmem:[%s1541_s6] sm:$0xff]  ;;  %v511_v58 = vmul.f32 %v1408_v7, %v494_v5  ;;  %v518_v29 = vmul.f32 %v1408_v7, %v501_v13 }
 0x157   :  { %v510_v50 = vmul.f32 %v1408_v7, %v493_v44  ;;  %v521_v18 = vmul.f32 %v1408_v7, %v504_v55  ;;  %v519_v62 = vmul.f32 %v1408_v7, %v502_v39  ;;  %v516_v41 = vmul.f32 %v1408_v7, %v499_v22 }
 0x158   :  { %825 = vmatmul.mubr.msk.bf16.gmra.mxu0 %vm60_vm0, %v479_v60  ;;  %v475_v2 = vmul.f32 %v459_v38, %v315_v32  ;;  %v514_v24 = vmul.f32 %v1408_v7, %v497_v49  ;;  %v517_v45 = vmul.f32 %v1408_v7, %v500_v56  ;;  %v524_v63 = vmul.f32 %v1408_v7, %v507_v23 }
 0x159   :  { %v515_v28 = vmul.f32 %v1408_v7, %v498_v47  ;;  %v522_v6 = vmul.f32 %v1408_v7, %v505_v12  ;;  %v525_v33 = vmul.f32 %v1408_v7, %v508_v43  ;;  %v523_v32 = vmul.f32 %v1408_v7, %v506_v11 }
 0x15a   :  { %v483_v48 = vpack.c.bf16 %v475_v2, %v474_v3 }
 0x15c   :  { %833 = vmatmul.mubr.msk.bf16.gmra.mxu1 %vm60_vm0, %v483_v48 }
 0x208   :  { %v822_v25 = vpop.f32.mrf.mxu0 }
 0x209   :  { %v617_v0 = vadd.f32 %v822_v25, %v512_v26 }
 0x20a   :  { %v608_v54 = vpop.f32.mrf.mxu0 }
 0x20b   :  { %674 = vst.msk [vmem:[%s1542_s7 + $0x10] sm:$0xff] %vm671_vm1, %v617_v0  ;;  %v609_v53 = vadd.f32 %v608_v54, %v510_v50 }
 0x20c   :  { %v823_v17 = vpop.f32.mrf.mxu0  ;;  %v830_v31 = vpop.f32.mrf.mxu1 }
 0x20d   :  { %672 = vst.msk [vmem:[%s1542_s7] sm:$0xff] %vm671_vm1, %v609_v53  ;;  %v620_v35 = vadd.f32 %v823_v17, %v513_v15  ;;  %v649_v40 = vadd.f32 %v830_v31, %v520_v37 }
 0x20e   :  { %v611_v30 = vpop.f32.mrf.mxu0  ;;  %v640_v21 = vpop.f32.mrf.mxu1 }
 0x20f   :  { %675 = vst.msk [vmem:[%s1542_s7 + $0x18] sm:$0xff] %vm671_vm1, %v620_v35  ;;  %682 = vst.msk [vmem:[%s1542_s7 + $0x50] sm:$0xff] %vm671_vm1, %v649_v40  ;;  %v612_v20 = vadd.f32 %v611_v30, %v511_v58  ;;  %v641_v8 = vadd.f32 %v640_v21, %v518_v29 }
 0x210   :  { %v831_v36 = vpop.f32.mrf.mxu1 }
 0x211   :  { %673 = vst.msk [vmem:[%s1542_s7 + $0x8] sm:$0xff] %vm671_vm1, %v612_v20  ;;  %680 = vst.msk [vmem:[%s1542_s7 + $0x40] sm:$0xff] %vm671_vm1, %v641_v8  ;;  %v652_v1 = vadd.f32 %v831_v36, %v521_v18 }
 0x212   :  { %v643_v4 = vpop.f32.mrf.mxu1 }
 0x213   :  { %683 = vst.msk [vmem:[%s1542_s7 + $0x58] sm:$0xff] %vm671_vm1, %v652_v1  ;;  %v644_v57 = vadd.f32 %v643_v4, %v519_v62 }
 0x215   :  { %681 = vst.msk [vmem:[%s1542_s7 + $0x48] sm:$0xff] %vm671_vm1, %v644_v57 }
 0x218   :  { %v826_v14 = vpop.f32.mrf.mxu0 }
 0x219   :  { %v633_v52 = vadd.f32 %v826_v14, %v516_v41 }
 0x21a   :  { %v624_v19 = vpop.f32.mrf.mxu0 }
 0x21b   :  { %678 = vst.msk [vmem:[%s1542_s7 + $0x30] sm:$0xff] %vm671_vm1, %v633_v52  ;;  %v625_v27 = vadd.f32 %v624_v19, %v514_v24 }
 0x21c   :  { %v827_v59 = vpop.f32.mrf.mxu0  ;;  %v834_v51 = vpop.f32.mrf.mxu1 }
 0x21d   :  { %676 = vst.msk [vmem:[%s1542_s7 + $0x20] sm:$0xff] %vm671_vm1, %v625_v27  ;;  %v636_v46 = vadd.f32 %v827_v59, %v517_v45  ;;  %v665_v38 = vadd.f32 %v834_v51, %v524_v63 }
 0x21e   :  { %v627_v42 = vpop.f32.mrf.mxu0  ;;  %v656_v16 = vpop.f32.mrf.mxu1 }
 0x21f   :  { %679 = vst.msk [vmem:[%s1542_s7 + $0x38] sm:$0xff] %vm671_vm1, %v636_v46  ;;  %686 = vst.msk [vmem:[%s1542_s7 + $0x70] sm:$0xff] %vm671_vm1, %v665_v38  ;;  %v628_v34 = vadd.f32 %v627_v42, %v515_v28  ;;  %v657_v60 = vadd.f32 %v656_v16, %v522_v6 }
 0x220   :  { %v835_v3 = vpop.f32.mrf.mxu1 }
 0x221   :  { %677 = vst.msk [vmem:[%s1542_s7 + $0x28] sm:$0xff] %vm671_vm1, %v628_v34  ;;  %684 = vst.msk [vmem:[%s1542_s7 + $0x60] sm:$0xff] %vm671_vm1, %v657_v60  ;;  %v668_v2 = vadd.f32 %v835_v3, %v525_v33 }
 0x222   :  { %v659_v48 = vpop.f32.mrf.mxu1 }
 0x223   :  { %687 = vst.msk [vmem:[%s1542_s7 + $0x78] sm:$0xff] %vm671_vm1, %v668_v2  ;;  %v660_v61 = vadd.f32 %v659_v48, %v523_v32 }
 0x225   :  { %685 = vst.msk [vmem:[%s1542_s7 + $0x68] sm:$0xff] %vm671_vm1, %v660_v61 }

// kernel: cascaded_vmamba_block.17
= control target key start
LH: loop header
LB: loop body
LE: loop exit
PB: predicated region body
PF: predicated region fallthrough
CT: control target
= control target key end

     0   :  { %vm88_vm0 = vcmask 523264   ;;  %s822_s0 = inlined_call_operand.<no memory space> [shape: f32[1,1], index: 0, kind: input, shape index: {}]   ;;  %s823_s1 = inlined_call_operand.vmem [shape: f32[128,64], index: 1, kind: input, shape index: {}]   ;;  %s824_s2 = inlined_call_operand.vmem [shape: f32[128,64], index: 2, kind: input, shape index: {}]   ;;  %s825_s3 = inlined_call_operand.vmem [shape: f32[1,64], index: 3, kind: input, shape index: {}]   ;;  %s826_s4 = inlined_call_operand.vmem [shape: f32[1,64], index: 4, kind: input, shape index: {}]   ;;  %s827_s5 = inlined_call_operand.hbm [shape: f32[128,64], index: 5, kind: output, shape index: {}]  }
   0x1   :  { %v23_v0 = vld [vmem:[%s823_s1] sm:$0xff]  ;;  %v474_v1 = vstv %s822_s0  ;;  %v25_v3 = vld [vmem:[%s823_s1 + $0x10] sm:$0xff]  ;;  %v24_v7 = vld [vmem:[%s823_s1 + $0x8] sm:$0xff] }
   0x2   :  { %v56_v2 = vld [vmem:[%s824_s2] sm:$0xff]  ;;  %v40_v4 = vmul.f32 %v474_v1, %v23_v0  ;;  %v42_v5 = vmul.f32 %v474_v1, %v25_v3  ;;  %v58_v6 = vld [vmem:[%s824_s2 + $0x10] sm:$0xff]  ;;  %v57_v8 = vld [vmem:[%s824_s2 + $0x8] sm:$0xff]  ;;  %v41_v9 = vmul.f32 %v474_v1, %v24_v7 }
   0x3   :  { %v26_v10 = vld [vmem:[%s823_s1 + $0x18] sm:$0xff]  ;;  %v27_v12 = vld [vmem:[%s823_s1 + $0x20] sm:$0xff]  ;;  %v28_v18 = vld [vmem:[%s823_s1 + $0x28] sm:$0xff] }
   0x4   :  { %v59_v11 = vld [vmem:[%s824_s2 + $0x18] sm:$0xff]  ;;  %v503_v13 = vadd.f32 %v56_v2, %v40_v4  ;;  %v505_v14 = vadd.f32 %v58_v6, %v42_v5  ;;  %v43_v15 = vmul.f32 %v474_v1, %v26_v10  ;;  %v44_v16 = vmul.f32 %v474_v1, %v27_v12  ;;  %v60_v17 = vld [vmem:[%s824_s2 + $0x20] sm:$0xff]  ;;  %v61_v21 = vld [vmem:[%s824_s2 + $0x28] sm:$0xff] }
   0x5   :  { %v515_v19 = vadd.f32 %v57_v8, %v41_v9  ;;  %v45_v20 = vmul.f32 %v474_v1, %v28_v18  ;;  %v29_v22 = vld [vmem:[%s823_s1 + $0x30] sm:$0xff]  ;;  %v30_v23 = vld [vmem:[%s823_s1 + $0x38] sm:$0xff]  ;;  %v31_v33 = vld [vmem:[%s823_s1 + $0x40] sm:$0xff] }
   0x6   :  { %v89_v24 = vsel %vm88_vm0, %v503_v13, 0.0  ;;  %v95_v25 = vsel %vm88_vm0, %v505_v14, 0.0  ;;  %v531_v26 = vadd.f32 %v59_v11, %v43_v15  ;;  %v535_v28 = vadd.f32 %v60_v17, %v44_v16  ;;  %v62_v34 = vld [vmem:[%s824_s2 + $0x30] sm:$0xff]  ;;  %v63_v35 = vld [vmem:[%s824_s2 + $0x38] sm:$0xff]  ;;  %v32_v36 = vld [vmem:[%s823_s1 + $0x48] sm:$0xff] }
   0x7   :  { %90 = vadd.xlane.f32.xlu0 %v89_v24  ;;  %96 = vadd.xlane.f32.xlu1 %v95_v25  ;;  %v92_v27 = vsel %vm88_vm0, %v515_v19, 0.0  ;;  %v539_v30 = vadd.f32 %v61_v21, %v45_v20  ;;  %v46_v31 = vmul.f32 %v474_v1, %v29_v22  ;;  %v47_v32 = vmul.f32 %v474_v1, %v30_v23 }
   0x8   :  { %v98_v29 = vsel %vm88_vm0, %v531_v26, 0.0  ;;  %v101_v37 = vsel %vm88_vm0, %v535_v28, 0.0  ;;  %v48_v38 = vmul.f32 %v474_v1, %v31_v33 }
   0xb   :  { %93 = vadd.xlane.f32.xlu0 %v92_v27  ;;  %99 = vadd.xlane.f32.xlu1 %v98_v29 }
   0xc   :  { %11 = vsyncpa [#allocation4], 0  ;;  %v104_v39 = vsel %vm88_vm0, %v539_v30, 0.0  ;;  %v560_v40 = vadd.f32 %v62_v34, %v46_v31  ;;  %v562_v41 = vadd.f32 %v63_v35, %v47_v32  ;;  %v64_v42 = vld [vmem:[%s824_s2 + $0x40] sm:$0xff]  ;;  %v49_v43 = vmul.f32 %v474_v1, %v32_v36  ;;  %v33_v44 = vld [vmem:[%s823_s1 + $0x50] sm:$0xff] }
   0xd   :  { %v65_v45 = vld [vmem:[%s824_s2 + $0x48] sm:$0xff]  ;;  %v34_v46 = vld [vmem:[%s823_s1 + $0x58] sm:$0xff]  ;;  %v577_v47 = vadd.f32 %v64_v42, %v48_v38  ;;  %v50_v48 = vmul.f32 %v474_v1, %v33_v44  ;;  %v66_v52 = vld [vmem:[%s824_s2 + $0x50] sm:$0xff] }
   0xe   :  { %v107_v49 = vsel %vm88_vm0, %v560_v40, 0.0  ;;  %v110_v50 = vsel %vm88_vm0, %v562_v41, 0.0  ;;  %v584_v51 = vadd.f32 %v65_v45, %v49_v43  ;;  %v51_v53 = vmul.f32 %v474_v1, %v34_v46  ;;  %v35_v54 = vld [vmem:[%s823_s1 + $0x60] sm:$0xff]  ;;  %v67_v55 = vld [vmem:[%s824_s2 + $0x58] sm:$0xff]  ;;  %v36_v56 = vld [vmem:[%s823_s1 + $0x68] sm:$0xff] }
   0xf   :  { %102 = vadd.xlane.f32.xlu0 %v101_v37  ;;  %105 = vadd.xlane.f32.xlu1 %v104_v39  ;;  %v599_v57 = vadd.f32 %v66_v52, %v50_v48  ;;  %v52_v58 = vmul.f32 %v474_v1, %v35_v54  ;;  %v113_v59 = vsel %vm88_vm0, %v577_v47, 0.0  ;;  %v68_v62 = vld [vmem:[%s824_s2 + $0x60] sm:$0xff]  ;;  %v53_v63 = vmul.f32 %v474_v1, %v36_v56  ;;  %v69_v0 = vld [vmem:[%s824_s2 + $0x68] sm:$0xff]  ;;  %v37_v2 = vld [vmem:[%s823_s1 + $0x70] sm:$0xff] }
  0x10   :  { %v116_v60 = vsel %vm88_vm0, %v584_v51, 0.0  ;;  %v606_v61 = vadd.f32 %v67_v55, %v51_v53  ;;  %v38_v3 = vld [vmem:[%s823_s1 + $0x78] sm:$0xff]  ;;  %v54_v8 = vmul.f32 %v474_v1, %v37_v2  ;;  %v70_v10 = vld [vmem:[%s824_s2 + $0x70] sm:$0xff] }
  0x11   :  { %v119_v4 = vsel %vm88_vm0, %v599_v57, 0.0  ;;  %v623_v5 = vadd.f32 %v68_v62, %v52_v58  ;;  %v627_v7 = vadd.f32 %v69_v0, %v53_v63  ;;  %v55_v9 = vmul.f32 %v474_v1, %v38_v3  ;;  %v71_v11 = vld [vmem:[%s824_s2 + $0x78] sm:$0xff] }
  0x12   :  { %v122_v6 = vsel %vm88_vm0, %v606_v61, 0.0  ;;  %v641_v16 = vadd.f32 %v70_v10, %v54_v8 }
  0x13   :  { %108 = vadd.xlane.f32.xlu0 %v107_v49  ;;  %111 = vadd.xlane.f32.xlu1 %v110_v50  ;;  %v125_v12 = vsel %vm88_vm0, %v623_v5, 0.0  ;;  %v128_v15 = vsel %vm88_vm0, %v627_v7, 0.0  ;;  %v643_v17 = vadd.f32 %v71_v11, %v55_v9 }
  0x14   :  { %v131_v1 = vsel %vm88_vm0, %v641_v16, 0.0 }
  0x15   :  { %v134_v18 = vsel %vm88_vm0, %v643_v17, 0.0 }
  0x17   :  { %114 = vadd.xlane.f32.xlu0 %v113_v59  ;;  %117 = vadd.xlane.f32.xlu1 %v116_v60 }
  0x1b   :  { %120 = vadd.xlane.f32.xlu0 %v119_v4  ;;  %123 = vadd.xlane.f32.xlu1 %v122_v6 }
  0x1f   :  { %126 = vadd.xlane.f32.xlu0 %v125_v12  ;;  %129 = vadd.xlane.f32.xlu1 %v128_v15 }
  0x23   :  { %132 = vadd.xlane.f32.xlu0 %v131_v1  ;;  %135 = vadd.xlane.f32.xlu1 %v134_v18 }
  0x90   :  { %v91_v20 = vpop.xlane.xlu0 %90  ;;  %v97_v21 = vpop.xlane.xlu1 %96 }
  0x91   :  { %v138_v22 = vmul.f32 0.015625, %v91_v20  ;;  %v140_v23 = vmul.f32 0.015625, %v97_v21 }
  0x93   :  { %v650_v24 = vsub.f32 %v503_v13, %v138_v22  ;;  %v653_v25 = vsub.f32 %v505_v14, %v140_v23 }
  0x94   :  { %v94_v27 = vpop.xlane.xlu0 %93  ;;  %v100_v29 = vpop.xlane.xlu1 %99 }
  0x95   :  { %v139_v31 = vmul.f32 0.015625, %v94_v27  ;;  %v141_v32 = vmul.f32 0.015625, %v100_v29  ;;  %v170_v33 = vmul.f32 %v650_v24, %v650_v24  ;;  %v172_v34 = vmul.f32 %v653_v25, %v653_v25 }
  0x97   :  { %v660_v35 = vsub.f32 %v515_v19, %v139_v31  ;;  %v663_v36 = vsub.f32 %v531_v26, %v141_v32  ;;  %v186_v13 = vsel %vm88_vm0, %v170_v33, 0.0  ;;  %v192_v38 = vsel %vm88_vm0, %v172_v34, 0.0 }
  0x98   :  { %187 = vadd.xlane.f32.xlu0 %v186_v13  ;;  %v103_v14 = vpop.xlane.xlu0 %102  ;;  %v106_v37 = vpop.xlane.xlu1 %105 }
  0x99   :  { %v142_v39 = vmul.f32 0.015625, %v103_v14  ;;  %v143_v42 = vmul.f32 0.015625, %v106_v37  ;;  %v171_v43 = vmul.f32 %v660_v35, %v660_v35  ;;  %v173_v44 = vmul.f32 %v663_v36, %v663_v36 }
  0x9b   :  { %v672_v19 = vsub.f32 %v535_v28, %v142_v39  ;;  %v675_v26 = vsub.f32 %v539_v30, %v143_v42  ;;  %v189_v45 = vsel %vm88_vm0, %v171_v43, 0.0  ;;  %v195_v49 = vsel %vm88_vm0, %v173_v44, 0.0 }
  0x9c   :  { %193 = vadd.xlane.f32.xlu0 %v192_v38  ;;  %190 = vadd.xlane.f32.xlu1 %v189_v45  ;;  %v109_v46 = vpop.xlane.xlu0 %108  ;;  %v112_v48 = vpop.xlane.xlu1 %111 }
  0x9d   :  { %v144_v50 = vmul.f32 0.015625, %v109_v46  ;;  %v145_v52 = vmul.f32 0.015625, %v112_v48  ;;  %v174_v53 = vmul.f32 %v672_v19, %v672_v19  ;;  %v175_v28 = vmul.f32 %v675_v26, %v675_v26 }
  0x9f   :  { %v684_v54 = vsub.f32 %v560_v40, %v144_v50  ;;  %v687_v30 = vsub.f32 %v562_v41, %v145_v52  ;;  %v198_v55 = vsel %vm88_vm0, %v174_v53, 0.0  ;;  %v201_v59 = vsel %vm88_vm0, %v175_v28, 0.0 }
  0xa0   :  { %196 = vadd.xlane.f32.xlu1 %v195_v49  ;;  %199 = vadd.xlane.f32.xlu0 %v198_v55  ;;  %v115_v56 = vpop.xlane.xlu0 %114  ;;  %v118_v58 = vpop.xlane.xlu1 %117 }
  0xa1   :  { %v146_v60 = vmul.f32 0.015625, %v115_v56  ;;  %v147_v62 = vmul.f32 0.015625, %v118_v58  ;;  %v176_v63 = vmul.f32 %v684_v54, %v684_v54  ;;  %v177_v40 = vmul.f32 %v687_v30, %v687_v30 }
  0xa3   :  { %v696_v0 = vsub.f32 %v577_v47, %v146_v60  ;;  %v699_v41 = vsub.f32 %v584_v51, %v147_v62  ;;  %v204_v2 = vsel %vm88_vm0, %v176_v63, 0.0  ;;  %v207_v6 = vsel %vm88_vm0, %v177_v40, 0.0 }
  0xa4   :  { %202 = vadd.xlane.f32.xlu1 %v201_v59  ;;  %205 = vadd.xlane.f32.xlu0 %v204_v2  ;;  %v121_v3 = vpop.xlane.xlu0 %120  ;;  %v124_v4 = vpop.xlane.xlu1 %123 }
  0xa5   :  { %v148_v8 = vmul.f32 0.015625, %v121_v3  ;;  %v149_v9 = vmul.f32 0.015625, %v124_v4  ;;  %v178_v10 = vmul.f32 %v696_v0, %v696_v0  ;;  %v179_v47 = vmul.f32 %v699_v41, %v699_v41 }
  0xa7   :  { %v708_v11 = vsub.f32 %v599_v57, %v148_v8  ;;  %v711_v51 = vsub.f32 %v606_v61, %v149_v9  ;;  %v210_v12 = vsel %vm88_vm0, %v178_v10, 0.0  ;;  %v213_v18 = vsel %vm88_vm0, %v179_v47, 0.0 }
  0xa8   :  { %208 = vadd.xlane.f32.xlu1 %v207_v6  ;;  %211 = vadd.xlane.f32.xlu0 %v210_v12  ;;  %v127_v15 = vpop.xlane.xlu0 %126  ;;  %v130_v1 = vpop.xlane.xlu1 %129  ;;  %v748_v12 = vld [vmem:[%s825_s3] ss:$0 sm:$0xff]  ;;  %s435_s3 = smov [#allocation3]  }
  0xa9   :  { %v150_v20 = vmul.f32 0.015625, %v127_v15  ;;  %v151_v21 = vmul.f32 0.015625, %v130_v1  ;;  %v180_v22 = vmul.f32 %v708_v11, %v708_v11  ;;  %v181_v57 = vmul.f32 %v711_v51, %v711_v51 }
  0xab   :  { %v720_v23 = vsub.f32 %v623_v5, %v150_v20  ;;  %v723_v61 = vsub.f32 %v627_v7, %v151_v21  ;;  %v216_v27 = vsel %vm88_vm0, %v180_v22, 0.0  ;;  %v219_v32 = vsel %vm88_vm0, %v181_v57, 0.0  ;;  %v754_v20 = vld [vmem:[%s826_s4] ss:$0 sm:$0xff]  ;;  %s365_s4 = sshll.u32 %s435_s3, 4  ;;  %s366_s4 = int_to_ptr.vmem [resolvable:$true] %s365_s4 }
  0xac   :  { %214 = vadd.xlane.f32.xlu1 %v213_v18  ;;  %217 = vadd.xlane.f32.xlu0 %v216_v27  ;;  %v133_v29 = vpop.xlane.xlu0 %132  ;;  %v136_v31 = vpop.xlane.xlu1 %135  ;;  %s413_s8 = scalar_lea.vmem %s366_s4, 2048  ;;  %p418_p1 = scmp.lt.s32.totalorder %s366_s4, %s366_s4 }
  0xad   :  { %v152_v33 = vmul.f32 0.015625, %v133_v29  ;;  %v153_v34 = vmul.f32 0.015625, %v136_v31  ;;  %v182_v13 = vmul.f32 %v720_v23, %v720_v23  ;;  %v183_v5 = vmul.f32 %v723_v61, %v723_v61  ;;  %p414_p0 = scmp.ne.s32.totalorder %s366_s4, %s413_s8  ;;  %p419_p2 = scmp.lt.s32.totalorder %s413_s8, %s413_s8 }
  0xaf   :  { %v732_v14 = vsub.f32 %v641_v16, %v152_v33  ;;  %v735_v7 = vsub.f32 %v643_v17, %v153_v34  ;;  %v222_v37 = vsel %vm88_vm0, %v182_v13, 0.0  ;;  %v225_v38 = vsel %vm88_vm0, %v183_v5, 0.0  ;;  %p420_p3 = por %p419_p2, %p418_p1 }
  0xb0   :  { %220 = vadd.xlane.f32.xlu1 %v219_v32  ;;  %223 = vadd.xlane.f32.xlu0 %v222_v37 }
  0xb1   :  { %v184_v39 = vmul.f32 %v732_v14, %v732_v14  ;;  %v185_v42 = vmul.f32 %v735_v7, %v735_v7  ;;  %p421_p4 = pnand %p420_p3, %p414_p0 }
  0xb3   :  { %v228_v43 = vsel %vm88_vm0, %v184_v39, 0.0  ;;  %v231_v16 = vsel %vm88_vm0, %v185_v42, 0.0 }
  0xb4   :  { %226 = vadd.xlane.f32.xlu1 %v225_v38  ;;  %229 = vadd.xlane.f32.xlu0 %v228_v43 }
  0xb8   :  { %232 = vadd.xlane.f32.xlu1 %v231_v16 }
 0x121   :  { %v188_v17 = vpop.xlane.xlu0 %187 }
 0x122   :  { %v234_v44 = vmul.f32 0.015625, %v188_v17 }
 0x124   :  { %v250_v45 = vadd.f32 1e-05, %v234_v44 }
 0x125   :  { %v191_v46 = vpop.xlane.xlu1 %190  ;;  %v194_v48 = vpop.xlane.xlu0 %193 }
 0x126   :  { %381 = vrsqrt.f32 %v250_v45  ;;  %v235_v49 = vmul.f32 0.015625, %v191_v46  ;;  %v236_v50 = vmul.f32 0.015625, %v194_v48 }
 0x128   :  { %v251_v52 = vadd.f32 1e-05, %v235_v49  ;;  %v252_v53 = vadd.f32 1e-05, %v236_v50 }
 0x129   :  { %v197_v28 = vpop.xlane.xlu1 %196  ;;  %v200_v55 = vpop.xlane.xlu0 %199 }
 0x12a   :  { %383 = vrsqrt.f32 %v251_v52  ;;  %v237_v56 = vmul.f32 0.015625, %v197_v28  ;;  %v238_v58 = vmul.f32 0.015625, %v200_v55 }
 0x12b   :  { %385 = vrsqrt.f32 %v252_v53 }
 0x12c   :  { %v253_v59 = vadd.f32 1e-05, %v237_v56  ;;  %v254_v60 = vadd.f32 1e-05, %v238_v58 }
 0x12d   :  { %v203_v62 = vpop.xlane.xlu1 %202  ;;  %v206_v63 = vpop.xlane.xlu0 %205 }
 0x12e   :  { %387 = vrsqrt.f32 %v253_v59  ;;  %v239_v40 = vmul.f32 0.015625, %v203_v62  ;;  %v240_v2 = vmul.f32 0.015625, %v206_v63 }
 0x12f   :  { %389 = vrsqrt.f32 %v254_v60 }
 0x130   :  { %v255_v3 = vadd.f32 1e-05, %v239_v40  ;;  %v256_v4 = vadd.f32 1e-05, %v240_v2 }
 0x131   :  { %v209_v6 = vpop.xlane.xlu1 %208  ;;  %v212_v8 = vpop.xlane.xlu0 %211 }
 0x132   :  { %391 = vrsqrt.f32 %v255_v3  ;;  %v241_v9 = vmul.f32 0.015625, %v209_v6  ;;  %v242_v10 = vmul.f32 0.015625, %v212_v8 }
 0x133   :  { %v382_v47 = vpop.eup %381  ;;  %393 = vrsqrt.f32 %v256_v4 }
 0x134   :  { %v282_v15 = vmul.f32 %v382_v47, %v650_v24  ;;  %v257_v1 = vadd.f32 1e-05, %v241_v9  ;;  %v258_v18 = vadd.f32 1e-05, %v242_v10 }
 0x135   :  { %v215_v21 = vpop.xlane.xlu1 %214  ;;  %v218_v22 = vpop.xlane.xlu0 %217 }
 0x136   :  { %v305_v57 = vmul.f32 %v748_v12, %v282_v15  ;;  %395 = vrsqrt.f32 %v257_v1  ;;  %v243_v27 = vmul.f32 0.015625, %v215_v21  ;;  %v244_v29 = vmul.f32 0.015625, %v218_v22 }
 0x137   :  { %v384_v31 = vpop.eup %383  ;;  %397 = vrsqrt.f32 %v258_v18 }
 0x138   :  { %v386_v32 = vpop.eup %385  ;;  %v328_v33 = vadd.f32 %v754_v20, %v305_v57  ;;  %v283_v24 = vmul.f32 %v384_v31, %v660_v35  ;;  %v259_v34 = vadd.f32 1e-05, %v243_v27  ;;  %v260_v13 = vadd.f32 1e-05, %v244_v29 }
 0x139   :  { %v284_v5 = vmul.f32 %v386_v32, %v653_v25  ;;  %v221_v37 = vpop.xlane.xlu1 %220  ;;  %v224_v38 = vpop.xlane.xlu0 %223 }
 0x13a   :  { %344 = vst.msk [vmem:[#allocation3] sm:$0xff] %vm88_vm0, %v328_v33  ;;  %v306_v39 = vmul.f32 %v748_v12, %v283_v24  ;;  %399 = vrsqrt.f32 %v259_v34  ;;  %v245_v42 = vmul.f32 0.015625, %v221_v37  ;;  %v246_v43 = vmul.f32 0.015625, %v224_v38 }
 0x13b   :  { %v388_v16 = vpop.eup %387  ;;  %v307_v17 = vmul.f32 %v748_v12, %v284_v5  ;;  %401 = vrsqrt.f32 %v260_v13 }
 0x13c   :  { %v390_v44 = vpop.eup %389  ;;  %v329_v35 = vadd.f32 %v754_v20, %v306_v39  ;;  %v285_v45 = vmul.f32 %v388_v16, %v663_v36  ;;  %v261_v46 = vadd.f32 1e-05, %v245_v42  ;;  %v262_v25 = vadd.f32 1e-05, %v246_v43 }
 0x13d   :  { %v330_v48 = vadd.f32 %v754_v20, %v307_v17  ;;  %v286_v49 = vmul.f32 %v390_v44, %v672_v19  ;;  %v227_v50 = vpop.xlane.xlu1 %226  ;;  %v230_v52 = vpop.xlane.xlu0 %229 }
 0x13e   :  { %345 = vst.msk [vmem:[#allocation3 + $0x8] sm:$0xff] %vm88_vm0, %v329_v35  ;;  %v308_v53 = vmul.f32 %v748_v12, %v285_v45  ;;  %403 = vrsqrt.f32 %v261_v46  ;;  %v247_v28 = vmul.f32 0.015625, %v227_v50  ;;  %v248_v55 = vmul.f32 0.015625, %v230_v52 }
 0x13f   :  { %v392_v56 = vpop.eup %391  ;;  %346 = vst.msk [vmem:[#allocation3 + $0x10] sm:$0xff] %vm88_vm0, %v330_v48  ;;  %v309_v36 = vmul.f32 %v748_v12, %v286_v49  ;;  %405 = vrsqrt.f32 %v262_v25 }
 0x140   :  { %v394_v58 = vpop.eup %393  ;;  %v331_v59 = vadd.f32 %v754_v20, %v308_v53  ;;  %v287_v19 = vmul.f32 %v392_v56, %v675_v26  ;;  %v263_v60 = vadd.f32 1e-05, %v247_v28  ;;  %v264_v62 = vadd.f32 1e-05, %v248_v55 }
 0x141   :  { %v332_v63 = vadd.f32 %v754_v20, %v309_v36  ;;  %v288_v40 = vmul.f32 %v394_v58, %v684_v54  ;;  %v233_v2 = vpop.xlane.xlu1 %232 }
 0x142   :  { %347 = vst.msk [vmem:[#allocation3 + $0x18] sm:$0xff] %vm88_vm0, %v331_v59  ;;  %v310_v3 = vmul.f32 %v748_v12, %v287_v19  ;;  %407 = vrsqrt.f32 %v263_v60  ;;  %v249_v4 = vmul.f32 0.015625, %v233_v2 }
 0x143   :  { %v396_v6 = vpop.eup %395  ;;  %348 = vst.msk [vmem:[#allocation3 + $0x20] sm:$0xff] %vm88_vm0, %v332_v63  ;;  %v311_v8 = vmul.f32 %v748_v12, %v288_v40  ;;  %409 = vrsqrt.f32 %v264_v62 }
 0x144   :  { %v398_v26 = vpop.eup %397  ;;  %v333_v9 = vadd.f32 %v754_v20, %v310_v3  ;;  %v289_v10 = vmul.f32 %v396_v6, %v687_v30  ;;  %v265_v47 = vadd.f32 1e-05, %v249_v4 }
 0x145   :  { %v334_v54 = vadd.f32 %v754_v20, %v311_v8  ;;  %v290_v15 = vmul.f32 %v398_v26, %v696_v0 }
 0x146   :  { %349 = vst.msk [vmem:[#allocation3 + $0x28] sm:$0xff] %vm88_vm0, %v333_v9  ;;  %v312_v1 = vmul.f32 %v748_v12, %v289_v10  ;;  %411 = vrsqrt.f32 %v265_v47 }
 0x147   :  { %v400_v18 = vpop.eup %399  ;;  %350 = vst.msk [vmem:[#allocation3 + $0x30] sm:$0xff] %vm88_vm0, %v334_v54  ;;  %v313_v21 = vmul.f32 %v748_v12, %v290_v15 }
 0x148   :  { %v402_v22 = vpop.eup %401  ;;  %v335_v57 = vadd.f32 %v754_v20, %v312_v1  ;;  %v291_v30 = vmul.f32 %v400_v18, %v699_v41 }
 0x149   :  { %v336_v27 = vadd.f32 %v754_v20, %v313_v21  ;;  %v292_v29 = vmul.f32 %v402_v22, %v708_v11 }
 0x14a   :  { %351 = vst.msk [vmem:[#allocation3 + $0x38] sm:$0xff] %vm88_vm0, %v335_v57  ;;  %v314_v0 = vmul.f32 %v748_v12, %v291_v30 }
 0x14b   :  { %v404_v31 = vpop.eup %403  ;;  %352 = vst.msk [vmem:[#allocation3 + $0x40] sm:$0xff] %vm88_vm0, %v336_v27  ;;  %v315_v32 = vmul.f32 %v748_v12, %v292_v29 }
 0x14c   :  { %v406_v33 = vpop.eup %405  ;;  %v337_v24 = vadd.f32 %v754_v20, %v314_v0  ;;  %v293_v34 = vmul.f32 %v404_v31, %v711_v51 }
 0x14d   :  { %v338_v41 = vadd.f32 %v754_v20, %v315_v32  ;;  %v294_v13 = vmul.f32 %v406_v33, %v720_v23 }
 0x14e   :  { %353 = vst.msk [vmem:[#allocation3 + $0x48] sm:$0xff] %vm88_vm0, %v337_v24  ;;  %v316_v11 = vmul.f32 %v748_v12, %v293_v34 }
 0x14f   :  { %v408_v5 = vpop.eup %407  ;;  %354 = vst.msk [vmem:[#allocation3 + $0x50] sm:$0xff] %vm88_vm0, %v338_v41  ;;  %v317_v37 = vmul.f32 %v748_v12, %v294_v13 }
 0x150   :  { %v410_v38 = vpop.eup %409  ;;  %v339_v39 = vadd.f32 %v754_v20, %v316_v11  ;;  %v295_v42 = vmul.f32 %v408_v5, %v723_v61 }
 0x151   :  { %v340_v51 = vadd.f32 %v754_v20, %v317_v37  ;;  %v296_v43 = vmul.f32 %v410_v38, %v732_v14 }
 0x152   :  { %355 = vst.msk [vmem:[#allocation3 + $0x58] sm:$0xff] %vm88_vm0, %v339_v39  ;;  %v318_v23 = vmul.f32 %v748_v12, %v295_v42 }
 0x153   :  { %v412_v16 = vpop.eup %411  ;;  %356 = vst.msk [vmem:[#allocation3 + $0x60] sm:$0xff] %vm88_vm0, %v340_v51  ;;  %v319_v17 = vmul.f32 %v748_v12, %v296_v43 }
 0x154   :  { %v341_v44 = vadd.f32 %v754_v20, %v318_v23  ;;  %v297_v35 = vmul.f32 %v412_v16, %v735_v7 }
 0x155   :  { %v342_v45 = vadd.f32 %v754_v20, %v319_v17 }
 0x156   :  { %357 = vst.msk [vmem:[#allocation3 + $0x68] sm:$0xff] %vm88_vm0, %v341_v44  ;;  %v320_v61 = vmul.f32 %v748_v12, %v297_v35 }
 0x157   :  { %358 = vst.msk [vmem:[#allocation3 + $0x70] sm:$0xff] %vm88_vm0, %v342_v45 }
 0x158   :  { %v343_v14 = vadd.f32 %v754_v20, %v320_v61 }
 0x15a   :  { %359 = vst.msk [vmem:[#allocation3 + $0x78] sm:$0xff] %vm88_vm0, %v343_v14 }
 0x15b   :  { %424 = shalt.err (!%p421_p4)
}
 0x15c   :  { %s436_s9 = smov 128   ;;  %s437_s10 = smov 8  }
 0x15d   :  { %371 = dma.vmem_to_hbm [thread:$0]  %s366_s4, 2048, %s827_s5, [#allocation4], %s436_s9, %s436_s9, %s437_s10  }
 0x15e   :  { %433 = dma.done.wait [#allocation4], 2048  }
 0x15f   :  { %434 = vsyncadd [#allocation4], 4294965248 }
 0x160   :  { %375 = vsyncpa [#allocation4], 1 }

// kernel: cascaded_vmamba_block.11
= control target key start
LH: loop header
LB: loop body
LE: loop exit
PB: predicated region body
PF: predicated region fallthrough
CT: control target
= control target key end

     0   :  { %s4225_s18 = smov 0   ;;  %s5438_s0 = inlined_call_operand.vmem [shape: bf16[2,8,8,64], index: 0, kind: input, shape index: {}]   ;;  %s5439_s1 = inlined_call_operand.vmem [shape: bf16[2,64,256], index: 1, kind: input, shape index: {}]   ;;  %s5440_s2 = inlined_call_operand.vmem [shape: f32[2,2,8,64], index: 2, kind: input, shape index: {}]   ;;  %s5441_s3 = inlined_call_operand.vmem [shape: f32[2,2,1,64], index: 3, kind: input, shape index: {}]   ;;  %s5442_s4 = inlined_call_operand.vmem [shape: f32[2,2,1,64], index: 4, kind: input, shape index: {}]   ;;  %s5443_s5 = inlined_call_operand.vmem [shape: bf16[2,8,8,64], index: 5, kind: output, shape index: {}]  }
   0x1 LB: > { %s3632_s19 = sadd.s32 4294967295, %s4119_s18   ;;  %p3636_p0 = scmp.ge.s32.totalorder %s4119_s18, 1  ;;  %s4119_s18 = sphi %s4225_s18, %s15_s18  }
   0x2   : > { %p187_p1 = scmp.lt.s32.totalorder %s4119_s18, 3 }
   0x4   : > { %p188_p2 = pnand %p3636_p0, %p187_p1 }
   0x5   : > { %p215_p3 = scmp.lt.s32.totalorder (!%p188_p2), %s3632_s19, 1  ;;  %s4299_s23 = smov (!%p188_p2), 0  }
   0x6   : > { %191 = sbr.rel (%p188_p2) target bundleno = 2297 (0x8f9), region = 40 }
   0xb   : > { %v3913_v0 = vld [vmem:[%s5439_s1 + $0x34] ss:$8 sps:$4 sm:$0xff]   ;;  %v3915_v1 = vld [vmem:[%s5439_s1 + $0x30] ss:$8 sps:$4 sm:$0xff]   ;;  %v4153_v2 = vmov 0   ;;  %s5461_s19 = smov (!%p215_p3, %s3632_s19), 1 }
   0xc   : > { %355 = vmatprep.mubr.bf16.mxu0 %v4153_v2  ;;  %331 = vmatprep.subr.bf16.mxu0 %v3913_v0  ;;  %v3916_v3 = vld [vmem:[%s5439_s1 + $0x24] ss:$8 sps:$4 sm:$0xff]   ;;  %v3918_v4 = vld [vmem:[%s5439_s1 + $0x20] ss:$8 sps:$4 sm:$0xff]   ;;  %v3919_v5 = vld [vmem:[%s5439_s1 + $0x14] ss:$8 sps:$4 sm:$0xff]  }
   0xd   : > { %332 = vmatpush1.bf16.msra.mxu0 %v3915_v1  ;;  %s3770_s30 = sshll.u32 %s5461_s19, 5  ;;  %vm242_vm0 = vcmask 523264   ;;  %v3921_v9 = vld [vmem:[%s5439_s1 + $0x10] ss:$8 sps:$4 sm:$0xff]   ;;  %v3922_v15 = vld [vmem:[%s5439_s1 + $0x4] ss:$8 sps:$4 sm:$0xff]  }
   0xe   : > { %333 = vmatprep.subr.bf16.mxu0 %v3916_v3  ;;  %s4252_s8 = scalar_lea.vmem %s5438_s0, %s3770_s30  ;;  %s4257_s11 = scalar_lea.vmem %s5443_s5, %s3770_s30  ;;  %v3924_v20 = vld [vmem:[%s5439_s1] ss:$8 sps:$4 sm:$0xff]   ;;  %v4297_v51 = vmov 0.0  }
   0xf   : > { %v3777_v6 = vld [vmem:[%s4252_s8] sm:$0xff]   ;;  %v3792_v7 = vld [vmem:[%s4252_s8 + $0x8] sm:$0xff]   ;;  %v3793_v8 = vld [vmem:[%s4252_s8 + $0x10] sm:$0xff]  }
  0x10   : > { %v3778_v10 = vunpack.c.l.bf16 %v3777_v6  ;;  %v3779_v11 = vunpack.c.h.bf16 %v3777_v6  ;;  %v3782_v12 = vunpack.c.l.bf16 %v3792_v7  ;;  %v3783_v13 = vunpack.c.h.bf16 %v3792_v7  ;;  %v3794_v14 = vld [vmem:[%s4252_s8 + $0x18] sm:$0xff]   ;;  %v4290_v33 = vld [vmem:[%s5440_s2] sm:$0xff] }
  0x11   : > { %334 = vmatpush1.bf16.msra.mxu0 %v3918_v4  ;;  %v3786_v16 = vunpack.c.l.bf16 %v3793_v8  ;;  %v3787_v17 = vunpack.c.h.bf16 %v3793_v8  ;;  %v3790_v18 = vunpack.c.l.bf16 %v3794_v14  ;;  %v3791_v19 = vunpack.c.h.bf16 %v3794_v14  ;;  %v4295_v34 = vld [vmem:[%s5442_s4] ss:$0 sm:$0xff] }
  0x12   : > { %335 = vmatprep.subr.bf16.mxu0 %v3919_v5  ;;  %243 = vst.msk [vmem:[#allocation2] sm:$0xff] %vm242_vm0, %v3778_v10  ;;  %244 = vst.msk [vmem:[#allocation2 + $0x8] sm:$0xff] %vm242_vm0, %v3779_v11 }
  0x13   : > { %245 = vst.msk [vmem:[#allocation2 + $0x10] sm:$0xff] %vm242_vm0, %v3782_v12  ;;  %246 = vst.msk [vmem:[#allocation2 + $0x18] sm:$0xff] %vm242_vm0, %v3783_v13 }
  0x14   : > { %247 = vst.msk [vmem:[#allocation2 + $0x20] sm:$0xff] %vm242_vm0, %v3786_v16  ;;  %248 = vst.msk [vmem:[#allocation2 + $0x28] sm:$0xff] %vm242_vm0, %v3787_v17 }
  0x15   : > { %249 = vst.msk [vmem:[#allocation2 + $0x30] sm:$0xff] %vm242_vm0, %v3790_v18  ;;  %250 = vst.msk [vmem:[#allocation2 + $0x38] sm:$0xff] %vm242_vm0, %v3791_v19  ;;  %336 = vmatpush1.bf16.msra.mxu0 %v3921_v9 }
  0x16   : > { %337 = vmatprep.subr.bf16.mxu0 %v3922_v15 }
  0x19   : > { %338 = vmatpush1.bf16.msra.mxu0 %v3924_v20  ;;  %v251_v21 = vld [vmem:[#allocation2] sm:$0xff]  ;;  %v252_v22 = vld [vmem:[#allocation2 + $0x8] sm:$0xff] }
  0x1a   : > { %v259_v23 = vpack.c.bf16 %v252_v22, %v251_v21  ;;  %v253_v24 = vld [vmem:[#allocation2 + $0x10] sm:$0xff]  ;;  %v254_v25 = vld [vmem:[#allocation2 + $0x18] sm:$0xff] }
  0x1b   : > { %v260_v26 = vpack.c.bf16 %v254_v25, %v253_v24  ;;  %v255_v27 = vld [vmem:[#allocation2 + $0x20] sm:$0xff]  ;;  %v256_v28 = vld [vmem:[#allocation2 + $0x28] sm:$0xff] }
  0x1c   : > { %3649 = vmatmul.mubr.msk.bf16.vlgmr.msra.gmra.mxu0 %vm242_vm0, %v259_v23  ;;  %v261_v29 = vpack.c.bf16 %v256_v28, %v255_v27  ;;  %v257_v30 = vld [vmem:[#allocation2 + $0x30] sm:$0xff]  ;;  %v258_v31 = vld [vmem:[#allocation2 + $0x38] sm:$0xff] }
  0x1d   : > { %365 = vmatprep.mubr.bf16.mxu0 %v4153_v2  ;;  %v262_v32 = vpack.c.bf16 %v258_v31, %v257_v30 }
  0x24   : > { %3650 = vmatmul.mubr.msk.bf16.gmra.mxu0 %vm242_vm0, %v260_v26 }
  0x25   : > { %375 = vmatprep.mubr.bf16.mxu0 %v4153_v2 }
  0x2c   : > { %3651 = vmatmul.mubr.msk.bf16.gmra.mxu0 %vm242_vm0, %v261_v29 }
  0x2d   : > { %385 = vmatprep.mubr.bf16.mxu0 %v4153_v2 }
  0x34   : > { %3652 = vmatmul.mubr.msk.bf16.gmra.mxu0 %vm242_vm0, %v262_v32 }
  0xdc   : > { %v357_v35 = vpop.f32.mrf.mxu0 }
  0xdd   : > { %396 = vst [vmem:[#allocation3] sm:$0xff] %v357_v35 }
  0xde   : > { %v359_v36 = vpop.f32.mrf.mxu0 }
  0xdf   : > { %397 = vst [vmem:[#allocation3 + $0x8] sm:$0xff] %v359_v36 }
  0xe0   : > { %v361_v37 = vpop.f32.mrf.mxu0 }
  0xe1   : > { %398 = vst [vmem:[#allocation3 + $0x10] sm:$0xff] %v361_v37 }
  0xe2   : > { %v363_v38 = vpop.f32.mrf.mxu0 }
  0xe3   : > { %399 = vst [vmem:[#allocation3 + $0x18] sm:$0xff] %v363_v38 }
  0xe4   : > { %v367_v39 = vpop.f32.mrf.mxu0 }
  0xe5   : > { %400 = vst [vmem:[#allocation3 + $0x20] sm:$0xff] %v367_v39 }
  0xe6   : > { %v369_v40 = vpop.f32.mrf.mxu0 }
  0xe7   : > { %401 = vst [vmem:[#allocation3 + $0x28] sm:$0xff] %v369_v40 }
  0xe8   : > { %v371_v41 = vpop.f32.mrf.mxu0 }
  0xe9   : > { %402 = vst [vmem:[#allocation3 + $0x30] sm:$0xff] %v371_v41 }
  0xea   : > { %v373_v42 = vpop.f32.mrf.mxu0 }
  0xeb   : > { %403 = vst [vmem:[#allocation3 + $0x38] sm:$0xff] %v373_v42 }
  0xec   : > { %v377_v43 = vpop.f32.mrf.mxu0 }
  0xed   : > { %404 = vst [vmem:[#allocation3 + $0x40] sm:$0xff] %v377_v43 }
  0xee   : > { %v379_v44 = vpop.f32.mrf.mxu0 }
  0xef   : > { %405 = vst [vmem:[#allocation3 + $0x48] sm:$0xff] %v379_v44 }
  0xf0   : > { %v381_v45 = vpop.f32.mrf.mxu0 }
  0xf1   : > { %406 = vst [vmem:[#allocation3 + $0x50] sm:$0xff] %v381_v45 }
  0xf2   : > { %v383_v46 = vpop.f32.mrf.mxu0 }
  0xf3   : > { %407 = vst [vmem:[#allocation3 + $0x58] sm:$0xff] %v383_v46 }
  0xf4   : > { %v387_v47 = vpop.f32.mrf.mxu0 }
  0xf5   : > { %408 = vst [vmem:[#allocation3 + $0x60] sm:$0xff] %v387_v47 }
  0xf6   : > { %v389_v48 = vpop.f32.mrf.mxu0 }
  0xf7   : > { %409 = vst [vmem:[#allocation3 + $0x68] sm:$0xff] %v389_v48 }
  0xf8   : > { %v391_v49 = vpop.f32.mrf.mxu0 }
  0xf9   : > { %410 = vst [vmem:[#allocation3 + $0x70] sm:$0xff] %v391_v49 }
  0xfa   : > { %v393_v50 = vpop.f32.mrf.mxu0 }
  0xfb   : > { %411 = vst [vmem:[#allocation3 + $0x78] sm:$0xff] %v393_v50 }
  0xfc LB: >> { %v4154_v52 = vmov 0   ;;  %s4308_s24 = sshll.u32 %s4127_s23, 3  ;;  %s4155_s28 = smov 64   ;;  %v4157_v11 = vmov 1   ;;  %v4158_v13 = vmov 2   ;;  %v4159_v14 = vmov 5   ;;  %s4127_s23 = sphi %s4299_s23, %s419_s23   ;;  %v4123_v51 = vphi %v4297_v51, %v835_v51  }
  0xfd   : >> { %3925 = vset.pattern.permute.xlu0 %v4154_v52  ;;  %s424_s25 = sshra.s32 %s4308_s24, 3  ;;  %s4156_s29 = smov 56   ;;  %v4160_v15 = vmov 3   ;;  %v4161_v16 = vmov 7   ;;  %v4162_v18 = vmov 4   ;;  %v4163_v19 = vmov 6  }
  0xfe   : >> { %s3772_s26 = sshll.u32 %s424_s25, 4  ;;  %s422_s30 = scalar_lea.vmem [#allocation2], %s4308_s24  ;;  %v4164_v20 = vmov 1966171168   ;;  %v532_v22 = vlaneseq  ;;  %vm667_vm3 = vcmask 516096  }
  0xff   : >> { %s428_s27 = scalar_lea.vmem [#allocation3], %s3772_s26  ;;  %v423_v5 = vld [vmem:[%s422_s30] sm:$0xff]  ;;  %v530_v21 = vunpack.c.l.s4 %v4164_v20  ;;  %s4394_s6 = scalar_lea.vmem [#allocation4], %s4308_s24 }
 0x100   : >> { %v4318_v24 = vshrl.u32 %v532_v22, 7  ;;  %s419_s23 = sadd.s32 1, %s4127_s23  }
 0x101   : >> { %v531_v23 = vunpack.c.0.s8 %v530_v21  ;;  %p416_p4 = scmp.ge.s32.totalorder %s419_s23, 8  }
 0x102   : >> { %v429_v53 = vld [vmem:[%s428_s27] sm:$0xff]  ;;  %v4326_v27 = vsub.s32 0, %v4318_v24  ;;  %s4433_s13 = smov (%p416_p4), 0  }
 0x103   : >> { %457 = vrot.lane.b32.xlu0 %v429_v53, %s4155_s28  ;;  %v436_v54 = vadd.f32 %v4295_v34, %v429_v53  ;;  %v4321_v25 = vsub.s32 %v531_v23, %v4318_v24  ;;  %v4370_v23 = vsub.s32 4, %v4318_v24 }
 0x105   : >> { %v440_v55 = vand.u32 2147483647, %v436_v54  ;;  %v437_v1 = vmax.f32 %v436_v54, 0.0  ;;  %vm438_vm2 = vcmp.ne.f32.partialorder %v436_v54, %v436_v54 }
 0x107   : >> { %v441_v56 = vsub.f32 0.0, %v440_v55  ;;  %492 = vrot.lane.b32.xlu0 %v429_v53, %s4156_s29 }
 0x109   : >> { %v442_v57 = vmul.f32 1.442695, %v441_v56 }
 0x10b   : >> { %3941 = vpow2.f32 %v442_v57 }
 0x118   : >> { %v3942_v58 = vpop.eup %3941 }
 0x119   : >> { %v444_v59 = vadd.f32 1.0, %v3942_v58  ;;  %v447_v60 = vmul.f32 -0.5, %v3942_v58  ;;  %v450_v62 = vand.u32 2147483647, %v3942_v58 }
 0x11b   : >> { %3943 = vlog2.f32 %v444_v59  ;;  %v448_v61 = vadd.f32 1.0, %v447_v60  ;;  %vm451_vm1 = vcmp.lt.f32.partialorder %v450_v62, 0.0004427343  ;;  %v4349_v59 = vsub.s32 1, %v4318_v24 }
 0x11d   : >> { %v449_v63 = vmul.f32 %v3942_v58, %v448_v61 }
 0x128   : >> { %v3944_v0 = vpop.eup %3943 }
 0x129   : >> { %v446_v3 = vmul.f32 0.6931472, %v3944_v0 }
 0x12b   : >> { %v452_v4 = vsel %vm451_vm1, %v449_v63, %v446_v3 }
 0x12c   : >> { %v453_v6 = vadd.f32 %v452_v4, %v437_v1 }
 0x12e   : >> { %v4313_v7 = vsel %vm438_vm2, %v436_v54, %v453_v6 }
 0x12f   : >> { %v4316_v8 = vmul.f32 %v4313_v7, %v423_v5  ;;  %v535_v26 = vrot.slane %v4313_v7, %v4321_v25  ;;  %v528_v35 = vcombine.high %v4313_v7, %v4313_v7  ;;  %v4357_v5 = vsub.s32 2, %v4318_v24 }
 0x131   : >> { %v551_v28 = vrot.slane %v535_v26, %v4321_v25  ;;  %v543_v29 = vcombine.high %v535_v26, %v535_v26  ;;  %v542_v39 = vrot.slane %v528_v35, %v4321_v25  ;;  %v650_v58 = vrot.slane %v4316_v8, %v4326_v27 }
 0x132   : >> { %v677_v4 = vrot.slane %v4316_v8, %v4349_v59 }
 0x133   : >> { %v580_v30 = vrot.slane %v551_v28, %v4326_v27  ;;  %v565_v31 = vrot.slane %v543_v29, %v4321_v25  ;;  %v573_v36 = vcombine.high %v551_v28, %v551_v28  ;;  %v544_v43 = vcombine.high %v542_v39, %v542_v39 }
 0x134   : >> { %v558_v44 = vrot.slane %v542_v39, %v4321_v25 }
 0x135   : >> { %v617_v32 = vmul.f32 %v580_v30, %v4290_v33  ;;  %v584_v37 = vrot.slane %v565_v31, %v4326_v27  ;;  %v575_v40 = vcombine.high %v565_v31, %v565_v31  ;;  %v588_v42 = vrot.slane %v573_v36, %v4326_v27 }
 0x136   : >> { %v572_v48 = vrot.slane %v544_v43, %v4321_v25  ;;  %v574_v53 = vcombine.high %v558_v44, %v558_v44  ;;  %v755_v36 = vrot.slane %v4316_v8, %v4370_v23 }
 0x137   : >> { %v625_v38 = vmul.f32 1.442695, %v617_v32  ;;  %v618_v41 = vmul.f32 %v584_v37, %v4290_v33  ;;  %v619_v46 = vmul.f32 %v588_v42, %v4290_v33  ;;  %v592_v47 = vrot.slane %v575_v40, %v4326_v27 }
 0x138   : >> { %v600_v54 = vrot.slane %v572_v48, %v4326_v27  ;;  %v604_v62 = vrot.slane %v574_v53, %v4326_v27  ;;  %v576_v63 = vcombine.high %v572_v48, %v572_v48  ;;  %v4375_v37 = vsub.s32 5, %v4318_v24 }
 0x139   : >> { %3945 = vpow2.f32 %v625_v38  ;;  %v627_v45 = vmul.f32 1.442695, %v618_v41  ;;  %v629_v49 = vmul.f32 1.442695, %v619_v46  ;;  %v620_v50 = vmul.f32 %v592_v47, %v4290_v33 }
 0x13a   : >> { %v622_v60 = vmul.f32 %v600_v54, %v4290_v33  ;;  %v4378_v46 = vsub.s32 6, %v4318_v24  ;;  %v781_v48 = vrot.slane %v4316_v8, %v4375_v37 }
 0x13b   : >> { %3947 = vpow2.f32 %v627_v45  ;;  %v631_v55 = vmul.f32 1.442695, %v620_v50 }
 0x13c   : >> { %3949 = vpow2.f32 %v629_v49  ;;  %v635_v6 = vmul.f32 1.442695, %v622_v60 }
 0x13d   : >> { %3951 = vpow2.f32 %v631_v55  ;;  %v807_v55 = vrot.slane %v4316_v8, %v4378_v46 }
 0x146   : >> { %v3946_v57 = vpop.eup %3945 }
 0x147   : >> { %v641_v0 = vmul.f32 %v4123_v51, %v3946_v57  ;;  %v703_v51 = vrot.slane %v4316_v8, %v4357_v5 }
 0x175   : >> { %v458_v9 = vpop.permute.xlu0 %457 }
 0x176   : >> { %460 = vxpose.xlu1.b32.start.end [1/1] (short) (narrow) %v458_v9, 8  ;;  %v623_v9 = vmul.f32 %v604_v62, %v4290_v33 }
 0x179   : >> { %v493_v10 = vpop.permute.xlu0 %492 }
 0x17a   : >> { %495 = vxpose.xlu1.b32.start.end [1/1] (short) (narrow) %v493_v10, 8  ;;  %v608_v10 = vrot.slane %v576_v63, %v4326_v27  ;;  %v4386_v63 = vsub.s32 7, %v4318_v24 }
 0x198   : >> { %3926 = vset.pattern.permute.xlu1 %v4157_v11 }
 0x1f2   : >> { %v476_v12 = vpop.trf.xlu1 }
 0x1f3   : >> { %644 = vperm.xlu0 %3925, %v476_v12   ;;  %671 = vperm.xlu1 %3926, %v476_v12  }
 0x1f6   : >> { %v511_v17 = vpop.trf.xlu1 }
 0x1f7   : >> { %3927 = vset.pattern.permute.xlu0 %v4158_v13  ;;  %3930 = vset.pattern.permute.xlu1 %v4159_v14 }
 0x1f8   : >> { %697 = vperm.xlu0 %3927, %v476_v12   ;;  %775 = vperm.xlu1 %3930, %v476_v12  }
 0x1fc   : >> { %3928 = vset.pattern.permute.xlu0 %v4160_v15  ;;  %3932 = vset.pattern.permute.xlu1 %v4161_v16 }
 0x1fd   : >> { %723 = vperm.xlu0 %3928, %v476_v12   ;;  %827 = vperm.xlu1 %3932, %v476_v12  }
 0x201   : >> { %3929 = vset.pattern.permute.xlu0 %v4162_v18  ;;  %3933 = vset.pattern.permute.xlu1 %v4154_v52  ;;  %v596_v52 = vrot.slane %v558_v44, %v4326_v27 }
 0x202   : >> { %749 = vperm.xlu0 %3929, %v476_v12   ;;  %655 = vperm.xlu1 %3933, %v511_v17  }
 0x203   : >> { %v621_v56 = vmul.f32 %v596_v52, %v4290_v33 }
 0x205   : >> { %v633_v61 = vmul.f32 1.442695, %v621_v56 }
 0x206   : >> { %3931 = vset.pattern.permute.xlu0 %v4163_v19  ;;  %3935 = vset.pattern.permute.xlu1 %v4158_v13  ;;  %v4364_v13 = vsub.s32 3, %v4318_v24 }
 0x207   : >> { %801 = vperm.xlu0 %3931, %v476_v12   ;;  %707 = vperm.xlu1 %3935, %v511_v17   ;;  %3953 = vpow2.f32 %v633_v61 }
 0x208   : >> { %3955 = vpow2.f32 %v635_v6  ;;  %v729_v22 = vrot.slane %v4316_v8, %v4364_v13 }
 0x20b   : >> { %3934 = vset.pattern.permute.xlu0 %v4157_v11  ;;  %3936 = vset.pattern.permute.xlu1 %v4160_v15  ;;  %v3948_v11 = vpop.eup %3947 }
 0x20c   : >> { %681 = vperm.xlu0 %3934, %v511_v17   ;;  %733 = vperm.xlu1 %3936, %v511_v17   ;;  %v3950_v20 = vpop.eup %3949 }
 0x20d   : >> { %v3952_v30 = vpop.eup %3951 }
 0x210   : >> { %3937 = vset.pattern.permute.xlu0 %v4162_v18  ;;  %3938 = vset.pattern.permute.xlu1 %v4159_v14  ;;  %v637_v18 = vmul.f32 1.442695, %v623_v9 }
 0x211   : >> { %759 = vperm.xlu0 %3937, %v511_v17   ;;  %785 = vperm.xlu1 %3938, %v511_v17  }
 0x212   : >> { %3957 = vpow2.f32 %v637_v18 }
 0x214   : >> { %v3954_v40 = vpop.eup %3953 }
 0x215   : >> { %3940 = vset.pattern.permute.xlu0 %v4161_v16  ;;  %3939 = vset.pattern.permute.xlu1 %v4163_v19  ;;  %v624_v19 = vmul.f32 %v608_v10, %v4290_v33  ;;  %v3956_v47 = vpop.eup %3955 }
 0x216   : >> { %837 = vperm.xlu0 %3940, %v511_v17   ;;  %811 = vperm.xlu1 %3939, %v511_v17  }
 0x217   : >> { %v639_v29 = vmul.f32 1.442695, %v624_v19 }
 0x219   : >> { %3959 = vpow2.f32 %v639_v29 }
 0x21f   : >> { %v3958_v62 = vpop.eup %3957 }
 0x26e   : >> { %v645_v1 = vpop.permute.xlu0 %644  ;;  %v672_v3 = vpop.permute.xlu1 %671 }
 0x26f   : >> { %v651_v7 = vmul.f32 %v650_v58, %v645_v1  ;;  %v678_v15 = vmul.f32 %v677_v4, %v672_v3 }
 0x271   : >> { %v652_v12 = vadd.f32 %v651_v7, %v641_v0 }
 0x273   : >> { %v669_v14 = vmul.f32 %v3948_v11, %v652_v12  ;;  %v698_v16 = vpop.permute.xlu0 %697  ;;  %v776_v17 = vpop.permute.xlu1 %775 }
 0x274   : >> { %v704_v28 = vmul.f32 %v703_v51, %v698_v16  ;;  %v782_v57 = vmul.f32 %v781_v48, %v776_v17  ;;  %v833_v51 = vrot.slane %v4316_v8, %v4386_v63 }
 0x275   : >> { %v679_v21 = vadd.f32 %v678_v15, %v669_v14 }
 0x277   : >> { %v695_v26 = vmul.f32 %v3950_v20, %v679_v21 }
 0x278   : >> { %v724_v31 = vpop.permute.xlu0 %723  ;;  %v828_v32 = vpop.permute.xlu1 %827 }
 0x279   : >> { %v705_v35 = vadd.f32 %v704_v28, %v695_v26  ;;  %v730_v39 = vmul.f32 %v729_v22, %v724_v31 }
 0x27b   : >> { %v721_v38 = vmul.f32 %v3952_v30, %v705_v35  ;;  %v834_v30 = vmul.f32 %v833_v51, %v828_v32 }
 0x27d   : >> { %v731_v41 = vadd.f32 %v730_v39, %v721_v38  ;;  %v750_v42 = vpop.permute.xlu0 %749  ;;  %v656_v43 = vpop.permute.xlu1 %655 }
 0x27e   : >> { %v756_v44 = vmul.f32 %v755_v36, %v750_v42  ;;  %v658_v45 = vmul.f32 %v656_v43, %v652_v12  ;;  %v3960_v12 = vpop.eup %3959 }
 0x27f   : >> { %v747_v49 = vmul.f32 %v3954_v40, %v731_v41 }
 0x280   : >> { %v659_v50 = vsel %vm242_vm0, %v658_v45, 0.0 }
 0x281   : >> { %v757_v52 = vadd.f32 %v756_v44, %v747_v49  ;;  %v660_v53 = vrot.slane %v659_v50, 4 }
 0x282   : >> { %v802_v54 = vpop.permute.xlu0 %801  ;;  %v708_v56 = vpop.permute.xlu1 %707 }
 0x283   : >> { %v773_v58 = vmul.f32 %v3956_v47, %v757_v52  ;;  %v661_v60 = vadd.f32 %v660_v53, %v659_v50  ;;  %v710_v61 = vmul.f32 %v708_v56, %v705_v35  ;;  %v808_v9 = vmul.f32 %v807_v55, %v802_v54 }
 0x285   : >> { %v662_v0 = vrot.slane %v661_v60, 2  ;;  %v783_v1 = vadd.f32 %v782_v57, %v773_v58  ;;  %v711_v3 = vsel %vm242_vm0, %v710_v61, 0.0 }
 0x286   : >> { %v712_v4 = vrot.slane %v711_v3, 4 }
 0x287   : >> { %v663_v6 = vadd.f32 %v662_v0, %v661_v60  ;;  %v799_v7 = vmul.f32 %v3958_v62, %v783_v1  ;;  %v682_v10 = vpop.permute.xlu0 %681  ;;  %v734_v11 = vpop.permute.xlu1 %733 }
 0x288   : >> { %v713_v14 = vadd.f32 %v712_v4, %v711_v3  ;;  %v684_v15 = vmul.f32 %v682_v10, %v679_v21  ;;  %v736_v16 = vmul.f32 %v734_v11, %v731_v41 }
 0x289   : >> { %v664_v24 = vrot.slane %v663_v6, 1  ;;  %v809_v17 = vadd.f32 %v808_v9, %v799_v7 }
 0x28a   : >> { %v714_v18 = vrot.slane %v713_v14, 2  ;;  %v685_v19 = vsel %vm242_vm0, %v684_v15, 0.0  ;;  %v737_v20 = vsel %vm242_vm0, %v736_v16, 0.0 }
 0x28b   : >> { %v665_v22 = vadd.f32 %v664_v24, %v663_v6  ;;  %v686_v26 = vrot.slane %v685_v19, 4  ;;  %v738_v28 = vrot.slane %v737_v20, 4  ;;  %v825_v29 = vmul.f32 %v3960_v12, %v809_v17 }
 0x28c   : >> { %v715_v31 = vadd.f32 %v714_v18, %v713_v14  ;;  %v760_v35 = vpop.permute.xlu0 %759  ;;  %v786_v8 = vpop.permute.xlu1 %785 }
 0x28d   : >> { %668 = vst.msk [vmem:[%s4394_s6] sm:$0x1] %vm667_vm3, %v665_v22  ;;  %v687_v21 = vadd.f32 %v686_v26, %v685_v19  ;;  %v739_v36 = vadd.f32 %v738_v28, %v737_v20  ;;  %v762_v38 = vmul.f32 %v760_v35, %v757_v52  ;;  %v788_v39 = vmul.f32 %v786_v8, %v783_v1 }
 0x28e   : >> { %v716_v40 = vrot.slane %v715_v31, 1  ;;  %v835_v51 = vadd.f32 %v834_v30, %v825_v29   ;;  %v4424_v29 = vld [vmem:[%s5440_s2 + $0x8] sm:$0xff] (%p416_p4)  ;;  %v4429_v30 = vld [vmem:[%s5442_s4 + $0x1] ss:$0 sm:$0xff] (%p416_p4) }
 0x28f   : >> { %v688_v41 = vrot.slane %v687_v21, 2  ;;  %v740_v42 = vrot.slane %v739_v36, 2  ;;  %v763_v43 = vsel %vm242_vm0, %v762_v38, 0.0  ;;  %v789_v32 = vsel %vm242_vm0, %v788_v39, 0.0 }
 0x290   : >> { %v717_v44 = vadd.f32 %v716_v40, %v715_v31  ;;  %v764_v45 = vrot.slane %v763_v43, 4  ;;  %v790_v47 = vrot.slane %v789_v32, 4  ;;  %v4431_v31 = vmov (%p416_p4), 0.0  }
 0x291   : >> { %v689_v48 = vadd.f32 %v688_v41, %v687_v21  ;;  %v741_v49 = vadd.f32 %v740_v42, %v739_v36  ;;  %v838_v50 = vpop.permute.xlu0 %837  ;;  %v812_v53 = vpop.permute.xlu1 %811 }
 0x292   : >> { %3660 = vst.msk [vmem:[%s4394_s6 + $0x2] sm:$0x1] %vm667_vm3, %v717_v44  ;;  %v765_v54 = vadd.f32 %v764_v45, %v763_v43  ;;  %v791_v52 = vadd.f32 %v790_v47, %v789_v32  ;;  %v840_v55 = vmul.f32 %v838_v50, %v835_v51  ;;  %v814_v56 = vmul.f32 %v812_v53, %v809_v17 }
 0x293   : >> { %v690_v57 = vrot.slane %v689_v48, 1  ;;  %v742_v58 = vrot.slane %v741_v49, 1 }
 0x294   : >> { %v766_v60 = vrot.slane %v765_v54, 2  ;;  %v792_v61 = vrot.slane %v791_v52, 2  ;;  %v841_v62 = vsel %vm242_vm0, %v840_v55, 0.0  ;;  %v815_v0 = vsel %vm242_vm0, %v814_v56, 0.0 }
 0x295   : >> { %v691_v1 = vadd.f32 %v690_v57, %v689_v48  ;;  %v743_v3 = vadd.f32 %v742_v58, %v741_v49  ;;  %v842_v4 = vrot.slane %v841_v62, 4  ;;  %v816_v6 = vrot.slane %v815_v0, 4 }
 0x296   : >> { %v767_v7 = vadd.f32 %v766_v60, %v765_v54  ;;  %v793_v9 = vadd.f32 %v792_v61, %v791_v52 }
 0x297   : >> { %3658 = vst.msk [vmem:[%s4394_s6 + $0x1] sm:$0x1] %vm667_vm3, %v691_v1  ;;  %3662 = vst.msk [vmem:[%s4394_s6 + $0x3] sm:$0x1] %vm667_vm3, %v743_v3  ;;  %v843_v10 = vadd.f32 %v842_v4, %v841_v62  ;;  %v817_v11 = vadd.f32 %v816_v6, %v815_v0 }
 0x298   : >> { %v768_v12 = vrot.slane %v767_v7, 1  ;;  %v794_v14 = vrot.slane %v793_v9, 1 }
 0x299   : >> { %v844_v15 = vrot.slane %v843_v10, 2  ;;  %v818_v16 = vrot.slane %v817_v11, 2 }
 0x29a   : >> { %v769_v24 = vadd.f32 %v768_v12, %v767_v7  ;;  %v795_v17 = vadd.f32 %v794_v14, %v793_v9 }
 0x29b   : >> { %v845_v18 = vadd.f32 %v844_v15, %v843_v10  ;;  %v819_v19 = vadd.f32 %v818_v16, %v817_v11 }
 0x29c   : >> { %3664 = vst.msk [vmem:[%s4394_s6 + $0x4] sm:$0x1] %vm667_vm3, %v769_v24  ;;  %3666 = vst.msk [vmem:[%s4394_s6 + $0x5] sm:$0x1] %vm667_vm3, %v795_v17 }
 0x29d   : >> { %v846_v20 = vrot.slane %v845_v18, 1  ;;  %v820_v22 = vrot.slane %v819_v19, 1  ;;  %418 = sbr.rel (!%p416_p4) target bundleno = 252 (0xfc), region = 148 }
 0x29f   : >> { %v847_v26 = vadd.f32 %v846_v20, %v845_v18  ;;  %v821_v28 = vadd.f32 %v820_v22, %v819_v19 }
 0x2a1   : >> { %3670 = vst.msk [vmem:[%s4394_s6 + $0x7] sm:$0x1] %vm667_vm3, %v847_v26  ;;  %3668 = vst.msk [vmem:[%s4394_s6 + $0x6] sm:$0x1] %vm667_vm3, %v821_v28 }
 0x2a2 LB: >> { %v4165_v33 = vmov 7   ;;  %s862_s14 = ssub.s32 7, %s4135_s13  ;;  %s4166_s20 = smov 64   ;;  %v4168_v52 = vmov 6   ;;  %v4169_v56 = vmov 5   ;;  %v4170_v57 = vmov 2   ;;  %s4135_s13 = sphi %s4433_s13, %s860_s13   ;;  %v4131_v31 = vphi %v4431_v31, %v4496_v31  }
 0x2a3   : >> { %3961 = vset.pattern.permute.xlu0 %v4165_v33  ;;  %s4442_s15 = sshll.u32 %s862_s14, 3  ;;  %s4167_s21 = smov 56   ;;  %v4171_v58 = vmov 4   ;;  %v4172_v60 = vmov 0   ;;  %v4173_v62 = vmov 3   ;;  %v4174_v0 = vmov 1  }
 0x2a4   : >> { %s866_s16 = sshra.s32 %s4442_s15, 3  ;;  %s864_s22 = scalar_lea.vmem [#allocation2], %s4442_s15 }
 0x2a5   : >> { %s3773_s17 = sshll.u32 %s866_s16, 4  ;;  %v865_v47 = vld [vmem:[%s864_s22] sm:$0xff]  ;;  %s4491_s23 = scalar_lea.vmem [#allocation4], %s4442_s15 }
 0x2a6   : >> { %s870_s19 = scalar_lea.vmem [#allocation3], %s3773_s17  ;;  %s860_s13 = sadd.s32 1, %s4135_s13  }
 0x2a7   : >> { %v871_v34 = vld [vmem:[%s870_s19 + $0x8] sm:$0xff]  ;;  %p857_p5 = scmp.ge.s32.totalorder %s860_s13, 8  }
 0x2a8   : >> { %899 = vrot.lane.b32.xlu0 %v871_v34, %s4166_s20  ;;  %v878_v51 = vadd.f32 %v4429_v30, %v871_v34  ;;  %1836 = vmatprep.mubr.bf16.mxu1 (%p857_p5), %v4153_v2  ;;  %vm1409_vm6 = vcmask (%p857_p5), 1041409   ;;  %v1309_v30 = vld [vmem:[%s5441_s3] sm:$0x1] (%p857_p5)  ;;  %vm1412_vm7 = vcmask (%p857_p5), 1042434   ;;  %vm1415_vm8 = vcmask (%p857_p5), 1043459   ;;  %s4761_s25 = smov (%p857_p5), 0  }
 0x2a9   : > { %vm1418_vm9 = vcmask (%p857_p5), 1044484   ;;  %vm1421_vm10 = vcmask (%p857_p5), 1045509   ;;  %vm1424_vm11 = vcmask (%p857_p5), 1046534   ;;  %vm1427_vm12 = vcmask (%p857_p5), 1047559  }
 0x2aa   : >> { %v882_v35 = vand.u32 2147483647, %v878_v51  ;;  %v879_v32 = vmax.f32 %v878_v51, 0.0  ;;  %vm880_vm5 = vcmp.ne.f32.partialorder %v878_v51, %v878_v51  ;;  %vm1470_vm13 = vcmask (%p857_p5), 523265  }
 0x2ab   : > { %vm1515_vm14 = vcmask (%p857_p5), 517120   ;;  %vm1513_vm15 = vcmask (%p857_p5), 523266   ;;  %vm1556_vm1 = vcmask (%p857_p5), 523267   ;;  %vm1558_vm2 = vcmask (%p857_p5), 518144  }
 0x2ac   : >> { %v883_v8 = vsub.f32 0.0, %v882_v35  ;;  %934 = vrot.lane.b32.xlu0 %v871_v34, %s4167_s21 }
 0x2ae   : >> { %v884_v21 = vmul.f32 1.442695, %v883_v8 }
 0x2b0   : >> { %3977 = vpow2.f32 %v884_v21 }
 0x2bd   : >> { %v3978_v36 = vpop.eup %3977 }
 0x2be   : >> { %v886_v38 = vadd.f32 1.0, %v3978_v36  ;;  %v889_v39 = vmul.f32 -0.5, %v3978_v36  ;;  %v892_v41 = vand.u32 2147483647, %v3978_v36 }
 0x2c0   : >> { %3979 = vlog2.f32 %v886_v38  ;;  %v890_v40 = vadd.f32 1.0, %v889_v39  ;;  %vm893_vm4 = vcmp.lt.f32.partialorder %v892_v41, 0.0004427343 }
 0x2c2   : >> { %v891_v42 = vmul.f32 %v3978_v36, %v890_v40 }
 0x2cd   : >> { %v3980_v43 = vpop.eup %3979 }
 0x2ce   : >> { %v888_v44 = vmul.f32 0.6931472, %v3980_v43 }
 0x2d0   : >> { %v894_v45 = vsel %vm893_vm4, %v891_v42, %v888_v44  ;;  %vm1375_vm4 = vcmask (%p857_p5), 519168  }
 0x2d1   : >> { %v895_v48 = vadd.f32 %v894_v45, %v879_v32 }
 0x2d3   : >> { %v896_v49 = vsel %vm880_vm5, %v878_v51, %v895_v48  ;;  %vm1599_vm5 = vcmask (%p857_p5), 523268  }
 0x2d4   : >> { %v4447_v50 = vmul.f32 %v896_v49, %v865_v47  ;;  %v970_v1 = vcombine.high %v896_v49, %v896_v49  ;;  %v977_v11 = vrot.slane %v896_v49, %v4321_v25 }
 0x2d6   : >> { %v984_v3 = vrot.slane %v970_v1, %v4321_v25  ;;  %v985_v15 = vcombine.high %v977_v11, %v977_v11  ;;  %v993_v20 = vrot.slane %v977_v11, %v4321_v25  ;;  %v1092_v42 = vrot.slane %v4447_v50, %v4386_v63 }
 0x2d8   : >> { %v986_v4 = vcombine.high %v984_v3, %v984_v3  ;;  %v1000_v9 = vrot.slane %v984_v3, %v4321_v25  ;;  %v1007_v17 = vrot.slane %v985_v15, %v4321_v25  ;;  %v1015_v34 = vcombine.high %v993_v20, %v993_v20 }
 0x2d9   : >> { %v1022_v44 = vrot.slane %v993_v20, %v4326_v27  ;;  %v1178_v3 = vrot.slane %v4447_v50, %v4370_v23 }
 0x2da   : >> { %v1014_v6 = vrot.slane %v986_v4, %v4321_v25  ;;  %v1016_v12 = vcombine.high %v1000_v9, %v1000_v9  ;;  %v1017_v22 = vcombine.high %v1007_v17, %v1007_v17  ;;  %v1038_v26 = vrot.slane %v1000_v9, %v4326_v27 }
 0x2db   : >> { %v1030_v21 = vrot.slane %v1015_v34, %v4326_v27  ;;  %v1026_v40 = vrot.slane %v1007_v17, %v4326_v27 }
 0x2dc   : >> { %v1018_v7 = vcombine.high %v1014_v6, %v1014_v6  ;;  %v1046_v16 = vrot.slane %v1016_v12, %v4326_v27  ;;  %v1042_v18 = vrot.slane %v1014_v6, %v4326_v27  ;;  %v1034_v51 = vrot.slane %v1017_v22, %v4326_v27 }
 0x2dd   : >> { %v1063_v35 = vmul.f32 %v4424_v29, %v1038_v26  ;;  %v1061_v41 = vmul.f32 %v4424_v29, %v1030_v21  ;;  %v1060_v45 = vmul.f32 %v4424_v29, %v1026_v40  ;;  %v1234_v26 = vrot.slane %v4447_v50, %v4357_v5 }
 0x2de   : >> { %v1050_v10 = vrot.slane %v1018_v7, %v4326_v27  ;;  %v1065_v19 = vmul.f32 %v4424_v29, %v1046_v16  ;;  %v1062_v38 = vmul.f32 %v4424_v29, %v1034_v51  ;;  %v1262_v21 = vrot.slane %v4447_v50, %v4349_v59 }
 0x2df   : >> { %v1075_v36 = vmul.f32 1.442695, %v1063_v35 }
 0x2e0   : >> { %v1066_v14 = vmul.f32 %v4424_v29, %v1050_v10  ;;  %v1079_v28 = vmul.f32 1.442695, %v1065_v19  ;;  %v1073_v43 = vmul.f32 1.442695, %v1062_v38 }
 0x2e2   : >> { %v1081_v24 = vmul.f32 1.442695, %v1066_v14  ;;  %v1206_v14 = vrot.slane %v4447_v50, %v4364_v13 }
 0x2e4   : >> { %3981 = vpow2.f32 %v1081_v24 }
 0x2e5   : >> { %3983 = vpow2.f32 %v1079_v28 }
 0x2f1   : >> { %v3982_v39 = vpop.eup %3981 }
 0x2f2   : >> { %v1083_v32 = vmul.f32 %v4131_v31, %v3982_v39 }
 0x31a   : >> { %v900_v53 = vpop.permute.xlu0 %899 }
 0x31b   : >> { %902 = vxpose.xlu1.b32.start.end [1/1] (short) (narrow) %v900_v53, 8  ;;  %v1122_v53 = vrot.slane %v4447_v50, %v4378_v46 }
 0x31e   : >> { %v935_v54 = vpop.permute.xlu0 %934 }
 0x31f   : >> { %937 = vxpose.xlu1.b32.start.end [1/1] (short) (narrow) %v935_v54, 8  ;;  %v1071_v54 = vmul.f32 1.442695, %v1061_v41 }
 0x33d   : >> { %3962 = vset.pattern.permute.xlu1 %v4168_v52 }
 0x397   : >> { %v918_v55 = vpop.trf.xlu1 }
 0x398   : >> { %1086 = vperm.xlu0 %3961, %v918_v55   ;;  %1116 = vperm.xlu1 %3962, %v918_v55  }
 0x39b   : >> { %v953_v61 = vpop.trf.xlu1 }
 0x39c   : >> { %3963 = vset.pattern.permute.xlu0 %v4169_v56  ;;  %3966 = vset.pattern.permute.xlu1 %v4170_v57 }
 0x39d   : >> { %1144 = vperm.xlu0 %3963, %v918_v55   ;;  %1228 = vperm.xlu1 %3966, %v918_v55  }
 0x3a1   : >> { %3964 = vset.pattern.permute.xlu0 %v4171_v58  ;;  %3968 = vset.pattern.permute.xlu1 %v4172_v60 }
 0x3a2   : >> { %1172 = vperm.xlu0 %3964, %v918_v55   ;;  %1284 = vperm.xlu1 %3968, %v918_v55  }
 0x3a6   : >> { %3965 = vset.pattern.permute.xlu0 %v4173_v62  ;;  %3969 = vset.pattern.permute.xlu1 %v4165_v33  ;;  %v1064_v33 = vmul.f32 %v4424_v29, %v1042_v18 }
 0x3a7   : >> { %1200 = vperm.xlu0 %3965, %v918_v55   ;;  %1097 = vperm.xlu1 %3969, %v953_v61  }
 0x3a8   : >> { %v1077_v8 = vmul.f32 1.442695, %v1064_v33 }
 0x3aa   : >> { %3985 = vpow2.f32 %v1077_v8 }
 0x3ab   : >> { %3967 = vset.pattern.permute.xlu0 %v4174_v0  ;;  %3971 = vset.pattern.permute.xlu1 %v4169_v56  ;;  %3987 = vpow2.f32 %v1075_v36  ;;  %v1059_v56 = vmul.f32 %v4424_v29, %v1022_v44  ;;  %v4003_v29 = vld [vmem:[%s5439_s1 + $0x54] ss:$8 sps:$4 sm:$0xff] (%p857_p5)  }
 0x3ac   : >> { %1256 = vperm.xlu0 %3967, %v918_v55   ;;  %1154 = vperm.xlu1 %3971, %v953_v61   ;;  %3989 = vpow2.f32 %v1073_v43 }
 0x3ad   : >> { %3991 = vpow2.f32 %v1071_v54  ;;  %v1067_v7 = vmul.f32 1.442695, %v1059_v56 }
 0x3b0   : >> { %3970 = vset.pattern.permute.xlu0 %v4168_v52  ;;  %3972 = vset.pattern.permute.xlu1 %v4171_v58  ;;  %v3984_v52 = vpop.eup %3983 }
 0x3b1   : >> { %1126 = vperm.xlu0 %3970, %v953_v61   ;;  %1182 = vperm.xlu1 %3972, %v953_v61  }
 0x3b5   : >> { %3973 = vset.pattern.permute.xlu0 %v4173_v62  ;;  %3974 = vset.pattern.permute.xlu1 %v4170_v57  ;;  %v1150_v57 = vrot.slane %v4447_v50, %v4375_v37  ;;  %v1069_v62 = vmul.f32 1.442695, %v1060_v45 }
 0x3b6   : >> { %1210 = vperm.xlu0 %3973, %v953_v61   ;;  %1238 = vperm.xlu1 %3974, %v953_v61  }
 0x3b7   : >> { %3993 = vpow2.f32 %v1069_v62 }
 0x3b8   : >> { %3995 = vpow2.f32 %v1067_v7 }
 0x3ba   : >> { %3976 = vset.pattern.permute.xlu0 %v4172_v60  ;;  %3975 = vset.pattern.permute.xlu1 %v4174_v0  ;;  %v3986_v0 = vpop.eup %3985 }
 0x3bb   : >> { %1294 = vperm.xlu0 %3976, %v953_v61   ;;  %1266 = vperm.xlu1 %3975, %v953_v61   ;;  %v3988_v9 = vpop.eup %3987 }
 0x3bc   : >> { %v3990_v24 = vpop.eup %3989 }
 0x3bd   : >> { %v3992_v33 = vpop.eup %3991 }
 0x413   : >> { %v1087_v47 = vpop.permute.xlu0 %1086  ;;  %v1117_v48 = vpop.permute.xlu1 %1116 }
 0x414   : >> { %v1093_v49 = vmul.f32 %v1092_v42, %v1087_v47  ;;  %v1123_v58 = vmul.f32 %v1122_v53, %v1117_v48  ;;  %v3994_v42 = vpop.eup %3993 }
 0x416   : >> { %v1094_v55 = vadd.f32 %v1093_v49, %v1083_v32 }
 0x418   : >> { %v1114_v31 = vmul.f32 %v3984_v52, %v1094_v55  ;;  %v1145_v60 = vpop.permute.xlu0 %1144  ;;  %v1229_v61 = vpop.permute.xlu1 %1228 }
 0x419   : >> { %v1151_v6 = vmul.f32 %v1150_v57, %v1145_v60  ;;  %v1235_v38 = vmul.f32 %v1234_v26, %v1229_v61  ;;  %v3996_v52 = vpop.eup %3995  ;;  %v3678_v61 = vld [vmem:[%s4491_s23 + $0x7] sm:$0x1] }
 0x41a   : >> { %v1124_v1 = vadd.f32 %v1123_v58, %v1114_v31 }
 0x41c   : >> { %v1142_v4 = vmul.f32 %v3986_v0, %v1124_v1 }
 0x41d   : >> { %v1173_v10 = vpop.permute.xlu0 %1172  ;;  %v1285_v11 = vpop.permute.xlu1 %1284 }
 0x41e   : >> { %v1152_v12 = vadd.f32 %v1151_v6, %v1142_v4  ;;  %v1179_v16 = vmul.f32 %v1178_v3, %v1173_v10 }
 0x420   : >> { %v1170_v15 = vmul.f32 %v3988_v9, %v1152_v12 }
 0x422   : >> { %v1180_v17 = vadd.f32 %v1179_v16, %v1170_v15  ;;  %v1201_v18 = vpop.permute.xlu0 %1200  ;;  %v1098_v19 = vpop.permute.xlu1 %1097 }
 0x423   : >> { %v1207_v20 = vmul.f32 %v1206_v14, %v1201_v18  ;;  %v1100_v22 = vmul.f32 %v1098_v19, %v1094_v55  ;;  %v1290_v55 = vrot.slane %v4447_v50, %v4326_v27  ;;  %v3684_v19 = vld [vmem:[%s4491_s23 + $0x5] sm:$0x1] }
 0x424   : >> { %v1198_v28 = vmul.f32 %v3990_v24, %v1180_v17 }
 0x425   : >> { %v1101_v34 = vsel %vm242_vm0, %v1100_v22, 0.0  ;;  %v1291_v9 = vmul.f32 %v1290_v55, %v1285_v11 }
 0x426   : >> { %v1208_v51 = vadd.f32 %v1207_v20, %v1198_v28  ;;  %v1102_v35 = vrot.slane %v1101_v34, 4 }
 0x427   : >> { %v1257_v8 = vpop.permute.xlu0 %1256  ;;  %v1155_v36 = vpop.permute.xlu1 %1154 }
 0x428   : >> { %v1226_v39 = vmul.f32 %v3992_v33, %v1208_v51  ;;  %v1103_v40 = vadd.f32 %v1102_v35, %v1101_v34  ;;  %v1157_v41 = vmul.f32 %v1155_v36, %v1152_v12  ;;  %v1263_v49 = vmul.f32 %v1262_v21, %v1257_v8 }
 0x42a   : >> { %v1104_v43 = vrot.slane %v1103_v40, 2  ;;  %v1236_v32 = vadd.f32 %v1235_v38, %v1226_v39  ;;  %v1158_v44 = vsel %vm242_vm0, %v1157_v41, 0.0  ;;  %v3681_v41 = vld [vmem:[%s4491_s23 + $0x6] sm:$0x1] }
 0x42b   : >> { %v1159_v45 = vrot.slane %v1158_v44, 4 }
 0x42c   : >> { %v1105_v47 = vadd.f32 %v1104_v43, %v1103_v40  ;;  %v1254_v48 = vmul.f32 %v3994_v42, %v1236_v32  ;;  %v1127_v53 = vpop.permute.xlu0 %1126  ;;  %v1183_v54 = vpop.permute.xlu1 %1182 }
 0x42d   : >> { %v1160_v56 = vadd.f32 %v1159_v45, %v1158_v44  ;;  %v1129_v57 = vmul.f32 %v1127_v53, %v1124_v1  ;;  %v1185_v31 = vmul.f32 %v1183_v54, %v1180_v17  ;;  %v3687_v44 = vld [vmem:[%s4491_s23 + $0x4] sm:$0x1] }
 0x42e   : >> { %v1106_v58 = vrot.slane %v1105_v47, 1  ;;  %v1264_v60 = vadd.f32 %v1263_v49, %v1254_v48 }
 0x42f   : >> { %v1161_v62 = vrot.slane %v1160_v56, 2  ;;  %v1130_v0 = vsel %vm242_vm0, %v1129_v57, 0.0  ;;  %v1186_v3 = vsel %vm242_vm0, %v1185_v31, 0.0 }
 0x430   : >> { %v1107_v4 = vadd.f32 %v1106_v58, %v1105_v47  ;;  %v1131_v6 = vrot.slane %v1130_v0, 4  ;;  %v1187_v7 = vrot.slane %v1186_v3, 4  ;;  %v1282_v50 = vmul.f32 %v3996_v52, %v1264_v60 }
 0x431   : >> { %v1162_v1 = vadd.f32 %v1161_v62, %v1160_v56  ;;  %v1211_v10 = vpop.permute.xlu0 %1210  ;;  %v1239_v12 = vpop.permute.xlu1 %1238 }
 0x432   : >> { %v1111_v14 = vadd.f32 %v3678_v61, %v1107_v4  ;;  %v1132_v15 = vadd.f32 %v1131_v6, %v1130_v0  ;;  %v1188_v16 = vadd.f32 %v1187_v7, %v1186_v3  ;;  %v1213_v24 = vmul.f32 %v1211_v10, %v1208_v51  ;;  %v3690_v3 = vld [vmem:[%s4491_s23 + $0x3] sm:$0x1] }
 0x433   : >> { %v1163_v17 = vrot.slane %v1162_v1, 1  ;;  %v1241_v18 = vmul.f32 %v1239_v12, %v1236_v32  ;;  %v4496_v31 = vadd.f32 %v1291_v9, %v1282_v50   ;;  %v3693_v50 = vld [vmem:[%s4491_s23 + $0x2] sm:$0x1] }
 0x434   : >> { %3679 = vst.msk [vmem:[%s4491_s23 + $0x7] sm:$0x1] %vm667_vm3, %v1111_v14  ;;  %v1133_v20 = vrot.slane %v1132_v15, 2  ;;  %v1189_v22 = vrot.slane %v1188_v16, 2  ;;  %v1214_v26 = vsel %vm242_vm0, %v1213_v24, 0.0 }
 0x435   : >> { %v1164_v11 = vadd.f32 %v1163_v17, %v1162_v1  ;;  %v1215_v28 = vrot.slane %v1214_v26, 4  ;;  %v1242_v33 = vsel %vm242_vm0, %v1241_v18, 0.0  ;;  %v1306_v24 = vld [vmem:[%s4491_s23] sm:$0x1] }
 0x436   : >> { %v1134_v34 = vadd.f32 %v1133_v20, %v1132_v15  ;;  %v1190_v51 = vadd.f32 %v1189_v22, %v1188_v16  ;;  %v1243_v35 = vrot.slane %v1242_v33, 4  ;;  %v1295_v8 = vpop.permute.xlu0 %1294  ;;  %v1267_v21 = vpop.permute.xlu1 %1266 }
 0x437   : >> { %v1168_v36 = vadd.f32 %v3684_v19, %v1164_v11  ;;  %v1216_v38 = vadd.f32 %v1215_v28, %v1214_v26  ;;  %v1297_v39 = vmul.f32 %v1295_v8, %v4496_v31  ;;  %v1269_v40 = vmul.f32 %v1267_v21, %v1264_v60  ;;  %v3696_v19 = vld [vmem:[%s4491_s23 + $0x1] sm:$0x1]  ;;  %v3997_v11 = vld [vmem:[%s5439_s1 + $0x74] ss:$8 sps:$4 sm:$0xff] (%p857_p5)   ;;  %v3999_v28 = vld [vmem:[%s5439_s1 + $0x70] ss:$8 sps:$4 sm:$0xff] (%p857_p5)  }
 0x438   : >> { %v1135_v42 = vrot.slane %v1134_v34, 1  ;;  %v1191_v43 = vrot.slane %v1190_v51, 1  ;;  %v1244_v32 = vadd.f32 %v1243_v35, %v1242_v33  ;;  %1812 = vmatprep.subr.bf16.mxu1 (%p857_p5), %v3997_v11  ;;  %v4000_v33 = vld [vmem:[%s5439_s1 + $0x64] ss:$8 sps:$4 sm:$0xff] (%p857_p5)   ;;  %v4002_v31 = vld [vmem:[%s5439_s1 + $0x60] ss:$8 sps:$4 sm:$0xff] (%p857_p5)  }
 0x439   : >> { %3685 = vst.msk [vmem:[%s4491_s23 + $0x5] sm:$0x1] %vm667_vm3, %v1168_v36  ;;  %v1217_v45 = vrot.slane %v1216_v38, 2  ;;  %v1298_v47 = vsel %vm242_vm0, %v1297_v39, 0.0  ;;  %v1270_v48 = vsel %vm242_vm0, %v1269_v40, 0.0  ;;  %1813 = vmatpush1.bf16.msra.mxu1 (%p857_p5), %v3999_v28  ;;  %v1322_v39 = vld [vmem:[#allocation2 + $0x8] sm:$0xff] (%p857_p5) }
 0x43a   : >> { %v1136_v49 = vadd.f32 %v1135_v42, %v1134_v34  ;;  %v1192_v53 = vadd.f32 %v1191_v43, %v1190_v51  ;;  %v1245_v54 = vrot.slane %v1244_v32, 2  ;;  %v1299_v52 = vrot.slane %v1298_v47, 4  ;;  %1814 = vmatprep.subr.bf16.mxu1 (%p857_p5), %v4000_v33  ;;  %v3698_v34 = vld [vmem:[%s5441_s3 + $0x1] sm:$0x1] (%p857_p5)  ;;  %v4005_v51 = vld [vmem:[%s5439_s1 + $0x50] ss:$8 sps:$4 sm:$0xff] (%p857_p5)  }
 0x43b   : >> { %v1218_v55 = vadd.f32 %v1217_v45, %v1216_v38  ;;  %v1271_v56 = vrot.slane %v1270_v48, 4  ;;  %v4006_v35 = vld [vmem:[%s5439_s1 + $0x44] ss:$8 sps:$4 sm:$0xff] (%p857_p5)   ;;  %v1312_v8 = vadd.f32 (%p857_p5), %v3698_v34, %v1309_v30  ;;  %v1384_v40 = vld [vmem:[%s4252_s8] sm:$0x1] (%p857_p5) }
 0x43c   : >> { %v1140_v57 = vadd.f32 %v3681_v41, %v1136_v49  ;;  %v1196_v58 = vadd.f32 %v3687_v44, %v1192_v53  ;;  %v1246_v60 = vadd.f32 %v1245_v54, %v1244_v32  ;;  %v1300_v61 = vadd.f32 %v1299_v52, %v1298_v47  ;;  %v1321_v38 = vld [vmem:[#allocation2] sm:$0xff] (%p857_p5)  ;;  %v1386_v43 = vld [vmem:[%s4252_s8 + $0x8] sm:$0x1] (%p857_p5)  ;;  %v1387_v32 = vld [vmem:[%s4252_s8 + $0xc] sm:$0x1] (%p857_p5) }
 0x43d   : >> { %v1219_v62 = vrot.slane %v1218_v55, 1  ;;  %v1272_v0 = vadd.f32 %v1271_v56, %v1270_v48  ;;  %1815 = vmatpush1.bf16.msra.mxu1 (%p857_p5), %v4002_v31  ;;  %v1385_v41 = vld [vmem:[%s4252_s8 + $0x4] sm:$0x1] (%p857_p5)  ;;  %v4563_v42 = vrot.slane (%p857_p5), %v1312_v8, %v4326_v27  ;;  %v1388_v44 = vld [vmem:[%s4252_s8 + $0x10] sm:$0x1] (%p857_p5)  ;;  %v1392_v54 = vunpack.c.l.bf16 (%p857_p5), %v1384_v40 }
 0x43e   : >> { %3682 = vst.msk [vmem:[%s4491_s23 + $0x6] sm:$0x1] %vm667_vm3, %v1140_v57  ;;  %3688 = vst.msk [vmem:[%s4491_s23 + $0x4] sm:$0x1] %vm667_vm3, %v1196_v58  ;;  %v1247_v4 = vrot.slane %v1246_v60, 1  ;;  %v1301_v6 = vrot.slane %v1300_v61, 2  ;;  %1816 = vmatprep.subr.bf16.mxu1 (%p857_p5), %v4003_v29  ;;  %v1393_v45 = vunpack.c.l.bf16 (%p857_p5), %v1385_v41  ;;  %v1394_v52 = vunpack.c.l.bf16 (%p857_p5), %v1386_v43 }
 0x43f   : >> { %v1220_v7 = vadd.f32 %v1219_v62, %v1218_v55  ;;  %v1273_v9 = vrot.slane %v1272_v0, 2  ;;  %v4008_v47 = vld [vmem:[%s5439_s1 + $0x40] ss:$8 sps:$4 sm:$0xff] (%p857_p5)   ;;  %v1389_v48 = vld [vmem:[%s4252_s8 + $0x14] sm:$0x1] (%p857_p5)  ;;  %v1395_v55 = vunpack.c.l.bf16 (%p857_p5), %v1387_v32  ;;  %v1396_v56 = vunpack.c.l.bf16 (%p857_p5), %v1388_v44 }
 0x440   : >> { %v1248_v1 = vadd.f32 %v1247_v4, %v1246_v60  ;;  %v1302_v10 = vadd.f32 %v1301_v6, %v1300_v61  ;;  %v1390_v49 = vld [vmem:[%s4252_s8 + $0x18] sm:$0x1] (%p857_p5)  ;;  %v1391_v53 = vld [vmem:[%s4252_s8 + $0x1c] sm:$0x1] (%p857_p5)  ;;  %v1335_v57 = vmul.f32 (%p857_p5), %v4563_v42, %v1321_v38  ;;  %v1336_v58 = vmul.f32 (%p857_p5), %v4563_v42, %v1322_v39  ;;  %v1431_v62 = vld [vmem:[%s4252_s8] sm:$0x1] (%p857_p5) }
 0x441   : >> { %v1224_v12 = vadd.f32 %v3690_v3, %v1220_v7  ;;  %v1274_v14 = vadd.f32 %v1273_v9, %v1272_v0  ;;  %v1397_v60 = vunpack.c.l.bf16 (%p857_p5), %v1389_v48  ;;  %v1398_v61 = vunpack.c.l.bf16 (%p857_p5), %v1390_v49  ;;  %v1432_v0 = vld [vmem:[%s4252_s8 + $0x4] sm:$0x1] (%p857_p5)  ;;  %v1433_v3 = vld [vmem:[%s4252_s8 + $0x8] sm:$0x1] (%p857_p5)  ;;  %1817 = vmatpush1.bf16.msra.mxu1 (%p857_p5), %v4005_v51  ;;  %v1434_v9 = vld [vmem:[%s4252_s8 + $0xc] sm:$0x1] (%p857_p5) }
 0x442   : >> { %v1252_v15 = vadd.f32 %v3693_v50, %v1248_v1  ;;  %v1303_v16 = vrot.slane %v1302_v10, 1  ;;  %v1399_v4 = vunpack.c.l.bf16 (%p857_p5), %v1391_v53  ;;  %v1408_v6 = vrot.slane (%p857_p5), %v1393_v45, 7  ;;  %1818 = vmatprep.subr.bf16.mxu1 (%p857_p5), %v4006_v35  ;;  %v4591_v38 = vld [vmem:[%s4252_s8] sm:$0x2] (%p857_p5)  ;;  %v1475_v39 = vld [vmem:[%s4252_s8 + $0x4] sm:$0x2] (%p857_p5) }
 0x443   : >> { %3691 = vst.msk [vmem:[%s4491_s23 + $0x3] sm:$0x1] %vm667_vm3, %v1224_v12  ;;  %v1275_v17 = vrot.slane %v1274_v14, 1  ;;  %v1411_v7 = vrot.slane (%p857_p5), %v1394_v52, 6  ;;  %v1414_v50 = vrot.slane (%p857_p5), %v1395_v55, 5  ;;  %v1417_v12 = vrot.slane (%p857_p5), %v1396_v56, 4 }
 0x444   : >> { %3694 = vst.msk [vmem:[%s4491_s23 + $0x2] sm:$0x1] %vm667_vm3, %v1252_v15  ;;  %v1304_v18 = vadd.f32 %v1303_v16, %v1302_v10  ;;  %v1435_v15 = vld [vmem:[%s4252_s8 + $0x10] sm:$0x1] (%p857_p5)  ;;  %v1436_v16 = vld [vmem:[%s4252_s8 + $0x14] sm:$0x1] (%p857_p5)  ;;  %v1440_v11 = vunpack.c.l.bf16 (%p857_p5), %v1432_v0  ;;  %v1441_v28 = vunpack.c.l.bf16 (%p857_p5), %v1433_v3  ;;  %v1442_v33 = vunpack.c.l.bf16 (%p857_p5), %v1434_v9 }
 0x445   : >> { %v1276_v20 = vadd.f32 %v1275_v17, %v1274_v14  ;;  %859 = sbr.rel (!%p857_p5) target bundleno = 674 (0x2a2), region = 159  ;;  %v1420_v14 = vrot.slane (%p857_p5), %v1397_v60, 3  ;;  %v1423_v17 = vrot.slane (%p857_p5), %v1398_v61, 2  ;;  %1819 = vmatpush1.bf16.msra.mxu1 (%p857_p5), %v4008_v47  ;;  %v1443_v29 = vunpack.c.l.bf16 (%p857_p5), %v1435_v15  ;;  %v1476_v45 = vld [vmem:[%s4252_s8 + $0x8] sm:$0x2] (%p857_p5)  ;;  %v1324_v52 = vld [vmem:[#allocation2 + $0x18] sm:$0xff] (%p857_p5) }
 0x446   : >> { %v1307_v22 = vadd.f32 %v1306_v24, %v1304_v18  ;;  %v1410_v24 = vsel (%p857_p5), %vm1409_vm6, %v1408_v6, %v1392_v54  ;;  %v1426_v18 = vrot.slane (%p857_p5), %v1399_v4, 1  ;;  %v1444_v30 = vunpack.c.l.bf16 (%p857_p5), %v1436_v16  ;;  %v1323_v54 = vld [vmem:[#allocation2 + $0x10] sm:$0xff] (%p857_p5)  ;;  %v1477_v55 = vld [vmem:[%s4252_s8 + $0xc] sm:$0x2] (%p857_p5)  ;;  %v1480_v3 = vld [vmem:[%s4252_s8 + $0x18] sm:$0x2] (%p857_p5) }
 0x447   : >> { %v1280_v26 = vadd.f32 %v3696_v19, %v1276_v20  ;;  %v1437_v19 = vld [vmem:[%s4252_s8 + $0x18] sm:$0x1] (%p857_p5)  ;;  %v1438_v20 = vld [vmem:[%s4252_s8 + $0x1c] sm:$0x1] (%p857_p5)  ;;  %v1455_v8 = vrot.slane (%p857_p5), %v1440_v11, 7  ;;  %v1459_v41 = vrot.slane (%p857_p5), %v1442_v33, 5  ;;  %v1338_v60 = vmul.f32 (%p857_p5), %v4563_v42, %v1324_v52 }
 0x448   : >> { %1308 = vst.msk [vmem:[%s4491_s23] sm:$0x1] %vm667_vm3, %v1307_v22  ;;  %v1439_v22 = vunpack.c.l.bf16 (%p857_p5), %v1431_v62  ;;  %v1445_v34 = vunpack.c.l.bf16 (%p857_p5), %v1437_v19  ;;  %v1446_v35 = vunpack.c.l.bf16 (%p857_p5), %v1438_v20  ;;  %v1461_v43 = vrot.slane (%p857_p5), %v1443_v29, 4  ;;  %v1478_v61 = vld [vmem:[%s4252_s8 + $0x10] sm:$0x2] (%p857_p5) }
 0x449   : >> { %3697 = vst.msk [vmem:[%s4491_s23 + $0x1] sm:$0x1] %vm667_vm3, %v1280_v26  ;;  %v1413_v26 = vsel (%p857_p5), %vm1412_vm7, %v1411_v7, %v1410_v24  ;;  %v1463_v32 = vrot.slane (%p857_p5), %v1444_v30, 3  ;;  %v1479_v0 = vld [vmem:[%s4252_s8 + $0x14] sm:$0x2] (%p857_p5)  ;;  %v1482_v6 = vunpack.c.l.bf16 (%p857_p5), %v4591_v38  ;;  %v1483_v7 = vunpack.c.l.bf16 (%p857_p5), %v1475_v39 }
 0x44a   : > { %v1416_v31 = vsel %vm1415_vm8, %v1414_v50, %v1413_v26  ;;  %v1456_v48 = vsel %vm1412_vm7, %v1455_v8, %v1439_v22  ;;  %v1465_v49 = vrot.slane %v1445_v34, 2  ;;  %v1467_v53 = vrot.slane %v1446_v35, 1  ;;  %v1481_v4 = vld [vmem:[%s4252_s8 + $0x1c] sm:$0x2]  ;;  %v1517_v19 = vld [vmem:[%s4252_s8] sm:$0x2] }
 0x44b   : > { %v1419_v51 = vsel %vm1418_vm9, %v1417_v12, %v1416_v31  ;;  %v1484_v50 = vunpack.c.l.bf16 %v1476_v45  ;;  %v1485_v15 = vunpack.c.l.bf16 %v1477_v55  ;;  %v1518_v20 = vld [vmem:[%s4252_s8 + $0x4] sm:$0x2]  ;;  %v1519_v22 = vld [vmem:[%s4252_s8 + $0x8] sm:$0x2]  ;;  %v1487_v11 = vunpack.c.l.bf16 %v1479_v0  ;;  %v1520_v31 = vld [vmem:[%s4252_s8 + $0xc] sm:$0x2] }
 0x44c   : > { %v1422_v40 = vsel %vm1421_vm10, %v1420_v14, %v1419_v51  ;;  %1473 = vst.msk [vmem:[#allocation2 + $0xf] sm:$0x1] %vm667_vm3, %v1467_v53  ;;  %v1489_v33 = vunpack.c.l.bf16 %v1481_v4  ;;  %v1521_v29 = vld [vmem:[%s4252_s8 + $0x10] sm:$0x2]  ;;  %v1522_v30 = vld [vmem:[%s4252_s8 + $0x14] sm:$0x2]  ;;  %v1528_v45 = vunpack.c.l.bf16 %v1520_v31 }
 0x44d   : > { %v1425_v47 = vsel %vm1424_vm11, %v1423_v17, %v1422_v40  ;;  %v1498_v34 = vrot.slane %v1483_v7, 7  ;;  %v1500_v51 = vrot.slane %v1484_v50, 6  ;;  %v1502_v35 = vrot.slane %v1485_v15, 5  ;;  %v1524_v40 = vld [vmem:[%s4252_s8 + $0x1c] sm:$0x2]  ;;  %v1326_v15 = vld [vmem:[#allocation2 + $0x28] sm:$0xff] }
 0x44e   : > { %v1428_v56 = vsel %vm1427_vm12, %v1426_v18, %v1425_v47  ;;  %v1486_v18 = vunpack.c.l.bf16 %v1478_v61  ;;  %v1509_v39 = vrot.slane %v1489_v33, 1  ;;  %v1530_v53 = vunpack.c.l.bf16 %v1522_v30 }
 0x44f   : > { %1430 = vst.msk [vmem:[#allocation2] sm:$0xff] %vm242_vm0, %v1428_v56  ;;  %v1532_v55 = vunpack.c.l.bf16 %v1524_v40  ;;  %v1545_v61 = vrot.slane %v1528_v45, 5 }
 0x450   : > { %v1313_v21 = vld [vmem:[#allocation4] sm:$0xff]  ;;  %v1314_v36 = vld [vmem:[#allocation4 + $0x8] sm:$0xff]  ;;  %v1316_v44 = vld [vmem:[#allocation4 + $0x18] sm:$0xff]  ;;  %v1504_v8 = vrot.slane %v1486_v18, 4 }
 0x451   : > { %v1343_v1 = vadd.f32 %v1335_v57, %v1313_v21  ;;  %v1344_v10 = vadd.f32 %v1336_v58, %v1314_v36  ;;  %v1457_v21 = vrot.slane %v1441_v28, 6  ;;  %v1315_v36 = vld [vmem:[#allocation4 + $0x10] sm:$0xff]  ;;  %v1337_v58 = vmul.f32 %v4563_v42, %v1323_v54  ;;  %v1317_v0 = vld [vmem:[#allocation4 + $0x20] sm:$0xff] }
 0x452   : > { %v1346_v14 = vadd.f32 %v1338_v60, %v1316_v44  ;;  %v1488_v28 = vunpack.c.l.bf16 %v1480_v3  ;;  %v1527_v44 = vunpack.c.l.bf16 %v1519_v22  ;;  %v1325_v3 = vld [vmem:[#allocation2 + $0x20] sm:$0xff] }
 0x453   : > { %1351 = vst.msk [vmem:[#allocation4] sm:$0xff] %vm242_vm0, %v1343_v1  ;;  %1352 = vst.msk [vmem:[#allocation4 + $0x8] sm:$0xff] %vm242_vm0, %v1344_v10  ;;  %v1458_v57 = vsel %vm1415_vm8, %v1457_v21, %v1456_v48  ;;  %v1345_v12 = vadd.f32 %v1337_v58, %v1315_v36  ;;  %v1523_v21 = vld [vmem:[%s4252_s8 + $0x18] sm:$0x2]  ;;  %v1506_v36 = vrot.slane %v1487_v11, 3  ;;  %v1339_v30 = vmul.f32 %v4563_v42, %v1325_v3 }
 0x454   : > { %v1460_v62 = vsel %vm1418_vm9, %v1459_v41, %v1458_v57  ;;  %1354 = vst.msk [vmem:[#allocation4 + $0x18] sm:$0xff] %vm242_vm0, %v1346_v14  ;;  %v1508_v38 = vrot.slane %v1488_v28, 2  ;;  %v1525_v41 = vunpack.c.l.bf16 %v1517_v19  ;;  %v1531_v52 = vunpack.c.l.bf16 %v1523_v21  ;;  %v1318_v14 = vld [vmem:[#allocation4 + $0x28] sm:$0xff]  ;;  %v1561_v11 = vld [vmem:[%s4252_s8 + $0x4] sm:$0x4] }
 0x455   : > { %v1462_v10 = vsel %vm1421_vm10, %v1461_v43, %v1460_v62  ;;  %1353 = vst.msk [vmem:[#allocation4 + $0x10] sm:$0xff] %vm242_vm0, %v1345_v12  ;;  %v1499_v43 = vsel %vm1415_vm8, %v1498_v34, %v1482_v6  ;;  %v1543_v60 = vrot.slane %v1527_v44, 6  ;;  %v1562_v28 = vld [vmem:[%s4252_s8 + $0x8] sm:$0x4]  ;;  %v1563_v34 = vld [vmem:[%s4252_s8 + $0xc] sm:$0x4]  ;;  %v1347_v40 = vadd.f32 %v1339_v30, %v1317_v0 }
 0x456   : > { %v1464_v17 = vsel %vm1424_vm11, %v1463_v32, %v1462_v10  ;;  %v1526_v32 = vunpack.c.l.bf16 %v1518_v20  ;;  %v1501_v47 = vsel %vm1418_vm9, %v1500_v51, %v1499_v43  ;;  %v1510_v48 = vsel %vm1409_vm6, %v1509_v39, %v1508_v38  ;;  %v1731_v57 = vld [vmem:[#allocation2] sm:$0xff]  ;;  %v1564_v51 = vld [vmem:[%s4252_s8 + $0x10] sm:$0x4]  ;;  %v1566_v38 = vld [vmem:[%s4252_s8 + $0x18] sm:$0x4] }
 0x457   : > { %v1466_v26 = vsel %vm1427_vm12, %v1465_v49, %v1464_v17  ;;  %v1529_v49 = vunpack.c.l.bf16 %v1521_v29  ;;  %v1503_v54 = vsel %vm1421_vm10, %v1502_v35, %v1501_v47  ;;  %1516 = vst.msk [vmem:[#allocation2 + $0x16] sm:$0x3] %vm1515_vm14, %v1510_v48  ;;  %v1549_v10 = vrot.slane %v1530_v53, 3  ;;  %v1560_v17 = vld [vmem:[%s4252_s8] sm:$0x4] }
 0x458   : > { %1471 = vst.msk [vmem:[#allocation2 + $0x7] sm:$0xfe] %vm1470_vm13, %v1466_v26  ;;  %v1541_v56 = vrot.slane %v1526_v32, 7  ;;  %v1505_v58 = vsel %vm1424_vm11, %v1504_v8, %v1503_v54  ;;  %v1550_v12 = vrot.slane %v1531_v52, 2  ;;  %v1552_v26 = vrot.slane %v1532_v55, 1 }
 0x459   : > { %v1547_v62 = vrot.slane %v1529_v49, 4  ;;  %v1507_v7 = vsel %vm1427_vm12, %v1506_v36, %v1505_v58  ;;  %v1565_v35 = vld [vmem:[%s4252_s8 + $0x14] sm:$0x4]  ;;  %v1340_v36 = vmul.f32 %v4563_v42, %v1326_v15  ;;  %v1567_v39 = vld [vmem:[%s4252_s8 + $0x1c] sm:$0x4]  ;;  %v1569_v43 = vunpack.c.l.bf16 %v1561_v11  ;;  %1355 = vst.msk [vmem:[#allocation4 + $0x20] sm:$0xff] %vm242_vm0, %v1347_v40 }
 0x45a   : > { %v4611_v9 = vld [vmem:[#allocation4] sm:$0xff]  ;;  %v4613_v1 = vld [vmem:[#allocation4 + $0x8] sm:$0xff]  ;;  %v1542_v50 = vsel %vm1418_vm9, %v1541_v56, %v1525_v41  ;;  %1514 = vst.msk [vmem:[#allocation2 + $0xe] sm:$0xfc] %vm1513_vm15, %v1507_v7  ;;  %v1551_v29 = vsel %vm1409_vm6, %v1550_v12, %v1549_v10  ;;  %v1568_v41 = vunpack.c.l.bf16 %v1560_v17  ;;  %v1570_v32 = vunpack.c.l.bf16 %v1562_v28  ;;  %v1606_v55 = vld [vmem:[%s4252_s8 + $0x10] sm:$0x4] }
 0x45b   : > { %v1367_v16 = vpack.c.bf16 %v4611_v9, %v4611_v9  ;;  %v1368_v24 = vpack.c.bf16 %v4613_v1, %v4613_v1  ;;  %v1362_v6 = vld [vmem:[#allocation4 + $0x18] sm:$0xff]  ;;  %v1544_v22 = vsel %vm1421_vm10, %v1543_v60, %v1542_v50  ;;  %v1553_v21 = vsel %vm1412_vm7, %v1552_v26, %v1551_v29  ;;  %v1602_v47 = vld [vmem:[%s4252_s8] sm:$0x4]  ;;  %v1603_v1 = vld [vmem:[%s4252_s8 + $0x4] sm:$0x4] }
 0x45c   : > { %v1361_v4 = vld [vmem:[#allocation4 + $0x10] sm:$0xff]  ;;  %v1370_v20 = vpack.c.bf16 %v1362_v6, %v1362_v6  ;;  %v1546_v31 = vsel %vm1424_vm11, %v1545_v61, %v1544_v22  ;;  %1559 = vst.msk [vmem:[#allocation2 + $0x1d] sm:$0x7] %vm1558_vm2, %v1553_v21  ;;  %v1348_v44 = vadd.f32 %v1340_v36, %v1318_v14  ;;  %v1571_v9 = vunpack.c.l.bf16 %v1563_v34  ;;  %v1604_v48 = vld [vmem:[%s4252_s8 + $0x8] sm:$0x4] }
 0x45d   : > { %v1369_v19 = vpack.c.bf16 %v1361_v4, %v1361_v4  ;;  %v1548_v8 = vsel %vm1427_vm12, %v1547_v62, %v1546_v31  ;;  %1376 = vst.msk [vmem:[%s4257_s11] sm:$0xf] %vm1375_vm4, %v1367_v16  ;;  %1377 = vst.msk [vmem:[%s4257_s11 + $0x4] sm:$0xf] %vm1375_vm4, %v1368_v24  ;;  %v1572_v45 = vunpack.c.l.bf16 %v1564_v51  ;;  %v1573_v16 = vunpack.c.l.bf16 %v1565_v35  ;;  %v1605_v52 = vld [vmem:[%s4252_s8 + $0xc] sm:$0x4] }
 0x45e   : > { %1557 = vst.msk [vmem:[#allocation2 + $0x15] sm:$0xf8] %vm1556_vm1, %v1548_v8  ;;  %v1574_v24 = vunpack.c.l.bf16 %v1566_v38  ;;  %v1575_v49 = vunpack.c.l.bf16 %v1567_v39  ;;  %v1584_v53 = vrot.slane %v1569_v43, 7  ;;  %v1586_v54 = vrot.slane %v1570_v32, 6  ;;  %v1607_v60 = vld [vmem:[%s4252_s8 + $0x14] sm:$0x4] }
 0x45f   : > { %v1732_v18 = vld [vmem:[#allocation2 + $0x8] sm:$0xff]  ;;  %1378 = vst.msk [vmem:[%s4257_s11 + $0x8] sm:$0xf] %vm1375_vm4, %v1369_v19  ;;  %1379 = vst.msk [vmem:[%s4257_s11 + $0xc] sm:$0xf] %vm1375_vm4, %v1370_v20  ;;  %v1588_v56 = vrot.slane %v1571_v9, 5  ;;  %v1610_v6 = vunpack.c.l.bf16 %v1602_v47  ;;  %v1611_v12 = vunpack.c.l.bf16 %v1603_v1  ;;  %v1612_v14 = vunpack.c.l.bf16 %v1604_v48 }
 0x460   : > { %v1739_v33 = vpack.c.bf16 %v1732_v18, %v1731_v57  ;;  %1356 = vst.msk [vmem:[#allocation4 + $0x28] sm:$0xff] %vm242_vm0, %v1348_v44  ;;  %v1590_v57 = vrot.slane %v1572_v45, 4  ;;  %v1591_v58 = vrot.slane %v1573_v16, 3  ;;  %v1585_v61 = vsel %vm1421_vm10, %v1584_v53, %v1568_v41  ;;  %v1608_v3 = vld [vmem:[%s4252_s8 + $0x18] sm:$0x4]  ;;  %v1319_v35 = vld [vmem:[#allocation4 + $0x30] sm:$0xff] }
 0x461   : > { %v1593_v62 = vrot.slane %v1574_v24, 2  ;;  %v1595_v0 = vrot.slane %v1575_v49, 1  ;;  %v1609_v4 = vld [vmem:[%s4252_s8 + $0x1c] sm:$0x4]  ;;  %v1733_v7 = vld [vmem:[#allocation2 + $0x10] sm:$0xff]  ;;  %v1587_v50 = vsel %vm1424_vm11, %v1586_v54, %v1585_v61  ;;  %v1613_v18 = vunpack.c.l.bf16 %v1605_v52  ;;  %v1363_v21 = vld [vmem:[#allocation4 + $0x20] sm:$0xff] }
 0x462   : > { %3715 = vmatmul.mubr.msk.bf16.vlgmr.msra.gmra.mxu1 %vm242_vm0, %v1739_v33  ;;  %v1592_v10 = vsel %vm1409_vm6, %v1591_v58, %v1590_v57  ;;  %v1589_v15 = vsel %vm1427_vm12, %v1588_v56, %v1587_v50  ;;  %v1614_v19 = vunpack.c.l.bf16 %v1606_v55  ;;  %v1615_v26 = vunpack.c.l.bf16 %v1607_v60  ;;  %v4693_v33 = vld [vmem:[%s4252_s8] sm:$0x8]  ;;  %v1646_v31 = vld [vmem:[%s4252_s8 + $0x4] sm:$0x8]  ;;  %v1647_v8 = vld [vmem:[%s4252_s8 + $0x8] sm:$0x8] }
 0x463   : > { %1846 = vmatprep.mubr.bf16.mxu1 %v4153_v2  ;;  %v1594_v17 = vsel %vm1412_vm7, %v1593_v62, %v1592_v10  ;;  %1600 = vst.msk [vmem:[#allocation2 + $0x1c] sm:$0xf0] %vm1599_vm5, %v1589_v15  ;;  %v1616_v11 = vunpack.c.l.bf16 %v1608_v3  ;;  %v1617_v28 = vunpack.c.l.bf16 %v1609_v4  ;;  %v1626_v30 = vrot.slane %v1611_v12, 7  ;;  %v1320_v41 = vld [vmem:[#allocation4 + $0x38] sm:$0xff]  ;;  %v1327_v9 = vld [vmem:[#allocation2 + $0x30] sm:$0xff] }
 0x464   : > { %v1596_v22 = vsel %vm1415_vm8, %v1595_v0, %v1594_v17  ;;  %v1628_v34 = vrot.slane %v1612_v14, 6  ;;  %v1630_v51 = vrot.slane %v1613_v18, 5  ;;  %v1631_v36 = vrot.slane %v1614_v19, 4  ;;  %v1648_v45 = vld [vmem:[%s4252_s8 + $0xc] sm:$0x8]  ;;  %v1328_v48 = vld [vmem:[#allocation2 + $0x38] sm:$0xff] }
 0x465   : > { %v1734_v20 = vld [vmem:[#allocation2 + $0x18] sm:$0xff]  ;;  %1601 = vst.msk [vmem:[#allocation2 + $0x24] sm:$0xf] %vm1375_vm4, %v1596_v22  ;;  %v1633_v38 = vrot.slane %v1615_v26, 3  ;;  %v1635_v39 = vrot.slane %v1616_v11, 2  ;;  %v1637_v40 = vrot.slane %v1617_v28, 1  ;;  %v1371_v32 = vpack.c.bf16 %v1363_v21, %v1363_v21 }
 0x466   : > { %v1740_v29 = vpack.c.bf16 %v1734_v20, %v1733_v7  ;;  %v1627_v44 = vsel %vm1424_vm11, %v1626_v30, %v1610_v6  ;;  %vm1641_vm13 = vcmask 523269   ;;  %vm1643_vm14 = vcmask 520192   ;;  %v1649_v49 = vld [vmem:[%s4252_s8 + $0x10] sm:$0x8]  ;;  %v1650_v53 = vld [vmem:[%s4252_s8 + $0x14] sm:$0x8] }
 0x467   : > { %v1364_v43 = vld [vmem:[#allocation4 + $0x28] sm:$0xff]  ;;  %v1629_v47 = vsel %vm1427_vm12, %v1628_v34, %v1627_v44  ;;  %v1632_v1 = vsel %vm1409_vm6, %v1631_v36, %v1630_v51  ;;  %v1341_v24 = vmul.f32 %v4563_v42, %v1327_v9  ;;  %1380 = vst.msk [vmem:[%s4257_s11 + $0x10] sm:$0xf] %vm1375_vm4, %v1371_v32  ;;  %v1342_v52 = vmul.f32 %v4563_v42, %v1328_v48  ;;  %v1651_v55 = vld [vmem:[%s4252_s8 + $0x18] sm:$0x8] }
 0x468   : > { %v1372_v16 = vpack.c.bf16 %v1364_v43, %v1364_v43  ;;  %v1634_v54 = vsel %vm1412_vm7, %v1633_v38, %v1632_v1  ;;  %1642 = vst.msk [vmem:[#allocation2 + $0x23] sm:$0xe0] %vm1641_vm13, %v1629_v47  ;;  %v1652_v56 = vld [vmem:[%s4252_s8 + $0x1c] sm:$0x8]  ;;  %v1653_v57 = vunpack.c.l.bf16 %v4693_v33  ;;  %v1654_v58 = vunpack.c.l.bf16 %v1646_v31  ;;  %v1688_v3 = vld [vmem:[%s4252_s8] sm:$0x8] }
 0x469   : > { %v1636_v60 = vsel %vm1415_vm8, %v1635_v39, %v1634_v54  ;;  %v1349_v61 = vadd.f32 %v1341_v24, %v1319_v35  ;;  %v1655_v62 = vunpack.c.l.bf16 %v1647_v8  ;;  %v1656_v0 = vunpack.c.l.bf16 %v1648_v45  ;;  %v1689_v50 = vld [vmem:[%s4252_s8 + $0x4] sm:$0x8]  ;;  %v1690_v10 = vld [vmem:[%s4252_s8 + $0x8] sm:$0x8]  ;;  %v1691_v12 = vld [vmem:[%s4252_s8 + $0xc] sm:$0x8] }
 0x46a   : > { %3716 = vmatmul.mubr.msk.bf16.gmra.mxu1 %vm242_vm0, %v1740_v29  ;;  %1381 = vst.msk [vmem:[%s4257_s11 + $0x14] sm:$0xf] %vm1375_vm4, %v1372_v16  ;;  %v1638_v4 = vsel %vm1418_vm9, %v1637_v40, %v1636_v60  ;;  %v1350_v42 = vadd.f32 %v1342_v52, %v1320_v41  ;;  %v1657_v6 = vunpack.c.l.bf16 %v1649_v49  ;;  %v1658_v7 = vunpack.c.l.bf16 %v1650_v53  ;;  %v1692_v19 = vld [vmem:[%s4252_s8 + $0x10] sm:$0x8]  ;;  %v1693_v20 = vld [vmem:[%s4252_s8 + $0x14] sm:$0x8] }
 0x46b   : > { %1856 = vmatprep.mubr.bf16.mxu1 %v4153_v2  ;;  %1644 = vst.msk [vmem:[#allocation2 + $0x2b] sm:$0x1f] %vm1643_vm14, %v1638_v4  ;;  %v1659_v14 = vunpack.c.l.bf16 %v1651_v55  ;;  %v1660_v15 = vunpack.c.l.bf16 %v1652_v56  ;;  %v1669_v17 = vrot.slane %v1654_v58, 7  ;;  %v1671_v18 = vrot.slane %v1655_v62, 6  ;;  %v1694_v28 = vld [vmem:[%s4252_s8 + $0x18] sm:$0x8] }
 0x46c   : > { %1357 = vst.msk [vmem:[#allocation4 + $0x30] sm:$0xff] %vm242_vm0, %v1349_v61  ;;  %1358 = vst.msk [vmem:[#allocation4 + $0x38] sm:$0xff] %vm242_vm0, %v1350_v42  ;;  %v1672_v22 = vrot.slane %v1656_v0, 5  ;;  %v1674_v26 = vrot.slane %v1657_v6, 4  ;;  %v1676_v11 = vrot.slane %v1658_v7, 3  ;;  %vm1684_vm15 = vcmask 523270  }
 0x46d   : > { %v1670_v33 = vsel %vm1427_vm12, %v1669_v17, %v1653_v57  ;;  %v1678_v31 = vrot.slane %v1659_v14, 2  ;;  %v1680_v29 = vrot.slane %v1660_v15, 1  ;;  %vm1686_vm1 = vcmask 521216   ;;  %v1695_v30 = vld [vmem:[%s4252_s8 + $0x1c] sm:$0x8]  ;;  %v1735_v40 = vld [vmem:[#allocation2 + $0x20] sm:$0xff] }
 0x46e   : > { %v1673_v34 = vsel %vm1409_vm6, %v1672_v22, %v1671_v18  ;;  %1685 = vst.msk [vmem:[#allocation2 + $0x2a] sm:$0xc0] %vm1684_vm15, %v1670_v33  ;;  %v1696_v51 = vunpack.c.l.bf16 %v1688_v3  ;;  %v1697_v35 = vunpack.c.l.bf16 %v1689_v50  ;;  %v1698_v8 = vunpack.c.l.bf16 %v1690_v10  ;;  %v4752_v7 = vld [vmem:[%s5440_s2 + $0x10] sm:$0xff] }
 0x46f   : > { %v1675_v21 = vsel %vm1412_vm7, %v1674_v26, %v1673_v34  ;;  %v1699_v36 = vunpack.c.l.bf16 %v1691_v12  ;;  %v1700_v38 = vunpack.c.l.bf16 %v1692_v19  ;;  %v1701_v39 = vunpack.c.l.bf16 %v1693_v20 }
 0x470   : > { %v1677_v41 = vsel %vm1415_vm8, %v1676_v11, %v1675_v21  ;;  %v1702_v43 = vunpack.c.l.bf16 %v1694_v28  ;;  %v1703_v32 = vunpack.c.l.bf16 %v1695_v30  ;;  %v1712_v44 = vrot.slane %v1697_v35, 7 }
 0x471   : > { %v1679_v9 = vsel %vm1418_vm9, %v1678_v31, %v1677_v41  ;;  %v1713_v45 = vrot.slane %v1698_v8, 6  ;;  %v1715_v16 = vrot.slane %v1699_v36, 5  ;;  %v1717_v47 = vrot.slane %v1700_v38, 4 }
 0x472   : > { %v1736_v1 = vld [vmem:[#allocation2 + $0x28] sm:$0xff]  ;;  %v1681_v24 = vsel %vm1421_vm10, %v1680_v29, %v1679_v9  ;;  %v1719_v49 = vrot.slane %v1701_v39, 3  ;;  %v1721_v53 = vrot.slane %v1702_v43, 2  ;;  %vm1727_vm12 = vcmask 523271  }
 0x473   : > { %v1365_v48 = vld [vmem:[#allocation4 + $0x30] sm:$0xff]  ;;  %v1741_v54 = vpack.c.bf16 %v1736_v1, %v1735_v40  ;;  %v1366_v52 = vld [vmem:[#allocation4 + $0x38] sm:$0xff]  ;;  %1687 = vst.msk [vmem:[#allocation2 + $0x32] sm:$0x3f] %vm1686_vm1, %v1681_v24  ;;  %v1714_v56 = vsel %vm1409_vm6, %v1713_v45, %v1712_v44  ;;  %v1723_v60 = vrot.slane %v1703_v32, 1  ;;  %vm1729_vm2 = vcmask 522240  }
 0x474   : > { %v1373_v55 = vpack.c.bf16 %v1365_v48, %v1365_v48  ;;  %v1374_v57 = vpack.c.bf16 %v1366_v52, %v1366_v52  ;;  %v1716_v58 = vsel %vm1412_vm7, %v1715_v16, %v1714_v56  ;;  %1728 = vst.msk [vmem:[#allocation2 + $0x31] sm:$0x80] %vm1727_vm12, %v1696_v51  ;;  %v4759_v30 = vmov 0.0  }
 0x475   : > { %3717 = vmatmul.mubr.msk.bf16.gmra.mxu1 %vm242_vm0, %v1741_v54  ;;  %v1718_v61 = vsel %vm1415_vm8, %v1717_v47, %v1716_v58 }
 0x476   : > { %1382 = vst.msk [vmem:[%s4257_s11 + $0x18] sm:$0xf] %vm1375_vm4, %v1373_v55  ;;  %1866 = vmatprep.mubr.bf16.mxu1 %v4153_v2  ;;  %1383 = vst.msk [vmem:[%s4257_s11 + $0x1c] sm:$0xf] %vm1375_vm4, %v1374_v57  ;;  %v1720_v62 = vsel %vm1418_vm9, %v1719_v49, %v1718_v61  ;;  %v4757_v2 = vld [vmem:[%s5442_s4 + $0x2] ss:$0 sm:$0xff] }
 0x477   : > { %v1722_v0 = vsel %vm1421_vm10, %v1721_v53, %v1720_v62 }
 0x478   : > { %v1724_v3 = vsel %vm1424_vm11, %v1723_v60, %v1722_v0 }
 0x479   : > { %1730 = vst.msk [vmem:[#allocation2 + $0x39] sm:$0x7f] %vm1729_vm2, %v1724_v3 }
 0x47a   : > { %v1737_v4 = vld [vmem:[#allocation2 + $0x30] sm:$0xff] }
 0x480   : > { %v1738_v42 = vld [vmem:[#allocation2 + $0x38] sm:$0xff] }
 0x481   : > { %v1742_v6 = vpack.c.bf16 %v1738_v42, %v1737_v4 }
 0x483   : > { %3718 = vmatmul.mubr.msk.bf16.gmra.mxu1 %vm242_vm0, %v1742_v6 }
 0x522   : > { %v1838_v50 = vpop.f32.mrf.mxu1 }
 0x523   : > { %1877 = vst [vmem:[#allocation3] sm:$0xff] %v1838_v50 }
 0x524   : > { %v1840_v10 = vpop.f32.mrf.mxu1 }
 0x525   : > { %1878 = vst [vmem:[#allocation3 + $0x8] sm:$0xff] %v1840_v10 }
 0x526   : > { %v1842_v12 = vpop.f32.mrf.mxu1 }
 0x527   : > { %1879 = vst [vmem:[#allocation3 + $0x10] sm:$0xff] %v1842_v12 }
 0x528   : > { %v1844_v14 = vpop.f32.mrf.mxu1 }
 0x529   : > { %1880 = vst [vmem:[#allocation3 + $0x18] sm:$0xff] %v1844_v14 }
 0x52a   : > { %v1848_v15 = vpop.f32.mrf.mxu1 }
 0x52b   : > { %1881 = vst [vmem:[#allocation3 + $0x20] sm:$0xff] %v1848_v15 }
 0x52c   : > { %v1850_v17 = vpop.f32.mrf.mxu1 }
 0x52d   : > { %1882 = vst [vmem:[#allocation3 + $0x28] sm:$0xff] %v1850_v17 }
 0x52e   : > { %v1852_v18 = vpop.f32.mrf.mxu1 }
 0x52f   : > { %1883 = vst [vmem:[#allocation3 + $0x30] sm:$0xff] %v1852_v18 }
 0x530   : > { %v1854_v19 = vpop.f32.mrf.mxu1 }
 0x531   : > { %1884 = vst [vmem:[#allocation3 + $0x38] sm:$0xff] %v1854_v19 }
 0x535   : > { %v1858_v20 = vpop.f32.mrf.mxu1 }
 0x536   : > { %1885 = vst [vmem:[#allocation3 + $0x40] sm:$0xff] %v1858_v20 }
 0x537   : > { %v1860_v22 = vpop.f32.mrf.mxu1 }
 0x538   : > { %1886 = vst [vmem:[#allocation3 + $0x48] sm:$0xff] %v1860_v22 }
 0x539   : > { %v1862_v26 = vpop.f32.mrf.mxu1 }
 0x53a   : > { %1887 = vst [vmem:[#allocation3 + $0x50] sm:$0xff] %v1862_v26 }
 0x53b   : > { %v1864_v11 = vpop.f32.mrf.mxu1 }
 0x53c   : > { %1888 = vst [vmem:[#allocation3 + $0x58] sm:$0xff] %v1864_v11 }
 0x543   : > { %v1868_v28 = vpop.f32.mrf.mxu1 }
 0x544   : > { %1889 = vst [vmem:[#allocation3 + $0x60] sm:$0xff] %v1868_v28 }
 0x545   : > { %v1870_v33 = vpop.f32.mrf.mxu1 }
 0x546   : > { %1890 = vst [vmem:[#allocation3 + $0x68] sm:$0xff] %v1870_v33 }
 0x547   : > { %v1872_v31 = vpop.f32.mrf.mxu1 }
 0x548   : > { %1891 = vst [vmem:[#allocation3 + $0x70] sm:$0xff] %v1872_v31 }
 0x549   : > { %v1874_v29 = vpop.f32.mrf.mxu1 }
 0x54a   : > { %1892 = vst [vmem:[#allocation3 + $0x78] sm:$0xff] %v1874_v29 }
 0x54b LB: >> { %v4175_v34 = vmov 0   ;;  %s4770_s26 = sshll.u32 %s4143_s25, 3  ;;  %s4176_s30 = smov 64   ;;  %v4178_v54 = vmov 1   ;;  %v4179_v55 = vmov 2   ;;  %v4180_v56 = vmov 5   ;;  %s4143_s25 = sphi %s4761_s25, %s1902_s25   ;;  %v4139_v30 = vphi %v4759_v30, %v2317_v30  }
 0x54c   : >> { %4009 = vset.pattern.permute.xlu0 %v4175_v34  ;;  %s1907_s27 = sshra.s32 %s4770_s26, 3  ;;  %s4177_s6 = smov 56   ;;  %v4181_v57 = vmov 3   ;;  %v4182_v58 = vmov 7   ;;  %v4183_v61 = vmov 4   ;;  %v4184_v62 = vmov 6  }
 0x54d   : >> { %s3774_s28 = sshll.u32 %s1907_s27, 4  ;;  %s1905_s7 = scalar_lea.vmem [#allocation2], %s4770_s26 }
 0x54e   : >> { %s1911_s29 = scalar_lea.vmem [#allocation3], %s3774_s28  ;;  %v1906_v47 = vld [vmem:[%s1905_s7] sm:$0xff]  ;;  %s4821_s9 = scalar_lea.vmem [#allocation4], %s4770_s26 }
 0x54f   : >> { %s1902_s25 = sadd.s32 1, %s4143_s25  }
 0x550   : >> { %p1899_p6 = scmp.ge.s32.totalorder %s1902_s25, 8  }
 0x551   : >> { %v1912_v51 = vld [vmem:[%s1911_s29] sm:$0xff]  ;;  %s4860_s15 = smov (%p1899_p6), 0  }
 0x552   : >> { %1940 = vrot.lane.b32.xlu0 %v1912_v51, %s4176_s30  ;;  %v1919_v35 = vadd.f32 %v4757_v2, %v1912_v51 }
 0x554   : >> { %v1923_v8 = vand.u32 2147483647, %v1919_v35  ;;  %v1920_v9 = vmax.f32 %v1919_v35, 0.0  ;;  %vm1921_vm7 = vcmp.ne.f32.partialorder %v1919_v35, %v1919_v35 }
 0x556   : >> { %v1924_v21 = vsub.f32 0.0, %v1923_v8  ;;  %1975 = vrot.lane.b32.xlu0 %v1912_v51, %s4177_s6 }
 0x558   : >> { %v1925_v36 = vmul.f32 1.442695, %v1924_v21 }
 0x55a   : >> { %4025 = vpow2.f32 %v1925_v36 }
 0x567   : >> { %v4026_v38 = vpop.eup %4025 }
 0x568   : >> { %v1927_v39 = vadd.f32 1.0, %v4026_v38  ;;  %v1930_v40 = vmul.f32 -0.5, %v4026_v38  ;;  %v1933_v43 = vand.u32 2147483647, %v4026_v38 }
 0x56a   : >> { %4027 = vlog2.f32 %v1927_v39  ;;  %v1931_v41 = vadd.f32 1.0, %v1930_v40  ;;  %vm1934_vm6 = vcmp.lt.f32.partialorder %v1933_v43, 0.0004427343 }
 0x56c   : >> { %v1932_v32 = vmul.f32 %v4026_v38, %v1931_v41 }
 0x577   : >> { %v4028_v44 = vpop.eup %4027 }
 0x578   : >> { %v1929_v45 = vmul.f32 0.6931472, %v4028_v44 }
 0x57a   : >> { %v1935_v16 = vsel %vm1934_vm6, %v1932_v32, %v1929_v45 }
 0x57b   : >> { %v1936_v1 = vadd.f32 %v1935_v16, %v1920_v9 }
 0x57d   : >> { %v1937_v48 = vsel %vm1921_vm7, %v1919_v35, %v1936_v1 }
 0x57e   : >> { %v4775_v24 = vmul.f32 %v1937_v48, %v1906_v47  ;;  %v2018_v0 = vrot.slane %v1937_v48, %v4321_v25  ;;  %v2011_v10 = vcombine.high %v1937_v48, %v1937_v48 }
 0x580   : >> { %v2034_v3 = vrot.slane %v2018_v0, %v4321_v25  ;;  %v2026_v4 = vcombine.high %v2018_v0, %v2018_v0  ;;  %v2025_v17 = vrot.slane %v2011_v10, %v4321_v25  ;;  %v2133_v43 = vrot.slane %v4775_v24, %v4326_v27 }
 0x581   : >> { %v2159_v48 = vrot.slane %v4775_v24, %v4349_v59  ;;  %v2211_v0 = vrot.slane %v4775_v24, %v4364_v13 }
 0x582   : >> { %v2063_v42 = vrot.slane %v2034_v3, %v4326_v27  ;;  %v2048_v6 = vrot.slane %v2026_v4, %v4321_v25  ;;  %v2056_v12 = vcombine.high %v2034_v3, %v2034_v3  ;;  %v2027_v22 = vcombine.high %v2025_v17, %v2025_v17 }
 0x583   : >> { %v2041_v26 = vrot.slane %v2025_v17, %v4321_v25 }
 0x584   : >> { %v2100_v50 = vmul.f32 %v4752_v7, %v2063_v42  ;;  %v2067_v14 = vrot.slane %v2048_v6, %v4326_v27  ;;  %v2058_v18 = vcombine.high %v2048_v6, %v2048_v6  ;;  %v2071_v19 = vrot.slane %v2056_v12, %v4326_v27 }
 0x585   : >> { %v2055_v31 = vrot.slane %v2027_v22, %v4321_v25  ;;  %v2079_v29 = vrot.slane %v2041_v26, %v4326_v27  ;;  %v2057_v35 = vcombine.high %v2041_v26, %v2041_v26 }
 0x586   : >> { %v2108_v15 = vmul.f32 1.442695, %v2100_v50  ;;  %v2101_v20 = vmul.f32 %v4752_v7, %v2067_v14  ;;  %v2075_v11 = vrot.slane %v2058_v18, %v4326_v27  ;;  %v2102_v28 = vmul.f32 %v4752_v7, %v2071_v19 }
 0x587   : >> { %v2083_v8 = vrot.slane %v2055_v31, %v4326_v27  ;;  %v2104_v21 = vmul.f32 %v4752_v7, %v2079_v29  ;;  %v2059_v39 = vcombine.high %v2055_v31, %v2055_v31  ;;  %v2087_v41 = vrot.slane %v2057_v35, %v4326_v27 }
 0x588   : >> { %4029 = vpow2.f32 %v2108_v15  ;;  %v2110_v33 = vmul.f32 1.442695, %v2101_v20  ;;  %v2103_v51 = vmul.f32 %v4752_v7, %v2075_v11  ;;  %v2237_v14 = vrot.slane %v4775_v24, %v4370_v23 }
 0x589   : >> { %v2105_v40 = vmul.f32 %v4752_v7, %v2083_v8  ;;  %v2116_v32 = vmul.f32 1.442695, %v2104_v21  ;;  %v2091_v9 = vrot.slane %v2059_v39, %v4326_v27  ;;  %v2289_v8 = vrot.slane %v4775_v24, %v4378_v46 }
 0x58a   : >> { %4031 = vpow2.f32 %v2110_v33  ;;  %v2114_v36 = vmul.f32 1.442695, %v2103_v51  ;;  %v2263_v33 = vrot.slane %v4775_v24, %v4375_v37 }
 0x58b   : >> { %v2118_v47 = vmul.f32 1.442695, %v2105_v40 }
 0x595   : >> { %v4030_v38 = vpop.eup %4029 }
 0x596   : >> { %v2124_v44 = vmul.f32 %v4139_v30, %v4030_v38 }
 0x5c4   : >> { %v1941_v49 = vpop.permute.xlu0 %1940 }
 0x5c5   : >> { %1943 = vxpose.xlu1.b32.start.end [1/1] (short) (narrow) %v1941_v49, 8  ;;  %v2106_v49 = vmul.f32 %v4752_v7, %v2087_v41 }
 0x5c8   : >> { %v1976_v53 = vpop.permute.xlu0 %1975 }
 0x5c9   : >> { %1978 = vxpose.xlu1.b32.start.end [1/1] (short) (narrow) %v1976_v53, 8  ;;  %v4032_v53 = vpop.eup %4031 }
 0x5e7   : >> { %4010 = vset.pattern.permute.xlu1 %v4178_v54 }
 0x641   : >> { %v1959_v52 = vpop.trf.xlu1 }
 0x642   : >> { %2127 = vperm.xlu0 %4009, %v1959_v52   ;;  %2153 = vperm.xlu1 %4010, %v1959_v52  }
 0x645   : >> { %v1994_v60 = vpop.trf.xlu1 }
 0x646   : >> { %4011 = vset.pattern.permute.xlu0 %v4179_v55  ;;  %4014 = vset.pattern.permute.xlu1 %v4180_v56 }
 0x647   : >> { %2179 = vperm.xlu0 %4011, %v1959_v52   ;;  %2257 = vperm.xlu1 %4014, %v1959_v52  }
 0x64b   : >> { %4012 = vset.pattern.permute.xlu0 %v4181_v57  ;;  %4016 = vset.pattern.permute.xlu1 %v4182_v58 }
 0x64c   : >> { %2205 = vperm.xlu0 %4012, %v1959_v52   ;;  %2309 = vperm.xlu1 %4016, %v1959_v52  }
 0x650   : >> { %4013 = vset.pattern.permute.xlu0 %v4183_v61  ;;  %4017 = vset.pattern.permute.xlu1 %v4175_v34  ;;  %v2112_v34 = vmul.f32 1.442695, %v2102_v28 }
 0x651   : >> { %2231 = vperm.xlu0 %4013, %v1959_v52   ;;  %2138 = vperm.xlu1 %4017, %v1994_v60  }
 0x652   : >> { %4033 = vpow2.f32 %v2112_v34 }
 0x653   : >> { %4035 = vpow2.f32 %v2114_v36 }
 0x654   : >> { %4037 = vpow2.f32 %v2116_v32 }
 0x655   : >> { %4015 = vset.pattern.permute.xlu0 %v4184_v62  ;;  %4019 = vset.pattern.permute.xlu1 %v4179_v55  ;;  %4039 = vpow2.f32 %v2118_v47 }
 0x656   : >> { %2283 = vperm.xlu0 %4015, %v1959_v52   ;;  %2189 = vperm.xlu1 %4019, %v1994_v60   ;;  %v2185_v52 = vrot.slane %v4775_v24, %v4357_v5 }
 0x65a   : >> { %4018 = vset.pattern.permute.xlu0 %v4178_v54  ;;  %4020 = vset.pattern.permute.xlu1 %v4181_v57 }
 0x65b   : >> { %2163 = vperm.xlu0 %4018, %v1994_v60   ;;  %2215 = vperm.xlu1 %4020, %v1994_v60  }
 0x65f   : >> { %4021 = vset.pattern.permute.xlu0 %v4183_v61  ;;  %4022 = vset.pattern.permute.xlu1 %v4180_v56  ;;  %v4034_v61 = vpop.eup %4033 }
 0x660   : >> { %2241 = vperm.xlu0 %4021, %v1994_v60   ;;  %2267 = vperm.xlu1 %4022, %v1994_v60   ;;  %v4036_v6 = vpop.eup %4035 }
 0x661   : >> { %v4038_v18 = vpop.eup %4037 }
 0x662   : >> { %v4040_v28 = vpop.eup %4039 }
 0x664   : >> { %4024 = vset.pattern.permute.xlu0 %v4182_v58  ;;  %4023 = vset.pattern.permute.xlu1 %v4184_v62  ;;  %v2120_v58 = vmul.f32 1.442695, %v2106_v49 }
 0x665   : >> { %2319 = vperm.xlu0 %4024, %v1994_v60   ;;  %2293 = vperm.xlu1 %4023, %v1994_v60   ;;  %v2107_v60 = vmul.f32 %v4752_v7, %v2091_v9 }
 0x666   : >> { %4041 = vpow2.f32 %v2120_v58 }
 0x667   : >> { %v2122_v42 = vmul.f32 1.442695, %v2107_v60 }
 0x669   : >> { %4043 = vpow2.f32 %v2122_v42 }
 0x673   : >> { %v4042_v41 = vpop.eup %4041 }
 0x676   : >> { %v4044_v49 = vpop.eup %4043 }
 0x6bd   : >> { %v2128_v45 = vpop.permute.xlu0 %2127  ;;  %v2154_v16 = vpop.permute.xlu1 %2153 }
 0x6be   : >> { %v2134_v1 = vmul.f32 %v2133_v43, %v2128_v45  ;;  %v2160_v30 = vmul.f32 %v2159_v48, %v2154_v16 }
 0x6c0   : >> { %v2135_v54 = vadd.f32 %v2134_v1, %v2124_v44 }
 0x6c2   : >> { %v2151_v55 = vmul.f32 %v4032_v53, %v2135_v54  ;;  %v2180_v56 = vpop.permute.xlu0 %2179  ;;  %v2258_v57 = vpop.permute.xlu1 %2257  ;;  %v2315_v53 = vrot.slane %v4775_v24, %v4386_v63 }
 0x6c3   : >> { %v2186_v4 = vmul.f32 %v2185_v52, %v2180_v56  ;;  %v2264_v36 = vmul.f32 %v2263_v33, %v2258_v57 }
 0x6c4   : >> { %v2161_v62 = vadd.f32 %v2160_v30, %v2151_v55 }
 0x6c6   : >> { %v2177_v3 = vmul.f32 %v4034_v61, %v2161_v62 }
 0x6c7   : >> { %v2206_v50 = vpop.permute.xlu0 %2205  ;;  %v2310_v10 = vpop.permute.xlu1 %2309 }
 0x6c8   : >> { %v2187_v12 = vadd.f32 %v2186_v4, %v2177_v3  ;;  %v2212_v17 = vmul.f32 %v2211_v0, %v2206_v50  ;;  %v2316_v42 = vmul.f32 %v2315_v53, %v2310_v10 }
 0x6ca   : >> { %v2203_v15 = vmul.f32 %v4036_v6, %v2187_v12 }
 0x6cc   : >> { %v2213_v19 = vadd.f32 %v2212_v17, %v2203_v15  ;;  %v2232_v20 = vpop.permute.xlu0 %2231  ;;  %v2139_v22 = vpop.permute.xlu1 %2138 }
 0x6cd   : >> { %v2238_v26 = vmul.f32 %v2237_v14, %v2232_v20  ;;  %v2141_v11 = vmul.f32 %v2139_v22, %v2135_v54 }
 0x6ce   : >> { %v2229_v31 = vmul.f32 %v4038_v18, %v2213_v19 }
 0x6cf   : >> { %v2142_v29 = vsel %vm242_vm0, %v2141_v11, 0.0 }
 0x6d0   : >> { %v2239_v34 = vadd.f32 %v2238_v26, %v2229_v31  ;;  %v2143_v51 = vrot.slane %v2142_v29, 4 }
 0x6d1   : >> { %v2284_v35 = vpop.permute.xlu0 %2283  ;;  %v2190_v21 = vpop.permute.xlu1 %2189 }
 0x6d2   : >> { %v2255_v38 = vmul.f32 %v4040_v28, %v2239_v34  ;;  %v2144_v39 = vadd.f32 %v2143_v51, %v2142_v29  ;;  %v2192_v40 = vmul.f32 %v2190_v21, %v2187_v12  ;;  %v2290_v47 = vmul.f32 %v2289_v8, %v2284_v35 }
 0x6d4   : >> { %v2145_v43 = vrot.slane %v2144_v39, 2  ;;  %v2265_v32 = vadd.f32 %v2264_v36, %v2255_v38  ;;  %v2193_v44 = vsel %vm242_vm0, %v2192_v40, 0.0 }
 0x6d5   : >> { %v2194_v9 = vrot.slane %v2193_v44, 4 }
 0x6d6   : >> { %v2146_v45 = vadd.f32 %v2145_v43, %v2144_v39  ;;  %v2281_v16 = vmul.f32 %v4042_v41, %v2265_v32  ;;  %v2164_v1 = vpop.permute.xlu0 %2163  ;;  %v2216_v48 = vpop.permute.xlu1 %2215 }
 0x6d7   : >> { %v2195_v54 = vadd.f32 %v2194_v9, %v2193_v44  ;;  %v2166_v52 = vmul.f32 %v2164_v1, %v2161_v62  ;;  %v2218_v55 = vmul.f32 %v2216_v48, %v2213_v19 }
 0x6d8   : >> { %v2147_v30 = vrot.slane %v2146_v45, 1  ;;  %v2291_v56 = vadd.f32 %v2290_v47, %v2281_v16 }
 0x6d9   : >> { %v2196_v57 = vrot.slane %v2195_v54, 2  ;;  %v2167_v58 = vsel %vm242_vm0, %v2166_v52, 0.0  ;;  %v2219_v60 = vsel %vm242_vm0, %v2218_v55, 0.0 }
 0x6da   : >> { %v2148_v61 = vadd.f32 %v2147_v30, %v2146_v45  ;;  %v2168_v0 = vrot.slane %v2167_v58, 4  ;;  %v2220_v3 = vrot.slane %v2219_v60, 4  ;;  %v2307_v4 = vmul.f32 %v4044_v49, %v2291_v56 }
 0x6db   : >> { %v2197_v6 = vadd.f32 %v2196_v57, %v2195_v54  ;;  %v2242_v50 = vpop.permute.xlu0 %2241  ;;  %v2268_v12 = vpop.permute.xlu1 %2267 }
 0x6dc   : >> { %2150 = vst.msk [vmem:[%s4821_s9] sm:$0x1] %vm667_vm3, %v2148_v61  ;;  %v2169_v24 = vadd.f32 %v2168_v0, %v2167_v58  ;;  %v2221_v62 = vadd.f32 %v2220_v3, %v2219_v60  ;;  %v2244_v14 = vmul.f32 %v2242_v50, %v2239_v34  ;;  %v2270_v15 = vmul.f32 %v2268_v12, %v2265_v32  ;;  %v4851_v3 = vld [vmem:[%s5440_s2 + $0x18] sm:$0xff] (%p1899_p6) }
 0x6dd   : >> { %v2198_v17 = vrot.slane %v2197_v6, 1  ;;  %v2317_v30 = vadd.f32 %v2316_v42, %v2307_v4   ;;  %v4856_v4 = vld [vmem:[%s5442_s4 + $0x3] ss:$0 sm:$0xff] (%p1899_p6)  ;;  %v4858_v42 = vmov (%p1899_p6), 0.0  }
 0x6de   : >> { %v2170_v18 = vrot.slane %v2169_v24, 2  ;;  %v2222_v19 = vrot.slane %v2221_v62, 2  ;;  %v2245_v20 = vsel %vm242_vm0, %v2244_v14, 0.0  ;;  %v2271_v10 = vsel %vm242_vm0, %v2270_v15, 0.0 }
 0x6df   : >> { %v2199_v22 = vadd.f32 %v2198_v17, %v2197_v6  ;;  %v2246_v26 = vrot.slane %v2245_v20, 4  ;;  %v2272_v11 = vrot.slane %v2271_v10, 4 }
 0x6e0   : >> { %v2171_v28 = vadd.f32 %v2170_v18, %v2169_v24  ;;  %v2223_v33 = vadd.f32 %v2222_v19, %v2221_v62  ;;  %v2320_v31 = vpop.permute.xlu0 %2319  ;;  %v2294_v29 = vpop.permute.xlu1 %2293 }
 0x6e1   : >> { %3728 = vst.msk [vmem:[%s4821_s9 + $0x2] sm:$0x1] %vm667_vm3, %v2199_v22  ;;  %v2247_v51 = vadd.f32 %v2246_v26, %v2245_v20  ;;  %v2273_v34 = vadd.f32 %v2272_v11, %v2271_v10  ;;  %v2322_v35 = vmul.f32 %v2320_v31, %v2317_v30  ;;  %v2296_v8 = vmul.f32 %v2294_v29, %v2291_v56 }
 0x6e2   : >> { %v2172_v21 = vrot.slane %v2171_v28, 1  ;;  %v2224_v36 = vrot.slane %v2223_v33, 1 }
 0x6e3   : >> { %v2248_v38 = vrot.slane %v2247_v51, 2  ;;  %v2274_v39 = vrot.slane %v2273_v34, 2  ;;  %v2323_v40 = vsel %vm242_vm0, %v2322_v35, 0.0  ;;  %v2297_v41 = vsel %vm242_vm0, %v2296_v8, 0.0 }
 0x6e4   : >> { %v2173_v43 = vadd.f32 %v2172_v21, %v2171_v28  ;;  %v2225_v32 = vadd.f32 %v2224_v36, %v2223_v33  ;;  %v2324_v44 = vrot.slane %v2323_v40, 4  ;;  %v2298_v9 = vrot.slane %v2297_v41, 4 }
 0x6e5   : >> { %v2249_v45 = vadd.f32 %v2248_v38, %v2247_v51  ;;  %v2275_v16 = vadd.f32 %v2274_v39, %v2273_v34 }
 0x6e6   : >> { %3726 = vst.msk [vmem:[%s4821_s9 + $0x1] sm:$0x1] %vm667_vm3, %v2173_v43  ;;  %3730 = vst.msk [vmem:[%s4821_s9 + $0x3] sm:$0x1] %vm667_vm3, %v2225_v32  ;;  %v2325_v47 = vadd.f32 %v2324_v44, %v2323_v40  ;;  %v2299_v1 = vadd.f32 %v2298_v9, %v2297_v41 }
 0x6e7   : >> { %v2250_v48 = vrot.slane %v2249_v45, 1  ;;  %v2276_v49 = vrot.slane %v2275_v16, 1 }
 0x6e8   : >> { %v2326_v53 = vrot.slane %v2325_v47, 2  ;;  %v2300_v54 = vrot.slane %v2299_v1, 2 }
 0x6e9   : >> { %v2251_v52 = vadd.f32 %v2250_v48, %v2249_v45  ;;  %v2277_v55 = vadd.f32 %v2276_v49, %v2275_v16 }
 0x6ea   : >> { %v2327_v56 = vadd.f32 %v2326_v53, %v2325_v47  ;;  %v2301_v57 = vadd.f32 %v2300_v54, %v2299_v1 }
 0x6eb   : >> { %3732 = vst.msk [vmem:[%s4821_s9 + $0x4] sm:$0x1] %vm667_vm3, %v2251_v52  ;;  %3734 = vst.msk [vmem:[%s4821_s9 + $0x5] sm:$0x1] %vm667_vm3, %v2277_v55 }
 0x6ec   : >> { %v2328_v58 = vrot.slane %v2327_v56, 1  ;;  %v2302_v60 = vrot.slane %v2301_v57, 1  ;;  %1901 = sbr.rel (!%p1899_p6) target bundleno = 1355 (0x54b), region = 170 }
 0x6ee   : >> { %v2329_v61 = vadd.f32 %v2328_v58, %v2327_v56  ;;  %v2303_v0 = vadd.f32 %v2302_v60, %v2301_v57 }
 0x6f0   : >> { %3738 = vst.msk [vmem:[%s4821_s9 + $0x7] sm:$0x1] %vm667_vm3, %v2329_v61  ;;  %3736 = vst.msk [vmem:[%s4821_s9 + $0x6] sm:$0x1] %vm667_vm3, %v2303_v0 }
 0x6f1 LB: >> { %v4185_v7 = vmov 7   ;;  %s2344_s16 = ssub.s32 7, %s4151_s15  ;;  %s4186_s8 = smov 64   ;;  %v4188_v51 = vmov 6   ;;  %v4189_v35 = vmov 5   ;;  %v4190_v8 = vmov 2   ;;  %s4151_s15 = sphi %s4860_s15, %s2342_s15   ;;  %v4147_v42 = vphi %v4858_v42, %v4923_v42  }
 0x6f2   : >> { %4045 = vset.pattern.permute.xlu0 %v4185_v7  ;;  %s4869_s17 = sshll.u32 %s2344_s16, 3  ;;  %s4187_s22 = smov 56   ;;  %v4191_v21 = vmov 4   ;;  %v4192_v36 = vmov 0   ;;  %v4193_v39 = vmov 3   ;;  %v4194_v40 = vmov 1  }
 0x6f3   : >> { %s2348_s19 = sshra.s32 %s4869_s17, 3  ;;  %s2346_s23 = scalar_lea.vmem [#allocation2], %s4869_s17 }
 0x6f4   : >> { %s3775_s20 = sshll.u32 %s2348_s19, 4  ;;  %v2347_v26 = vld [vmem:[%s2346_s23] sm:$0xff]  ;;  %s4918_s24 = scalar_lea.vmem [#allocation4], %s4869_s17 }
 0x6f5   : >> { %s2352_s21 = scalar_lea.vmem [#allocation3], %s3775_s20  ;;  %s2342_s15 = sadd.s32 1, %s4151_s15  }
 0x6f6   : >> { %v2353_v2 = vld [vmem:[%s2352_s21 + $0x8] sm:$0xff]  ;;  %p2339_p7 = scmp.ge.s32.totalorder %s2342_s15, 8  }
 0x6f7   : >> { %2381 = vrot.lane.b32.xlu0 %v2353_v2, %s4186_s8  ;;  %v2360_v30 = vadd.f32 %v4856_v4, %v2353_v2  ;;  %vm2891_vm10 = vsmask.f32 (%p2339_p7), 256  ;;  %vm3039_vm11 = vcmask (%p2339_p7), 517121   ;;  %vm3040_vm4 = vsmask.f32 (%p2339_p7), 1280 }
 0x6f8   : > { %vm3188_vm5 = vcmask (%p2339_p7), 518146   ;;  %vm3337_vm13 = vcmask (%p2339_p7), 519171   ;;  %vm3338_vm14 = vsmask.f32 (%p2339_p7), 3328  ;;  %vm4990_vm15 = vmand (%p2339_p7), %vm667_vm3, %vm2891_vm10  ;;  %vm2965_vm6 = vsmask.f32 (%p2339_p7), 7938 }
 0x6f9   : >> { %v2364_v6 = vand.u32 2147483647, %v2360_v30  ;;  %v2361_v20 = vmax.f32 %v2360_v30, 0.0  ;;  %vm2362_vm9 = vcmp.ne.f32.partialorder %v2360_v30, %v2360_v30  ;;  %vm5014_vm1 = vmand (%p2339_p7), %vm3039_vm11, %vm3040_vm4  ;;  %vm3114_vm7 = vsmask.f32 (%p2339_p7), 7942 }
 0x6fa   : > { %vm5036_vm2 = vmand (%p2339_p7), %vm3337_vm13, %vm3338_vm14 }
 0x6fb   : >> { %v2365_v50 = vsub.f32 0.0, %v2364_v6  ;;  %2416 = vrot.lane.b32.xlu0 %v2353_v2, %s4187_s22  ;;  %vm5227_vm10 = vmand (%p2339_p7), %vm667_vm3, %vm2965_vm6 }
 0x6fc   : > { %vm5234_vm4 = vmand (%p2339_p7), %vm3039_vm11, %vm3114_vm7 }
 0x6fd   : >> { %v2366_v12 = vmul.f32 1.442695, %v2365_v50 }
 0x6ff   : >> { %4061 = vpow2.f32 %v2366_v12 }
 0x70c   : >> { %v4062_v24 = vpop.eup %4061 }
 0x70d   : >> { %v2368_v62 = vadd.f32 1.0, %v4062_v24  ;;  %v2371_v14 = vmul.f32 -0.5, %v4062_v24  ;;  %v2374_v17 = vand.u32 2147483647, %v4062_v24 }
 0x70f   : >> { %4063 = vlog2.f32 %v2368_v62  ;;  %v2372_v15 = vadd.f32 1.0, %v2371_v14  ;;  %vm2375_vm8 = vcmp.lt.f32.partialorder %v2374_v17, 0.0004427343 }
 0x711   : >> { %v2373_v18 = vmul.f32 %v4062_v24, %v2372_v15 }
 0x71c   : >> { %v4064_v19 = vpop.eup %4063 }
 0x71d   : >> { %v2370_v10 = vmul.f32 0.6931472, %v4064_v19 }
 0x71f   : >> { %v2376_v22 = vsel %vm2375_vm8, %v2373_v18, %v2370_v10  ;;  %vm3263_vm8 = vsmask.f32 (%p2339_p7), 7946 }
 0x720   : >> { %v2377_v11 = vadd.f32 %v2376_v22, %v2361_v20 }
 0x722   : >> { %v2378_v28 = vsel %vm2362_vm9, %v2360_v30, %v2377_v11  ;;  %vm3412_vm9 = vsmask.f32 (%p2339_p7), 7950 }
 0x723   : >> { %v4874_v33 = vmul.f32 %v2378_v28, %v2347_v26  ;;  %v2452_v41 = vcombine.high %v2378_v28, %v2378_v28  ;;  %v2459_v47 = vrot.slane %v2378_v28, %v4321_v25  ;;  %vm5253_vm11 = vmand (%p2339_p7), %vm3337_vm13, %vm3412_vm9 }
 0x725   : >> { %v2466_v43 = vrot.slane %v2452_v41, %v4321_v25  ;;  %v2467_v49 = vcombine.high %v2459_v47, %v2459_v47  ;;  %v2475_v57 = vrot.slane %v2459_v47, %v4321_v25  ;;  %v2574_v17 = vrot.slane %v4874_v33, %v4386_v63 }
 0x726   : >> { %v2603_v28 = vrot.slane %v4874_v33, %v4378_v46  ;;  %v2659_v41 = vrot.slane %v4874_v33, %v4370_v23 }
 0x727   : >> { %v2468_v32 = vcombine.high %v2466_v43, %v2466_v43  ;;  %v2482_v45 = vrot.slane %v2466_v43, %v4321_v25  ;;  %v2489_v52 = vrot.slane %v2467_v49, %v4321_v25  ;;  %v2504_v20 = vrot.slane %v2475_v57, %v4326_v27 }
 0x729   : >> { %v2496_v44 = vrot.slane %v2468_v32, %v4321_v25  ;;  %v2498_v1 = vcombine.high %v2482_v45, %v2482_v45  ;;  %v2499_v58 = vcombine.high %v2489_v52, %v2489_v52  ;;  %v2520_v60 = vrot.slane %v2482_v45, %v4326_v27  ;;  %v2804_v25 = vld [vmem:[#allocation2 + $0x8] sm:$0xff] (%p2339_p7) }
 0x72a   : >> { %v2508_v14 = vrot.slane %v2489_v52, %v4326_v27 }
 0x72b   : >> { %v2500_v9 = vcombine.high %v2496_v44, %v2496_v44  ;;  %v2528_v53 = vrot.slane %v2498_v1, %v4326_v27  ;;  %v2524_v55 = vrot.slane %v2496_v44, %v4326_v27  ;;  %v2516_v2 = vrot.slane %v2499_v58, %v4326_v27 }
 0x72c   : >> { %v2545_v30 = vmul.f32 %v4851_v3, %v2520_v60  ;;  %v2542_v10 = vmul.f32 %v4851_v3, %v2508_v14  ;;  %v2687_v1 = vrot.slane %v4874_v33, %v4364_v13  ;;  %v2715_v58 = vrot.slane %v4874_v33, %v4357_v5  ;;  %v2806_v5 = vld [vmem:[#allocation2 + $0x18] sm:$0xff] (%p2339_p7) }
 0x72d   : >> { %v2532_v16 = vrot.slane %v2500_v9, %v4326_v27  ;;  %v2547_v56 = vmul.f32 %v4851_v3, %v2528_v53  ;;  %v2546_v0 = vmul.f32 %v4851_v3, %v2524_v55  ;;  %v2544_v24 = vmul.f32 %v4851_v3, %v2516_v2 }
 0x72e   : >> { %v2557_v12 = vmul.f32 1.442695, %v2545_v30 }
 0x72f   : >> { %v2548_v48 = vmul.f32 %v4851_v3, %v2532_v16  ;;  %v2561_v61 = vmul.f32 1.442695, %v2547_v56  ;;  %v2559_v6 = vmul.f32 1.442695, %v2546_v0  ;;  %v2555_v18 = vmul.f32 1.442695, %v2544_v24 }
 0x731   : >> { %v2563_v54 = vmul.f32 1.442695, %v2548_v48 }
 0x733   : >> { %4065 = vpow2.f32 %v2563_v54 }
 0x734   : >> { %4067 = vpow2.f32 %v2561_v61 }
 0x735   : >> { %4069 = vpow2.f32 %v2559_v6  ;;  %v2743_v6 = vrot.slane %v4874_v33, %v4349_v59 }
 0x736   : >> { %4071 = vpow2.f32 %v2557_v12 }
 0x737   : >> { %4073 = vpow2.f32 %v2555_v18 }
 0x740   : >> { %v4066_v62 = vpop.eup %4065 }
 0x741   : >> { %v2565_v19 = vmul.f32 %v4147_v42, %v4066_v62 }
 0x769   : >> { %v2382_v31 = vpop.permute.xlu0 %2381 }
 0x76a   : >> { %2384 = vxpose.xlu1.b32.start.end [1/1] (short) (narrow) %v2382_v31, 8 }
 0x76d   : >> { %v2417_v29 = vpop.permute.xlu0 %2416 }
 0x76e   : >> { %2419 = vxpose.xlu1.b32.start.end [1/1] (short) (narrow) %v2417_v29, 8  ;;  %v4068_v29 = vpop.eup %4067 }
 0x78c   : >> { %4046 = vset.pattern.permute.xlu1 %v4188_v51 }
 0x7e6   : >> { %v2400_v34 = vpop.trf.xlu1 }
 0x7e7   : >> { %2568 = vperm.xlu0 %4045, %v2400_v34   ;;  %2597 = vperm.xlu1 %4046, %v2400_v34  }
 0x7ea   : >> { %v2435_v38 = vpop.trf.xlu1 }
 0x7eb   : >> { %4047 = vset.pattern.permute.xlu0 %v4189_v35  ;;  %4050 = vset.pattern.permute.xlu1 %v4190_v8 }
 0x7ec   : >> { %2625 = vperm.xlu0 %4047, %v2400_v34   ;;  %2709 = vperm.xlu1 %4050, %v2400_v34  }
 0x7f0   : >> { %4048 = vset.pattern.permute.xlu0 %v4191_v21  ;;  %4052 = vset.pattern.permute.xlu1 %v4192_v36 }
 0x7f1   : >> { %2653 = vperm.xlu0 %4048, %v2400_v34   ;;  %2765 = vperm.xlu1 %4052, %v2400_v34  }
 0x7f5   : >> { %4049 = vset.pattern.permute.xlu0 %v4193_v39  ;;  %4053 = vset.pattern.permute.xlu1 %v4185_v7  ;;  %v2497_v7 = vcombine.high %v2475_v57, %v2475_v57 }
 0x7f6   : >> { %2681 = vperm.xlu0 %4049, %v2400_v34   ;;  %2579 = vperm.xlu1 %4053, %v2435_v38  }
 0x7f7   : >> { %v2512_v50 = vrot.slane %v2497_v7, %v4326_v27 }
 0x7f9   : >> { %v2543_v15 = vmul.f32 %v4851_v3, %v2512_v50 }
 0x7fa   : >> { %4051 = vset.pattern.permute.xlu0 %v4194_v40  ;;  %4055 = vset.pattern.permute.xlu1 %v4189_v35  ;;  %v2631_v35 = vrot.slane %v4874_v33, %v4375_v37 }
 0x7fb   : >> { %2737 = vperm.xlu0 %4051, %v2400_v34   ;;  %2635 = vperm.xlu1 %4055, %v2435_v38   ;;  %v2553_v31 = vmul.f32 1.442695, %v2543_v15  ;;  %v2541_v34 = vmul.f32 %v4851_v3, %v2504_v20  ;;  %v2808_v3 = vld [vmem:[#allocation2 + $0x28] sm:$0xff] (%p2339_p7) }
 0x7fd   : >> { %4075 = vpow2.f32 %v2553_v31  ;;  %v2549_v44 = vmul.f32 1.442695, %v2541_v34 }
 0x7ff   : >> { %4054 = vset.pattern.permute.xlu0 %v4188_v51  ;;  %4056 = vset.pattern.permute.xlu1 %v4191_v21 }
 0x800   : >> { %2607 = vperm.xlu0 %4054, %v2435_v38   ;;  %2663 = vperm.xlu1 %4056, %v2435_v38  }
 0x804   : >> { %4057 = vset.pattern.permute.xlu0 %v4193_v39  ;;  %4058 = vset.pattern.permute.xlu1 %v4190_v8  ;;  %v4070_v39 = vpop.eup %4069 }
 0x805   : >> { %2691 = vperm.xlu0 %4057, %v2435_v38   ;;  %2719 = vperm.xlu1 %4058, %v2435_v38   ;;  %v4072_v9 = vpop.eup %4071 }
 0x806   : >> { %v4074_v53 = vpop.eup %4073 }
 0x809   : >> { %4060 = vset.pattern.permute.xlu0 %v4192_v36  ;;  %4059 = vset.pattern.permute.xlu1 %v4194_v40 }
 0x80a   : >> { %2775 = vperm.xlu0 %4060, %v2435_v38   ;;  %2747 = vperm.xlu1 %4059, %v2435_v38   ;;  %v2551_v38 = vmul.f32 1.442695, %v2542_v10  ;;  %v4076_v61 = vpop.eup %4075 }
 0x80c   : >> { %4077 = vpow2.f32 %v2551_v38 }
 0x80d   : >> { %4079 = vpow2.f32 %v2549_v44 }
 0x819   : >> { %v4078_v15 = vpop.eup %4077 }
 0x81a   : >> { %v4080_v31 = vpop.eup %4079 }
 0x862   : >> { %v2569_v22 = vpop.permute.xlu0 %2568  ;;  %v2598_v26 = vpop.permute.xlu1 %2597 }
 0x863   : >> { %v2575_v11 = vmul.f32 %v2574_v17, %v2569_v22  ;;  %v2604_v8 = vmul.f32 %v2603_v28, %v2598_v26 }
 0x865   : >> { %v2576_v51 = vadd.f32 %v2575_v11, %v2565_v19 }
 0x867   : >> { %v2595_v42 = vmul.f32 %v4068_v29, %v2576_v51  ;;  %v2626_v21 = vpop.permute.xlu0 %2625  ;;  %v2710_v36 = vpop.permute.xlu1 %2709  ;;  %v2771_v29 = vrot.slane %v4874_v33, %v4326_v27 }
 0x868   : >> { %v2632_v32 = vmul.f32 %v2631_v35, %v2626_v21  ;;  %v2716_v12 = vmul.f32 %v2715_v58, %v2710_v36  ;;  %v3746_v21 = vld [vmem:[%s4918_s24 + $0x7] sm:$0x1] }
 0x869   : >> { %v2605_v40 = vadd.f32 %v2604_v8, %v2595_v42 }
 0x86b   : >> { %v2623_v43 = vmul.f32 %v4070_v39, %v2605_v40 }
 0x86c   : >> { %v2654_v45 = vpop.permute.xlu0 %2653  ;;  %v2766_v16 = vpop.permute.xlu1 %2765 }
 0x86d   : >> { %v2633_v47 = vadd.f32 %v2632_v32, %v2623_v43  ;;  %v2660_v49 = vmul.f32 %v2659_v41, %v2654_v45  ;;  %v2772_v44 = vmul.f32 %v2771_v29, %v2766_v16 }
 0x86f   : >> { %v2651_v48 = vmul.f32 %v4072_v9, %v2633_v47 }
 0x871   : >> { %v2661_v54 = vadd.f32 %v2660_v49, %v2651_v48  ;;  %v2682_v52 = vpop.permute.xlu0 %2681  ;;  %v2580_v55 = vpop.permute.xlu1 %2579 }
 0x872   : >> { %v2688_v56 = vmul.f32 %v2687_v1, %v2682_v52  ;;  %v2582_v57 = vmul.f32 %v2580_v55, %v2576_v51  ;;  %v3752_v52 = vld [vmem:[%s4918_s24 + $0x5] sm:$0x1] }
 0x873   : >> { %v2679_v60 = vmul.f32 %v4074_v53, %v2661_v54 }
 0x874   : >> { %v2583_v0 = vsel %vm242_vm0, %v2582_v57, 0.0 }
 0x875   : >> { %v2689_v7 = vadd.f32 %v2688_v56, %v2679_v60  ;;  %v2584_v2 = vrot.slane %v2583_v0, 4 }
 0x876   : >> { %v2738_v30 = vpop.permute.xlu0 %2737  ;;  %v2636_v50 = vpop.permute.xlu1 %2635 }
 0x877   : >> { %v2707_v24 = vmul.f32 %v4076_v61, %v2689_v7  ;;  %v2585_v62 = vadd.f32 %v2584_v2, %v2583_v0  ;;  %v2638_v14 = vmul.f32 %v2636_v50, %v2633_v47  ;;  %v2744_v26 = vmul.f32 %v2743_v6, %v2738_v30 }
 0x879   : >> { %v2586_v17 = vrot.slane %v2585_v62, 2  ;;  %v2717_v18 = vadd.f32 %v2716_v12, %v2707_v24  ;;  %v2639_v19 = vsel %vm242_vm0, %v2638_v14, 0.0 }
 0x87a   : >> { %v2640_v20 = vrot.slane %v2639_v19, 4 }
 0x87b   : >> { %v2587_v10 = vadd.f32 %v2586_v17, %v2585_v62  ;;  %v2735_v22 = vmul.f32 %v4078_v15, %v2717_v18  ;;  %v2608_v11 = vpop.permute.xlu0 %2607  ;;  %v2664_v28 = vpop.permute.xlu1 %2663  ;;  %v3749_v62 = vld [vmem:[%s4918_s24 + $0x6] sm:$0x1] }
 0x87c   : >> { %v2641_v51 = vadd.f32 %v2640_v20, %v2639_v19  ;;  %v2610_v34 = vmul.f32 %v2608_v11, %v2605_v40  ;;  %v2666_v35 = vmul.f32 %v2664_v28, %v2661_v54 }
 0x87d   : >> { %v2588_v42 = vrot.slane %v2587_v10, 1  ;;  %v2745_v8 = vadd.f32 %v2744_v26, %v2735_v22 }
 0x87e   : >> { %v2642_v36 = vrot.slane %v2641_v51, 2  ;;  %v2611_v38 = vsel %vm242_vm0, %v2610_v34, 0.0  ;;  %v2667_v39 = vsel %vm242_vm0, %v2666_v35, 0.0 }
 0x87f   : >> { %v2589_v41 = vadd.f32 %v2588_v42, %v2587_v10  ;;  %v2612_v43 = vrot.slane %v2611_v38, 4  ;;  %v2668_v32 = vrot.slane %v2667_v39, 4  ;;  %v2763_v33 = vmul.f32 %v4080_v31, %v2745_v8 }
 0x880   : >> { %v2643_v40 = vadd.f32 %v2642_v36, %v2641_v51  ;;  %v2692_v9 = vpop.permute.xlu0 %2691  ;;  %v2720_v45 = vpop.permute.xlu1 %2719 }
 0x881   : >> { %v2593_v47 = vadd.f32 %v3746_v21, %v2589_v41  ;;  %v2613_v1 = vadd.f32 %v2612_v43, %v2611_v38  ;;  %v2669_v48 = vadd.f32 %v2668_v32, %v2667_v39  ;;  %v2694_v49 = vmul.f32 %v2692_v9, %v2689_v7  ;;  %v3758_v38 = vld [vmem:[%s4918_s24 + $0x3] sm:$0x1]  ;;  %v3761_v32 = vld [vmem:[%s4918_s24 + $0x2] sm:$0x1] }
 0x882   : >> { %v2644_v53 = vrot.slane %v2643_v40, 1  ;;  %v2722_v54 = vmul.f32 %v2720_v45, %v2717_v18  ;;  %v4923_v42 = vadd.f32 %v2772_v44, %v2763_v33   ;;  %v3755_v18 = vld [vmem:[%s4918_s24 + $0x4] sm:$0x1] }
 0x883   : >> { %3747 = vst.msk [vmem:[%s4918_s24 + $0x7] sm:$0x1] %vm667_vm3, %v2593_v47  ;;  %v2614_v55 = vrot.slane %v2613_v1, 2  ;;  %v2670_v56 = vrot.slane %v2669_v48, 2  ;;  %v2695_v57 = vsel %vm242_vm0, %v2694_v49, 0.0 }
 0x884   : >> { %v2645_v16 = vadd.f32 %v2644_v53, %v2643_v40  ;;  %v2696_v58 = vrot.slane %v2695_v57, 4  ;;  %v2723_v60 = vsel %vm242_vm0, %v2722_v54, 0.0  ;;  %v3764_v54 = vld [vmem:[%s4918_s24 + $0x1] sm:$0x1] }
 0x885   : >> { %v2615_v61 = vadd.f32 %v2614_v55, %v2613_v1  ;;  %v2671_v0 = vadd.f32 %v2670_v56, %v2669_v48  ;;  %v2724_v7 = vrot.slane %v2723_v60, 4  ;;  %v2776_v2 = vpop.permute.xlu0 %2775  ;;  %v2748_v30 = vpop.permute.xlu1 %2747  ;;  %v2787_v48 = vld [vmem:[%s4918_s24] sm:$0x1] }
 0x886   : >> { %v2649_v6 = vadd.f32 %v3752_v52, %v2645_v16  ;;  %v2697_v50 = vadd.f32 %v2696_v58, %v2695_v57  ;;  %v2778_v12 = vmul.f32 %v2776_v2, %v4923_v42  ;;  %v2750_v24 = vmul.f32 %v2748_v30, %v2745_v8  ;;  %v3766_v57 = vld [vmem:[%s5441_s3 + $0x2] sm:$0x1] (%p2339_p7)  ;;  %v3767_v16 = vld [vmem:[%s5441_s3 + $0x3] sm:$0x1] (%p2339_p7) }
 0x887   : >> { %v2616_v14 = vrot.slane %v2615_v61, 1  ;;  %v2672_v15 = vrot.slane %v2671_v0, 1  ;;  %v2725_v17 = vadd.f32 %v2724_v7, %v2723_v60  ;;  %v2794_v58 = vadd.f32 (%p2339_p7), %v3767_v16, %v3766_v57  ;;  %v2803_v60 = vld [vmem:[#allocation2] sm:$0xff] (%p2339_p7) }
 0x888   : >> { %3753 = vst.msk [vmem:[%s4918_s24 + $0x5] sm:$0x1] %vm667_vm3, %v2649_v6  ;;  %v2698_v19 = vrot.slane %v2697_v50, 2  ;;  %v2779_v20 = vsel %vm242_vm0, %v2778_v12, 0.0  ;;  %v2751_v10 = vsel %vm242_vm0, %v2750_v24, 0.0  ;;  %v2807_v30 = vld [vmem:[#allocation2 + $0x20] sm:$0xff] (%p2339_p7) }
 0x889   : >> { %v2617_v22 = vadd.f32 %v2616_v14, %v2615_v61  ;;  %v2673_v26 = vadd.f32 %v2672_v15, %v2671_v0  ;;  %v2726_v11 = vrot.slane %v2725_v17, 2  ;;  %v2780_v28 = vrot.slane %v2779_v20, 4  ;;  %v2805_v61 = vld [vmem:[#allocation2 + $0x10] sm:$0xff] (%p2339_p7)  ;;  %v2810_v24 = vld [vmem:[#allocation2 + $0x38] sm:$0xff] (%p2339_p7) }
 0x88a   : >> { %v2699_v31 = vadd.f32 %v2698_v19, %v2697_v50  ;;  %v2752_v29 = vrot.slane %v2751_v10, 4  ;;  %v2815_v42 = vrot.slane (%p2339_p7), %v2794_v58, %v4326_v27  ;;  %v2809_v50 = vld [vmem:[#allocation2 + $0x30] sm:$0xff] (%p2339_p7)  ;;  %v3289_v58 = vld [vmem:[%s4257_s11 + $0x4] sm:$0x8] (%p2339_p7) }
 0x88b   : >> { %v2621_v51 = vadd.f32 %v3749_v62, %v2617_v22  ;;  %v2677_v34 = vadd.f32 %v3755_v18, %v2673_v26  ;;  %v2727_v35 = vadd.f32 %v2726_v11, %v2725_v17  ;;  %v2781_v8 = vadd.f32 %v2780_v28, %v2779_v20  ;;  %v2841_v28 = vld [vmem:[%s4257_s11] sm:$0x1] (%p2339_p7) }
 0x88c   : >> { %v2700_v21 = vrot.slane %v2699_v31, 1  ;;  %v2753_v36 = vadd.f32 %v2752_v29, %v2751_v10  ;;  %v2817_v23 = vmul.f32 (%p2339_p7), %v2815_v42, %v2803_v60  ;;  %v2819_v37 = vmul.f32 (%p2339_p7), %v2815_v42, %v2805_v61  ;;  %v3143_v29 = vld [vmem:[%s4257_s11 + $0x10] sm:$0x4] (%p2339_p7)  ;;  %v3047_v60 = vld [vmem:[%s4257_s11 + $0x8] sm:$0x2] (%p2339_p7) }
 0x88d   : >> { %3750 = vst.msk [vmem:[%s4918_s24 + $0x6] sm:$0x1] %vm667_vm3, %v2621_v51  ;;  %3756 = vst.msk [vmem:[%s4918_s24 + $0x4] sm:$0x1] %vm667_vm3, %v2677_v34  ;;  %v2728_v39 = vrot.slane %v2727_v35, 1  ;;  %v2782_v41 = vrot.slane %v2781_v8, 2  ;;  %v2821_v46 = vmul.f32 (%p2339_p7), %v2815_v42, %v2807_v30  ;;  %v2823_v63 = vmul.f32 (%p2339_p7), %v2815_v42, %v2809_v50 }
 0x88e   : >> { %v2701_v43 = vadd.f32 %v2700_v21, %v2699_v31  ;;  %v2754_v33 = vrot.slane %v2753_v36, 2  ;;  %v2818_v62 = vmul.f32 (%p2339_p7), %v2815_v42, %v2804_v25  ;;  %v2820_v14 = vmul.f32 (%p2339_p7), %v2815_v42, %v2806_v5  ;;  %v2992_v31 = vld [vmem:[%s4257_s11 + $0x8] sm:$0x2] (%p2339_p7)  ;;  %v3294_v51 = vld [vmem:[%s4257_s11 + $0x18] sm:$0x8] (%p2339_p7) }
 0x88f   : >> { %v2729_v44 = vadd.f32 %v2728_v39, %v2727_v35  ;;  %v2783_v40 = vadd.f32 %v2782_v41, %v2781_v8  ;;  %v2822_v15 = vmul.f32 (%p2339_p7), %v2815_v42, %v2808_v3  ;;  %v2824_v17 = vmul.f32 (%p2339_p7), %v2815_v42, %v2810_v24  ;;  %v2842_v34 = vld [vmem:[%s4257_s11 + $0x4] sm:$0x1] (%p2339_p7)  ;;  %v2843_v35 = vld [vmem:[%s4257_s11 + $0x8] sm:$0x1] (%p2339_p7)  ;;  %v2844_v8 = vld [vmem:[%s4257_s11 + $0xc] sm:$0x1] (%p2339_p7) }
 0x890   : >> { %v2705_v9 = vadd.f32 %v3758_v38, %v2701_v43  ;;  %v2755_v45 = vadd.f32 %v2754_v33, %v2753_v36  ;;  %v2849_v21 = vunpack.c.l.bf16 (%p2339_p7), %v2841_v28  ;;  %v3000_v36 = vunpack.c.l.bf16 (%p2339_p7), %v2992_v31  ;;  %v2845_v39 = vld [vmem:[%s4257_s11 + $0x10] sm:$0x1] (%p2339_p7)  ;;  %v4983_v41 = vld [vmem:[%s4257_s11 + $0x14] sm:$0x1] (%p2339_p7)  ;;  %v3202_v30 = vld [vmem:[%s4257_s11 + $0x10] sm:$0x4] (%p2339_p7) }
 0x891   : >> { %v2733_v47 = vadd.f32 %v3761_v32, %v2729_v44  ;;  %v2784_v1 = vrot.slane %v2783_v40, 1  ;;  %v3151_v38 = vunpack.c.l.bf16 (%p2339_p7), %v3143_v29  ;;  %v3302_v43 = vunpack.c.l.bf16 (%p2339_p7), %v3294_v51  ;;  %v4986_v32 = vld [vmem:[%s4257_s11 + $0x18] sm:$0x1] (%p2339_p7)  ;;  %v3053_v33 = vld [vmem:[%s4257_s11 + $0x10] sm:$0x2] (%p2339_p7) }
 0x892   : >> { %3759 = vst.msk [vmem:[%s4918_s24 + $0x3] sm:$0x1] %vm667_vm3, %v2705_v9  ;;  %v2756_v49 = vrot.slane %v2755_v45, 1  ;;  %v2850_v44 = vunpack.c.l.bf16 (%p2339_p7), %v2842_v34  ;;  %v2852_v9 = vunpack.c.l.bf16 (%p2339_p7), %v2844_v8  ;;  %v2993_v34 = vld [vmem:[%s4257_s11 + $0xc] sm:$0x2] (%p2339_p7) }
 0x893   : >> { %3762 = vst.msk [vmem:[%s4918_s24 + $0x2] sm:$0x1] %vm667_vm3, %v2733_v47  ;;  %v2785_v53 = vadd.f32 %v2784_v1, %v2783_v40  ;;  %v2851_v40 = vunpack.c.l.bf16 (%p2339_p7), %v2843_v35  ;;  %v4995_v47 = vld [vmem:[%s4257_s11 + $0x1c] sm:$0x1] (%p2339_p7)  ;;  %v4998_v1 = vld [vmem:[%s4257_s11] sm:$0x2] (%p2339_p7) }
 0x894   : >> { %v2757_v52 = vadd.f32 %v2756_v49, %v2755_v45  ;;  %2341 = sbr.rel (!%p2339_p7) target bundleno = 1777 (0x6f1), region = 181  ;;  %v2853_v45 = vunpack.c.l.bf16 (%p2339_p7), %v2845_v39 }
 0x895   : >> { %v2788_v55 = vadd.f32 %v2787_v48, %v2785_v53 }
 0x896   : >> { %v2761_v56 = vadd.f32 %v3764_v54, %v2757_v52  ;;  %v2854_v54 = vunpack.c.l.bf16 (%p2339_p7), %v4983_v41  ;;  %v2855_v52 = vunpack.c.l.bf16 (%p2339_p7), %v4986_v32  ;;  %v2907_v41 = vld [vmem:[%s4257_s11 + $0x14] sm:$0x1] (%p2339_p7)  ;;  %v2910_v32 = vld [vmem:[%s4257_s11 + $0x18] sm:$0x1] (%p2339_p7) }
 0x897   : >> { %2789 = vst.msk [vmem:[%s4918_s24] sm:$0x1] %vm667_vm3, %v2788_v55  ;;  %v2856_v55 = vunpack.c.l.bf16 (%p2339_p7), %v4995_v47 }
 0x898   : >> { %3765 = vst.msk [vmem:[%s4918_s24 + $0x1] sm:$0x1] %vm667_vm3, %v2761_v56  ;;  %v2998_v56 = vunpack.c.l.bf16 (%p2339_p7), %v4998_v1  ;;  %vm5243_vm3 = vmand (%p2339_p7), %vm3188_vm5, %vm3263_vm8 }
 0x89f   : > { %v2795_v0 = vld [vmem:[#allocation4] sm:$0xff]  ;;  %v2797_v7 = vld [vmem:[#allocation4 + $0x10] sm:$0xff]  ;;  %v2796_v12 = vld [vmem:[#allocation4 + $0x8] sm:$0xff] }
 0x8a0   : > { %v2799_v2 = vld [vmem:[#allocation4 + $0x20] sm:$0xff]  ;;  %v2801_v6 = vld [vmem:[#allocation4 + $0x30] sm:$0xff]  ;;  %v2798_v59 = vld [vmem:[#allocation4 + $0x18] sm:$0xff]  ;;  %v2825_v18 = vadd.f32 %v2817_v23, %v2795_v0  ;;  %v2827_v19 = vadd.f32 %v2819_v37, %v2797_v7  ;;  %v2826_v10 = vadd.f32 %v2818_v62, %v2796_v12 }
 0x8a1   : > { %v2800_v13 = vld [vmem:[#allocation4 + $0x28] sm:$0xff]  ;;  %v2802_v4 = vld [vmem:[#allocation4 + $0x38] sm:$0xff]  ;;  %v2829_v27 = vadd.f32 %v2821_v46, %v2799_v2  ;;  %v2831_v20 = vadd.f32 %v2823_v63, %v2801_v6  ;;  %v2828_v22 = vadd.f32 %v2820_v14, %v2798_v59  ;;  %v2895_v63 = vld [vmem:[%s4257_s11 + $0x4] sm:$0x1] }
 0x8a2   : > { %v2830_v26 = vadd.f32 %v2822_v15, %v2800_v13  ;;  %v2832_v11 = vadd.f32 %v2824_v17, %v2802_v4  ;;  %2833 = vst.msk [vmem:[#allocation4] sm:$0xff] %vm242_vm0, %v2825_v18  ;;  %2835 = vst.msk [vmem:[#allocation4 + $0x10] sm:$0xff] %vm242_vm0, %v2827_v19  ;;  %v3357_v23 = vld [vmem:[%s4257_s11 + $0x18] sm:$0x8]  ;;  %v2898_v18 = vld [vmem:[%s4257_s11 + $0x8] sm:$0x1] }
 0x8a3   : > { %2837 = vst.msk [vmem:[#allocation4 + $0x20] sm:$0xff] %vm242_vm0, %v2829_v27  ;;  %2839 = vst.msk [vmem:[#allocation4 + $0x30] sm:$0xff] %vm242_vm0, %v2831_v20  ;;  %v2901_v19 = vld [vmem:[%s4257_s11 + $0xc] sm:$0x1]  ;;  %v2904_v27 = vld [vmem:[%s4257_s11 + $0x10] sm:$0x1] }
 0x8a4   : > { %2834 = vst.msk [vmem:[#allocation4 + $0x8] sm:$0xff] %vm242_vm0, %v2826_v10  ;;  %2836 = vst.msk [vmem:[#allocation4 + $0x18] sm:$0xff] %vm242_vm0, %v2828_v22 }
 0x8a5   : > { %2838 = vst.msk [vmem:[#allocation4 + $0x28] sm:$0xff] %vm242_vm0, %v2830_v26  ;;  %2840 = vst.msk [vmem:[#allocation4 + $0x38] sm:$0xff] %vm242_vm0, %v2832_v11  ;;  %vm3189_vm0 = vsmask.f32 2304  ;;  %v2991_v11 = vld [vmem:[%s4257_s11 + $0x4] sm:$0x2] }
 0x8a6   : > { %vm5025_vm12 = vmand %vm3188_vm5, %vm3189_vm0 }
 0x8a9   : > { %v5000_v48 = vld [vmem:[#allocation4] sm:$0xff]  ;;  %v5002_v49 = vld [vmem:[#allocation4 + $0x10] sm:$0xff] }
 0x8aa   : > { %v5004_v53 = vld [vmem:[#allocation4 + $0x20] sm:$0xff]  ;;  %v2874_v57 = vadd.f32 %v5000_v48, %v2849_v21  ;;  %v3025_v16 = vadd.f32 %v5002_v49, %v3000_v36  ;;  %v5020_v0 = vld [vmem:[#allocation4 + $0x30] sm:$0xff]  ;;  %v2859_v7 = vrot.slane %v5000_v48, 1  ;;  %v2860_v42 = vrot.slane %v5000_v48, 2 }
 0x8ab   : > { %v3176_v61 = vadd.f32 %v5004_v53, %v3151_v38  ;;  %v3327_v6 = vadd.f32 %v5020_v0, %v3302_v43  ;;  %v2861_v50 = vrot.slane %v5000_v48, 3  ;;  %v2862_v12 = vrot.slane %v5000_v48, 4  ;;  %v2994_v38 = vld [vmem:[%s4257_s11 + $0x10] sm:$0x2] }
 0x8ac   : > { %v2882_v25 = vpack.c.bf16 %v2874_v57, %v2874_v57  ;;  %v3033_v59 = vpack.c.bf16 %v3025_v16, %v3025_v16  ;;  %v2875_v37 = vadd.f32 %v2859_v7, %v2850_v44  ;;  %v2876_v3 = vadd.f32 %v2860_v42, %v2851_v40  ;;  %v2995_v16 = vld [vmem:[%s4257_s11 + $0x14] sm:$0x2]  ;;  %v2997_v42 = vld [vmem:[%s4257_s11 + $0x1c] sm:$0x2] }
 0x8ad   : > { %v3184_v5 = vpack.c.bf16 %v3176_v61, %v3176_v61  ;;  %v3335_v46 = vpack.c.bf16 %v3327_v6, %v3327_v6  ;;  %v2877_v4 = vadd.f32 %v2861_v50, %v2852_v9  ;;  %v2878_v24 = vadd.f32 %v2862_v12, %v2853_v45  ;;  %v2913_v9 = vld [vmem:[%s4257_s11 + $0x1c] sm:$0x1]  ;;  %v2996_v6 = vld [vmem:[%s4257_s11 + $0x18] sm:$0x2] }
 0x8ae   : > { %v2893_v62 = vsel %vm4990_vm15, %v2882_v25, %v2841_v28  ;;  %v3048_v14 = vsel %vm5014_vm1, %v3033_v59, %v3047_v60  ;;  %v2883_v17 = vpack.c.bf16 %v2875_v37, %v2875_v37  ;;  %v2884_v10 = vpack.c.bf16 %v2876_v3, %v2876_v3  ;;  %v3044_v59 = vld [vmem:[%s4257_s11 + $0x4] sm:$0x2] }
 0x8af   : > { %v3203_v15 = vsel %vm5025_vm12, %v3184_v5, %v3202_v30  ;;  %2894 = vst [vmem:[%s4257_s11] sm:$0x1] %v2893_v62  ;;  %3049 = vst [vmem:[%s4257_s11 + $0x8] sm:$0x2] %v3048_v14  ;;  %v3358_v20 = vsel %vm5036_vm2, %v3335_v46, %v3357_v23  ;;  %v2885_v22 = vpack.c.bf16 %v2877_v4, %v2877_v4  ;;  %v2863_v31 = vrot.slane %v5000_v48, 5  ;;  %v3050_v5 = vld [vmem:[%s4257_s11 + $0xc] sm:$0x2] }
 0x8b0   : > { %3204 = vst [vmem:[%s4257_s11 + $0x10] sm:$0x4] %v3203_v15  ;;  %v2886_v26 = vpack.c.bf16 %v2878_v24, %v2878_v24  ;;  %3359 = vst [vmem:[%s4257_s11 + $0x18] sm:$0x8] %v3358_v20  ;;  %v2896_v28 = vsel %vm4990_vm15, %v2883_v17, %v2895_v63  ;;  %v2864_v29 = vrot.slane %v5000_v48, 6  ;;  %v2865_v51 = vrot.slane %v5000_v48, 7 }
 0x8b1   : > { %2897 = vst [vmem:[%s4257_s11 + $0x4] sm:$0x1] %v2896_v28  ;;  %v2899_v35 = vsel %vm4990_vm15, %v2884_v10, %v2898_v18  ;;  %v2902_v8 = vsel %vm4990_vm15, %v2885_v22, %v2901_v19  ;;  %v3008_v36 = vrot.slane %v5002_v49, 6  ;;  %v2879_v39 = vadd.f32 %v2863_v31, %v2854_v54  ;;  %v3139_v4 = vld [vmem:[%s4257_s11] sm:$0x4] }
 0x8b2   : > { %v2905_v21 = vsel %vm4990_vm15, %v2886_v26, %v2904_v27  ;;  %2900 = vst [vmem:[%s4257_s11 + $0x8] sm:$0x1] %v2899_v35  ;;  %2903 = vst [vmem:[%s4257_s11 + $0xc] sm:$0x1] %v2902_v8  ;;  %v2880_v43 = vadd.f32 %v2864_v29, %v2855_v52  ;;  %v2881_v44 = vadd.f32 %v2865_v51, %v2856_v55  ;;  %v2999_v40 = vunpack.c.l.bf16 %v2991_v11  ;;  %v3140_v17 = vld [vmem:[%s4257_s11 + $0x4] sm:$0x4] }
 0x8b3   : > { %2906 = vst [vmem:[%s4257_s11 + $0x10] sm:$0x1] %v2905_v21  ;;  %v3023_v45 = vadd.f32 %v3008_v36, %v2998_v56  ;;  %v3009_v47 = vrot.slane %v5002_v49, 7  ;;  %v3001_v48 = vunpack.c.l.bf16 %v2993_v34  ;;  %v3010_v57 = vrot.slane %v5002_v49, 1  ;;  %v3141_v20 = vld [vmem:[%s4257_s11 + $0x8] sm:$0x4] }
 0x8b4   : > { %v2887_v60 = vpack.c.bf16 %v2879_v39, %v2879_v39  ;;  %v2888_v54 = vpack.c.bf16 %v2880_v43, %v2880_v43  ;;  %v2889_v52 = vpack.c.bf16 %v2881_v44, %v2881_v44  ;;  %v3002_v55 = vunpack.c.l.bf16 %v2994_v38  ;;  %v3142_v28 = vld [vmem:[%s4257_s11 + $0xc] sm:$0x4]  ;;  %v3056_v29 = vld [vmem:[%s4257_s11 + $0x14] sm:$0x2]  ;;  %v3059_v51 = vld [vmem:[%s4257_s11 + $0x18] sm:$0x2] }
 0x8b5   : > { %v3031_v61 = vpack.c.bf16 %v3023_v45, %v3023_v45  ;;  %v3024_v7 = vadd.f32 %v3009_v47, %v2999_v40  ;;  %v3026_v30 = vadd.f32 %v3010_v57, %v3001_v48  ;;  %v3011_v56 = vrot.slane %v5002_v49, 2  ;;  %v3062_v36 = vld [vmem:[%s4257_s11 + $0x1c] sm:$0x2]  ;;  %v3193_v57 = vld [vmem:[%s4257_s11 + $0x4] sm:$0x4] }
 0x8b6   : > { %v2908_v50 = vsel %vm4990_vm15, %v2887_v60, %v2907_v41  ;;  %v2911_v12 = vsel %vm4990_vm15, %v2888_v54, %v2910_v32  ;;  %v2914_v25 = vsel %vm4990_vm15, %v2889_v52, %v2913_v9  ;;  %v3003_v23 = vunpack.c.l.bf16 %v2995_v16  ;;  %v3144_v41 = vld [vmem:[%s4257_s11 + $0x14] sm:$0x4]  ;;  %v3145_v9 = vld [vmem:[%s4257_s11 + $0x18] sm:$0x4]  ;;  %v3146_v60 = vld [vmem:[%s4257_s11 + $0x1c] sm:$0x4] }
 0x8b7   : > { %2909 = vst [vmem:[%s4257_s11 + $0x14] sm:$0x1] %v2908_v50  ;;  %2912 = vst [vmem:[%s4257_s11 + $0x18] sm:$0x1] %v2911_v12  ;;  %v3042_v37 = vsel %vm5014_vm1, %v3031_v61, %v4998_v1  ;;  %v3032_v46 = vpack.c.bf16 %v3024_v7, %v3024_v7  ;;  %v3034_v63 = vpack.c.bf16 %v3026_v30, %v3026_v30  ;;  %v3012_v24 = vrot.slane %v5002_v49, 3 }
 0x8b8   : > { %2915 = vst [vmem:[%s4257_s11 + $0x1c] sm:$0x1] %v2914_v25  ;;  %v3027_v3 = vadd.f32 %v3011_v56, %v3002_v55  ;;  %3043 = vst [vmem:[%s4257_s11] sm:$0x2] %v3042_v37  ;;  %v3004_v62 = vunpack.c.l.bf16 %v2996_v6  ;;  %v3013_v14 = vrot.slane %v5002_v49, 4  ;;  %v3005_v15 = vunpack.c.l.bf16 %v2997_v42  ;;  %v5137_v7 = vld [vmem:[%s4257_s11] sm:$0x8] }
 0x8b9   : > { %v3045_v1 = vsel %vm5014_vm1, %v3032_v46, %v3044_v59  ;;  %v3051_v18 = vsel %vm5014_vm1, %v3034_v63, %v3050_v5  ;;  %v3014_v27 = vrot.slane %v5002_v49, 5  ;;  %v3028_v10 = vadd.f32 %v3012_v24, %v3003_v23  ;;  %v3196_v56 = vld [vmem:[%s4257_s11 + $0x8] sm:$0x4]  ;;  %v3199_v59 = vld [vmem:[%s4257_s11 + $0xc] sm:$0x4] }
 0x8ba   : > { %v3035_v19 = vpack.c.bf16 %v3027_v3, %v3027_v3  ;;  %3046 = vst [vmem:[%s4257_s11 + $0x4] sm:$0x2] %v3045_v1  ;;  %3052 = vst [vmem:[%s4257_s11 + $0xc] sm:$0x2] %v3051_v18  ;;  %v3029_v22 = vadd.f32 %v3013_v14, %v3004_v62  ;;  %v3147_v26 = vunpack.c.l.bf16 %v3139_v4  ;;  %v3157_v11 = vrot.slane %v5004_v53, 4 }
 0x8bb   : > { %v3030_v34 = vadd.f32 %v3014_v27, %v3005_v15  ;;  %v3148_v35 = vunpack.c.l.bf16 %v3140_v17  ;;  %v3158_v49 = vrot.slane %v5004_v53, 5  ;;  %v3036_v8 = vpack.c.bf16 %v3028_v10, %v3028_v10  ;;  %v3205_v24 = vld [vmem:[%s4257_s11 + $0x14] sm:$0x4]  ;;  %v3291_v17 = vld [vmem:[%s4257_s11 + $0xc] sm:$0x8] }
 0x8bc   : > { %v3054_v31 = vsel %vm5014_vm1, %v3035_v19, %v3053_v33  ;;  %v3037_v21 = vpack.c.bf16 %v3029_v22, %v3029_v22  ;;  %v3172_v38 = vadd.f32 %v3157_v11, %v3147_v26  ;;  %v3149_v39 = vunpack.c.l.bf16 %v3141_v20  ;;  %v3208_v18 = vld [vmem:[%s4257_s11 + $0x18] sm:$0x4]  ;;  %v3211_v10 = vld [vmem:[%s4257_s11 + $0x1c] sm:$0x4] }
 0x8bd   : > { %3055 = vst [vmem:[%s4257_s11 + $0x10] sm:$0x2] %v3054_v31  ;;  %v3038_v43 = vpack.c.bf16 %v3030_v34, %v3030_v34  ;;  %v3173_v32 = vadd.f32 %v3158_v49, %v3148_v35  ;;  %v3159_v44 = vrot.slane %v5004_v53, 6  ;;  %v3150_v40 = vunpack.c.l.bf16 %v3142_v28  ;;  %v3292_v28 = vld [vmem:[%s4257_s11 + $0x10] sm:$0x8] }
 0x8be   : > { %v3057_v45 = vsel %vm5014_vm1, %v3036_v8, %v3056_v29  ;;  %v3060_v47 = vsel %vm5014_vm1, %v3037_v21, %v3059_v51  ;;  %v3180_v48 = vpack.c.bf16 %v3172_v38, %v3172_v38  ;;  %v3160_v16 = vrot.slane %v5004_v53, 7  ;;  %v3293_v35 = vld [vmem:[%s4257_s11 + $0x14] sm:$0x8]  ;;  %v3342_v21 = vld [vmem:[%s4257_s11 + $0x4] sm:$0x8] }
 0x8bf   : > { %3058 = vst [vmem:[%s4257_s11 + $0x14] sm:$0x2] %v3057_v45  ;;  %3061 = vst [vmem:[%s4257_s11 + $0x18] sm:$0x2] %v3060_v47  ;;  %v3063_v54 = vsel %vm5014_vm1, %v3038_v43, %v3062_v36  ;;  %v3181_v52 = vpack.c.bf16 %v3173_v32, %v3173_v32  ;;  %v3174_v55 = vadd.f32 %v3159_v44, %v3149_v39  ;;  %v3152_v61 = vunpack.c.l.bf16 %v3144_v41  ;;  %v3295_v39 = vld [vmem:[%s4257_s11 + $0x1c] sm:$0x8] }
 0x8c0   : > { %3064 = vst [vmem:[%s4257_s11 + $0x1c] sm:$0x2] %v3063_v54  ;;  %v3191_v30 = vsel %vm5025_vm12, %v3180_v48, %v3139_v4  ;;  %v3175_v6 = vadd.f32 %v3160_v16, %v3150_v40  ;;  %v3161_v42 = vrot.slane %v5004_v53, 1  ;;  %v3153_v50 = vunpack.c.l.bf16 %v3145_v9  ;;  %v3290_v4 = vld [vmem:[%s4257_s11 + $0x8] sm:$0x8] }
 0x8c1   : > { %3192 = vst [vmem:[%s4257_s11] sm:$0x4] %v3191_v30  ;;  %v3194_v12 = vsel %vm5025_vm12, %v3181_v52, %v3193_v57  ;;  %v3182_v25 = vpack.c.bf16 %v3174_v55, %v3174_v55  ;;  %v3162_v5 = vrot.slane %v5004_v53, 2  ;;  %v3154_v23 = vunpack.c.l.bf16 %v3146_v60  ;;  %v3345_v32 = vld [vmem:[%s4257_s11 + $0x8] sm:$0x8]  ;;  %v5183_v9 = vld [vmem:[%s4257_s11] sm:$0x1] }
 0x8c2   : > { %3195 = vst [vmem:[%s4257_s11 + $0x4] sm:$0x4] %v3194_v12  ;;  %v3183_v37 = vpack.c.bf16 %v3175_v6, %v3175_v6  ;;  %v3177_v46 = vadd.f32 %v3161_v42, %v3152_v61  ;;  %v3163_v63 = vrot.slane %v5004_v53, 3  ;;  %v3296_v3 = vunpack.c.l.bf16 %v5137_v7  ;;  %v5189_v57 = vld [vmem:[#allocation4 + $0x8] sm:$0xff]  ;;  %v5197_v30 = vld [vmem:[#allocation4 + $0x18] sm:$0xff] }
 0x8c3   : > { %v3197_v33 = vsel %vm5025_vm12, %v3182_v25, %v3196_v56  ;;  %v3178_v62 = vadd.f32 %v3162_v5, %v3153_v50  ;;  %v3306_v14 = vrot.slane %v5020_v0, 2  ;;  %v3297_v15 = vunpack.c.l.bf16 %v3289_v58  ;;  %v3067_v16 = vld [vmem:[%s4257_s11 + $0x8] sm:$0x2]  ;;  %v3348_v54 = vld [vmem:[%s4257_s11 + $0xc] sm:$0x8] }
 0x8c4   : > { %3198 = vst [vmem:[%s4257_s11 + $0x8] sm:$0x4] %v3197_v33  ;;  %v3200_v1 = vsel %vm5025_vm12, %v3183_v37, %v3199_v59  ;;  %v3185_v53 = vpack.c.bf16 %v3177_v46, %v3177_v46  ;;  %v3179_v19 = vadd.f32 %v3163_v63, %v3154_v23  ;;  %v3307_v27 = vrot.slane %v5020_v0, 3  ;;  %v3351_v42 = vld [vmem:[%s4257_s11 + $0x10] sm:$0x8]  ;;  %v5206_v12 = vld [vmem:[#allocation4 + $0x28] sm:$0xff] }
 0x8c5   : > { %3201 = vst [vmem:[%s4257_s11 + $0xc] sm:$0x4] %v3200_v1  ;;  %v3186_v20 = vpack.c.bf16 %v3178_v62, %v3178_v62  ;;  %v3321_v22 = vadd.f32 %v3306_v14, %v3296_v3  ;;  %v3298_v26 = vunpack.c.l.bf16 %v3290_v4  ;;  %v3308_v11 = vrot.slane %v5020_v0, 4  ;;  %v3369_v37 = vld [vmem:[%s4257_s11 + $0x18] sm:$0x8] }
 0x8c6   : > { %v3206_v31 = vsel %vm5025_vm12, %v3185_v53, %v3205_v24  ;;  %v3187_v29 = vpack.c.bf16 %v3179_v19, %v3179_v19  ;;  %v3322_v51 = vadd.f32 %v3307_v27, %v3297_v15  ;;  %v3299_v34 = vunpack.c.l.bf16 %v3291_v17  ;;  %v5211_v46 = vld [vmem:[#allocation4 + $0x38] sm:$0xff]  ;;  %v3354_v63 = vld [vmem:[%s4257_s11 + $0x14] sm:$0x8]  ;;  %v2917_v24 = vld [vmem:[%s4257_s11 + $0x4] sm:$0x1] }
 0x8c7   : > { %3207 = vst [vmem:[%s4257_s11 + $0x14] sm:$0x4] %v3206_v31  ;;  %v3209_v49 = vsel %vm5025_vm12, %v3186_v20, %v3208_v18  ;;  %v3329_v8 = vpack.c.bf16 %v3321_v22, %v3321_v22  ;;  %v3323_v36 = vadd.f32 %v3308_v11, %v3298_v26  ;;  %v3309_v38 = vrot.slane %v5020_v0, 5  ;;  %v3360_v15 = vld [vmem:[%s4257_s11 + $0x1c] sm:$0x8] }
 0x8c8   : > { %3210 = vst [vmem:[%s4257_s11 + $0x18] sm:$0x4] %v3209_v49  ;;  %v3212_v41 = vsel %vm5025_vm12, %v3187_v29, %v3211_v10  ;;  %v3330_v43 = vpack.c.bf16 %v3322_v51, %v3322_v51  ;;  %v3300_v44 = vunpack.c.l.bf16 %v3292_v28  ;;  %v3310_v40 = vrot.slane %v5020_v0, 6  ;;  %v2918_v53 = vld [vmem:[%s4257_s11 + $0x8] sm:$0x1] }
 0x8c9   : > { %3213 = vst [vmem:[%s4257_s11 + $0x1c] sm:$0x4] %v3212_v41  ;;  %v3340_v45 = vsel %vm5036_vm2, %v3329_v8, %v5137_v7  ;;  %v3331_v47 = vpack.c.bf16 %v3323_v36, %v3323_v36  ;;  %v3324_v48 = vadd.f32 %v3309_v38, %v3299_v34  ;;  %v3301_v2 = vunpack.c.l.bf16 %v3293_v35  ;;  %v3218_v7 = vld [vmem:[%s4257_s11 + $0x10] sm:$0x4]  ;;  %v2919_v29 = vld [vmem:[%s4257_s11 + $0xc] sm:$0x1] }
 0x8ca   : > { %3341 = vst [vmem:[%s4257_s11] sm:$0x8] %v3340_v45  ;;  %v3343_v60 = vsel %vm5036_vm2, %v3330_v43, %v3342_v21  ;;  %v3325_v52 = vadd.f32 %v3310_v40, %v3300_v44  ;;  %v3311_v55 = vrot.slane %v5020_v0, 7  ;;  %v3303_v61 = vunpack.c.l.bf16 %v3295_v39  ;;  %v2920_v21 = vld [vmem:[%s4257_s11 + $0x10] sm:$0x1]  ;;  %v3121_v38 = vld [vmem:[%s4257_s11 + $0x8] sm:$0x2] }
 0x8cb   : > { %3344 = vst [vmem:[%s4257_s11 + $0x4] sm:$0x8] %v3343_v60  ;;  %v3346_v56 = vsel %vm5036_vm2, %v3331_v47, %v3345_v32  ;;  %v3332_v6 = vpack.c.bf16 %v3324_v48, %v3324_v48  ;;  %v3312_v50 = vrot.slane %v5020_v0, 1  ;;  %v2924_v58 = vunpack.c.l.bf16 %v5183_v9  ;;  %v2921_v32 = vld [vmem:[%s4257_s11 + $0x14] sm:$0x1] }
 0x8cc   : > { %3347 = vst [vmem:[%s4257_s11 + $0x8] sm:$0x8] %v3346_v56  ;;  %v3333_v25 = vpack.c.bf16 %v3325_v52, %v3325_v52  ;;  %v3326_v59 = vadd.f32 %v3311_v55, %v3301_v2  ;;  %v2934_v5 = vrot.slane %v5189_v57, 7  ;;  %v3075_v23 = vunpack.c.l.bf16 %v3067_v16  ;;  %v3276_v40 = vld [vmem:[%s4257_s11 + $0x10] sm:$0x4] }
 0x8cd   : > { %v3349_v0 = vsel %vm5036_vm2, %v3332_v6, %v3348_v54  ;;  %v3328_v3 = vadd.f32 %v3312_v50, %v3303_v61  ;;  %v3085_v4 = vrot.slane %v5197_v30, 7  ;;  %v3226_v33 = vunpack.c.l.bf16 %v3218_v7  ;;  %v2922_v48 = vld [vmem:[%s4257_s11 + $0x18] sm:$0x1]  ;;  %v3431_v16 = vld [vmem:[%s4257_s11 + $0x18] sm:$0x8] }
 0x8ce   : > { %3350 = vst [vmem:[%s4257_s11 + $0xc] sm:$0x8] %v3349_v0  ;;  %v3352_v62 = vsel %vm5036_vm2, %v3333_v25, %v3351_v42  ;;  %v3334_v14 = vpack.c.bf16 %v3326_v59, %v3326_v59  ;;  %v2949_v17 = vadd.f32 %v2934_v5, %v2924_v58  ;;  %v3236_v1 = vrot.slane %v5206_v12, 7  ;;  %v2923_v55 = vld [vmem:[%s4257_s11 + $0x1c] sm:$0x1] }
 0x8cf   : > { %3353 = vst [vmem:[%s4257_s11 + $0x10] sm:$0x8] %v3352_v62  ;;  %v3336_v18 = vpack.c.bf16 %v3328_v3, %v3328_v3  ;;  %v3100_v27 = vadd.f32 %v3085_v4, %v3075_v23  ;;  %v3377_v20 = vunpack.c.l.bf16 %v3369_v37  ;;  %v3387_v10 = vrot.slane %v5211_v46, 7  ;;  %v2969_v7 = vld [vmem:[%s4257_s11 + $0x4] sm:$0x1] }
 0x8d0   : > { %v3355_v26 = vsel %vm5036_vm2, %v3334_v14, %v3354_v63  ;;  %v2957_v11 = vpack.c.bf16 %v2949_v17, %v2949_v17  ;;  %v3251_v28 = vadd.f32 %v3236_v1, %v3226_v33  ;;  %v2925_v31 = vunpack.c.l.bf16 %v2917_v24  ;;  %v3065_v50 = vld [vmem:[%s4257_s11] sm:$0x2]  ;;  %v2972_v23 = vld [vmem:[%s4257_s11 + $0x8] sm:$0x1]  ;;  %v3066_v4 = vld [vmem:[%s4257_s11 + $0x4] sm:$0x2] }
 0x8d1   : > { %3356 = vst [vmem:[%s4257_s11 + $0x14] sm:$0x8] %v3355_v26  ;;  %v3361_v34 = vsel %vm5036_vm2, %v3336_v18, %v3360_v15  ;;  %v3108_v35 = vpack.c.bf16 %v3100_v27, %v3100_v27  ;;  %v3402_v49 = vadd.f32 %v3387_v10, %v3377_v20  ;;  %v2926_v8 = vunpack.c.l.bf16 %v2918_v53  ;;  %v2975_v24 = vld [vmem:[%s4257_s11 + $0xc] sm:$0x1]  ;;  %v3068_v17 = vld [vmem:[%s4257_s11 + $0xc] sm:$0x2] }
 0x8d2   : > { %3362 = vst [vmem:[%s4257_s11 + $0x1c] sm:$0x8] %v3361_v34  ;;  %v2967_v13 = vsel %vm5227_vm10, %v2957_v11, %v5183_v9  ;;  %v3259_v39 = vpack.c.bf16 %v3251_v28, %v3251_v28  ;;  %v2950_v41 = vadd.f32 %v5189_v57, %v2925_v31  ;;  %v2935_v43 = vrot.slane %v5189_v57, 1  ;;  %v3069_v20 = vld [vmem:[%s4257_s11 + $0x10] sm:$0x2] }
 0x8d3   : > { %2968 = vst [vmem:[%s4257_s11] sm:$0x1] %v2967_v13  ;;  %v3122_v44 = vsel %vm5234_vm4, %v3108_v35, %v3121_v38  ;;  %v3410_v45 = vpack.c.bf16 %v3402_v49, %v3402_v49  ;;  %v2927_v47 = vunpack.c.l.bf16 %v2919_v29  ;;  %v2936_v9 = vrot.slane %v5189_v57, 2  ;;  %v2978_v10 = vld [vmem:[%s4257_s11 + $0x10] sm:$0x1]  ;;  %v2981_v29 = vld [vmem:[%s4257_s11 + $0x14] sm:$0x1] }
 0x8d4   : > { %3123 = vst [vmem:[%s4257_s11 + $0x8] sm:$0x2] %v3122_v44  ;;  %v3277_v2 = vsel %vm5243_vm3, %v3259_v39, %v3276_v40  ;;  %v2958_v60 = vpack.c.bf16 %v2950_v41, %v2950_v41  ;;  %v2951_v54 = vadd.f32 %v2935_v43, %v2926_v8  ;;  %v2928_v52 = vunpack.c.l.bf16 %v2920_v21  ;;  %v3070_v8 = vld [vmem:[%s4257_s11 + $0x14] sm:$0x2]  ;;  %v2984_v13 = vld [vmem:[%s4257_s11 + $0x18] sm:$0x1] }
 0x8d5   : > { %3278 = vst [vmem:[%s4257_s11 + $0x10] sm:$0x4] %v3277_v2  ;;  %v3432_v61 = vsel %vm5253_vm11, %v3410_v45, %v3431_v16  ;;  %v2952_v56 = vadd.f32 %v2936_v9, %v2927_v47  ;;  %v2937_v6 = vrot.slane %v5189_v57, 3  ;;  %v2929_v42 = vunpack.c.l.bf16 %v2921_v32  ;;  %v3071_v43 = vld [vmem:[%s4257_s11 + $0x18] sm:$0x2] }
 0x8d6   : > { %3433 = vst [vmem:[%s4257_s11 + $0x18] sm:$0x8] %v3432_v61  ;;  %v2970_v58 = vsel %vm5227_vm10, %v2958_v60, %v2969_v7  ;;  %v2959_v25 = vpack.c.bf16 %v2951_v54, %v2951_v54  ;;  %v2938_v59 = vrot.slane %v5189_v57, 4  ;;  %v2930_v5 = vunpack.c.l.bf16 %v2922_v48  ;;  %v2987_v44 = vld [vmem:[%s4257_s11 + $0x1c] sm:$0x1] }
 0x8d7   : > { %2971 = vst [vmem:[%s4257_s11 + $0x4] sm:$0x1] %v2970_v58  ;;  %v2960_v37 = vpack.c.bf16 %v2952_v56, %v2952_v56  ;;  %v2953_v0 = vadd.f32 %v2937_v6, %v2928_v52  ;;  %v2939_v63 = vrot.slane %v5189_v57, 5  ;;  %v2931_v3 = vunpack.c.l.bf16 %v2923_v55  ;;  %v3072_v9 = vld [vmem:[%s4257_s11 + $0x1c] sm:$0x2] }
 0x8d8   : > { %v2973_v33 = vsel %vm5227_vm10, %v2959_v25, %v2972_v23  ;;  %v2954_v62 = vadd.f32 %v2938_v59, %v2929_v42  ;;  %v2940_v14 = vrot.slane %v5189_v57, 6  ;;  %v3073_v15 = vunpack.c.l.bf16 %v3065_v50  ;;  %v3214_v54 = vld [vmem:[%s4257_s11] sm:$0x4]  ;;  %v3118_v55 = vld [vmem:[%s4257_s11 + $0x4] sm:$0x2] }
 0x8d9   : > { %2974 = vst [vmem:[%s4257_s11 + $0x8] sm:$0x1] %v2973_v33  ;;  %v2976_v1 = vsel %vm5227_vm10, %v2960_v37, %v2975_v24  ;;  %v2961_v53 = vpack.c.bf16 %v2953_v0, %v2953_v0  ;;  %v2955_v18 = vadd.f32 %v2939_v63, %v2930_v5  ;;  %v3083_v27 = vrot.slane %v5197_v30, 5  ;;  %v3215_v6 = vld [vmem:[%s4257_s11 + $0x4] sm:$0x4] }
 0x8da   : > { %2977 = vst [vmem:[%s4257_s11 + $0xc] sm:$0x1] %v2976_v1  ;;  %v2962_v26 = vpack.c.bf16 %v2954_v62, %v2954_v62  ;;  %v2956_v57 = vadd.f32 %v2940_v14, %v2931_v3  ;;  %v3074_v11 = vunpack.c.l.bf16 %v3066_v4  ;;  %v3084_v28 = vrot.slane %v5197_v30, 6  ;;  %v3124_v42 = vld [vmem:[%s4257_s11 + $0xc] sm:$0x2] }
 0x8db   : > { %v2979_v31 = vsel %vm5227_vm10, %v2961_v53, %v2978_v10  ;;  %v2963_v34 = vpack.c.bf16 %v2955_v18, %v2955_v18  ;;  %v3098_v35 = vadd.f32 %v3083_v27, %v3073_v15  ;;  %v3076_v49 = vunpack.c.l.bf16 %v3068_v17  ;;  %v3216_v5 = vld [vmem:[%s4257_s11 + $0x8] sm:$0x4]  ;;  %v3127_v63 = vld [vmem:[%s4257_s11 + $0x10] sm:$0x2]  ;;  %v3217_v62 = vld [vmem:[%s4257_s11 + $0xc] sm:$0x4] }
 0x8dc   : > { %2980 = vst [vmem:[%s4257_s11 + $0x10] sm:$0x1] %v2979_v31  ;;  %v2982_v21 = vsel %vm5227_vm10, %v2962_v26, %v2981_v29  ;;  %v2964_v38 = vpack.c.bf16 %v2956_v57, %v2956_v57  ;;  %v3099_v39 = vadd.f32 %v3084_v28, %v3074_v11  ;;  %v3077_v41 = vunpack.c.l.bf16 %v3069_v20  ;;  %v3130_v15 = vld [vmem:[%s4257_s11 + $0x14] sm:$0x2]  ;;  %v3219_v53 = vld [vmem:[%s4257_s11 + $0x14] sm:$0x4] }
 0x8dd   : > { %2983 = vst [vmem:[%s4257_s11 + $0x14] sm:$0x1] %v2982_v21  ;;  %v2985_v32 = vsel %vm5227_vm10, %v2963_v34, %v2984_v13  ;;  %v3106_v40 = vpack.c.bf16 %v3098_v35, %v3098_v35  ;;  %v3101_v45 = vadd.f32 %v5197_v30, %v3076_v49  ;;  %v3086_v47 = vrot.slane %v5197_v30, 1  ;;  %v3220_v26 = vld [vmem:[%s4257_s11 + $0x18] sm:$0x4] }
 0x8de   : > { %2986 = vst [vmem:[%s4257_s11 + $0x18] sm:$0x1] %v2985_v32  ;;  %v2988_v48 = vsel %vm5227_vm10, %v2964_v38, %v2987_v44  ;;  %v3107_v2 = vpack.c.bf16 %v3099_v39, %v3099_v39  ;;  %v3078_v16 = vunpack.c.l.bf16 %v3070_v8  ;;  %v3087_v60 = vrot.slane %v5197_v30, 2  ;;  %v3133_v57 = vld [vmem:[%s4257_s11 + $0x18] sm:$0x2] }
 0x8df   : > { %2989 = vst [vmem:[%s4257_s11 + $0x1c] sm:$0x1] %v2988_v48  ;;  %v3116_v52 = vsel %vm5234_vm4, %v3106_v40, %v3065_v50  ;;  %v3109_v61 = vpack.c.bf16 %v3101_v45, %v3101_v45  ;;  %v3102_v7 = vadd.f32 %v3086_v47, %v3077_v41  ;;  %v3079_v56 = vunpack.c.l.bf16 %v3071_v43  ;;  %v3136_v35 = vld [vmem:[%s4257_s11 + $0x1c] sm:$0x2]  ;;  %v3221_v13 = vld [vmem:[%s4257_s11 + $0x1c] sm:$0x4] }
 0x8e0   : > { %3117 = vst [vmem:[%s4257_s11] sm:$0x2] %v3116_v52  ;;  %v3119_v19 = vsel %vm5234_vm4, %v3107_v2, %v3118_v55  ;;  %v3103_v58 = vadd.f32 %v3087_v60, %v3078_v16  ;;  %v3088_v25 = vrot.slane %v5197_v30, 3  ;;  %v3080_v59 = vunpack.c.l.bf16 %v3072_v9  ;;  %v3363_v32 = vld [vmem:[%s4257_s11] sm:$0x8]  ;;  %v3267_v40 = vld [vmem:[%s4257_s11 + $0x4] sm:$0x4] }
 0x8e1   : > { %3120 = vst [vmem:[%s4257_s11 + $0x4] sm:$0x2] %v3119_v19  ;;  %v3125_v50 = vsel %vm5234_vm4, %v3109_v61, %v3124_v42  ;;  %v3110_v23 = vpack.c.bf16 %v3102_v7, %v3102_v7  ;;  %v3089_v37 = vrot.slane %v5197_v30, 4  ;;  %v3222_v0 = vunpack.c.l.bf16 %v3214_v54  ;;  %v3364_v22 = vld [vmem:[%s4257_s11 + $0x4] sm:$0x8] }
 0x8e2   : > { %3126 = vst [vmem:[%s4257_s11 + $0xc] sm:$0x2] %v3125_v50  ;;  %v3111_v3 = vpack.c.bf16 %v3103_v58, %v3103_v58  ;;  %v3104_v4 = vadd.f32 %v3088_v25, %v3079_v56  ;;  %v3232_v33 = vrot.slane %v5206_v12, 3  ;;  %v3223_v24 = vunpack.c.l.bf16 %v3215_v6  ;;  %v3270_v2 = vld [vmem:[%s4257_s11 + $0x8] sm:$0x4] }
 0x8e3   : > { %v3128_v14 = vsel %vm5234_vm4, %v3110_v23, %v3127_v63  ;;  %v3105_v17 = vadd.f32 %v3089_v37, %v3080_v59  ;;  %v3233_v1 = vrot.slane %v5206_v12, 4  ;;  %v3224_v30 = vunpack.c.l.bf16 %v3216_v5  ;;  %v3365_v52 = vld [vmem:[%s4257_s11 + $0x8] sm:$0x8]  ;;  %v3273_v61 = vld [vmem:[%s4257_s11 + $0xc] sm:$0x4] }
 0x8e4   : > { %3129 = vst [vmem:[%s4257_s11 + $0x10] sm:$0x2] %v3128_v14  ;;  %v3131_v18 = vsel %vm5234_vm4, %v3111_v3, %v3130_v15  ;;  %v3112_v27 = vpack.c.bf16 %v3104_v4, %v3104_v4  ;;  %v3247_v20 = vadd.f32 %v3232_v33, %v3222_v0  ;;  %v3234_v10 = vrot.slane %v5206_v12, 5  ;;  %v3366_v19 = vld [vmem:[%s4257_s11 + $0xc] sm:$0x8] }
 0x8e5   : > { %3132 = vst [vmem:[%s4257_s11 + $0x14] sm:$0x2] %v3131_v18  ;;  %v3113_v11 = vpack.c.bf16 %v3105_v17, %v3105_v17  ;;  %v3248_v28 = vadd.f32 %v3233_v1, %v3223_v24  ;;  %v3225_v31 = vunpack.c.l.bf16 %v3217_v62  ;;  %v3235_v29 = vrot.slane %v5206_v12, 6  ;;  %v3279_v58 = vld [vmem:[%s4257_s11 + $0x14] sm:$0x4] }
 0x8e6   : > { %v3134_v34 = vsel %vm5234_vm4, %v3112_v27, %v3133_v57  ;;  %v3255_v49 = vpack.c.bf16 %v3247_v20, %v3247_v20  ;;  %v3249_v8 = vadd.f32 %v3234_v10, %v3224_v30  ;;  %v3227_v21 = vunpack.c.l.bf16 %v3219_v53  ;;  %v3367_v5 = vld [vmem:[%s4257_s11 + $0x10] sm:$0x8]  ;;  %v3282_v63 = vld [vmem:[%s4257_s11 + $0x18] sm:$0x4]  ;;  %v3368_v62 = vld [vmem:[%s4257_s11 + $0x14] sm:$0x8] }
 0x8e7   : > { %3135 = vst [vmem:[%s4257_s11 + $0x18] sm:$0x2] %v3134_v34  ;;  %v3137_v38 = vsel %vm5234_vm4, %v3113_v11, %v3136_v35  ;;  %v3256_v39 = vpack.c.bf16 %v3248_v28, %v3248_v28  ;;  %v3250_v41 = vadd.f32 %v3235_v29, %v3225_v31  ;;  %v3228_v43 = vunpack.c.l.bf16 %v3220_v26  ;;  %v3285_v15 = vld [vmem:[%s4257_s11 + $0x1c] sm:$0x4]  ;;  %v3370_v53 = vld [vmem:[%s4257_s11 + $0x1c] sm:$0x8] }
 0x8e8   : > { %3138 = vst [vmem:[%s4257_s11 + $0x1c] sm:$0x2] %v3137_v38  ;;  %v3265_v44 = vsel %vm5243_vm3, %v3255_v49, %v3214_v54  ;;  %v3257_v45 = vpack.c.bf16 %v3249_v8, %v3249_v8  ;;  %v3252_v47 = vadd.f32 %v5206_v12, %v3227_v21  ;;  %v3237_v9 = vrot.slane %v5206_v12, 1  ;;  %v3416_v29 = vld [vmem:[%s4257_s11 + $0x4] sm:$0x8] }
 0x8e9   : > { %3266 = vst [vmem:[%s4257_s11] sm:$0x4] %v3265_v44  ;;  %v3268_v48 = vsel %vm5243_vm3, %v3256_v39, %v3267_v40  ;;  %v3258_v16 = vpack.c.bf16 %v3250_v41, %v3250_v41  ;;  %v3229_v60 = vunpack.c.l.bf16 %v3221_v13  ;;  %v3238_v54 = vrot.slane %v5206_v12, 2  ;;  %v3419_v8 = vld [vmem:[%s4257_s11 + $0x8] sm:$0x8]  ;;  %v3422_v39 = vld [vmem:[%s4257_s11 + $0xc] sm:$0x8] }
 0x8ea   : > { %3269 = vst [vmem:[%s4257_s11 + $0x4] sm:$0x4] %v3268_v48  ;;  %v3271_v55 = vsel %vm5243_vm3, %v3257_v45, %v3270_v2  ;;  %v3260_v7 = vpack.c.bf16 %v3252_v47, %v3252_v47  ;;  %v3253_v56 = vadd.f32 %v3237_v9, %v3228_v43  ;;  %v3371_v6 = vunpack.c.l.bf16 %v3363_v32  ;;  %v3425_v44 = vld [vmem:[%s4257_s11 + $0x10] sm:$0x8]  ;;  %v3428_v47 = vld [vmem:[%s4257_s11 + $0x14] sm:$0x8] }
 0x8eb   : > { %3272 = vst [vmem:[%s4257_s11 + $0x8] sm:$0x4] %v3271_v55  ;;  %v3274_v42 = vsel %vm5243_vm3, %v3258_v16, %v3273_v61  ;;  %v3254_v12 = vadd.f32 %v3238_v54, %v3229_v60  ;;  %v3381_v25 = vrot.slane %v5211_v46, 1  ;;  %v3372_v59 = vunpack.c.l.bf16 %v3364_v22  ;;  %v3434_v48 = vld [vmem:[%s4257_s11 + $0x1c] sm:$0x8] }
 0x8ec   : > { %3275 = vst [vmem:[%s4257_s11 + $0xc] sm:$0x4] %v3274_v42  ;;  %v3280_v50 = vsel %vm5243_vm3, %v3260_v7, %v3279_v58  ;;  %v3261_v23 = vpack.c.bf16 %v3253_v56, %v3253_v56  ;;  %v3382_v37 = vrot.slane %v5211_v46, 2  ;;  %v3373_v0 = vunpack.c.l.bf16 %v3365_v52 }
 0x8ed   : > { %3281 = vst [vmem:[%s4257_s11 + $0x14] sm:$0x4] %v3280_v50  ;;  %v3262_v3 = vpack.c.bf16 %v3254_v12, %v3254_v12  ;;  %v3396_v4 = vadd.f32 %v3381_v25, %v3371_v6  ;;  %v3383_v33 = vrot.slane %v5211_v46, 3  ;;  %v3374_v24 = vunpack.c.l.bf16 %v3366_v19 }
 0x8ee   : > { %v3283_v14 = vsel %vm5243_vm3, %v3261_v23, %v3282_v63  ;;  %v3397_v17 = vadd.f32 %v3382_v37, %v3372_v59  ;;  %v3384_v1 = vrot.slane %v5211_v46, 4  ;;  %v3375_v30 = vunpack.c.l.bf16 %v3367_v5 }
 0x8ef   : > { %3284 = vst [vmem:[%s4257_s11 + $0x18] sm:$0x4] %v3283_v14  ;;  %v3286_v18 = vsel %vm5243_vm3, %v3262_v3, %v3285_v15  ;;  %v3404_v27 = vpack.c.bf16 %v3396_v4, %v3396_v4  ;;  %v3398_v20 = vadd.f32 %v3383_v33, %v3373_v0  ;;  %v3385_v10 = vrot.slane %v5211_v46, 5 }
 0x8f0   : > { %3287 = vst [vmem:[%s4257_s11 + $0x1c] sm:$0x4] %v3286_v18  ;;  %v3405_v26 = vpack.c.bf16 %v3397_v17, %v3397_v17  ;;  %v3399_v57 = vadd.f32 %v3384_v1, %v3374_v24  ;;  %v3376_v11 = vunpack.c.l.bf16 %v3368_v62  ;;  %v3386_v28 = vrot.slane %v5211_v46, 6 }
 0x8f1   : > { %v3414_v31 = vsel %vm5253_vm11, %v3404_v27, %v3363_v32  ;;  %v3406_v51 = vpack.c.bf16 %v3398_v20, %v3398_v20  ;;  %v3400_v34 = vadd.f32 %v3385_v10, %v3375_v30  ;;  %v3378_v35 = vunpack.c.l.bf16 %v3370_v53 }
 0x8f2   : > { %3415 = vst [vmem:[%s4257_s11] sm:$0x8] %v3414_v31  ;;  %v3417_v49 = vsel %vm5253_vm11, %v3405_v26, %v3416_v29  ;;  %v3407_v21 = vpack.c.bf16 %v3399_v57, %v3399_v57  ;;  %v3401_v13 = vadd.f32 %v3386_v28, %v3376_v11 }
 0x8f3   : > { %3418 = vst [vmem:[%s4257_s11 + $0x4] sm:$0x8] %v3417_v49  ;;  %v3420_v38 = vsel %vm5253_vm11, %v3406_v51, %v3419_v8  ;;  %v3408_v41 = vpack.c.bf16 %v3400_v34, %v3400_v34  ;;  %v3403_v43 = vadd.f32 %v5211_v46, %v3378_v35 }
 0x8f4   : > { %3421 = vst [vmem:[%s4257_s11 + $0x8] sm:$0x8] %v3420_v38  ;;  %v3423_v32 = vsel %vm5253_vm11, %v3407_v21, %v3422_v39  ;;  %v3409_v40 = vpack.c.bf16 %v3401_v13, %v3401_v13 }
 0x8f5   : > { %3424 = vst [vmem:[%s4257_s11 + $0xc] sm:$0x8] %v3423_v32  ;;  %v3426_v45 = vsel %vm5253_vm11, %v3408_v41, %v3425_v44  ;;  %v3411_v9 = vpack.c.bf16 %v3403_v43, %v3403_v43 }
 0x8f6   : > { %3427 = vst [vmem:[%s4257_s11 + $0x10] sm:$0x8] %v3426_v45  ;;  %v3429_v22 = vsel %vm5253_vm11, %v3409_v40, %v3428_v47 }
 0x8f7   : > { %3430 = vst [vmem:[%s4257_s11 + $0x14] sm:$0x8] %v3429_v22  ;;  %v3435_v46 = vsel %vm5253_vm11, %v3411_v9, %v3434_v48 }
 0x8f8   : > { %3436 = vst [vmem:[%s4257_s11 + $0x1c] sm:$0x8] %v3435_v46 }
 0x8f9 PF: > { %s15_s18 = sadd.s32 1, %s4119_s18  }
 0x8fa   : > { %p12_p8 = scmp.ge.s32.totalorder %s15_s18, 4  }
 0x8fc   :  { %14 = sbr.rel (!%p12_p8) target bundleno = 1 (0x1), region = 192 }

</bundles_post_ra>
